<compile_context>
chip_gen: v6e
topology: v6e:2x2x1
jax: 0.10.0
libtpu: 0.0.40
codegen_flags: <defaults>
</compile_context>

<pallas_src>
import functools

import numpy as np
import jax
import jax.numpy as jnp
from jax.experimental import pallas as pl
from jax.experimental.pallas import tpu as pltpu

BN_EPS = 1e-5
# Explicit VMEM budget: blocks here are tiny, but sized so the same code stays legal on
# v7x (64 MiB physical VMEM) with headroom, and on v5e/v6e (128 MiB).
VMEM_LIMIT_BYTES = 48 * 1024 * 1024


def _cparams(*semantics):
    return pltpu.CompilerParams(dimension_semantics=semantics,
                                vmem_limit_bytes=VMEM_LIMIT_BYTES)


# --------------------------------------------------------------------------------------
# Kernel 1: fused  local1(3x3,BN) + local2(1x1,BN) + qkv(1x1)  projection
# --------------------------------------------------------------------------------------

def _fused_proj_kernel(x_ref, w_ref, b_ref, local_ref, qkv_ref, *,
                       tile_h, W, K, Cin, C_local, C_qkv):
    r = pl.program_id(1)
    row0 = pl.multiple_of(r * tile_h, tile_h)
    # (tile_h + K - 1, W + K - 1, Cin) slab of the zero-padded input (bf16)
    slab = x_ref[0, pl.ds(row0, tile_h + K - 1), :, :]
    Cout = C_local + C_qkv
    acc = jnp.zeros((tile_h * W, Cout), jnp.float32)
    for kh in range(K):
        for kw in range(K):
            patch = slab[kh:kh + tile_h, kw:kw + W, :].reshape(tile_h * W, Cin)
            acc = acc + jnp.dot(patch, w_ref[kh, kw],
                                preferred_element_type=jnp.float32)
    acc = (acc + b_ref[...]).reshape(tile_h, W, Cout)
    local_ref[0] = acc[:, :, :C_local].astype(local_ref.dtype)
    qkv_ref[0] = acc[:, :, C_local:].astype(qkv_ref.dtype)


def fused_local_qkv_proj(x, fused_w, fused_b, *, tile_h):
    """x: (B,H,W,C) f32.  Returns local (B,H,W,C) f32 and qkv (B,H,W,3C) f32."""
    B, H, W, C = x.shape
    K = fused_w.shape[0]
    Cout = fused_w.shape[-1]
    C_qkv = Cout - C
    xpad = jnp.pad(x, ((0, 0), (1, 1), (1, 1), (0, 0))).astype(jnp.bfloat16)
    kernel = functools.partial(_fused_proj_kernel, tile_h=tile_h, W=W, K=K,
                               Cin=C, C_local=C, C_qkv=C_qkv)
    local, qkv = pl.pallas_call(
        kernel,
        out_shape=(jax.ShapeDtypeStruct((B, H, W, C), jnp.float32),
                   jax.ShapeDtypeStruct((B, H, W, C_qkv), jnp.float32)),
        grid=(B, H // tile_h),
        in_specs=[
            # full padded image per batch stays resident across the row-tile axis
            pl.BlockSpec((1, H + K - 1, W + K - 1, C), lambda b, r: (b, 0, 0, 0)),
            pl.BlockSpec((K, K, C, Cout), lambda b, r: (0, 0, 0, 0)),
            pl.BlockSpec((1, Cout), lambda b, r: (0, 0)),
        ],
        out_specs=[
            pl.BlockSpec((1, tile_h, W, C), lambda b, r: (b, r, 0, 0)),
            pl.BlockSpec((1, tile_h, W, C_qkv), lambda b, r: (b, r, 0, 0)),
        ],
        compiler_params=_cparams("parallel", "parallel"),
    )(xpad, fused_w.astype(jnp.bfloat16), fused_b.reshape(1, Cout).astype(jnp.float32))
    return local, qkv


# --------------------------------------------------------------------------------------
# Kernel 2: window attention, batched over NW_TILE windows per grid step
# --------------------------------------------------------------------------------------

def _window_attn_kernel(qkv_ref, bias_ref, o_ref, *, heads, hd, C, scale):
    outs = []
    for h in range(heads):
        q = qkv_ref[:, :, h * hd:(h + 1) * hd].astype(jnp.bfloat16)          # (G,n,hd)
        k = qkv_ref[:, :, C + h * hd:C + (h + 1) * hd].astype(jnp.bfloat16)
        v = qkv_ref[:, :, 2 * C + h * hd:2 * C + (h + 1) * hd].astype(jnp.bfloat16)
        s = jnp.einsum('gqd,gkd->gqk', q, k,
                       preferred_element_type=jnp.float32) * scale
        s = s + bias_ref[h]                                                   # (n,n) bias
        s = s - jnp.max(s, axis=-1, keepdims=True)
        p = jnp.exp(s)
        p = p * pl.reciprocal(jnp.sum(p, axis=-1, keepdims=True), approx=True)
        o = jnp.einsum('gqk,gkd->gqd', p.astype(jnp.bfloat16), v,
                       preferred_element_type=jnp.float32)
        outs.append(o)
    o_ref[...] = jnp.concatenate(outs, axis=-1).astype(o_ref.dtype)


def window_attention(qkv_win, bias, *, heads, scale, nw_tile):
    """qkv_win: (NW, n, 3C) f32, bias: (heads, n, n) f32 -> (NW, n, C) f32."""
    NW, n, C3 = qkv_win.shape
    C = C3 // 3
    hd = C // heads
    kernel = functools.partial(_window_attn_kernel, heads=heads, hd=hd, C=C, scale=scale)
    return pl.pallas_call(
        kernel,
        out_shape=jax.ShapeDtypeStruct((NW, n, C), jnp.float32),
        grid=(NW // nw_tile,),
        in_specs=[
            pl.BlockSpec((nw_tile, n, C3), lambda g: (g, 0, 0)),
            pl.BlockSpec((heads, n, n), lambda g: (0, 0, 0)),
        ],
        out_specs=pl.BlockSpec((nw_tile, n, C), lambda g: (g, 0, 0)),
        compiler_params=_cparams("parallel"),
    )(qkv_win, bias)


# --------------------------------------------------------------------------------------
# Kernel 3: fused attn_x + attn_y average pooling + local residual
# --------------------------------------------------------------------------------------

def _pool_add_local_kernel(xpad_ref, local_ref, o_ref, *, tile_h, W, ws, pad_h, pad_w, C):
    r = pl.program_id(1)
    row0 = pl.multiple_of(r * tile_h, tile_h)
    slab = xpad_ref[0, pl.ds(row0, tile_h + ws - 1), :, :]    # (tile_h+ws-1, W+ws-1, C)
    acc = jnp.zeros((tile_h, W, C), jnp.float32)
    for d in range(ws):
        acc = acc + slab[d:d + tile_h, pad_w:pad_w + W, :]     # attn_x (vertical pool)
        acc = acc + slab[pad_h:pad_h + tile_h, d:d + W, :]     # attn_y (horizontal pool)
    o_ref[0] = (acc * (1.0 / ws) + local_ref[0]).astype(o_ref.dtype)


def pool_add_local(attn, local, *, ws, tile_h):
    """attn, local: (B,H,W,C) f32 -> attn_x(attn) + attn_y(attn) + local."""
    B, H, W, C = attn.shape
    pad_h = ws // 2 - 1
    pad_w = ws // 2 - 1
    # reflect the extra bottom row / right col (F.pad(..., reflect)), then zero pad for
    # AvgPool2d(count_include_pad=True).  One padded copy serves both pooling directions.
    ar = jnp.pad(attn, ((0, 0), (0, 1), (0, 1), (0, 0)), mode='reflect')
    xpad = jnp.pad(ar, ((0, 0), (pad_h, pad_h), (pad_w, pad_w), (0, 0)))
    Hp_, Wp_ = xpad.shape[1], xpad.shape[2]
    kernel = functools.partial(_pool_add_local_kernel, tile_h=tile_h, W=W, ws=ws,
                               pad_h=pad_h, pad_w=pad_w, C=C)
    return pl.pallas_call(
        kernel,
        out_shape=jax.ShapeDtypeStruct((B, H, W, C), jnp.float32),
        grid=(B, H // tile_h),
        in_specs=[
            pl.BlockSpec((1, Hp_, Wp_, C), lambda b, r: (b, 0, 0, 0)),
            pl.BlockSpec((1, tile_h, W, C), lambda b, r: (b, r, 0, 0)),
        ],
        out_specs=pl.BlockSpec((1, tile_h, W, C), lambda b, r: (b, r, 0, 0)),
        compiler_params=_cparams("parallel", "parallel"),
    )(xpad, local)


# --------------------------------------------------------------------------------------
# Kernel 4: fused proj = depthwise(ws x ws) + pointwise(1x1)   (WTFConv2d approximation)
# --------------------------------------------------------------------------------------

def _proj_kernel(x_ref, wdw_ref, wpw_ref, o_ref, *, tile_h, W, ws, C):
    r = pl.program_id(1)
    row0 = pl.multiple_of(r * tile_h, tile_h)
    slab = x_ref[0, pl.ds(row0, tile_h + ws - 1), :, :]        # (tile_h+ws-1, W+ws+1, C)
    dw = jnp.zeros((tile_h, W, C), jnp.float32)
    for kh in range(ws):
        for kw in range(ws):
            dw = dw + slab[kh:kh + tile_h, kw:kw + W, :] * wdw_ref[kh, kw, :]
    out = jnp.dot(dw.reshape(tile_h * W, C).astype(jnp.bfloat16), wpw_ref[...],
                  preferred_element_type=jnp.float32)
    o_ref[0] = out.reshape(tile_h, W, C).astype(o_ref.dtype)


def proj_sep_conv(x, wdw, wpw, *, ws, tile_h):
    """x: (B,H,W,C) pre-pad_out feature map -> proj output cropped to (B,H,W,C)."""
    B, H, W, C = x.shape
    pw = ws // 2
    xp = jnp.pad(x, ((0, 0), (0, 1), (0, 1), (0, 0)), mode='reflect')   # module's pad_out
    xp = jnp.pad(xp, ((0, 0), (pw, pw), (pw, pw), (0, 0)))              # conv 'same' zero pad
    Hp_, Wp_ = xp.shape[1], xp.shape[2]
    kernel = functools.partial(_proj_kernel, tile_h=tile_h, W=W, ws=ws, C=C)
    return pl.pallas_call(
        kernel,
        out_shape=jax.ShapeDtypeStruct((B, H, W, C), jnp.float32),
        grid=(B, H // tile_h),
        in_specs=[
            pl.BlockSpec((1, Hp_, Wp_, C), lambda b, r: (b, 0, 0, 0)),
            pl.BlockSpec((ws, ws, C), lambda b, r: (0, 0, 0)),
            pl.BlockSpec((C, C), lambda b, r: (0, 0)),
        ],
        out_specs=pl.BlockSpec((1, tile_h, W, C), lambda b, r: (b, r, 0, 0)),
        compiler_params=_cparams("parallel", "parallel"),
    )(xp, wdw.astype(jnp.float32), wpw.astype(jnp.bfloat16))


# --------------------------------------------------------------------------------------
# Parameter setup (deterministic, synthetic)
# --------------------------------------------------------------------------------------

def _bn_params(key, c):
    k1, k2, k3, k4 = jax.random.split(key, 4)
    return dict(
        gamma=1.0 + 0.1 * jax.random.normal(k1, (c,), jnp.float32),
        beta=0.1 * jax.random.normal(k2, (c,), jnp.float32),
        mean=0.1 * jax.random.normal(k3, (c,), jnp.float32),
        var=1.0 + 0.1 * jnp.abs(jax.random.normal(k4, (c,), jnp.float32)),
    )


def fold_bn_into_conv(w, p):
    """w: (K,K,Cin,Cout), BN over Cout -> folded weight and bias."""
    scale = p['gamma'] / jnp.sqrt(p['var'] + BN_EPS)
    return w * scale, p['beta'] - p['mean'] * scale


def relative_position_index(ws):
    coords = np.stack(np.meshgrid(np.arange(ws), np.arange(ws), indexing='ij'))  # (2,ws,ws)
    coords_flat = coords.reshape(2, -1)
    rel = coords_flat[:, :, None] - coords_flat[:, None, :]                      # (2,n,n)
    rel = rel.transpose(1, 2, 0).copy()
    rel[:, :, 0] += ws - 1
    rel[:, :, 1] += ws - 1
    rel[:, :, 0] *= 2 * ws - 1
    return jnp.asarray(rel.sum(-1), jnp.int32)                                   # (n,n)


def init_params(key, dim, heads, ws):
    ks = jax.random.split(key, 8)

    def w(k, shape, std=0.05):
        return std * jax.random.normal(k, shape, jnp.float32)

    return dict(
        local1_w=w(ks[0], (3, 3, dim, dim)),
        local1_bn=_bn_params(ks[1], dim),
        local2_w=w(ks[2], (1, 1, dim, dim)),
        local2_bn=_bn_params(ks[3], dim),
        qkv_w=w(ks[4], (1, 1, dim, 3 * dim)),
        rel_table=0.02 * jax.random.normal(ks[5], ((2 * ws - 1) ** 2, heads), jnp.float32),
        rel_index=relative_position_index(ws),
        proj_dw_w=w(ks[6], (ws, ws, dim)),
        proj_pw_w=w(ks[7], (dim, dim)),
    )


# --------------------------------------------------------------------------------------
# GlobalLocalAttention forward
# --------------------------------------------------------------------------------------

def global_local_attention(x_nchw, p, *, heads, ws):
    x = jnp.transpose(x_nchw, (0, 2, 3, 1))                   # NCHW -> NHWC
    B, H, W, C = x.shape
    hd = C // heads
    scale = hd ** (-0.5)
    tile_h = 8 if H % 8 == 0 else H

    # ---- fused local1 + local2 + qkv projection (one MXU kernel, 4C-wide output) --------
    w1, b1 = fold_bn_into_conv(p['local1_w'], p['local1_bn'])
    w2, b2 = fold_bn_into_conv(p['local2_w'], p['local2_bn'])
    w_local = w1.at[1, 1].add(w2[0, 0])                       # local = local1 + local2
    w_qkv = jnp.zeros((3, 3, C, 3 * C), jnp.float32).at[1, 1].set(p['qkv_w'][0, 0])
    fused_w = jnp.concatenate([w_local, w_qkv], axis=-1)      # (3,3,C,4C)
    fused_b = jnp.concatenate([b1 + b2, jnp.zeros((3 * C,), jnp.float32)])
    local, qkv = fused_local_qkv_proj(x, fused_w, fused_b, tile_h=tile_h)

    # ---- window attention ----------------------------------------------------------------
    # (reflect pad the qkv projection; equivalent to projecting the reflect-padded input)
    qkv_p = qkv
    if W % ws != 0:
        qkv_p = jnp.pad(qkv_p, ((0, 0), (0, 0), (0, ws - W % ws), (0, 0)), mode='reflect')
    if H % ws != 0:
        qkv_p = jnp.pad(qkv_p, ((0, 0), (0, ws - H % ws), (0, 0), (0, 0)), mode='reflect')
    Hp, Wp = qkv_p.shape[1], qkv_p.shape[2]
    hh, ww = Hp // ws, Wp // ws
    n = ws * ws
    NW = B * hh * ww

    # spatial window partition only (heads stay packed in channels; split in-kernel)
    qkv_win = qkv_p.reshape(B, hh, ws, ww, ws, 3 * C).transpose(0, 1, 3, 2, 4, 5)
    qkv_win = qkv_win.reshape(NW, n, 3 * C)

    bias = p['rel_table'][p['rel_index'].reshape(-1)].reshape(n, n, heads)
    bias = jnp.transpose(bias, (2, 0, 1)).astype(jnp.float32)   # (heads, n, n)

    nw_tile = 8 if NW % 8 == 0 else 1
    attn_win = window_attention(qkv_win, bias, heads=heads, scale=scale, nw_tile=nw_tile)

    attn = attn_win.reshape(B, hh, ww, ws, ws, C).transpose(0, 1, 3, 2, 4, 5)
    attn = attn.reshape(B, Hp, Wp, C)[:, :H, :W, :]

    # ---- attn_x + attn_y pooling + local residual (single fused kernel) -------------------
    out = pool_add_local(attn, local, ws=ws, tile_h=tile_h)

    # ---- proj ------------------------------------------------------------------------------
    # TODO(synk): WTFConv2d (wavelet conv) source was not provided; approximated by a
    #             depthwise(ws x ws) + pointwise(1x1) separable conv.
    out = proj_sep_conv(out, p['proj_dw_w'], p['proj_pw_w'], ws=ws, tile_h=tile_h)

    return jnp.transpose(out, (0, 3, 1, 2))                   # NHWC -> NCHW


# --------------------------------------------------------------------------------------

if __name__ == "__main__":
    B, dim, H, W = 2, 32, 16, 16
    heads, ws = 4, 4

    key = jax.random.PRNGKey(0)
    kx, kp = jax.random.split(key)
    x = jax.random.normal(kx, (B, dim, H, W), jnp.float32)    # NCHW, like the PyTorch module
    params = init_params(kp, dim, heads, ws)

    fwd = jax.jit(functools.partial(global_local_attention, heads=heads, ws=ws))
    out = fwd(x, params)
    jax.block_until_ready(out)
    assert out.shape == (B, dim, H, W) and out.dtype == jnp.float32
    assert bool(jnp.all(jnp.isfinite(out)))
    print("KERNEL_OK")
</pallas_src>

<mosaic_0001>
module attributes {stable_mosaic.version = 11 : i64} {
  func.func @_fused_proj_kernel(%arg0: i32, %arg1: i32, %arg2: memref<1x18x18x32xbf16, #tpu.memory_space<vmem>>, %arg3: memref<3x3x32x128xbf16, #tpu.memory_space<vmem>>, %arg4: memref<1x128xf32, #tpu.memory_space<vmem>>, %arg5: memref<1x8x16x32xf32, #tpu.memory_space<vmem>>, %arg6: memref<1x8x16x96xf32, #tpu.memory_space<vmem>>) attributes {dimension_semantics = [#tpu.dimension_semantics<parallel>, #tpu.dimension_semantics<parallel>], iteration_bounds = array<i64: 2, 2>, scalar_prefetch = 0 : i64, scratch_operands = 0 : i64, tpu.core_type = #tpu.core_type<tc>, window_params = [{transform_indices = @transform_0, window_bounds = array<i64: 1, 18, 18, 32>}, {pipeline_mode = #tpu.pipeline_mode<synchronous>, transform_indices = @transform_1, window_bounds = array<i64: 3, 3, 32, 128>}, {pipeline_mode = #tpu.pipeline_mode<synchronous>, transform_indices = @transform_2, window_bounds = array<i64: 1, 128>}, {transform_indices = @transform_3, window_bounds = array<i64: 1, 8, 16, 32>}, {transform_indices = @transform_4, window_bounds = array<i64: 1, 8, 16, 96>}]} {
    %c8_i32 = arith.constant 8 : i32
    %0 = arith.muli %arg1, %c8_i32 : i32
    %1 = tpu.assume_multiple %0, 8 : i32
    %c0 = arith.constant 0 : index
    %2 = arith.index_cast %1 : i32 to index
    %c0_0 = arith.constant 0 : index
    %c0_1 = arith.constant 0 : index
    %3 = vector.load %arg2[%c0, %2, %c0_0, %c0_1] : memref<1x18x18x32xbf16, #tpu.memory_space<vmem>>, vector<1x10x18x32xbf16>
    %4 = vector.shape_cast %3 : vector<1x10x18x32xbf16> to vector<10x18x32xbf16>
    %cst = arith.constant 0.000000e+00 : f32
    %5 = vector.broadcast %cst : f32 to vector<128x128xf32>
    %6 = vector.extract_strided_slice %4 {offsets = [0, 0, 0], sizes = [8, 16, 32], strides = [1, 1, 1]} : vector<10x18x32xbf16> to vector<8x16x32xbf16>
    %7 = vector.shape_cast %6 : vector<8x16x32xbf16> to vector<128x32xbf16>
    %c0_2 = arith.constant 0 : index
    %c0_3 = arith.constant 0 : index
    %c0_4 = arith.constant 0 : index
    %c0_5 = arith.constant 0 : index
    %8 = vector.load %arg3[%c0_2, %c0_3, %c0_4, %c0_5] : memref<3x3x32x128xbf16, #tpu.memory_space<vmem>>, vector<1x1x32x128xbf16>
    %9 = vector.shape_cast %8 : vector<1x1x32x128xbf16> to vector<32x128xbf16>
    %cst_6 = arith.constant dense<0.000000e+00> : vector<128x128xf32>
    %10 = tpu.matmul %7, %9, %cst_6 {dimension_numbers = #tpu.dot_dimension_numbers<[1], [0], [0], [1], [0, 0, 1, 1], [], []>} : vector<128x32xbf16>, vector<32x128xbf16>, vector<128x128xf32> -> vector<128x128xf32>
    %11 = arith.addf %5, %10 : vector<128x128xf32>
    %12 = vector.extract_strided_slice %4 {offsets = [0, 1, 0], sizes = [8, 16, 32], strides = [1, 1, 1]} : vector<10x18x32xbf16> to vector<8x16x32xbf16>
    %13 = vector.shape_cast %12 : vector<8x16x32xbf16> to vector<128x32xbf16>
    %c0_7 = arith.constant 0 : index
    %c1 = arith.constant 1 : index
    %c0_8 = arith.constant 0 : index
    %c0_9 = arith.constant 0 : index
    %14 = vector.load %arg3[%c0_7, %c1, %c0_8, %c0_9] : memref<3x3x32x128xbf16, #tpu.memory_space<vmem>>, vector<1x1x32x128xbf16>
    %15 = vector.shape_cast %14 : vector<1x1x32x128xbf16> to vector<32x128xbf16>
    %cst_10 = arith.constant dense<0.000000e+00> : vector<128x128xf32>
    %16 = tpu.matmul %13, %15, %cst_10 {dimension_numbers = #tpu.dot_dimension_numbers<[1], [0], [0], [1], [0, 0, 1, 1], [], []>} : vector<128x32xbf16>, vector<32x128xbf16>, vector<128x128xf32> -> vector<128x128xf32>
    %17 = arith.addf %11, %16 : vector<128x128xf32>
    %18 = vector.extract_strided_slice %4 {offsets = [0, 2, 0], sizes = [8, 16, 32], strides = [1, 1, 1]} : vector<10x18x32xbf16> to vector<8x16x32xbf16>
    %19 = vector.shape_cast %18 : vector<8x16x32xbf16> to vector<128x32xbf16>
    %c0_11 = arith.constant 0 : index
    %c2 = arith.constant 2 : index
    %c0_12 = arith.constant 0 : index
    %c0_13 = arith.constant 0 : index
    %20 = vector.load %arg3[%c0_11, %c2, %c0_12, %c0_13] : memref<3x3x32x128xbf16, #tpu.memory_space<vmem>>, vector<1x1x32x128xbf16>
    %21 = vector.shape_cast %20 : vector<1x1x32x128xbf16> to vector<32x128xbf16>
    %cst_14 = arith.constant dense<0.000000e+00> : vector<128x128xf32>
    %22 = tpu.matmul %19, %21, %cst_14 {dimension_numbers = #tpu.dot_dimension_numbers<[1], [0], [0], [1], [0, 0, 1, 1], [], []>} : vector<128x32xbf16>, vector<32x128xbf16>, vector<128x128xf32> -> vector<128x128xf32>
    %23 = arith.addf %17, %22 : vector<128x128xf32>
    %24 = vector.extract_strided_slice %4 {offsets = [1, 0, 0], sizes = [8, 16, 32], strides = [1, 1, 1]} : vector<10x18x32xbf16> to vector<8x16x32xbf16>
    %25 = vector.shape_cast %24 : vector<8x16x32xbf16> to vector<128x32xbf16>
    %c1_15 = arith.constant 1 : index
    %c0_16 = arith.constant 0 : index
    %c0_17 = arith.constant 0 : index
    %c0_18 = arith.constant 0 : index
    %26 = vector.load %arg3[%c1_15, %c0_16, %c0_17, %c0_18] : memref<3x3x32x128xbf16, #tpu.memory_space<vmem>>, vector<1x1x32x128xbf16>
    %27 = vector.shape_cast %26 : vector<1x1x32x128xbf16> to vector<32x128xbf16>
    %cst_19 = arith.constant dense<0.000000e+00> : vector<128x128xf32>
    %28 = tpu.matmul %25, %27, %cst_19 {dimension_numbers = #tpu.dot_dimension_numbers<[1], [0], [0], [1], [0, 0, 1, 1], [], []>} : vector<128x32xbf16>, vector<32x128xbf16>, vector<128x128xf32> -> vector<128x128xf32>
    %29 = arith.addf %23, %28 : vector<128x128xf32>
    %30 = vector.extract_strided_slice %4 {offsets = [1, 1, 0], sizes = [8, 16, 32], strides = [1, 1, 1]} : vector<10x18x32xbf16> to vector<8x16x32xbf16>
    %31 = vector.shape_cast %30 : vector<8x16x32xbf16> to vector<128x32xbf16>
    %c1_20 = arith.constant 1 : index
    %c1_21 = arith.constant 1 : index
    %c0_22 = arith.constant 0 : index
    %c0_23 = arith.constant 0 : index
    %32 = vector.load %arg3[%c1_20, %c1_21, %c0_22, %c0_23] : memref<3x3x32x128xbf16, #tpu.memory_space<vmem>>, vector<1x1x32x128xbf16>
    %33 = vector.shape_cast %32 : vector<1x1x32x128xbf16> to vector<32x128xbf16>
    %cst_24 = arith.constant dense<0.000000e+00> : vector<128x128xf32>
    %34 = tpu.matmul %31, %33, %cst_24 {dimension_numbers = #tpu.dot_dimension_numbers<[1], [0], [0], [1], [0, 0, 1, 1], [], []>} : vector<128x32xbf16>, vector<32x128xbf16>, vector<128x128xf32> -> vector<128x128xf32>
    %35 = arith.addf %29, %34 : vector<128x128xf32>
    %36 = vector.extract_strided_slice %4 {offsets = [1, 2, 0], sizes = [8, 16, 32], strides = [1, 1, 1]} : vector<10x18x32xbf16> to vector<8x16x32xbf16>
    %37 = vector.shape_cast %36 : vector<8x16x32xbf16> to vector<128x32xbf16>
    %c1_25 = arith.constant 1 : index
    %c2_26 = arith.constant 2 : index
    %c0_27 = arith.constant 0 : index
    %c0_28 = arith.constant 0 : index
    %38 = vector.load %arg3[%c1_25, %c2_26, %c0_27, %c0_28] : memref<3x3x32x128xbf16, #tpu.memory_space<vmem>>, vector<1x1x32x128xbf16>
    %39 = vector.shape_cast %38 : vector<1x1x32x128xbf16> to vector<32x128xbf16>
    %cst_29 = arith.constant dense<0.000000e+00> : vector<128x128xf32>
    %40 = tpu.matmul %37, %39, %cst_29 {dimension_numbers = #tpu.dot_dimension_numbers<[1], [0], [0], [1], [0, 0, 1, 1], [], []>} : vector<128x32xbf16>, vector<32x128xbf16>, vector<128x128xf32> -> vector<128x128xf32>
    %41 = arith.addf %35, %40 : vector<128x128xf32>
    %42 = vector.extract_strided_slice %4 {offsets = [2, 0, 0], sizes = [8, 16, 32], strides = [1, 1, 1]} : vector<10x18x32xbf16> to vector<8x16x32xbf16>
    %43 = vector.shape_cast %42 : vector<8x16x32xbf16> to vector<128x32xbf16>
    %c2_30 = arith.constant 2 : index
    %c0_31 = arith.constant 0 : index
    %c0_32 = arith.constant 0 : index
    %c0_33 = arith.constant 0 : index
    %44 = vector.load %arg3[%c2_30, %c0_31, %c0_32, %c0_33] : memref<3x3x32x128xbf16, #tpu.memory_space<vmem>>, vector<1x1x32x128xbf16>
    %45 = vector.shape_cast %44 : vector<1x1x32x128xbf16> to vector<32x128xbf16>
    %cst_34 = arith.constant dense<0.000000e+00> : vector<128x128xf32>
    %46 = tpu.matmul %43, %45, %cst_34 {dimension_numbers = #tpu.dot_dimension_numbers<[1], [0], [0], [1], [0, 0, 1, 1], [], []>} : vector<128x32xbf16>, vector<32x128xbf16>, vector<128x128xf32> -> vector<128x128xf32>
    %47 = arith.addf %41, %46 : vector<128x128xf32>
    %48 = vector.extract_strided_slice %4 {offsets = [2, 1, 0], sizes = [8, 16, 32], strides = [1, 1, 1]} : vector<10x18x32xbf16> to vector<8x16x32xbf16>
    %49 = vector.shape_cast %48 : vector<8x16x32xbf16> to vector<128x32xbf16>
    %c2_35 = arith.constant 2 : index
    %c1_36 = arith.constant 1 : index
    %c0_37 = arith.constant 0 : index
    %c0_38 = arith.constant 0 : index
    %50 = vector.load %arg3[%c2_35, %c1_36, %c0_37, %c0_38] : memref<3x3x32x128xbf16, #tpu.memory_space<vmem>>, vector<1x1x32x128xbf16>
    %51 = vector.shape_cast %50 : vector<1x1x32x128xbf16> to vector<32x128xbf16>
    %cst_39 = arith.constant dense<0.000000e+00> : vector<128x128xf32>
    %52 = tpu.matmul %49, %51, %cst_39 {dimension_numbers = #tpu.dot_dimension_numbers<[1], [0], [0], [1], [0, 0, 1, 1], [], []>} : vector<128x32xbf16>, vector<32x128xbf16>, vector<128x128xf32> -> vector<128x128xf32>
    %53 = arith.addf %47, %52 : vector<128x128xf32>
    %54 = vector.extract_strided_slice %4 {offsets = [2, 2, 0], sizes = [8, 16, 32], strides = [1, 1, 1]} : vector<10x18x32xbf16> to vector<8x16x32xbf16>
    %55 = vector.shape_cast %54 : vector<8x16x32xbf16> to vector<128x32xbf16>
    %c2_40 = arith.constant 2 : index
    %c2_41 = arith.constant 2 : index
    %c0_42 = arith.constant 0 : index
    %c0_43 = arith.constant 0 : index
    %56 = vector.load %arg3[%c2_40, %c2_41, %c0_42, %c0_43] : memref<3x3x32x128xbf16, #tpu.memory_space<vmem>>, vector<1x1x32x128xbf16>
    %57 = vector.shape_cast %56 : vector<1x1x32x128xbf16> to vector<32x128xbf16>
    %cst_44 = arith.constant dense<0.000000e+00> : vector<128x128xf32>
    %58 = tpu.matmul %55, %57, %cst_44 {dimension_numbers = #tpu.dot_dimension_numbers<[1], [0], [0], [1], [0, 0, 1, 1], [], []>} : vector<128x32xbf16>, vector<32x128xbf16>, vector<128x128xf32> -> vector<128x128xf32>
    %59 = arith.addf %53, %58 : vector<128x128xf32>
    %c0_45 = arith.constant 0 : index
    %c0_46 = arith.constant 0 : index
    %60 = vector.load %arg4[%c0_45, %c0_46] : memref<1x128xf32, #tpu.memory_space<vmem>>, vector<1x128xf32>
    %61 = vector.broadcast %60 : vector<1x128xf32> to vector<128x128xf32>
    %62 = arith.addf %59, %61 : vector<128x128xf32>
    %63 = vector.shape_cast %62 : vector<128x128xf32> to vector<8x16x128xf32>
    %64 = vector.extract_strided_slice %63 {offsets = [0, 0, 0], sizes = [8, 16, 32], strides = [1, 1, 1]} : vector<8x16x128xf32> to vector<8x16x32xf32>
    %c0_47 = arith.constant 0 : index
    %c0_48 = arith.constant 0 : index
    %c0_49 = arith.constant 0 : index
    %c0_50 = arith.constant 0 : index
    %65 = vector.load %arg5[%c0_47, %c0_48, %c0_49, %c0_50] : memref<1x8x16x32xf32, #tpu.memory_space<vmem>>, vector<1x8x16x32xf32>
    %66 = vector.shape_cast %65 : vector<1x8x16x32xf32> to vector<8x16x32xf32>
    %67 = vector.shape_cast %64 : vector<8x16x32xf32> to vector<1x8x16x32xf32>
    tpu.vector_store %arg5[%c0_47, %c0_48, %c0_49, %c0_50], %67 {strides = array<i32>} : memref<1x8x16x32xf32, #tpu.memory_space<vmem>>, vector<1x8x16x32xf32>,
    %68 = vector.extract_strided_slice %63 {offsets = [0, 0, 32], sizes = [8, 16, 96], strides = [1, 1, 1]} : vector<8x16x128xf32> to vector<8x16x96xf32>
    %c0_51 = arith.constant 0 : index
    %c0_52 = arith.constant 0 : index
    %c0_53 = arith.constant 0 : index
    %c0_54 = arith.constant 0 : index
    %69 = vector.load %arg6[%c0_51, %c0_52, %c0_53, %c0_54] : memref<1x8x16x96xf32, #tpu.memory_space<vmem>>, vector<1x8x16x96xf32>
    %70 = vector.shape_cast %69 : vector<1x8x16x96xf32> to vector<8x16x96xf32>
    %71 = vector.shape_cast %68 : vector<8x16x96xf32> to vector<1x8x16x96xf32>
    tpu.vector_store %arg6[%c0_51, %c0_52, %c0_53, %c0_54], %71 {strides = array<i32>} : memref<1x8x16x96xf32, #tpu.memory_space<vmem>>, vector<1x8x16x96xf32>,
    return
  }
  func.func @transform_0(%arg0: i32, %arg1: i32) -> (i32, i32, i32, i32) {
    %c0_i32 = arith.constant 0 : i32
    %c0_i32_0 = arith.constant 0 : i32
    %c0_i32_1 = arith.constant 0 : i32
    %c0_i32_2 = arith.constant 0 : i32
    return %arg0, %c0_i32, %c0_i32_0, %c0_i32_1 : i32, i32, i32, i32
  }
  func.func @transform_1(%arg0: i32, %arg1: i32) -> (i32, i32, i32, i32) {
    %c0_i32 = arith.constant 0 : i32
    %c0_i32_0 = arith.constant 0 : i32
    %c0_i32_1 = arith.constant 0 : i32
    %c0_i32_2 = arith.constant 0 : i32
    %c0_i32_3 = arith.constant 0 : i32
    return %c0_i32, %c0_i32_0, %c0_i32_1, %c0_i32_2 : i32, i32, i32, i32
  }
  func.func @transform_2(%arg0: i32, %arg1: i32) -> (i32, i32) {
    %c0_i32 = arith.constant 0 : i32
    %c0_i32_0 = arith.constant 0 : i32
    %c0_i32_1 = arith.constant 0 : i32
    return %c0_i32, %c0_i32_0 : i32, i32
  }
  func.func @transform_3(%arg0: i32, %arg1: i32) -> (i32, i32, i32, i32) {
    %c0_i32 = arith.constant 0 : i32
    %c0_i32_0 = arith.constant 0 : i32
    %c0_i32_1 = arith.constant 0 : i32
    return %arg0, %arg1, %c0_i32, %c0_i32_0 : i32, i32, i32, i32
  }
  func.func @transform_4(%arg0: i32, %arg1: i32) -> (i32, i32, i32, i32) {
    %c0_i32 = arith.constant 0 : i32
    %c0_i32_0 = arith.constant 0 : i32
    %c0_i32_1 = arith.constant 0 : i32
    return %arg0, %arg1, %c0_i32, %c0_i32_0 : i32, i32, i32, i32
  }
}

module attributes {stable_mosaic.version = 11 : i64} {
  func.func @_window_attn_kernel(%arg0: i32, %arg1: memref<8x16x96xf32, #tpu.memory_space<vmem>>, %arg2: memref<4x16x16xf32, #tpu.memory_space<vmem>>, %arg3: memref<8x16x32xf32, #tpu.memory_space<vmem>>) attributes {dimension_semantics = [#tpu.dimension_semantics<parallel>], iteration_bounds = array<i64: 4>, scalar_prefetch = 0 : i64, scratch_operands = 0 : i64, tpu.core_type = #tpu.core_type<tc>, window_params = [{transform_indices = @transform_0, window_bounds = array<i64: 8, 16, 96>}, {pipeline_mode = #tpu.pipeline_mode<synchronous>, transform_indices = @transform_1, window_bounds = array<i64: 4, 16, 16>}, {transform_indices = @transform_2, window_bounds = array<i64: 8, 16, 32>}]} {
    %c0 = arith.constant 0 : index
    %c0_0 = arith.constant 0 : index
    %c0_1 = arith.constant 0 : index
    %0 = vector.load %arg1[%c0, %c0_0, %c0_1] : memref<8x16x96xf32, #tpu.memory_space<vmem>>, vector<8x16x8xf32>
    %1 = arith.truncf %0 : vector<8x16x8xf32> to vector<8x16x8xbf16>
    %c0_2 = arith.constant 0 : index
    %c0_3 = arith.constant 0 : index
    %c32 = arith.constant 32 : index
    %2 = vector.load %arg1[%c0_2, %c0_3, %c32] : memref<8x16x96xf32, #tpu.memory_space<vmem>>, vector<8x16x8xf32>
    %3 = arith.truncf %2 : vector<8x16x8xf32> to vector<8x16x8xbf16>
    %c0_4 = arith.constant 0 : index
    %c0_5 = arith.constant 0 : index
    %c64 = arith.constant 64 : index
    %4 = vector.load %arg1[%c0_4, %c0_5, %c64] : memref<8x16x96xf32, #tpu.memory_space<vmem>>, vector<8x16x8xf32>
    %5 = arith.truncf %4 : vector<8x16x8xf32> to vector<8x16x8xbf16>
    "tpu.trace_start"() <{level = 10 : i32, message = "gqd,gkd->gqk"}> : () -> ()
    %cst = arith.constant dense<0.000000e+00> : vector<8x16x16xf32>
    %6 = tpu.matmul %1, %3, %cst {dimension_numbers = #tpu.dot_dimension_numbers<[2], [2], [1], [1], [0, 0, 0, 1, 1, 1], [0], [0]>} : vector<8x16x8xbf16>, vector<8x16x8xbf16>, vector<8x16x16xf32> -> vector<8x16x16xf32>
    "tpu.trace_stop"() : () -> ()
    %cst_6 = arith.constant 0.353553385 : f32
    %7 = vector.broadcast %cst_6 : f32 to vector<8x16x16xf32>
    %8 = arith.mulf %6, %7 : vector<8x16x16xf32>
    %c0_7 = arith.constant 0 : index
    %c0_8 = arith.constant 0 : index
    %c0_9 = arith.constant 0 : index
    %9 = vector.load %arg2[%c0_7, %c0_8, %c0_9] : memref<4x16x16xf32, #tpu.memory_space<vmem>>, vector<1x16x16xf32>
    %10 = vector.shape_cast %9 : vector<1x16x16xf32> to vector<16x16xf32>
    %11 = vector.shape_cast %10 : vector<16x16xf32> to vector<1x16x16xf32>
    %12 = vector.broadcast %11 : vector<1x16x16xf32> to vector<8x16x16xf32>
    %13 = arith.addf %8, %12 : vector<8x16x16xf32>
    %cst_10 = arith.constant dense<0xFF800000> : vector<8x16xf32>
    %14 = vector.multi_reduction <maximumf>, %13, %cst_10 [2] : vector<8x16x16xf32> to vector<8x16xf32>
    %15 = vector.shape_cast %14 : vector<8x16xf32> to vector<8x16x1xf32>
    %16 = vector.broadcast %15 : vector<8x16x1xf32> to vector<8x16x16xf32>
    %17 = arith.subf %13, %16 : vector<8x16x16xf32>
    %18 = math.exp %17 : vector<8x16x16xf32>
    %cst_11 = arith.constant dense<0.000000e+00> : vector<8x16xf32>
    %19 = vector.multi_reduction <add>, %18, %cst_11 [2] : vector<8x16x16xf32> to vector<8x16xf32>
    %20 = vector.shape_cast %19 : vector<8x16xf32> to vector<8x16x1xf32>
    %21 = tpu.reciprocal %20 {approx = true} : vector<8x16x1xf32> -> vector<8x16x1xf32>
    %22 = vector.broadcast %21 : vector<8x16x1xf32> to vector<8x16x16xf32>
    %23 = arith.mulf %18, %22 : vector<8x16x16xf32>
    %24 = arith.truncf %23 : vector<8x16x16xf32> to vector<8x16x16xbf16>
    "tpu.trace_start"() <{level = 10 : i32, message = "gqk,gkd->gqd"}> : () -> ()
    %cst_12 = arith.constant dense<0.000000e+00> : vector<8x16x8xf32>
    %25 = tpu.matmul %24, %5, %cst_12 {dimension_numbers = #tpu.dot_dimension_numbers<[2], [1], [1], [2], [0, 0, 0, 1, 1, 2], [0], [0]>} : vector<8x16x16xbf16>, vector<8x16x8xbf16>, vector<8x16x8xf32> -> vector<8x16x8xf32>
    "tpu.trace_stop"() : () -> ()
    %c0_13 = arith.constant 0 : index
    %c0_14 = arith.constant 0 : index
    %c8 = arith.constant 8 : index
    %26 = vector.load %arg1[%c0_13, %c0_14, %c8] : memref<8x16x96xf32, #tpu.memory_space<vmem>>, vector<8x16x8xf32>
    %27 = arith.truncf %26 : vector<8x16x8xf32> to vector<8x16x8xbf16>
    %c0_15 = arith.constant 0 : index
    %c0_16 = arith.constant 0 : index
    %c40 = arith.constant 40 : index
    %28 = vector.load %arg1[%c0_15, %c0_16, %c40] : memref<8x16x96xf32, #tpu.memory_space<vmem>>, vector<8x16x8xf32>
    %29 = arith.truncf %28 : vector<8x16x8xf32> to vector<8x16x8xbf16>
    %c0_17 = arith.constant 0 : index
    %c0_18 = arith.constant 0 : index
    %c72 = arith.constant 72 : index
    %30 = vector.load %arg1[%c0_17, %c0_18, %c72] : memref<8x16x96xf32, #tpu.memory_space<vmem>>, vector<8x16x8xf32>
    %31 = arith.truncf %30 : vector<8x16x8xf32> to vector<8x16x8xbf16>
    "tpu.trace_start"() <{level = 10 : i32, message = "gqd,gkd->gqk"}> : () -> ()
    %cst_19 = arith.constant dense<0.000000e+00> : vector<8x16x16xf32>
    %32 = tpu.matmul %27, %29, %cst_19 {dimension_numbers = #tpu.dot_dimension_numbers<[2], [2], [1], [1], [0, 0, 0, 1, 1, 1], [0], [0]>} : vector<8x16x8xbf16>, vector<8x16x8xbf16>, vector<8x16x16xf32> -> vector<8x16x16xf32>
    "tpu.trace_stop"() : () -> ()
    %cst_20 = arith.constant 0.353553385 : f32
    %33 = vector.broadcast %cst_20 : f32 to vector<8x16x16xf32>
    %34 = arith.mulf %32, %33 : vector<8x16x16xf32>
    %c1 = arith.constant 1 : index
    %c0_21 = arith.constant 0 : index
    %c0_22 = arith.constant 0 : index
    %35 = vector.load %arg2[%c1, %c0_21, %c0_22] : memref<4x16x16xf32, #tpu.memory_space<vmem>>, vector<1x16x16xf32>
    %36 = vector.shape_cast %35 : vector<1x16x16xf32> to vector<16x16xf32>
    %37 = vector.shape_cast %36 : vector<16x16xf32> to vector<1x16x16xf32>
    %38 = vector.broadcast %37 : vector<1x16x16xf32> to vector<8x16x16xf32>
    %39 = arith.addf %34, %38 : vector<8x16x16xf32>
    %cst_23 = arith.constant dense<0xFF800000> : vector<8x16xf32>
    %40 = vector.multi_reduction <maximumf>, %39, %cst_23 [2] : vector<8x16x16xf32> to vector<8x16xf32>
    %41 = vector.shape_cast %40 : vector<8x16xf32> to vector<8x16x1xf32>
    %42 = vector.broadcast %41 : vector<8x16x1xf32> to vector<8x16x16xf32>
    %43 = arith.subf %39, %42 : vector<8x16x16xf32>
    %44 = math.exp %43 : vector<8x16x16xf32>
    %cst_24 = arith.constant dense<0.000000e+00> : vector<8x16xf32>
    %45 = vector.multi_reduction <add>, %44, %cst_24 [2] : vector<8x16x16xf32> to vector<8x16xf32>
    %46 = vector.shape_cast %45 : vector<8x16xf32> to vector<8x16x1xf32>
    %47 = tpu.reciprocal %46 {approx = true} : vector<8x16x1xf32> -> vector<8x16x1xf32>
    %48 = vector.broadcast %47 : vector<8x16x1xf32> to vector<8x16x16xf32>
    %49 = arith.mulf %44, %48 : vector<8x16x16xf32>
    %50 = arith.truncf %49 : vector<8x16x16xf32> to vector<8x16x16xbf16>
    "tpu.trace_start"() <{level = 10 : i32, message = "gqk,gkd->gqd"}> : () -> ()
    %cst_25 = arith.constant dense<0.000000e+00> : vector<8x16x8xf32>
    %51 = tpu.matmul %50, %31, %cst_25 {dimension_numbers = #tpu.dot_dimension_numbers<[2], [1], [1], [2], [0, 0, 0, 1, 1, 2], [0], [0]>} : vector<8x16x16xbf16>, vector<8x16x8xbf16>, vector<8x16x8xf32> -> vector<8x16x8xf32>
    "tpu.trace_stop"() : () -> ()
    %c0_26 = arith.constant 0 : index
    %c0_27 = arith.constant 0 : index
    %c16 = arith.constant 16 : index
    %52 = vector.load %arg1[%c0_26, %c0_27, %c16] : memref<8x16x96xf32, #tpu.memory_space<vmem>>, vector<8x16x8xf32>
    %53 = arith.truncf %52 : vector<8x16x8xf32> to vector<8x16x8xbf16>
    %c0_28 = arith.constant 0 : index
    %c0_29 = arith.constant 0 : index
    %c48 = arith.constant 48 : index
    %54 = vector.load %arg1[%c0_28, %c0_29, %c48] : memref<8x16x96xf32, #tpu.memory_space<vmem>>, vector<8x16x8xf32>
    %55 = arith.truncf %54 : vector<8x16x8xf32> to vector<8x16x8xbf16>
    %c0_30 = arith.constant 0 : index
    %c0_31 = arith.constant 0 : index
    %c80 = arith.constant 80 : index
    %56 = vector.load %arg1[%c0_30, %c0_31, %c80] : memref<8x16x96xf32, #tpu.memory_space<vmem>>, vector<8x16x8xf32>
    %57 = arith.truncf %56 : vector<8x16x8xf32> to vector<8x16x8xbf16>
    "tpu.trace_start"() <{level = 10 : i32, message = "gqd,gkd->gqk"}> : () -> ()
    %cst_32 = arith.constant dense<0.000000e+00> : vector<8x16x16xf32>
    %58 = tpu.matmul %53, %55, %cst_32 {dimension_numbers = #tpu.dot_dimension_numbers<[2], [2], [1], [1], [0, 0, 0, 1, 1, 1], [0], [0]>} : vector<8x16x8xbf16>, vector<8x16x8xbf16>, vector<8x16x16xf32> -> vector<8x16x16xf32>
    "tpu.trace_stop"() : () -> ()
    %cst_33 = arith.constant 0.353553385 : f32
    %59 = vector.broadcast %cst_33 : f32 to vector<8x16x16xf32>
    %60 = arith.mulf %58, %59 : vector<8x16x16xf32>
    %c2 = arith.constant 2 : index
    %c0_34 = arith.constant 0 : index
    %c0_35 = arith.constant 0 : index
    %61 = vector.load %arg2[%c2, %c0_34, %c0_35] : memref<4x16x16xf32, #tpu.memory_space<vmem>>, vector<1x16x16xf32>
    %62 = vector.shape_cast %61 : vector<1x16x16xf32> to vector<16x16xf32>
    %63 = vector.shape_cast %62 : vector<16x16xf32> to vector<1x16x16xf32>
    %64 = vector.broadcast %63 : vector<1x16x16xf32> to vector<8x16x16xf32>
    %65 = arith.addf %60, %64 : vector<8x16x16xf32>
    %cst_36 = arith.constant dense<0xFF800000> : vector<8x16xf32>
    %66 = vector.multi_reduction <maximumf>, %65, %cst_36 [2] : vector<8x16x16xf32> to vector<8x16xf32>
    %67 = vector.shape_cast %66 : vector<8x16xf32> to vector<8x16x1xf32>
    %68 = vector.broadcast %67 : vector<8x16x1xf32> to vector<8x16x16xf32>
    %69 = arith.subf %65, %68 : vector<8x16x16xf32>
    %70 = math.exp %69 : vector<8x16x16xf32>
    %cst_37 = arith.constant dense<0.000000e+00> : vector<8x16xf32>
    %71 = vector.multi_reduction <add>, %70, %cst_37 [2] : vector<8x16x16xf32> to vector<8x16xf32>
    %72 = vector.shape_cast %71 : vector<8x16xf32> to vector<8x16x1xf32>
    %73 = tpu.reciprocal %72 {approx = true} : vector<8x16x1xf32> -> vector<8x16x1xf32>
    %74 = vector.broadcast %73 : vector<8x16x1xf32> to vector<8x16x16xf32>
    %75 = arith.mulf %70, %74 : vector<8x16x16xf32>
    %76 = arith.truncf %75 : vector<8x16x16xf32> to vector<8x16x16xbf16>
    "tpu.trace_start"() <{level = 10 : i32, message = "gqk,gkd->gqd"}> : () -> ()
    %cst_38 = arith.constant dense<0.000000e+00> : vector<8x16x8xf32>
    %77 = tpu.matmul %76, %57, %cst_38 {dimension_numbers = #tpu.dot_dimension_numbers<[2], [1], [1], [2], [0, 0, 0, 1, 1, 2], [0], [0]>} : vector<8x16x16xbf16>, vector<8x16x8xbf16>, vector<8x16x8xf32> -> vector<8x16x8xf32>
    "tpu.trace_stop"() : () -> ()
    %c0_39 = arith.constant 0 : index
    %c0_40 = arith.constant 0 : index
    %c24 = arith.constant 24 : index
    %78 = vector.load %arg1[%c0_39, %c0_40, %c24] : memref<8x16x96xf32, #tpu.memory_space<vmem>>, vector<8x16x8xf32>
    %79 = arith.truncf %78 : vector<8x16x8xf32> to vector<8x16x8xbf16>
    %c0_41 = arith.constant 0 : index
    %c0_42 = arith.constant 0 : index
    %c56 = arith.constant 56 : index
    %80 = vector.load %arg1[%c0_41, %c0_42, %c56] : memref<8x16x96xf32, #tpu.memory_space<vmem>>, vector<8x16x8xf32>
    %81 = arith.truncf %80 : vector<8x16x8xf32> to vector<8x16x8xbf16>
    %c0_43 = arith.constant 0 : index
    %c0_44 = arith.constant 0 : index
    %c88 = arith.constant 88 : index
    %82 = vector.load %arg1[%c0_43, %c0_44, %c88] : memref<8x16x96xf32, #tpu.memory_space<vmem>>, vector<8x16x8xf32>
    %83 = arith.truncf %82 : vector<8x16x8xf32> to vector<8x16x8xbf16>
    "tpu.trace_start"() <{level = 10 : i32, message = "gqd,gkd->gqk"}> : () -> ()
    %cst_45 = arith.constant dense<0.000000e+00> : vector<8x16x16xf32>
    %84 = tpu.matmul %79, %81, %cst_45 {dimension_numbers = #tpu.dot_dimension_numbers<[2], [2], [1], [1], [0, 0, 0, 1, 1, 1], [0], [0]>} : vector<8x16x8xbf16>, vector<8x16x8xbf16>, vector<8x16x16xf32> -> vector<8x16x16xf32>
    "tpu.trace_stop"() : () -> ()
    %cst_46 = arith.constant 0.353553385 : f32
    %85 = vector.broadcast %cst_46 : f32 to vector<8x16x16xf32>
    %86 = arith.mulf %84, %85 : vector<8x16x16xf32>
    %c3 = arith.constant 3 : index
    %c0_47 = arith.constant 0 : index
    %c0_48 = arith.constant 0 : index
    %87 = vector.load %arg2[%c3, %c0_47, %c0_48] : memref<4x16x16xf32, #tpu.memory_space<vmem>>, vector<1x16x16xf32>
    %88 = vector.shape_cast %87 : vector<1x16x16xf32> to vector<16x16xf32>
    %89 = vector.shape_cast %88 : vector<16x16xf32> to vector<1x16x16xf32>
    %90 = vector.broadcast %89 : vector<1x16x16xf32> to vector<8x16x16xf32>
    %91 = arith.addf %86, %90 : vector<8x16x16xf32>
    %cst_49 = arith.constant dense<0xFF800000> : vector<8x16xf32>
    %92 = vector.multi_reduction <maximumf>, %91, %cst_49 [2] : vector<8x16x16xf32> to vector<8x16xf32>
    %93 = vector.shape_cast %92 : vector<8x16xf32> to vector<8x16x1xf32>
    %94 = vector.broadcast %93 : vector<8x16x1xf32> to vector<8x16x16xf32>
    %95 = arith.subf %91, %94 : vector<8x16x16xf32>
    %96 = math.exp %95 : vector<8x16x16xf32>
    %cst_50 = arith.constant dense<0.000000e+00> : vector<8x16xf32>
    %97 = vector.multi_reduction <add>, %96, %cst_50 [2] : vector<8x16x16xf32> to vector<8x16xf32>
    %98 = vector.shape_cast %97 : vector<8x16xf32> to vector<8x16x1xf32>
    %99 = tpu.reciprocal %98 {approx = true} : vector<8x16x1xf32> -> vector<8x16x1xf32>
    %100 = vector.broadcast %99 : vector<8x16x1xf32> to vector<8x16x16xf32>
    %101 = arith.mulf %96, %100 : vector<8x16x16xf32>
    %102 = arith.truncf %101 : vector<8x16x16xf32> to vector<8x16x16xbf16>
    "tpu.trace_start"() <{level = 10 : i32, message = "gqk,gkd->gqd"}> : () -> ()
    %cst_51 = arith.constant dense<0.000000e+00> : vector<8x16x8xf32>
    %103 = tpu.matmul %102, %83, %cst_51 {dimension_numbers = #tpu.dot_dimension_numbers<[2], [1], [1], [2], [0, 0, 0, 1, 1, 2], [0], [0]>} : vector<8x16x16xbf16>, vector<8x16x8xbf16>, vector<8x16x8xf32> -> vector<8x16x8xf32>
    "tpu.trace_stop"() : () -> ()
    %104 = tpu.concatenate %25, %51, %77, %103 in 2 : vector<8x16x8xf32>, vector<8x16x8xf32>, vector<8x16x8xf32>, vector<8x16x8xf32> -> vector<8x16x32xf32>
    %c0_52 = arith.constant 0 : index
    %c0_53 = arith.constant 0 : index
    %c0_54 = arith.constant 0 : index
    %105 = vector.load %arg3[%c0_52, %c0_53, %c0_54] : memref<8x16x32xf32, #tpu.memory_space<vmem>>, vector<8x16x32xf32>
    tpu.vector_store %arg3[%c0_52, %c0_53, %c0_54], %104 {strides = array<i32>} : memref<8x16x32xf32, #tpu.memory_space<vmem>>, vector<8x16x32xf32>,
    return
  }
  func.func @transform_0(%arg0: i32) -> (i32, i32, i32) {
    %c0_i32 = arith.constant 0 : i32
    %c0_i32_0 = arith.constant 0 : i32
    %c0_i32_1 = arith.constant 0 : i32
    return %arg0, %c0_i32, %c0_i32_0 : i32, i32, i32
  }
  func.func @transform_1(%arg0: i32) -> (i32, i32, i32) {
    %c0_i32 = arith.constant 0 : i32
    %c0_i32_0 = arith.constant 0 : i32
    %c0_i32_1 = arith.constant 0 : i32
    %c0_i32_2 = arith.constant 0 : i32
    return %c0_i32, %c0_i32_0, %c0_i32_1 : i32, i32, i32
  }
  func.func @transform_2(%arg0: i32) -> (i32, i32, i32) {
    %c0_i32 = arith.constant 0 : i32
    %c0_i32_0 = arith.constant 0 : i32
    %c0_i32_1 = arith.constant 0 : i32
    return %arg0, %c0_i32, %c0_i32_0 : i32, i32, i32
  }
}

module attributes {stable_mosaic.version = 11 : i64} {
  func.func @_pool_add_local_kernel(%arg0: i32, %arg1: i32, %arg2: memref<1x19x19x32xf32, #tpu.memory_space<vmem>>, %arg3: memref<1x8x16x32xf32, #tpu.memory_space<vmem>>, %arg4: memref<1x8x16x32xf32, #tpu.memory_space<vmem>>) attributes {dimension_semantics = [#tpu.dimension_semantics<parallel>, #tpu.dimension_semantics<parallel>], iteration_bounds = array<i64: 2, 2>, scalar_prefetch = 0 : i64, scratch_operands = 0 : i64, tpu.core_type = #tpu.core_type<tc>, window_params = [{transform_indices = @transform_0, window_bounds = array<i64: 1, 19, 19, 32>}, {transform_indices = @transform_1, window_bounds = array<i64: 1, 8, 16, 32>}, {transform_indices = @transform_2, window_bounds = array<i64: 1, 8, 16, 32>}]} {
    %c8_i32 = arith.constant 8 : i32
    %0 = arith.muli %arg1, %c8_i32 : i32
    %1 = tpu.assume_multiple %0, 8 : i32
    %c0 = arith.constant 0 : index
    %2 = arith.index_cast %1 : i32 to index
    %c0_0 = arith.constant 0 : index
    %c0_1 = arith.constant 0 : index
    %3 = vector.load %arg2[%c0, %2, %c0_0, %c0_1] : memref<1x19x19x32xf32, #tpu.memory_space<vmem>>, vector<1x11x19x32xf32>
    %4 = vector.shape_cast %3 : vector<1x11x19x32xf32> to vector<11x19x32xf32>
    %cst = arith.constant 0.000000e+00 : f32
    %5 = vector.broadcast %cst : f32 to vector<8x16x32xf32>
    %6 = vector.extract_strided_slice %4 {offsets = [0, 1, 0], sizes = [8, 16, 32], strides = [1, 1, 1]} : vector<11x19x32xf32> to vector<8x16x32xf32>
    %7 = arith.addf %5, %6 : vector<8x16x32xf32>
    %8 = vector.extract_strided_slice %4 {offsets = [1, 0, 0], sizes = [8, 16, 32], strides = [1, 1, 1]} : vector<11x19x32xf32> to vector<8x16x32xf32>
    %9 = arith.addf %7, %8 : vector<8x16x32xf32>
    %10 = vector.extract_strided_slice %4 {offsets = [1, 1, 0], sizes = [8, 16, 32], strides = [1, 1, 1]} : vector<11x19x32xf32> to vector<8x16x32xf32>
    %11 = arith.addf %9, %10 : vector<8x16x32xf32>
    %12 = vector.extract_strided_slice %4 {offsets = [1, 1, 0], sizes = [8, 16, 32], strides = [1, 1, 1]} : vector<11x19x32xf32> to vector<8x16x32xf32>
    %13 = arith.addf %11, %12 : vector<8x16x32xf32>
    %14 = vector.extract_strided_slice %4 {offsets = [2, 1, 0], sizes = [8, 16, 32], strides = [1, 1, 1]} : vector<11x19x32xf32> to vector<8x16x32xf32>
    %15 = arith.addf %13, %14 : vector<8x16x32xf32>
    %16 = vector.extract_strided_slice %4 {offsets = [1, 2, 0], sizes = [8, 16, 32], strides = [1, 1, 1]} : vector<11x19x32xf32> to vector<8x16x32xf32>
    %17 = arith.addf %15, %16 : vector<8x16x32xf32>
    %18 = vector.extract_strided_slice %4 {offsets = [3, 1, 0], sizes = [8, 16, 32], strides = [1, 1, 1]} : vector<11x19x32xf32> to vector<8x16x32xf32>
    %19 = arith.addf %17, %18 : vector<8x16x32xf32>
    %20 = vector.extract_strided_slice %4 {offsets = [1, 3, 0], sizes = [8, 16, 32], strides = [1, 1, 1]} : vector<11x19x32xf32> to vector<8x16x32xf32>
    %21 = arith.addf %19, %20 : vector<8x16x32xf32>
    %cst_2 = arith.constant 2.500000e-01 : f32
    %22 = vector.broadcast %cst_2 : f32 to vector<8x16x32xf32>
    %23 = arith.mulf %21, %22 : vector<8x16x32xf32>
    %c0_3 = arith.constant 0 : index
    %c0_4 = arith.constant 0 : index
    %c0_5 = arith.constant 0 : index
    %c0_6 = arith.constant 0 : index
    %24 = vector.load %arg3[%c0_3, %c0_4, %c0_5, %c0_6] : memref<1x8x16x32xf32, #tpu.memory_space<vmem>>, vector<1x8x16x32xf32>
    %25 = vector.shape_cast %24 : vector<1x8x16x32xf32> to vector<8x16x32xf32>
    %26 = arith.addf %23, %25 : vector<8x16x32xf32>
    %c0_7 = arith.constant 0 : index
    %c0_8 = arith.constant 0 : index
    %c0_9 = arith.constant 0 : index
    %c0_10 = arith.constant 0 : index
    %27 = vector.load %arg4[%c0_7, %c0_8, %c0_9, %c0_10] : memref<1x8x16x32xf32, #tpu.memory_space<vmem>>, vector<1x8x16x32xf32>
    %28 = vector.shape_cast %27 : vector<1x8x16x32xf32> to vector<8x16x32xf32>
    %29 = vector.shape_cast %26 : vector<8x16x32xf32> to vector<1x8x16x32xf32>
    tpu.vector_store %arg4[%c0_7, %c0_8, %c0_9, %c0_10], %29 {strides = array<i32>} : memref<1x8x16x32xf32, #tpu.memory_space<vmem>>, vector<1x8x16x32xf32>,
    return
  }
  func.func @transform_0(%arg0: i32, %arg1: i32) -> (i32, i32, i32, i32) {
    %c0_i32 = arith.constant 0 : i32
    %c0_i32_0 = arith.constant 0 : i32
    %c0_i32_1 = arith.constant 0 : i32
    %c0_i32_2 = arith.constant 0 : i32
    return %arg0, %c0_i32, %c0_i32_0, %c0_i32_1 : i32, i32, i32, i32
  }
  func.func @transform_1(%arg0: i32, %arg1: i32) -> (i32, i32, i32, i32) {
    %c0_i32 = arith.constant 0 : i32
    %c0_i32_0 = arith.constant 0 : i32
    %c0_i32_1 = arith.constant 0 : i32
    return %arg0, %arg1, %c0_i32, %c0_i32_0 : i32, i32, i32, i32
  }
  func.func @transform_2(%arg0: i32, %arg1: i32) -> (i32, i32, i32, i32) {
    %c0_i32 = arith.constant 0 : i32
    %c0_i32_0 = arith.constant 0 : i32
    %c0_i32_1 = arith.constant 0 : i32
    return %arg0, %arg1, %c0_i32, %c0_i32_0 : i32, i32, i32, i32
  }
}

module attributes {stable_mosaic.version = 11 : i64} {
  func.func @_proj_kernel(%arg0: i32, %arg1: i32, %arg2: memref<1x21x21x32xf32, #tpu.memory_space<vmem>>, %arg3: memref<4x4x32xf32, #tpu.memory_space<vmem>>, %arg4: memref<32x32xbf16, #tpu.memory_space<vmem>>, %arg5: memref<1x8x16x32xf32, #tpu.memory_space<vmem>>) attributes {dimension_semantics = [#tpu.dimension_semantics<parallel>, #tpu.dimension_semantics<parallel>], iteration_bounds = array<i64: 2, 2>, scalar_prefetch = 0 : i64, scratch_operands = 0 : i64, tpu.core_type = #tpu.core_type<tc>, window_params = [{transform_indices = @transform_0, window_bounds = array<i64: 1, 21, 21, 32>}, {pipeline_mode = #tpu.pipeline_mode<synchronous>, transform_indices = @transform_1, window_bounds = array<i64: 4, 4, 32>}, {pipeline_mode = #tpu.pipeline_mode<synchronous>, transform_indices = @transform_2, window_bounds = array<i64: 32, 32>}, {transform_indices = @transform_3, window_bounds = array<i64: 1, 8, 16, 32>}]} {
    %c8_i32 = arith.constant 8 : i32
    %0 = arith.muli %arg1, %c8_i32 : i32
    %1 = tpu.assume_multiple %0, 8 : i32
    %c0 = arith.constant 0 : index
    %2 = arith.index_cast %1 : i32 to index
    %c0_0 = arith.constant 0 : index
    %c0_1 = arith.constant 0 : index
    %3 = vector.load %arg2[%c0, %2, %c0_0, %c0_1] : memref<1x21x21x32xf32, #tpu.memory_space<vmem>>, vector<1x11x21x32xf32>
    %4 = vector.shape_cast %3 : vector<1x11x21x32xf32> to vector<11x21x32xf32>
    %cst = arith.constant 0.000000e+00 : f32
    %5 = vector.broadcast %cst : f32 to vector<8x16x32xf32>
    %6 = vector.extract_strided_slice %4 {offsets = [0, 0, 0], sizes = [8, 16, 32], strides = [1, 1, 1]} : vector<11x21x32xf32> to vector<8x16x32xf32>
    %c0_2 = arith.constant 0 : index
    %c0_3 = arith.constant 0 : index
    %c0_4 = arith.constant 0 : index
    %7 = vector.load %arg3[%c0_2, %c0_3, %c0_4] : memref<4x4x32xf32, #tpu.memory_space<vmem>>, vector<1x1x32xf32>
    %8 = vector.shape_cast %7 : vector<1x1x32xf32> to vector<32xf32>
    %9 = vector.shape_cast %8 : vector<32xf32> to vector<1x1x32xf32>
    %10 = vector.broadcast %9 : vector<1x1x32xf32> to vector<8x16x32xf32>
    %11 = arith.mulf %6, %10 : vector<8x16x32xf32>
    %12 = arith.addf %5, %11 : vector<8x16x32xf32>
    %13 = vector.extract_strided_slice %4 {offsets = [0, 1, 0], sizes = [8, 16, 32], strides = [1, 1, 1]} : vector<11x21x32xf32> to vector<8x16x32xf32>
    %c0_5 = arith.constant 0 : index
    %c1 = arith.constant 1 : index
    %c0_6 = arith.constant 0 : index
    %14 = vector.load %arg3[%c0_5, %c1, %c0_6] : memref<4x4x32xf32, #tpu.memory_space<vmem>>, vector<1x1x32xf32>
    %15 = vector.shape_cast %14 : vector<1x1x32xf32> to vector<32xf32>
    %16 = vector.shape_cast %15 : vector<32xf32> to vector<1x1x32xf32>
    %17 = vector.broadcast %16 : vector<1x1x32xf32> to vector<8x16x32xf32>
    %18 = arith.mulf %13, %17 : vector<8x16x32xf32>
    %19 = arith.addf %12, %18 : vector<8x16x32xf32>
    %20 = vector.extract_strided_slice %4 {offsets = [0, 2, 0], sizes = [8, 16, 32], strides = [1, 1, 1]} : vector<11x21x32xf32> to vector<8x16x32xf32>
    %c0_7 = arith.constant 0 : index
    %c2 = arith.constant 2 : index
    %c0_8 = arith.constant 0 : index
    %21 = vector.load %arg3[%c0_7, %c2, %c0_8] : memref<4x4x32xf32, #tpu.memory_space<vmem>>, vector<1x1x32xf32>
    %22 = vector.shape_cast %21 : vector<1x1x32xf32> to vector<32xf32>
    %23 = vector.shape_cast %22 : vector<32xf32> to vector<1x1x32xf32>
    %24 = vector.broadcast %23 : vector<1x1x32xf32> to vector<8x16x32xf32>
    %25 = arith.mulf %20, %24 : vector<8x16x32xf32>
    %26 = arith.addf %19, %25 : vector<8x16x32xf32>
    %27 = vector.extract_strided_slice %4 {offsets = [0, 3, 0], sizes = [8, 16, 32], strides = [1, 1, 1]} : vector<11x21x32xf32> to vector<8x16x32xf32>
    %c0_9 = arith.constant 0 : index
    %c3 = arith.constant 3 : index
    %c0_10 = arith.constant 0 : index
    %28 = vector.load %arg3[%c0_9, %c3, %c0_10] : memref<4x4x32xf32, #tpu.memory_space<vmem>>, vector<1x1x32xf32>
    %29 = vector.shape_cast %28 : vector<1x1x32xf32> to vector<32xf32>
    %30 = vector.shape_cast %29 : vector<32xf32> to vector<1x1x32xf32>
    %31 = vector.broadcast %30 : vector<1x1x32xf32> to vector<8x16x32xf32>
    %32 = arith.mulf %27, %31 : vector<8x16x32xf32>
    %33 = arith.addf %26, %32 : vector<8x16x32xf32>
    %34 = vector.extract_strided_slice %4 {offsets = [1, 0, 0], sizes = [8, 16, 32], strides = [1, 1, 1]} : vector<11x21x32xf32> to vector<8x16x32xf32>
    %c1_11 = arith.constant 1 : index
    %c0_12 = arith.constant 0 : index
    %c0_13 = arith.constant 0 : index
    %35 = vector.load %arg3[%c1_11, %c0_12, %c0_13] : memref<4x4x32xf32, #tpu.memory_space<vmem>>, vector<1x1x32xf32>
    %36 = vector.shape_cast %35 : vector<1x1x32xf32> to vector<32xf32>
    %37 = vector.shape_cast %36 : vector<32xf32> to vector<1x1x32xf32>
    %38 = vector.broadcast %37 : vector<1x1x32xf32> to vector<8x16x32xf32>
    %39 = arith.mulf %34, %38 : vector<8x16x32xf32>
    %40 = arith.addf %33, %39 : vector<8x16x32xf32>
    %41 = vector.extract_strided_slice %4 {offsets = [1, 1, 0], sizes = [8, 16, 32], strides = [1, 1, 1]} : vector<11x21x32xf32> to vector<8x16x32xf32>
    %c1_14 = arith.constant 1 : index
    %c1_15 = arith.constant 1 : index
    %c0_16 = arith.constant 0 : index
    %42 = vector.load %arg3[%c1_14, %c1_15, %c0_16] : memref<4x4x32xf32, #tpu.memory_space<vmem>>, vector<1x1x32xf32>
    %43 = vector.shape_cast %42 : vector<1x1x32xf32> to vector<32xf32>
    %44 = vector.shape_cast %43 : vector<32xf32> to vector<1x1x32xf32>
    %45 = vector.broadcast %44 : vector<1x1x32xf32> to vector<8x16x32xf32>
    %46 = arith.mulf %41, %45 : vector<8x16x32xf32>
    %47 = arith.addf %40, %46 : vector<8x16x32xf32>
    %48 = vector.extract_strided_slice %4 {offsets = [1, 2, 0], sizes = [8, 16, 32], strides = [1, 1, 1]} : vector<11x21x32xf32> to vector<8x16x32xf32>
    %c1_17 = arith.constant 1 : index
    %c2_18 = arith.constant 2 : index
    %c0_19 = arith.constant 0 : index
    %49 = vector.load %arg3[%c1_17, %c2_18, %c0_19] : memref<4x4x32xf32, #tpu.memory_space<vmem>>, vector<1x1x32xf32>
    %50 = vector.shape_cast %49 : vector<1x1x32xf32> to vector<32xf32>
    %51 = vector.shape_cast %50 : vector<32xf32> to vector<1x1x32xf32>
    %52 = vector.broadcast %51 : vector<1x1x32xf32> to vector<8x16x32xf32>
    %53 = arith.mulf %48, %52 : vector<8x16x32xf32>
    %54 = arith.addf %47, %53 : vector<8x16x32xf32>
    %55 = vector.extract_strided_slice %4 {offsets = [1, 3, 0], sizes = [8, 16, 32], strides = [1, 1, 1]} : vector<11x21x32xf32> to vector<8x16x32xf32>
    %c1_20 = arith.constant 1 : index
    %c3_21 = arith.constant 3 : index
    %c0_22 = arith.constant 0 : index
    %56 = vector.load %arg3[%c1_20, %c3_21, %c0_22] : memref<4x4x32xf32, #tpu.memory_space<vmem>>, vector<1x1x32xf32>
    %57 = vector.shape_cast %56 : vector<1x1x32xf32> to vector<32xf32>
    %58 = vector.shape_cast %57 : vector<32xf32> to vector<1x1x32xf32>
    %59 = vector.broadcast %58 : vector<1x1x32xf32> to vector<8x16x32xf32>
    %60 = arith.mulf %55, %59 : vector<8x16x32xf32>
    %61 = arith.addf %54, %60 : vector<8x16x32xf32>
    %62 = vector.extract_strided_slice %4 {offsets = [2, 0, 0], sizes = [8, 16, 32], strides = [1, 1, 1]} : vector<11x21x32xf32> to vector<8x16x32xf32>
    %c2_23 = arith.constant 2 : index
    %c0_24 = arith.constant 0 : index
    %c0_25 = arith.constant 0 : index
    %63 = vector.load %arg3[%c2_23, %c0_24, %c0_25] : memref<4x4x32xf32, #tpu.memory_space<vmem>>, vector<1x1x32xf32>
    %64 = vector.shape_cast %63 : vector<1x1x32xf32> to vector<32xf32>
    %65 = vector.shape_cast %64 : vector<32xf32> to vector<1x1x32xf32>
    %66 = vector.broadcast %65 : vector<1x1x32xf32> to vector<8x16x32xf32>
    %67 = arith.mulf %62, %66 : vector<8x16x32xf32>
    %68 = arith.addf %61, %67 : vector<8x16x32xf32>
    %69 = vector.extract_strided_slice %4 {offsets = [2, 1, 0], sizes = [8, 16, 32], strides = [1, 1, 1]} : vector<11x21x32xf32> to vector<8x16x32xf32>
    %c2_26 = arith.constant 2 : index
    %c1_27 = arith.constant 1 : index
    %c0_28 = arith.constant 0 : index
    %70 = vector.load %arg3[%c2_26, %c1_27, %c0_28] : memref<4x4x32xf32, #tpu.memory_space<vmem>>, vector<1x1x32xf32>
    %71 = vector.shape_cast %70 : vector<1x1x32xf32> to vector<32xf32>
    %72 = vector.shape_cast %71 : vector<32xf32> to vector<1x1x32xf32>
    %73 = vector.broadcast %72 : vector<1x1x32xf32> to vector<8x16x32xf32>
    %74 = arith.mulf %69, %73 : vector<8x16x32xf32>
    %75 = arith.addf %68, %74 : vector<8x16x32xf32>
    %76 = vector.extract_strided_slice %4 {offsets = [2, 2, 0], sizes = [8, 16, 32], strides = [1, 1, 1]} : vector<11x21x32xf32> to vector<8x16x32xf32>
    %c2_29 = arith.constant 2 : index
    %c2_30 = arith.constant 2 : index
    %c0_31 = arith.constant 0 : index
    %77 = vector.load %arg3[%c2_29, %c2_30, %c0_31] : memref<4x4x32xf32, #tpu.memory_space<vmem>>, vector<1x1x32xf32>
    %78 = vector.shape_cast %77 : vector<1x1x32xf32> to vector<32xf32>
    %79 = vector.shape_cast %78 : vector<32xf32> to vector<1x1x32xf32>
    %80 = vector.broadcast %79 : vector<1x1x32xf32> to vector<8x16x32xf32>
    %81 = arith.mulf %76, %80 : vector<8x16x32xf32>
    %82 = arith.addf %75, %81 : vector<8x16x32xf32>
    %83 = vector.extract_strided_slice %4 {offsets = [2, 3, 0], sizes = [8, 16, 32], strides = [1, 1, 1]} : vector<11x21x32xf32> to vector<8x16x32xf32>
    %c2_32 = arith.constant 2 : index
    %c3_33 = arith.constant 3 : index
    %c0_34 = arith.constant 0 : index
    %84 = vector.load %arg3[%c2_32, %c3_33, %c0_34] : memref<4x4x32xf32, #tpu.memory_space<vmem>>, vector<1x1x32xf32>
    %85 = vector.shape_cast %84 : vector<1x1x32xf32> to vector<32xf32>
    %86 = vector.shape_cast %85 : vector<32xf32> to vector<1x1x32xf32>
    %87 = vector.broadcast %86 : vector<1x1x32xf32> to vector<8x16x32xf32>
    %88 = arith.mulf %83, %87 : vector<8x16x32xf32>
    %89 = arith.addf %82, %88 : vector<8x16x32xf32>
    %90 = vector.extract_strided_slice %4 {offsets = [3, 0, 0], sizes = [8, 16, 32], strides = [1, 1, 1]} : vector<11x21x32xf32> to vector<8x16x32xf32>
    %c3_35 = arith.constant 3 : index
    %c0_36 = arith.constant 0 : index
    %c0_37 = arith.constant 0 : index
    %91 = vector.load %arg3[%c3_35, %c0_36, %c0_37] : memref<4x4x32xf32, #tpu.memory_space<vmem>>, vector<1x1x32xf32>
    %92 = vector.shape_cast %91 : vector<1x1x32xf32> to vector<32xf32>
    %93 = vector.shape_cast %92 : vector<32xf32> to vector<1x1x32xf32>
    %94 = vector.broadcast %93 : vector<1x1x32xf32> to vector<8x16x32xf32>
    %95 = arith.mulf %90, %94 : vector<8x16x32xf32>
    %96 = arith.addf %89, %95 : vector<8x16x32xf32>
    %97 = vector.extract_strided_slice %4 {offsets = [3, 1, 0], sizes = [8, 16, 32], strides = [1, 1, 1]} : vector<11x21x32xf32> to vector<8x16x32xf32>
    %c3_38 = arith.constant 3 : index
    %c1_39 = arith.constant 1 : index
    %c0_40 = arith.constant 0 : index
    %98 = vector.load %arg3[%c3_38, %c1_39, %c0_40] : memref<4x4x32xf32, #tpu.memory_space<vmem>>, vector<1x1x32xf32>
    %99 = vector.shape_cast %98 : vector<1x1x32xf32> to vector<32xf32>
    %100 = vector.shape_cast %99 : vector<32xf32> to vector<1x1x32xf32>
    %101 = vector.broadcast %100 : vector<1x1x32xf32> to vector<8x16x32xf32>
    %102 = arith.mulf %97, %101 : vector<8x16x32xf32>
    %103 = arith.addf %96, %102 : vector<8x16x32xf32>
    %104 = vector.extract_strided_slice %4 {offsets = [3, 2, 0], sizes = [8, 16, 32], strides = [1, 1, 1]} : vector<11x21x32xf32> to vector<8x16x32xf32>
    %c3_41 = arith.constant 3 : index
    %c2_42 = arith.constant 2 : index
    %c0_43 = arith.constant 0 : index
    %105 = vector.load %arg3[%c3_41, %c2_42, %c0_43] : memref<4x4x32xf32, #tpu.memory_space<vmem>>, vector<1x1x32xf32>
    %106 = vector.shape_cast %105 : vector<1x1x32xf32> to vector<32xf32>
    %107 = vector.shape_cast %106 : vector<32xf32> to vector<1x1x32xf32>
    %108 = vector.broadcast %107 : vector<1x1x32xf32> to vector<8x16x32xf32>
    %109 = arith.mulf %104, %108 : vector<8x16x32xf32>
    %110 = arith.addf %103, %109 : vector<8x16x32xf32>
    %111 = vector.extract_strided_slice %4 {offsets = [3, 3, 0], sizes = [8, 16, 32], strides = [1, 1, 1]} : vector<11x21x32xf32> to vector<8x16x32xf32>
    %c3_44 = arith.constant 3 : index
    %c3_45 = arith.constant 3 : index
    %c0_46 = arith.constant 0 : index
    %112 = vector.load %arg3[%c3_44, %c3_45, %c0_46] : memref<4x4x32xf32, #tpu.memory_space<vmem>>, vector<1x1x32xf32>
    %113 = vector.shape_cast %112 : vector<1x1x32xf32> to vector<32xf32>
    %114 = vector.shape_cast %113 : vector<32xf32> to vector<1x1x32xf32>
    %115 = vector.broadcast %114 : vector<1x1x32xf32> to vector<8x16x32xf32>
    %116 = arith.mulf %111, %115 : vector<8x16x32xf32>
    %117 = arith.addf %110, %116 : vector<8x16x32xf32>
    %118 = vector.shape_cast %117 : vector<8x16x32xf32> to vector<128x32xf32>
    %119 = arith.truncf %118 : vector<128x32xf32> to vector<128x32xbf16>
    %c0_47 = arith.constant 0 : index
    %c0_48 = arith.constant 0 : index
    %120 = vector.load %arg4[%c0_47, %c0_48] : memref<32x32xbf16, #tpu.memory_space<vmem>>, vector<32x32xbf16>
    %cst_49 = arith.constant dense<0.000000e+00> : vector<128x32xf32>
    %121 = tpu.matmul %119, %120, %cst_49 {dimension_numbers = #tpu.dot_dimension_numbers<[1], [0], [0], [1], [0, 0, 1, 1], [], []>} : vector<128x32xbf16>, vector<32x32xbf16>, vector<128x32xf32> -> vector<128x32xf32>
    %122 = vector.shape_cast %121 : vector<128x32xf32> to vector<8x16x32xf32>
    %c0_50 = arith.constant 0 : index
    %c0_51 = arith.constant 0 : index
    %c0_52 = arith.constant 0 : index
    %c0_53 = arith.constant 0 : index
    %123 = vector.load %arg5[%c0_50, %c0_51, %c0_52, %c0_53] : memref<1x8x16x32xf32, #tpu.memory_space<vmem>>, vector<1x8x16x32xf32>
    %124 = vector.shape_cast %123 : vector<1x8x16x32xf32> to vector<8x16x32xf32>
    %125 = vector.shape_cast %122 : vector<8x16x32xf32> to vector<1x8x16x32xf32>
    tpu.vector_store %arg5[%c0_50, %c0_51, %c0_52, %c0_53], %125 {strides = array<i32>} : memref<1x8x16x32xf32, #tpu.memory_space<vmem>>, vector<1x8x16x32xf32>,
    return
  }
  func.func @transform_0(%arg0: i32, %arg1: i32) -> (i32, i32, i32, i32) {
    %c0_i32 = arith.constant 0 : i32
    %c0_i32_0 = arith.constant 0 : i32
    %c0_i32_1 = arith.constant 0 : i32
    %c0_i32_2 = arith.constant 0 : i32
    return %arg0, %c0_i32, %c0_i32_0, %c0_i32_1 : i32, i32, i32, i32
  }
  func.func @transform_1(%arg0: i32, %arg1: i32) -> (i32, i32, i32) {
    %c0_i32 = arith.constant 0 : i32
    %c0_i32_0 = arith.constant 0 : i32
    %c0_i32_1 = arith.constant 0 : i32
    %c0_i32_2 = arith.constant 0 : i32
    return %c0_i32, %c0_i32_0, %c0_i32_1 : i32, i32, i32
  }
  func.func @transform_2(%arg0: i32, %arg1: i32) -> (i32, i32) {
    %c0_i32 = arith.constant 0 : i32
    %c0_i32_0 = arith.constant 0 : i32
    %c0_i32_1 = arith.constant 0 : i32
    return %c0_i32, %c0_i32_0 : i32, i32
  }
  func.func @transform_3(%arg0: i32, %arg1: i32) -> (i32, i32, i32, i32) {
    %c0_i32 = arith.constant 0 : i32
    %c0_i32_0 = arith.constant 0 : i32
    %c0_i32_1 = arith.constant 0 : i32
    return %arg0, %arg1, %c0_i32, %c0_i32_0 : i32, i32, i32, i32
  }
}

</mosaic_0001>

<bundles_post_ra>
// kernel: global_local_attention.6
= control target key start
LH: loop header
LB: loop body
LE: loop exit
PB: predicated region body
PF: predicated region fallthrough
CT: control target
= control target key end

     0   :  { %s1021_s9 = smov 0   ;;  %s1023_s10 = smov 0   ;;  %s1555_s0 = inlined_call_operand.vmem [shape: f32[2,19,19,32], index: 0, kind: input, shape index: {}]   ;;  %s1556_s1 = inlined_call_operand.vmem [shape: f32[2,16,16,32], index: 1, kind: input, shape index: {}]   ;;  %s1557_s2 = inlined_call_operand.vmem [shape: f32[2,16,16,32], index: 2, kind: output, shape index: {}]  }
   0x1   :  { %s1025_s11 = smov 0   ;;  %s1027_s12 = smov 0  }
   0x2   :  { %s1029_s13 = smov 0  }
   0x3 LB: > { %s21_s14 = sadd.s32 1, %s996_s11  ;;  %s24_s15 = sadd.s32 1, %s1000_s12  ;;  %s1004_s13 = sphi %s1029_s13, %s12_s13   ;;  %s1000_s12 = sphi %s1027_s12, %s1561_s12   ;;  %s996_s11 = sphi %s1025_s11, %s1560_s11   ;;  %s992_s10 = sphi %s1023_s10, %s1559_s10   ;;  %s988_s9 = sphi %s1021_s9, %s1558_s9  }
   0x4   : > { %p22_p0 = scmp.ge.s32.totalorder %s21_s14, 2  ;;  %p911_p1 = scmp.ge.s32.totalorder %s1004_s13, 1 }
   0x5   : > { %p144_p2 = scmp.lt.s32.totalorder %s1004_s13, 5 }
   0x6   : > { %s1563_s14 = smov (%p22_p0, %s21_s14), 0  ;;  %s1565_s15 = smov (!%p22_p0, %s24_s15), %s1000_s12 }
   0x7   : > { %p145_p3 = pnand %p911_p1, %p144_p2  ;;  %p26_p4 = scmp.ge.s32.totalorder %s1565_s15, 2 }
   0x8   : > { %p181_p5 = scmp.lt.s32.totalorder (!%p145_p3), %s992_s10, 1  ;;  %s913_s16 = sshll.u32 (!%p145_p3), %s988_s9, 3 }
   0x9   : > { %s1567_s15 = smov (%p26_p4, %s1565_s15), 0  ;;  %148 = sbr.rel (%p145_p3) target bundleno = 113 (0x71), region = 28 }
   0xa   : > { %p189_p6 = scmp.lt.s32.totalorder (!%p145_p3), %s913_s16, 15  ;;  %s922_s17 = smul.u32 (!%p145_p3), 192, %s988_s9 }
   0xe   : > { %s1569_s10 = smov (!%p181_p5, %s992_s10), 1  ;;  %s1571_s16 = smov (!%p189_p6, %s913_s16), 15  ;;  %vm437_vm0 = vcmask 1046528   ;;  %vm550_vm1 = vcmask 1045504   ;;  %vm284_vm2 = vcmask 1040384   ;;  %vm767_vm3 = vcmask 261121  }
   0xf   : > { %s925_s18 = smul.u32 456, %s1569_s10  ;;  %s915_s19 = sshll.u32 %s1569_s10, 5  ;;  %vm769_vm4 = vcmask 261120   ;;  %vm771_vm5 = vcmask 253952  }
  0x10   : > { %s914_s20 = sshll.u32 %s1571_s16, 1 }
  0x11   : > { %s185_s23 = scalar_lea.vmem %s1555_s0, %s925_s18  ;;  %s1058_s24 = sadd.s32 %s915_s19, %s914_s20 }
  0x12   : > { %s916_s25 = sshll.u32 %s1058_s24, 3  ;;  %s1061_s26 = scalar_lea.vmem %s185_s23, %s922_s17 }
  0x13   : > { %s1068_s29 = scalar_lea.vmem %s1556_s1, %s916_s25  ;;  %v211_v0 = vld [vmem:[%s1061_s26] sm:$0xff]  ;;  %v214_v1 = vld [vmem:[%s1061_s26 + $0x18] sm:$0xff]  ;;  %v212_v9 = vld [vmem:[%s1061_s26 + $0x8] sm:$0xff]  ;;  %s1178_s4 = scalar_lea.vmem %s1557_s2, %s916_s25 }
  0x14   : > { %v1073_v2 = vld [vmem:[%s1061_s26 + $0x20] sm:$0xff]  ;;  %v285_v3 = vrot.slane %v214_v1, 7  ;;  %v438_v4 = vrot.slane %v214_v1, 1  ;;  %v551_v6 = vrot.slane %v214_v1, 2  ;;  %v1082_v10 = vld [vmem:[%s1061_s26 + $0x28] sm:$0x7] }
  0x15   : > { %v439_v5 = vrot.slane %v1073_v2, 1  ;;  %v552_v7 = vrot.slane %v1073_v2, 2  ;;  %v1078_v8 = vld [vmem:[%s1068_s29] sm:$0xff]  ;;  %v286_v11 = vrot.slane %v1073_v2, 7  ;;  %v1086_v12 = vld [vmem:[%s1061_s26 + $0x30] sm:$0xff]  ;;  %v441_v15 = vrot.slane %v1082_v10, 1 }
  0x16   : > { %v333_v13 = vadd.f32 %v285_v3, %v211_v0  ;;  %v1091_v16 = vld [vmem:[%s1068_s29 + $0x8] sm:$0xff]  ;;  %v695_v17 = vrot.slane %v1078_v8, 7  ;;  %v554_v19 = vrot.slane %v1082_v10, 2  ;;  %v213_v21 = vld [vmem:[%s1061_s26 + $0x10] sm:$0x7]  ;;  %v1100_v26 = vld [vmem:[%s1061_s26 + $0x38] sm:$0xff] }
  0x17   : > { %v440_v14 = vsel %vm437_vm0, %v438_v4, %v439_v5  ;;  %v287_v18 = vsel %vm284_vm2, %v285_v3, %v286_v11  ;;  %v696_v20 = vrot.slane %v1091_v16, 7  ;;  %v553_v23 = vsel %vm550_vm1, %v551_v6, %v552_v7  ;;  %v1109_v31 = vld [vmem:[%s1068_s29 + $0x10] sm:$0xff]  ;;  %v1126_v42 = vld [vmem:[%s1061_s26 + $0x40] sm:$0x7]  ;;  %v1138_v53 = vld [vmem:[%s1068_s29 + $0x18] sm:$0xff] }
  0x18   : > { %v357_v22 = vadd.f32 %v333_v13, %v214_v1  ;;  %v334_v24 = vadd.f32 %v287_v18, %v212_v9  ;;  %v335_v25 = vadd.f32 %v286_v11, %v213_v21  ;;  %v442_v27 = vsel %vm437_vm0, %v439_v5, %v441_v15  ;;  %v1141_v54 = vld [vmem:[%s1061_s26 + $0x48] sm:$0xff]  ;;  %v1150_v63 = vld [vmem:[%s1061_s26 + $0x50] sm:$0xff]  ;;  %v1153_v0 = vld [vmem:[%s1061_s26 + $0x58] sm:$0x7] }
  0x19   : > { %v555_v28 = vsel %vm550_vm1, %v552_v7, %v554_v19  ;;  %v288_v29 = vrot.slane %v1086_v12, 7  ;;  %v443_v30 = vrot.slane %v1086_v12, 1  ;;  %v444_v35 = vrot.slane %v1100_v26, 1 }
  0x1a   : > { %v381_v32 = vadd.f32 %v357_v22, %v214_v1  ;;  %v358_v33 = vadd.f32 %v334_v24, %v1073_v2  ;;  %v359_v34 = vadd.f32 %v335_v25, %v1082_v10  ;;  %v1119_v36 = vsel %vm284_vm2, %v695_v17, %v696_v20  ;;  %v1170_v24 = vld [vmem:[%s1061_s26 + $0x60] sm:$0xff] }
  0x1b   : > { %v336_v37 = vadd.f32 %v288_v29, %v214_v1  ;;  %v556_v38 = vrot.slane %v1086_v12, 2  ;;  %v557_v39 = vrot.slane %v1100_v26, 2  ;;  %v698_v44 = vrot.slane %v1109_v31, 7 }
  0x1c   : > { %v405_v40 = vadd.f32 %v381_v32, %v1086_v12  ;;  %v382_v41 = vadd.f32 %v358_v33, %v1073_v2  ;;  %v383_v43 = vadd.f32 %v359_v34, %v1082_v10  ;;  %v445_v46 = vsel %vm437_vm0, %v443_v30, %v444_v35 }
  0x1d   : > { %v360_v45 = vadd.f32 %v336_v37, %v1086_v12  ;;  %v289_v47 = vrot.slane %v1100_v26, 7  ;;  %v446_v48 = vrot.slane %v1126_v42, 1  ;;  %v559_v52 = vrot.slane %v1126_v42, 2 }
  0x1e   : > { %v502_v49 = vadd.f32 %v440_v14, %v405_v40  ;;  %v406_v50 = vadd.f32 %v382_v41, %v1100_v26  ;;  %v407_v51 = vadd.f32 %v383_v43, %v1126_v42  ;;  %v558_v56 = vsel %vm550_vm1, %v556_v38, %v557_v39  ;;  %v1202_v41 = vld [vmem:[%s1061_s26 + $0x68] sm:$0xff] }
  0x1f   : > { %v384_v55 = vadd.f32 %v360_v45, %v1086_v12  ;;  %v290_v57 = vsel %vm284_vm2, %v288_v29, %v289_v47  ;;  %v447_v58 = vsel %vm437_vm0, %v444_v35, %v446_v48  ;;  %v560_v3 = vsel %vm550_vm1, %v557_v39, %v559_v52  ;;  %v667_v39 = vld [vmem:[%s1068_s29 + $0x20] sm:$0xff] }
  0x20   : > { %v526_v59 = vadd.f32 %v502_v49, %v1141_v54  ;;  %v503_v60 = vadd.f32 %v442_v27, %v406_v50  ;;  %v504_v61 = vadd.f32 %v441_v15, %v407_v51  ;;  %v337_v62 = vadd.f32 %v290_v57, %v1073_v2 }
  0x21   : > { %v408_v1 = vadd.f32 %v384_v55, %v1141_v54  ;;  %v699_v4 = vrot.slane %v1138_v53, 7  ;;  %v338_v5 = vadd.f32 %v289_v47, %v1082_v10  ;;  %v291_v14 = vrot.slane %v1141_v54, 7 }
  0x22   : > { %v615_v6 = vadd.f32 %v553_v23, %v526_v59  ;;  %v527_v7 = vadd.f32 %v503_v60, %v1150_v63  ;;  %v528_v2 = vadd.f32 %v504_v61, %v1153_v0  ;;  %v361_v9 = vadd.f32 %v337_v62, %v1100_v26 }
  0x23   : > { %v505_v11 = vadd.f32 %v445_v46, %v408_v1  ;;  %v362_v13 = vadd.f32 %v338_v5, %v1126_v42  ;;  %v448_v15 = vrot.slane %v1141_v54, 1  ;;  %v449_v10 = vrot.slane %v1150_v63, 1  ;;  %v1234_v5 = vld [vmem:[%s1061_s26 + $0x78] sm:$0xff] }
  0x24   : > { %v639_v18 = vmul.f32 0.25, %v615_v6  ;;  %v616_v21 = vadd.f32 %v555_v28, %v527_v7  ;;  %v617_v22 = vadd.f32 %v554_v19, %v528_v2  ;;  %v385_v23 = vadd.f32 %v361_v9, %v1100_v26 }
  0x25   : > { %v529_v25 = vadd.f32 %v505_v11, %v1170_v24  ;;  %v386_v27 = vadd.f32 %v362_v13, %v1126_v42  ;;  %v339_v28 = vadd.f32 %v291_v14, %v1086_v12  ;;  %v700_v34 = vsel %vm284_vm2, %v698_v44, %v699_v4 }
  0x26   : > { %v743_v19 = vadd.f32 %v695_v17, %v639_v18  ;;  %v640_v29 = vmul.f32 0.25, %v616_v21  ;;  %v641_v30 = vmul.f32 0.25, %v617_v22  ;;  %v409_v32 = vadd.f32 %v385_v23, %v1150_v63  ;;  %v1252_v23 = vld [vmem:[%s1068_s29 + $0x30] sm:$0xff] }
  0x27   : > { %v618_v33 = vadd.f32 %v558_v56, %v529_v25  ;;  %v410_v12 = vadd.f32 %v386_v27, %v1153_v0  ;;  %v363_v8 = vadd.f32 %v339_v28, %v1141_v54  ;;  %v561_v38 = vrot.slane %v1141_v54, 2  ;;  %v1222_v56 = vld [vmem:[%s1068_s29 + $0x28] sm:$0xff] }
  0x28   : > { %768 = vst.msk [vmem:[%s1178_s4 - $0x1] sm:$0xfe] %vm767_vm3, %v743_v19  ;;  %v744_v17 = vadd.f32 %v1119_v36, %v640_v29  ;;  %v745_v35 = vadd.f32 %v696_v20, %v641_v30  ;;  %v506_v37 = vadd.f32 %v447_v58, %v409_v32  ;;  %v562_v46 = vrot.slane %v1150_v63, 2  ;;  %v1212_v20 = vld [vmem:[%s1061_s26 + $0x70] sm:$0x7] }
  0x29   : > { %v642_v40 = vmul.f32 0.25, %v618_v33  ;;  %v507_v43 = vadd.f32 %v446_v48, %v410_v12  ;;  %v387_v45 = vadd.f32 %v363_v8, %v1141_v54  ;;  %v450_v36 = vsel %vm437_vm0, %v448_v15, %v449_v10 }
  0x2a   : > { %770 = vst.msk [vmem:[%s1178_s4 + $0x7] sm:$0xff] %vm769_vm4, %v744_v17  ;;  %v530_v16 = vadd.f32 %v506_v37, %v1202_v41  ;;  %v292_v47 = vrot.slane %v1150_v63, 7  ;;  %v451_v49 = vrot.slane %v1153_v0, 1  ;;  %v701_v55 = vrot.slane %v667_v39, 7  ;;  %v1277_v37 = vld [vmem:[%s1061_s26 + $0x80] sm:$0xff] }
  0x2b   : > { %772 = vst.msk [vmem:[%s1178_s4 + $0xf] sm:$0x1] %vm771_vm5, %v745_v35  ;;  %v746_v48 = vadd.f32 %v698_v44, %v642_v40  ;;  %v531_v50 = vadd.f32 %v507_v43, %v1212_v20  ;;  %v411_v51 = vadd.f32 %v387_v45, %v1170_v24  ;;  %v563_v58 = vsel %vm550_vm1, %v561_v38, %v562_v46 }
  0x2c   : > { %v619_v57 = vadd.f32 %v560_v3, %v530_v16  ;;  %v293_v59 = vsel %vm284_vm2, %v291_v14, %v292_v47  ;;  %v564_v60 = vrot.slane %v1153_v0, 2  ;;  %v452_v62 = vsel %vm437_vm0, %v449_v10, %v451_v49 }
  0x2d   : > { %773 = vst.msk [vmem:[%s1178_s4 + $0xf] sm:$0xfe] %vm767_vm3, %v746_v48  ;;  %v620_v31 = vadd.f32 %v559_v52, %v531_v50  ;;  %v508_v44 = vadd.f32 %v450_v36, %v411_v51  ;;  %v340_v61 = vadd.f32 %v293_v59, %v1100_v26  ;;  %v702_v3 = vrot.slane %v1222_v56, 7 }
  0x2e   : > { %v643_v1 = vmul.f32 0.25, %v619_v57  ;;  %v341_v6 = vadd.f32 %v292_v47, %v1126_v42  ;;  %v294_v7 = vrot.slane %v1170_v24, 7  ;;  %v565_v26 = vsel %vm550_vm1, %v562_v46, %v564_v60  ;;  %v1286_v46 = vld [vmem:[%s1061_s26 + $0x88] sm:$0x7]  ;;  %v1297_v57 = vld [vmem:[%s1061_s26 + $0x90] sm:$0xff] }
  0x2f   : > { %v644_v2 = vmul.f32 0.25, %v620_v31  ;;  %v532_v9 = vadd.f32 %v508_v44, %v1234_v5  ;;  %v364_v52 = vadd.f32 %v340_v61, %v1150_v63  ;;  %v453_v15 = vrot.slane %v1170_v24, 1 }
  0x30   : > { %v747_v11 = vadd.f32 %v700_v34, %v643_v1  ;;  %v365_v13 = vadd.f32 %v341_v6, %v1153_v0  ;;  %v342_v14 = vadd.f32 %v294_v7, %v1141_v54  ;;  %v454_v22 = vrot.slane %v1202_v41, 1  ;;  %v1272_v34 = vld [vmem:[%s1068_s29 + $0x38] sm:$0xff] }
  0x31   : > { %v748_v42 = vadd.f32 %v699_v4, %v644_v2  ;;  %v621_v18 = vadd.f32 %v563_v58, %v532_v9  ;;  %v388_v21 = vadd.f32 %v364_v52, %v1150_v63  ;;  %v566_v54 = vrot.slane %v1170_v24, 2 }
  0x32   : > { %774 = vst.msk [vmem:[%s1178_s4 + $0x17] sm:$0xff] %vm769_vm4, %v747_v11  ;;  %v389_v25 = vadd.f32 %v365_v13, %v1153_v0  ;;  %v366_v27 = vadd.f32 %v342_v14, %v1170_v24  ;;  %v567_v53 = vrot.slane %v1202_v41, 2  ;;  %v703_v10 = vsel %vm284_vm2, %v701_v55, %v702_v3 }
  0x33   : > { %775 = vst.msk [vmem:[%s1178_s4 + $0x1f] sm:$0x1] %vm771_vm5, %v748_v42  ;;  %v645_v4 = vmul.f32 0.25, %v621_v18  ;;  %v412_v28 = vadd.f32 %v388_v21, %v1202_v41  ;;  %v455_v19 = vsel %vm437_vm0, %v453_v15, %v454_v22  ;;  %v704_v32 = vrot.slane %v1252_v23, 7 }
  0x34   : > { %v413_v29 = vadd.f32 %v389_v25, %v1212_v20  ;;  %v390_v30 = vadd.f32 %v366_v27, %v1170_v24  ;;  %v295_v33 = vrot.slane %v1202_v41, 7  ;;  %v456_v17 = vrot.slane %v1212_v20, 1 }
  0x35   : > { %v749_v12 = vadd.f32 %v701_v55, %v645_v4  ;;  %v509_v8 = vadd.f32 %v452_v62, %v412_v28  ;;  %v569_v35 = vrot.slane %v1212_v20, 2  ;;  %v568_v40 = vsel %vm550_vm1, %v566_v54, %v567_v53  ;;  %v1330_v54 = vld [vmem:[%s1068_s29 + $0x48] sm:$0xff] }
  0x36   : > { %v510_v38 = vadd.f32 %v451_v49, %v413_v29  ;;  %v414_v39 = vadd.f32 %v390_v30, %v1234_v5  ;;  %v296_v43 = vsel %vm284_vm2, %v294_v7, %v295_v33  ;;  %v457_v36 = vsel %vm437_vm0, %v454_v22, %v456_v17 }
  0x37   : > { %776 = vst.msk [vmem:[%s1178_s4 + $0x1f] sm:$0xfe] %vm767_vm3, %v749_v12  ;;  %v533_v45 = vadd.f32 %v509_v8, %v1277_v37  ;;  %v343_v16 = vadd.f32 %v296_v43, %v1150_v63  ;;  %v705_v47 = vrot.slane %v1272_v34, 7  ;;  %v570_v50 = vsel %vm550_vm1, %v567_v53, %v569_v35 }
  0x38   : > { %v534_v49 = vadd.f32 %v510_v38, %v1286_v46  ;;  %v511_v48 = vadd.f32 %v455_v19, %v414_v39  ;;  %v344_v51 = vadd.f32 %v295_v33, %v1153_v0  ;;  %v297_v63 = vrot.slane %v1234_v5, 7  ;;  %v1341_v19 = vld [vmem:[%s1061_s26 + $0xa0] sm:$0x7] }
  0x39   : > { %v622_v55 = vadd.f32 %v565_v26, %v533_v45  ;;  %v367_v58 = vadd.f32 %v343_v16, %v1202_v41  ;;  %v458_v59 = vrot.slane %v1234_v5, 1  ;;  %v459_v62 = vrot.slane %v1277_v37, 1  ;;  %v1315_v26 = vld [vmem:[%s1068_s29 + $0x40] sm:$0xff]  ;;  %v1359_v16 = vld [vmem:[%s1061_s26 + $0xa8] sm:$0xff] }
  0x3a   : > { %v623_v31 = vadd.f32 %v564_v60, %v534_v49  ;;  %v535_v44 = vadd.f32 %v511_v48, %v1297_v57  ;;  %v368_v61 = vadd.f32 %v344_v51, %v1212_v20  ;;  %v706_v7 = vsel %vm284_vm2, %v704_v32, %v705_v47 }
  0x3b   : > { %v646_v1 = vmul.f32 0.25, %v622_v55  ;;  %v391_v6 = vadd.f32 %v367_v58, %v1202_v41  ;;  %v345_v2 = vadd.f32 %v297_v63, %v1170_v24  ;;  %v571_v60 = vrot.slane %v1234_v5, 2 }
  0x3c   : > { %v647_v9 = vmul.f32 0.25, %v623_v31  ;;  %v624_v52 = vadd.f32 %v568_v40, %v535_v44  ;;  %v392_v0 = vadd.f32 %v368_v61, %v1212_v20  ;;  %v572_v15 = vrot.slane %v1277_v37, 2 }
  0x3d   : > { %v750_v11 = vadd.f32 %v703_v10, %v646_v1  ;;  %v415_v13 = vadd.f32 %v391_v6, %v1277_v37  ;;  %v369_v14 = vadd.f32 %v345_v2, %v1234_v5  ;;  %v460_v21 = vsel %vm437_vm0, %v458_v59, %v459_v62 }
  0x3e   : > { %v751_v24 = vadd.f32 %v702_v3, %v647_v9  ;;  %v648_v42 = vmul.f32 0.25, %v624_v52  ;;  %v416_v18 = vadd.f32 %v392_v0, %v1286_v46  ;;  %v707_v25 = vrot.slane %v1315_v26, 7  ;;  %v1335_v3 = vld [vmem:[%s1061_s26 + $0x98] sm:$0xff] }
  0x3f   : > { %777 = vst.msk [vmem:[%s1178_s4 + $0x27] sm:$0xff] %vm769_vm4, %v750_v11  ;;  %v512_v22 = vadd.f32 %v457_v36, %v415_v13  ;;  %v393_v23 = vadd.f32 %v369_v14, %v1234_v5  ;;  %v298_v27 = vrot.slane %v1277_v37, 7  ;;  %v461_v4 = vrot.slane %v1286_v46, 1  ;;  %v1393_v13 = vld [vmem:[%s1061_s26 + $0xb0] sm:$0xff] }
  0x40   : > { %778 = vst.msk [vmem:[%s1178_s4 + $0x2f] sm:$0x1] %vm771_vm5, %v751_v24  ;;  %v752_v56 = vadd.f32 %v704_v32, %v648_v42  ;;  %v513_v53 = vadd.f32 %v456_v17, %v416_v18  ;;  %v574_v28 = vrot.slane %v1286_v46, 2  ;;  %v573_v30 = vsel %vm550_vm1, %v571_v60, %v572_v15  ;;  %v1399_v18 = vld [vmem:[%s1061_s26 + $0xb8] sm:$0x7] }
  0x41   : > { %v536_v10 = vadd.f32 %v512_v22, %v1335_v3  ;;  %v417_v29 = vadd.f32 %v393_v23, %v1297_v57  ;;  %v299_v33 = vsel %vm284_vm2, %v297_v63, %v298_v27  ;;  %v462_v8 = vsel %vm437_vm0, %v459_v62, %v461_v4  ;;  %v1375_v62 = vld [vmem:[%s1068_s29 + $0x50] sm:$0xff] }
  0x42   : > { %779 = vst.msk [vmem:[%s1178_s4 + $0x2f] sm:$0xfe] %vm767_vm3, %v752_v56  ;;  %v537_v32 = vadd.f32 %v513_v53, %v1341_v19  ;;  %v346_v12 = vadd.f32 %v299_v33, %v1202_v41  ;;  %v708_v17 = vrot.slane %v1330_v54, 7  ;;  %v575_v40 = vsel %vm550_vm1, %v572_v15, %v574_v28  ;;  %v1448_v54 = vld [vmem:[%s1061_s26 + $0xc8] sm:$0xff] }
  0x43   : > { %v625_v38 = vadd.f32 %v570_v50, %v536_v10  ;;  %v514_v39 = vadd.f32 %v460_v21, %v417_v29  ;;  %v347_v43 = vadd.f32 %v298_v27, %v1212_v20  ;;  %v300_v36 = vrot.slane %v1297_v57, 7  ;;  %v1402_v21 = vld [vmem:[%s1061_s26 + $0xc0] sm:$0xff] }
  0x44   : > { %v626_v45 = vadd.f32 %v569_v35, %v537_v32  ;;  %v370_v41 = vadd.f32 %v346_v12, %v1277_v37  ;;  %v463_v49 = vrot.slane %v1297_v57, 1  ;;  %v464_v55 = vrot.slane %v1335_v3, 1 }
  0x45   : > { %v649_v48 = vmul.f32 0.25, %v625_v38  ;;  %v538_v50 = vadd.f32 %v514_v39, %v1359_v16  ;;  %v371_v51 = vadd.f32 %v347_v43, %v1286_v46  ;;  %v709_v35 = vsel %vm284_vm2, %v707_v25, %v708_v17 }
  0x46   : > { %v650_v58 = vmul.f32 0.25, %v626_v45  ;;  %v394_v20 = vadd.f32 %v370_v41, %v1277_v37  ;;  %v348_v63 = vadd.f32 %v300_v36, %v1234_v5  ;;  %v576_v61 = vrot.slane %v1297_v57, 2 }
  0x47   : > { %v753_v59 = vadd.f32 %v706_v7, %v649_v48  ;;  %v627_v31 = vadd.f32 %v573_v30, %v538_v50  ;;  %v395_v44 = vadd.f32 %v371_v51, %v1286_v46  ;;  %v577_v9 = vrot.slane %v1335_v3, 2 }
  0x48   : > { %v754_v1 = vadd.f32 %v705_v47, %v650_v58  ;;  %v418_v6 = vadd.f32 %v394_v20, %v1335_v3  ;;  %v372_v2 = vadd.f32 %v348_v63, %v1297_v57  ;;  %v465_v52 = vsel %vm437_vm0, %v463_v49, %v464_v55 }
  0x49   : > { %780 = vst.msk [vmem:[%s1178_s4 + $0x37] sm:$0xff] %vm769_vm4, %v753_v59  ;;  %v651_v5 = vmul.f32 0.25, %v627_v31  ;;  %v419_v7 = vadd.f32 %v395_v44, %v1341_v19  ;;  %v301_v0 = vrot.slane %v1335_v3, 7  ;;  %v710_v60 = vrot.slane %v1375_v62, 7  ;;  %v1443_v44 = vld [vmem:[%s1068_s29 + $0x60] sm:$0xff] }
  0x4a   : > { %781 = vst.msk [vmem:[%s1178_s4 + $0x3f] sm:$0x1] %vm771_vm5, %v754_v1  ;;  %v515_v34 = vadd.f32 %v462_v8, %v418_v6  ;;  %v396_v47 = vadd.f32 %v372_v2, %v1297_v57  ;;  %v466_v26 = vrot.slane %v1341_v19, 1  ;;  %v579_v24 = vrot.slane %v1341_v19, 2 }
  0x4b   : > { %v755_v11 = vadd.f32 %v707_v25, %v651_v5  ;;  %v516_v14 = vadd.f32 %v461_v4, %v419_v7  ;;  %v302_v15 = vsel %vm284_vm2, %v300_v36, %v301_v0  ;;  %v578_v23 = vsel %vm550_vm1, %v576_v61, %v577_v9  ;;  %v1408_v25 = vld [vmem:[%s1068_s29 + $0x58] sm:$0xff] }
  0x4c   : > { %v539_v42 = vadd.f32 %v515_v34, %v1393_v13  ;;  %v420_v22 = vadd.f32 %v396_v47, %v1359_v16  ;;  %v349_v27 = vadd.f32 %v302_v15, %v1277_v37  ;;  %v467_v53 = vsel %vm437_vm0, %v464_v55, %v466_v26  ;;  %v1470_v15 = vld [vmem:[%s1068_s29 + $0x68] sm:$0xff] }
  0x4d   : > { %782 = vst.msk [vmem:[%s1178_s4 + $0x3f] sm:$0xfe] %vm767_vm3, %v755_v11  ;;  %v540_v56 = vadd.f32 %v516_v14, %v1399_v18  ;;  %v580_v4 = vsel %vm550_vm1, %v577_v9, %v579_v24  ;;  %v350_v10 = vadd.f32 %v301_v0, %v1286_v46  ;;  %v303_v37 = vrot.slane %v1359_v16, 7  ;;  %v1455_v9 = vld [vmem:[%s1061_s26 + $0xd0] sm:$0x7] }
  0x4e   : > { %v628_v29 = vadd.f32 %v575_v40, %v539_v42  ;;  %v517_v30 = vadd.f32 %v465_v52, %v420_v22  ;;  %v373_v33 = vadd.f32 %v349_v27, %v1335_v3  ;;  %v711_v12 = vrot.slane %v1408_v25, 7 }
  0x4f   : > { %v629_v32 = vadd.f32 %v574_v28, %v540_v56  ;;  %v374_v8 = vadd.f32 %v350_v10, %v1341_v19  ;;  %v306_v38 = vrot.slane %v1402_v21, 7  ;;  %v351_v45 = vadd.f32 %v303_v37, %v1297_v57 }
  0x50   : > { %v652_v39 = vmul.f32 0.25, %v628_v29  ;;  %v541_v43 = vadd.f32 %v517_v30, %v1402_v21  ;;  %v397_v40 = vadd.f32 %v373_v33, %v1335_v3  ;;  %v468_v28 = vrot.slane %v1359_v16, 1 }
  0x51   : > { %v653_v41 = vmul.f32 0.25, %v629_v32  ;;  %v398_v36 = vadd.f32 %v374_v8, %v1341_v19  ;;  %v354_v46 = vadd.f32 %v306_v38, %v1359_v16  ;;  %v375_v51 = vadd.f32 %v351_v45, %v1359_v16  ;;  %v239_v45 = vld [vmem:[%s1061_s26 + $0xe0] sm:$0xff] }
  0x52   : > { %v756_v49 = vadd.f32 %v709_v35, %v652_v39  ;;  %v630_v48 = vadd.f32 %v578_v23, %v541_v43  ;;  %v421_v50 = vadd.f32 %v397_v40, %v1393_v13  ;;  %v469_v20 = vrot.slane %v1393_v13, 1 }
  0x53   : > { %v757_v55 = vadd.f32 %v708_v17, %v653_v41  ;;  %v422_v57 = vadd.f32 %v398_v36, %v1399_v18  ;;  %v378_v58 = vadd.f32 %v354_v46, %v1402_v21  ;;  %v399_v59 = vadd.f32 %v375_v51, %v1359_v16 }
  0x54   : > { %783 = vst.msk [vmem:[%s1178_s4 + $0x47] sm:$0xff] %vm769_vm4, %v756_v49  ;;  %v654_v63 = vmul.f32 0.25, %v630_v48  ;;  %v518_v35 = vadd.f32 %v467_v53, %v421_v50  ;;  %v581_v31 = vrot.slane %v1359_v16, 2  ;;  %v470_v62 = vsel %vm437_vm0, %v468_v28, %v469_v20  ;;  %v238_v16 = vld [vmem:[%s1061_s26 + $0xd8] sm:$0xff]  ;;  %v240_v48 = vld [vmem:[%s1061_s26 + $0xe8] sm:$0x7] }
  0x55   : > { %784 = vst.msk [vmem:[%s1178_s4 + $0x4f] sm:$0x1] %vm771_vm5, %v757_v55  ;;  %v519_v17 = vadd.f32 %v466_v26, %v422_v57  ;;  %v402_v61 = vadd.f32 %v378_v58, %v1402_v21  ;;  %v582_v1 = vrot.slane %v1393_v13, 2  ;;  %v423_v5 = vadd.f32 %v399_v59, %v1402_v21  ;;  %v241_v50 = vld [vmem:[%s1061_s26 + $0xf0] sm:$0xff] }
  0x56   : > { %v758_v6 = vadd.f32 %v710_v60, %v654_v63  ;;  %v542_v2 = vadd.f32 %v518_v35, %v1448_v54  ;;  %v712_v7 = vsel %vm284_vm2, %v710_v60, %v711_v12  ;;  %v713_v0 = vrot.slane %v1443_v44, 7 }
  0x57   : > { %v543_v52 = vadd.f32 %v519_v17, %v1455_v9  ;;  %v304_v34 = vrot.slane %v1393_v13, 7  ;;  %v520_v26 = vadd.f32 %v470_v62, %v423_v5  ;;  %v307_v11 = vrot.slane %v1448_v54, 7 }
  0x58   : > { %785 = vst.msk [vmem:[%s1178_s4 + $0x4f] sm:$0xfe] %vm767_vm3, %v758_v6  ;;  %v631_v47 = vadd.f32 %v580_v4, %v542_v2  ;;  %v471_v14 = vrot.slane %v1399_v18, 1  ;;  %v426_v60 = vadd.f32 %v402_v61, %v238_v16  ;;  %v583_v22 = vsel %vm550_vm1, %v581_v31, %v582_v1  ;;  %v677_v31 = vld [vmem:[%s1068_s29 + $0x70] sm:$0xff]  ;;  %v678_v6 = vld [vmem:[%s1068_s29 + $0x78] sm:$0xff] }
  0x59   : > { %v632_v42 = vadd.f32 %v579_v24, %v543_v52  ;;  %v305_v23 = vsel %vm284_vm2, %v303_v37, %v304_v34  ;;  %v544_v56 = vadd.f32 %v520_v26, %v238_v16  ;;  %v308_v53 = vsel %vm284_vm2, %v306_v38, %v307_v11  ;;  %v242_v16 = vld [vmem:[%s1061_s26 + $0xf8] sm:$0xff] }
  0x5a   : > { %v655_v27 = vmul.f32 0.25, %v631_v47  ;;  %v352_v4 = vadd.f32 %v305_v23, %v1335_v3  ;;  %v355_v29 = vadd.f32 %v308_v53, %v1393_v13  ;;  %v584_v30 = vrot.slane %v1399_v18, 2  ;;  %v243_v47 = vld [vmem:[%s1061_s26 + $0x100] sm:$0x7] }
  0x5b   : > { %v656_v10 = vmul.f32 0.25, %v632_v42  ;;  %v714_v24 = vrot.slane %v1470_v15, 7  ;;  %v633_v32 = vadd.f32 %v583_v22, %v544_v56  ;;  %v472_v8 = vsel %vm437_vm0, %v469_v20, %v471_v14 }
  0x5c   : > { %v759_v33 = vadd.f32 %v712_v7, %v655_v27  ;;  %v376_v37 = vadd.f32 %v352_v4, %v1393_v13  ;;  %v379_v39 = vadd.f32 %v355_v29, %v1448_v54  ;;  %v353_v3 = vadd.f32 %v304_v34, %v1341_v19 }
  0x5d   : > { %v760_v38 = vadd.f32 %v711_v12, %v656_v10  ;;  %v356_v43 = vadd.f32 %v307_v11, %v1399_v18  ;;  %v657_v40 = vmul.f32 0.25, %v633_v32  ;;  %v473_v36 = vrot.slane %v1402_v21, 1 }
  0x5e   : > { %786 = vst.msk [vmem:[%s1178_s4 + $0x57] sm:$0xff] %vm769_vm4, %v759_v33  ;;  %v400_v41 = vadd.f32 %v376_v37, %v1393_v13  ;;  %v474_v46 = vrot.slane %v1448_v54, 1  ;;  %v403_v25 = vadd.f32 %v379_v39, %v1448_v54  ;;  %v377_v19 = vadd.f32 %v353_v3, %v1399_v18 }
  0x5f   : > { %787 = vst.msk [vmem:[%s1178_s4 + $0x5f] sm:$0x1] %vm771_vm5, %v760_v38  ;;  %v380_v12 = vadd.f32 %v356_v43, %v1455_v9  ;;  %v586_v28 = vrot.slane %v1402_v21, 2  ;;  %v761_v49 = vadd.f32 %v713_v0, %v657_v40  ;;  %v587_v55 = vrot.slane %v1448_v54, 2 }
  0x60   : > { %v424_v13 = vadd.f32 %v400_v41, %v1448_v54  ;;  %v475_v51 = vsel %vm437_vm0, %v473_v36, %v474_v46  ;;  %v427_v57 = vadd.f32 %v403_v25, %v239_v45  ;;  %v401_v58 = vadd.f32 %v377_v19, %v1399_v18 }
  0x61   : > { %v404_v20 = vadd.f32 %v380_v12, %v1455_v9  ;;  %v523_v63 = vadd.f32 %v475_v51, %v426_v60  ;;  %788 = vst.msk [vmem:[%s1178_s4 + $0x5f] sm:$0xfe] %vm767_vm3, %v761_v49  ;;  %v585_v35 = vsel %vm550_vm1, %v582_v1, %v584_v30  ;;  %v588_v59 = vsel %vm550_vm1, %v586_v28, %v587_v55 }
  0x62   : > { %v521_v21 = vadd.f32 %v472_v8, %v424_v13  ;;  %v476_v17 = vrot.slane %v1455_v9, 1  ;;  %v425_v54 = vadd.f32 %v401_v58, %v1455_v9  ;;  %v589_v18 = vrot.slane %v1455_v9, 2 }
  0x63   : > { %v428_v61 = vadd.f32 %v404_v20, %v240_v48  ;;  %v547_v62 = vadd.f32 %v523_v63, %v241_v50  ;;  %v716_v1 = vrot.slane %v677_v31, 7  ;;  %v717_v42 = vrot.slane %v678_v6, 7 }
  0x64   : > { %v545_v2 = vadd.f32 %v521_v21, %v239_v45  ;;  %v477_v5 = vsel %vm437_vm0, %v474_v46, %v476_v17  ;;  %v522_v7 = vadd.f32 %v471_v14, %v425_v54  ;;  %v590_v11 = vsel %vm550_vm1, %v587_v55, %v589_v18 }
  0x65   : > { %v636_v52 = vadd.f32 %v588_v59, %v547_v62  ;;  %v524_v34 = vadd.f32 %v477_v5, %v427_v57  ;;  %v525_v60 = vadd.f32 %v476_v17, %v428_v61  ;;  %v715_v9 = vsel %vm284_vm2, %v713_v0, %v714_v24 }
  0x66   : > { %v634_v26 = vadd.f32 %v585_v35, %v545_v2  ;;  %v546_v22 = vadd.f32 %v522_v7, %v240_v48  ;;  %v718_v33 = vsel %vm284_vm2, %v716_v1, %v717_v42 }
  0x67   : > { %v660_v23 = vmul.f32 0.25, %v636_v52  ;;  %v548_v14 = vadd.f32 %v524_v34, %v242_v16  ;;  %v549_v56 = vadd.f32 %v525_v60, %v243_v47 }
  0x68   : > { %v658_v27 = vmul.f32 0.25, %v634_v26  ;;  %v635_v53 = vadd.f32 %v584_v30, %v546_v22 }
  0x69   : > { %v764_v4 = vadd.f32 %v716_v1, %v660_v23  ;;  %v637_v10 = vadd.f32 %v590_v11, %v548_v14  ;;  %v638_v32 = vadd.f32 %v589_v18, %v549_v56 }
  0x6a   : > { %v762_v29 = vadd.f32 %v715_v9, %v658_v27  ;;  %v659_v37 = vmul.f32 0.25, %v635_v53 }
  0x6b   : > { %791 = vst.msk [vmem:[%s1178_s4 + $0x6f] sm:$0xfe] %vm767_vm3, %v764_v4  ;;  %v661_v44 = vmul.f32 0.25, %v637_v10  ;;  %v662_v0 = vmul.f32 0.25, %v638_v32 }
  0x6c   : > { %789 = vst.msk [vmem:[%s1178_s4 + $0x67] sm:$0xff] %vm769_vm4, %v762_v29  ;;  %v763_v8 = vadd.f32 %v714_v24, %v659_v37 }
  0x6d   : > { %v765_v38 = vadd.f32 %v718_v33, %v661_v44  ;;  %v766_v39 = vadd.f32 %v717_v42, %v662_v0 }
  0x6e   : > { %790 = vst.msk [vmem:[%s1178_s4 + $0x6f] sm:$0x1] %vm771_vm5, %v763_v8 }
  0x6f   : > { %792 = vst.msk [vmem:[%s1178_s4 + $0x77] sm:$0xff] %vm769_vm4, %v765_v38 }
  0x70   : > { %793 = vst.msk [vmem:[%s1178_s4 + $0x7f] sm:$0x1] %vm771_vm5, %v766_v39 }
  0x71 PF: > { %s12_s13 = sadd.s32 1, %s1004_s13   ;;  %s1558_s9 = smov %s996_s11 }
  0x72   : > { %p9_p7 = scmp.ge.s32.totalorder %s12_s13, 6   ;;  %s1559_s10 = smov %s1000_s12 }
  0x73   : > { %s1560_s11 = smov %s1563_s14  ;;  %s1561_s12 = smov %s1567_s15 }
  0x74   :  { %11 = sbr.rel (!%p9_p7) target bundleno = 3 (0x3), region = 62 }

// kernel: global_local_attention.4
= control target key start
LH: loop header
LB: loop body
LE: loop exit
PB: predicated region body
PF: predicated region fallthrough
CT: control target
= control target key end

     0   :  { %s2809_s15 = smov 0   ;;  %s2811_s16 = smov 0   ;;  %s3735_s0 = inlined_call_operand.vmem [shape: bf16[2,18,18,32], index: 0, kind: input, shape index: {}]   ;;  %s3736_s1 = inlined_call_operand.vmem [shape: bf16[3,3,32,128], index: 1, kind: input, shape index: {}]   ;;  %s3737_s2 = inlined_call_operand.vmem [shape: f32[1,128], index: 2, kind: input, shape index: {}]   ;;  %s3738_s3 = inlined_call_operand.vmem [shape: f32[2,16,16,32], index: 3, kind: output, shape index: {0}]   ;;  %s3739_s4 = inlined_call_operand.vmem [shape: f32[2,16,16,96], index: 4, kind: output, shape index: {1}]  }
   0x1   :  { %s2813_s17 = smov 0   ;;  %s2815_s18 = smov 0  }
   0x2   :  { %s2817_s19 = smov 0  }
   0x3 LB: > { %s24_s20 = sadd.s32 1, %s2773_s17  ;;  %s27_s21 = sadd.s32 1, %s2777_s18  ;;  %s2781_s19 = sphi %s2817_s19, %s15_s19   ;;  %s2777_s18 = sphi %s2815_s18, %s3787_s18   ;;  %s2773_s17 = sphi %s2813_s17, %s3786_s17   ;;  %s2769_s16 = sphi %s2811_s16, %s3785_s16   ;;  %s2765_s15 = sphi %s2809_s15, %s3784_s15  }
   0x4   : > { %p25_p0 = scmp.ge.s32.totalorder %s24_s20, 2  ;;  %p2220_p1 = scmp.ge.s32.totalorder %s2781_s19, 1 }
   0x5   : > { %p181_p2 = scmp.lt.s32.totalorder %s2781_s19, 5 }
   0x6   : > { %s3789_s20 = smov (%p25_p0, %s24_s20), 0  ;;  %s3791_s21 = smov (!%p25_p0, %s27_s21), %s2777_s18 }
   0x7   : > { %p182_p3 = pnand %p2220_p1, %p181_p2  ;;  %p29_p4 = scmp.ge.s32.totalorder %s3791_s21, 2 }
   0x9   : > { %s3793_s21 = smov (%p29_p4, %s3791_s21), 0  ;;  %185 = sbr.rel (%p182_p3) target bundleno = 515 (0x203), region = 32 }
   0xe   : > { %v2715_v0 = vld [vmem:[%s3736_s1 + $0x18] sm:$0xff]   ;;  %p222_p5 = scmp.lt.s32.totalorder %s2769_s16, 1  ;;  %v2716_v1 = vld [vmem:[%s3736_s1 + $0x10] sm:$0xff]   ;;  %s2398_s26 = smul.u32 96, %s2765_s15  ;;  %v2854_v2 = vld [vmem:[%s3736_s1 + $0x8] sm:$0xff]   ;;  %vm524_vm3 = vcmask 261120  }
   0xf   : > { %2669 = vmatprep.subr.bf16.mxu1 %v2715_v0  ;;  %2489 = vmatprep.subr.bf16.mxu0 %v2715_v0  ;;  %v2859_v3 = vld [vmem:[%s3736_s1 + $0x28] sm:$0xff]   ;;  %vm288_vm0 = vsmask.f32 3328  ;;  %vm289_vm1 = vsmask.f32 7440  ;;  %vm827_vm4 = vcmask 1042432  }
  0x10   : > { %s3795_s16 = smov (!%p222_p5, %s2769_s16), 1  ;;  %2671 = vmatpush3.bf16.msra.mxu1 %v2715_v0  ;;  %2490 = vmatpush3.bf16.msra.mxu0 %v2715_v0  ;;  %vm2904_vm2 = vmor %vm288_vm0, %vm289_vm1  ;;  %vm828_vm5 = vcmask 1046532   ;;  %v2736_v29 = vld [vmem:[%s3736_s1 + $0x60] sm:$0xff]   ;;  %vm2051_vm7 = vcmask 785408  }
  0x11   : > { %2670 = vmatprep.subr.bf16.mxu1 %v2716_v1  ;;  %2491 = vmatprep.subr.bf16.mxu0 %v2716_v1  ;;  %s2673_s27 = smul.u32 216, %s3795_s16  ;;  %vm3053_vm6 = vmor %vm827_vm4, %vm828_vm5 }
  0x13   : > { %s226_s8 = scalar_lea.vmem %s3735_s0, %s2673_s27  ;;  %s2224_s27 = sshll.u32 %s3795_s16, 5 }
  0x14   : > { %2672 = vmatpush3.bf16.msra.mxu1 %v2716_v1  ;;  %2492 = vmatpush3.bf16.msra.mxu0 %v2716_v1  ;;  %s2864_s9 = scalar_lea.vmem %s226_s8, %s2398_s26  ;;  %s2222_s26 = sshll.u32 %s2765_s15, 3 }
  0x15   : > { %v2867_v4 = vld [vmem:[%s2864_s9] sm:$0xf]  ;;  %v2870_v5 = vld [vmem:[%s2864_s9 + $0x4] sm:$0xf]  ;;  %v2873_v6 = vld [vmem:[%s2864_s9 + $0x8] sm:$0x1]  ;;  %2509 = vmatprep.subr.bf16.mxu1 %v2854_v2  ;;  %2529 = vmatprep.subr.bf16.mxu0 %v2859_v3 }
  0x16   : > { %v292_v7 = vshrl.u32 %v2867_v4, 16  ;;  %v295_v8 = vshll.u32 %v2867_v4, 16  ;;  %v301_v9 = vshll.u32 %v2870_v5, 16  ;;  %v305_v10 = vshrl.u32 %v2870_v5, 16  ;;  %v2882_v11 = vld [vmem:[%s2864_s9 + $0x30] sm:$0xf] }
  0x17   : > { %v311_v12 = vshll.u32 %v2873_v6, 16  ;;  %v2886_v13 = vld [vmem:[%s2864_s9 + $0x34] sm:$0xf]  ;;  %v2889_v14 = vld [vmem:[%s2864_s9 + $0x38] sm:$0x1]  ;;  %v388_v20 = vshrl.u32 %v2882_v11, 16 }
  0x18   : > { %v294_v15 = vrot.slane %v292_v7, 4  ;;  %v297_v16 = vrot.slane %v295_v8, 5  ;;  %v303_v17 = vrot.slane %v301_v9, 5  ;;  %v307_v18 = vrot.slane %v305_v10, 4  ;;  %v2897_v27 = vld [vmem:[%s2864_s9 + $0xc] sm:$0xf] }
  0x19   : > { %v313_v19 = vrot.slane %v311_v12, 5  ;;  %v391_v21 = vshll.u32 %v2882_v11, 16  ;;  %v397_v22 = vshll.u32 %v2886_v13, 16  ;;  %v401_v25 = vshrl.u32 %v2886_v13, 16  ;;  %v2900_v28 = vld [vmem:[%s2864_s9 + $0x10] sm:$0xf] }
  0x1a   : > { %v298_v23 = vor.u32 %v297_v16, %v294_v15  ;;  %v308_v24 = vor.u32 %v307_v18, %v303_v17  ;;  %v407_v26 = vshll.u32 %v2889_v14, 16  ;;  %v390_v30 = vrot.slane %v388_v20, 4  ;;  %v2909_v38 = vld [vmem:[%s2864_s9 + $0x14] sm:$0x1]  ;;  %v2920_v50 = vld [vmem:[%s2864_s9 + $0x3c] sm:$0xf] }
  0x1b   : > { %v393_v31 = vrot.slane %v391_v21, 5  ;;  %v399_v32 = vrot.slane %v397_v22, 5  ;;  %v403_v35 = vrot.slane %v401_v25, 4  ;;  %v316_v39 = vshrl.u32 %v2897_v27, 16  ;;  %v2924_v55 = vld [vmem:[%s2864_s9 + $0x40] sm:$0xf] }
  0x1c   : > { %v299_v33 = vrot.slane %v298_v23, 4  ;;  %v309_v34 = vrot.slane %v308_v24, 4  ;;  %v409_v36 = vrot.slane %v407_v26, 5  ;;  %v319_v40 = vshll.u32 %v2897_v27, 16  ;;  %v2932_v60 = vld [vmem:[%s2864_s9 + $0x44] sm:$0x1] }
  0x1d   : > { %v394_v37 = vor.u32 %v393_v31, %v390_v30  ;;  %v325_v41 = vshll.u32 %v2900_v28, 16  ;;  %v404_v44 = vor.u32 %v403_v35, %v399_v32  ;;  %v329_v45 = vshrl.u32 %v2900_v28, 16  ;;  %v2938_v1 = vld [vmem:[%s2864_s9 + $0x18] sm:$0xf]  ;;  %v2945_v12 = vld [vmem:[%s2864_s9 + $0x1c] sm:$0xf] }
  0x1e   : > { %v304_v42 = vsel %vm2904_vm2, %v299_v33, %v303_v17  ;;  %v314_v43 = vsel %vm2904_vm2, %v309_v34, %v313_v19  ;;  %v318_v48 = vrot.slane %v316_v39, 4  ;;  %v321_v49 = vrot.slane %v319_v40, 5  ;;  %v2950_v19 = vld [vmem:[%s2864_s9 + $0x20] sm:$0x1]  ;;  %v2958_v24 = vld [vmem:[%s2864_s9 + $0x48] sm:$0xf] }
  0x1f   : > { %v2237_v46 = vcombine.low %v304_v42, %v314_v43  ;;  %v395_v47 = vrot.slane %v394_v37, 4  ;;  %v405_v51 = vrot.slane %v404_v44, 4  ;;  %v327_v52 = vrot.slane %v325_v41, 5  ;;  %v2720_v33 = vld [vmem:[%s3736_s1 + $0x20] sm:$0xff]   ;;  %v2975_v43 = vld [vmem:[%s2864_s9 + $0x50] sm:$0x1] }
  0x20   : > { %v331_v53 = vrot.slane %v329_v45, 4  ;;  %v335_v54 = vshll.u32 %v2909_v38, 16  ;;  %v835_v56 = vrot.slane %v2873_v6, 5  ;;  %v322_v58 = vor.u32 %v321_v49, %v318_v48  ;;  %v2982_v48 = vld [vmem:[%s2864_s9 + $0x24] sm:$0xf]  ;;  %p230_p6 = scmp.lt.s32.totalorder %s2222_s26, 15 }
  0x21   : > { %2493 = vmatprep.mubr.msk.bf16.mxu0 %vm524_vm3, %v2237_v46  ;;  %v400_v57 = vsel %vm2904_vm2, %v395_v47, %v399_v32  ;;  %v839_v59 = vrot.slane %v2900_v28, 5  ;;  %v410_v61 = vsel %vm2904_vm2, %v405_v51, %v409_v36  ;;  %v412_v0 = vshrl.u32 %v2920_v50, 16  ;;  %v2964_v32 = vld [vmem:[%s2864_s9 + $0x4c] sm:$0xf]  ;;  %s2783_s8 = smov 96  }
  0x22   : > { %v332_v62 = vor.u32 %v331_v53, %v327_v52  ;;  %v337_v63 = vrot.slane %v335_v54, 5  ;;  %v2940_v7 = vcombine.low %v400_v57, %v410_v61  ;;  %v323_v8 = vrot.slane %v322_v58, 4  ;;  %v2986_v54 = vld [vmem:[%s2864_s9 + $0x28] sm:$0xf]  ;;  %s3797_s26 = smov (!%p230_p6, %s2222_s26), 15 }
  0x23   : > { %v415_v9 = vshll.u32 %v2920_v50, 16  ;;  %v421_v10 = vshll.u32 %v2924_v55, 16  ;;  %v414_v16 = vrot.slane %v412_v0, 4  ;;  %v425_v17 = vshrl.u32 %v2924_v55, 16  ;;  %s2223_s15 = sshll.u32 %s3797_s26, 1 }
  0x24   : > { %v333_v15 = vrot.slane %v332_v62, 4  ;;  %v431_v18 = vshll.u32 %v2932_v60, 16  ;;  %2501 = vmatprep.mubr.msk.bf16.mxu1 %vm524_vm3, %v2940_v7  ;;  %v328_v20 = vsel %vm2904_vm2, %v323_v8, %v327_v52  ;;  %v340_v23 = vshrl.u32 %v2938_v1, 16  ;;  %s3545_s28 = sadd.s32 %s2224_s27, %s2223_s15 }
  0x25   : > { %v417_v21 = vrot.slane %v415_v9, 5  ;;  %v423_v22 = vrot.slane %v421_v10, 5  ;;  %v427_v26 = vrot.slane %v425_v17, 4  ;;  %v343_v31 = vshll.u32 %v2938_v1, 16  ;;  %s2225_s16 = sshll.u32 %s3545_s28, 3 }
  0x26   : > { %v338_v25 = vsel %vm2904_vm2, %v333_v15, %v337_v63  ;;  %v433_v30 = vrot.slane %v431_v18, 5  ;;  %v342_v36 = vrot.slane %v340_v23, 4  ;;  %v349_v37 = vshll.u32 %v2945_v12, 16  ;;  %v2719_v63 = vld [vmem:[%s3736_s1] sm:$0xff]   ;;  %s3569_s7 = scalar_lea.vmem %s3738_s3, %s2225_s16  ;;  %s3686_s11 = scalar_lea.vmem %s3739_s4, %s2225_s16 }
  0x27   : > { %v2969_v34 = vcombine.low %v328_v20, %v338_v25  ;;  %v418_v35 = vor.u32 %v417_v21, %v414_v16  ;;  %v428_v39 = vor.u32 %v427_v26, %v423_v22  ;;  %v345_v40 = vrot.slane %v343_v31, 5  ;;  %v3006_v20 = vld [vmem:[%s2864_s9 + $0x2c] sm:$0x1]  ;;  %v3009_v21 = vld [vmem:[%s2864_s9 + $0x54] sm:$0xf] }
  0x28   : > { %v353_v41 = vshrl.u32 %v2945_v12, 16  ;;  %v359_v42 = vshll.u32 %v2950_v19, 16  ;;  %v351_v45 = vrot.slane %v349_v37, 5  ;;  %v436_v46 = vshrl.u32 %v2958_v24, 16 }
  0x29   : > { %2494 = vmatmul.mubr.msk.bf16.vlgmr.msra.gmra.mxu0 %vm524_vm3, %v2969_v34  ;;  %v419_v44 = vrot.slane %v418_v35, 4  ;;  %v439_v47 = vshll.u32 %v2958_v24, 16  ;;  %v429_v49 = vrot.slane %v428_v39, 4  ;;  %v346_v51 = vor.u32 %v345_v40, %v342_v36 }
  0x2a   : > { %2530 = vmatpush3.bf16.msra.mxu0 %v2859_v3  ;;  %v355_v52 = vrot.slane %v353_v41, 4  ;;  %v361_v53 = vrot.slane %v359_v42, 5  ;;  %v438_v58 = vrot.slane %v436_v46, 4  ;;  %v445_v62 = vshll.u32 %v2964_v32, 16  ;;  %v2997_v3 = vld [vmem:[%s3736_s1 + $0x48] sm:$0xff]  }
  0x2b   : > { %v424_v57 = vsel %vm2904_vm2, %v419_v44, %v423_v22  ;;  %v441_v61 = vrot.slane %v439_v47, 5  ;;  %2531 = vmatprep.subr.bf16.mxu0 %v2720_v33  ;;  %v434_v0 = vsel %vm2904_vm2, %v429_v49, %v433_v30  ;;  %v347_v8 = vrot.slane %v346_v51, 4  ;;  %v3015_v30 = vld [vmem:[%s2864_s9 + $0x58] sm:$0xf] }
  0x2c   : > { %v356_v9 = vor.u32 %v355_v52, %v351_v45  ;;  %v449_v10 = vshrl.u32 %v2964_v32, 16  ;;  %v3002_v15 = vcombine.low %v424_v57, %v434_v0  ;;  %v447_v17 = vrot.slane %v445_v62, 5  ;;  %v3033_v47 = vld [vmem:[%s3736_s1 + $0x38] sm:$0xff]  }
  0x2d   : > { %v442_v16 = vor.u32 %v441_v61, %v438_v58  ;;  %v455_v18 = vshll.u32 %v2975_v43, 16  ;;  %v352_v22 = vsel %vm2904_vm2, %v347_v8, %v351_v45  ;;  %v364_v26 = vshrl.u32 %v2982_v48, 16  ;;  %v3037_v52 = vld [vmem:[%s2864_s9 + $0x5c] sm:$0x1] }
  0x2e   : > { %v357_v23 = vrot.slane %v356_v9, 4  ;;  %v451_v25 = vrot.slane %v449_v10, 4  ;;  %2532 = vmatpush3.bf16.msra.mxu0 %v2720_v33  ;;  %2502 = vmatmul.mubr.msk.bf16.vlgmr.msra.gmra.mxu1 %vm524_vm3, %v3002_v15  ;;  %v367_v36 = vshll.u32 %v2982_v48, 16  ;;  %v373_v37 = vshll.u32 %v2986_v54, 16 }
  0x2f   : > { %v443_v31 = vrot.slane %v442_v16, 4  ;;  %v457_v35 = vrot.slane %v455_v18, 5  ;;  %2569 = vmatprep.subr.bf16.mxu0 %v2997_v3  ;;  %2510 = vmatpush3.bf16.msra.mxu1 %v2854_v2  ;;  %v366_v41 = vrot.slane %v364_v26, 4  ;;  %v377_v33 = vshrl.u32 %v2986_v54, 16 }
  0x30   : > { %v362_v39 = vsel %vm2904_vm2, %v357_v23, %v361_v53  ;;  %v452_v40 = vor.u32 %v451_v25, %v447_v17  ;;  %2511 = vmatprep.subr.bf16.mxu1 %v2719_v63  ;;  %v369_v45 = vrot.slane %v367_v36, 5  ;;  %v375_v46 = vrot.slane %v373_v37, 5 }
  0x31   : > { %v3026_v42 = vcombine.low %v352_v22, %v362_v39  ;;  %v448_v44 = vsel %vm2904_vm2, %v443_v31, %v447_v17  ;;  %v379_v49 = vrot.slane %v377_v33, 4  ;;  %v383_v51 = vshll.u32 %v3006_v20, 16 }
  0x32   : > { %v453_v2 = vrot.slane %v452_v40, 4  ;;  %v460_v53 = vshrl.u32 %v3009_v21, 16  ;;  %v370_v57 = vor.u32 %v369_v45, %v366_v41  ;;  %v463_v58 = vshll.u32 %v3009_v21, 16 }
  0x33   : > { %2497 = vmatprep.mubr.msk.bf16.mxu0 %vm524_vm3, %v3026_v42  ;;  %v469_v61 = vshll.u32 %v3015_v30, 16  ;;  %v473_v62 = vshrl.u32 %v3015_v30, 16  ;;  %v380_v8 = vor.u32 %v379_v49, %v375_v46  ;;  %v385_v9 = vrot.slane %v383_v51, 5  ;;  %2512 = vmatpush3.bf16.msra.mxu1 %v2719_v63 }
  0x34   : > { %v458_v0 = vsel %vm2904_vm2, %v453_v2, %v457_v35  ;;  %v462_v10 = vrot.slane %v460_v53, 4  ;;  %v371_v17 = vrot.slane %v370_v57, 4  ;;  %v465_v18 = vrot.slane %v463_v58, 5  ;;  %2549 = vmatprep.subr.bf16.mxu1 %v3033_v47 }
  0x35   : > { %v3047_v16 = vcombine.low %v448_v44, %v458_v0  ;;  %v471_v22 = vrot.slane %v469_v61, 5  ;;  %v381_v23 = vrot.slane %v380_v8, 4  ;;  %v475_v25 = vrot.slane %v473_v62, 4 }
  0x36   : > { %v479_v26 = vshll.u32 %v3037_v52, 16  ;;  %v2273_v35 = vrot.slane %v2867_v4, 9  ;;  %v842_v63 = vrot.slane %v2909_v38, 5  ;;  %v376_v36 = vsel %vm2904_vm2, %v371_v17, %v375_v46 }
  0x37   : > { %2505 = vmatprep.mubr.msk.bf16.mxu1 %vm524_vm3, %v3047_v16  ;;  %v466_v37 = vor.u32 %v465_v18, %v462_v10  ;;  %v832_v39 = vrot.slane %v2870_v5, 5  ;;  %v386_v40 = vsel %vm2904_vm2, %v381_v23, %v385_v9  ;;  %v476_v41 = vor.u32 %v475_v25, %v471_v22 }
  0x38   : > { %v481_v33 = vrot.slane %v479_v26, 5  ;;  %v2274_v44 = vrot.slane %v2897_v27, 9  ;;  %v3067_v45 = vcombine.low %v376_v36, %v386_v40  ;;  %v2255_v46 = vcombine.low %v2867_v4, %v2870_v5 }
  0x39   : > { %v467_v2 = vrot.slane %v466_v37, 4  ;;  %v833_v38 = vsel %vm3053_vm6, %v2273_v35, %v832_v39  ;;  %v834_v49 = vrot.slane %v832_v39, 4  ;;  %v477_v51 = vrot.slane %v476_v41, 4  ;;  %v2730_v37 = vld [vmem:[%s3736_s1 + $0x40] sm:$0xff]  }
  0x3a   : > { %v840_v53 = vsel %vm3053_vm6, %v2274_v44, %v839_v59  ;;  %v841_v57 = vrot.slane %v839_v59, 4  ;;  %2498 = vmatmul.mubr.msk.bf16.gmra.mxu0 %vm524_vm3, %v3067_v45  ;;  %v2275_v4 = vrot.slane %v2938_v1, 9  ;;  %v846_v5 = vrot.slane %v2945_v12, 5 }
  0x3b   : > { %v472_v58 = vsel %vm2904_vm2, %v467_v2, %v471_v22  ;;  %v836_v61 = vsel %vm3053_vm6, %v834_v49, %v835_v56  ;;  %v482_v62 = vsel %vm2904_vm2, %v477_v51, %v481_v33  ;;  %v849_v8 = vrot.slane %v2950_v19, 5  ;;  %v3145_v51 = vld [vmem:[%s2864_s9 + $0x60] sm:$0xf] }
  0x3c   : > { %v2285_v0 = vcombine.low %v833_v38, %v836_v61  ;;  %v843_v59 = vsel %vm3053_vm6, %v841_v57, %v842_v63  ;;  %v3094_v9 = vcombine.low %v472_v58, %v482_v62  ;;  %v847_v6 = vsel %vm3053_vm6, %v2275_v4, %v846_v5  ;;  %v280_v57 = vld [vmem:[%s2864_s9 + $0x68] sm:$0x1] }
  0x3d   : > { %v848_v10 = vrot.slane %v846_v5, 4  ;;  %v863_v56 = vrot.slane %v2889_v14, 5  ;;  %v2276_v17 = vrot.slane %v2982_v48, 9  ;;  %v853_v18 = vrot.slane %v2986_v54, 5 }
  0x3e   : > { %2533 = vmatprep.mubr.msk.bf16.mxu0 %vm524_vm3, %v2285_v0  ;;  %v856_v22 = vrot.slane %v3006_v20, 5  ;;  %2506 = vmatmul.mubr.msk.bf16.gmra.mxu1 %vm524_vm3, %v3094_v9  ;;  %v3105_v19 = vcombine.low %v840_v53, %v843_v59  ;;  %v2277_v25 = vrot.slane %v2882_v11, 9  ;;  %v860_v14 = vrot.slane %v2886_v13, 5 }
  0x3f   : > { %v850_v23 = vsel %vm3053_vm6, %v848_v10, %v849_v8  ;;  %2513 = vmatprep.mubr.msk.bf16.mxu1 %vm524_vm3, %v2255_v46  ;;  %v855_v35 = vrot.slane %v853_v18, 4  ;;  %v2278_v20 = vrot.slane %v2920_v50, 9  ;;  %v867_v36 = vrot.slane %v2924_v55, 5 }
  0x40   : > { %v3112_v26 = vcombine.low %v847_v6, %v850_v23  ;;  %v862_v63 = vrot.slane %v860_v14, 4  ;;  %v3121_v39 = vcombine.low %v2897_v27, %v2900_v28  ;;  %v854_v40 = vsel %vm3053_vm6, %v2276_v17, %v853_v18 }
  0x41   : > { %v857_v41 = vsel %vm3053_vm6, %v855_v35, %v856_v22  ;;  %v870_v33 = vrot.slane %v2932_v60, 5  ;;  %v861_v44 = vsel %vm3053_vm6, %v2277_v25, %v860_v14  ;;  %v869_v27 = vrot.slane %v867_v36, 4  ;;  %v3204_v35 = vld [vmem:[%s2864_s9 + $0x6c] sm:$0xf] }
  0x42   : > { %2534 = vmatmul.mubr.msk.bf16.vlgmr.msra.gmra.mxu0 %vm524_vm3, %v3105_v19  ;;  %v864_v2 = vsel %vm3053_vm6, %v862_v63, %v863_v56  ;;  %v2279_v28 = vrot.slane %v2958_v24, 9  ;;  %v3138_v38 = vcombine.low %v2938_v1, %v2945_v12  ;;  %v874_v60 = vrot.slane %v2964_v32, 5  ;;  %v2728_v1 = vld [vmem:[%s3736_s1 + $0x30] sm:$0xff]  }
  0x43   : > { %2570 = vmatpush3.bf16.msra.mxu0 %v2997_v3  ;;  %2537 = vmatprep.mubr.msk.bf16.mxu0 %vm524_vm3, %v3112_v26  ;;  %v877_v49 = vrot.slane %v2975_v43, 5  ;;  %v3149_v46 = vcombine.low %v2982_v48, %v2986_v54  ;;  %v3151_v53 = vcombine.low %v854_v40, %v857_v41  ;;  %v3155_v3 = vcombine.low %v2882_v11, %v2886_v13  ;;  %v3163_v43 = vld [vmem:[%s2864_s9 + $0x64] sm:$0xf]  ;;  %v3174_v13 = vld [vmem:[%s3736_s1 + $0x68] sm:$0xff]  }
  0x44   : > { %v868_v12 = vsel %vm3053_vm6, %v2278_v20, %v867_v36  ;;  %2571 = vmatprep.subr.bf16.mxu0 %v2730_v37  ;;  %v3166_v58 = vcombine.low %v861_v44, %v864_v2  ;;  %v871_v48 = vsel %vm3053_vm6, %v869_v27, %v870_v33  ;;  %v876_v54 = vrot.slane %v874_v60, 4  ;;  %v283_v2 = vld [vmem:[%s2864_s9 + $0x74] sm:$0x1] }
  0x45   : > { %v881_v11 = vrot.slane %v3015_v30, 5  ;;  %v875_v61 = vsel %vm3053_vm6, %v2279_v28, %v874_v60  ;;  %v2280_v4 = vrot.slane %v3009_v21, 9  ;;  %v1203_v5 = vshrl.u32 %v3145_v51, 16 }
  0x46   : > { %2514 = vmatmul.mubr.msk.bf16.vlgmr.msra.gmra.mxu1 %vm524_vm3, %v3121_v39  ;;  %v1206_v62 = vshll.u32 %v3145_v51, 16  ;;  %v878_v0 = vsel %vm3053_vm6, %v876_v54, %v877_v49  ;;  %v1216_v59 = vshrl.u32 %v3163_v43, 16  ;;  %v1212_v8 = vshll.u32 %v3163_v43, 16 }
  0x47   : > { %2550 = vmatpush3.bf16.msra.mxu1 %v3033_v47  ;;  %2517 = vmatprep.mubr.msk.bf16.mxu1 %vm524_vm3, %v3138_v38  ;;  %v1222_v6 = vshll.u32 %v280_v57, 16  ;;  %v3190_v10 = vcombine.low %v868_v12, %v871_v48  ;;  %v884_v56 = vrot.slane %v3037_v52, 5  ;;  %v3196_v47 = vld [vmem:[%s3736_s1 + $0x58] sm:$0xff]   ;;  %v1205_v17 = vrot.slane %v1203_v5, 4 }
  0x48   : > { %2551 = vmatprep.subr.bf16.mxu1 %v2728_v1  ;;  %2572 = vmatpush3.bf16.msra.mxu0 %v2730_v37  ;;  %v1208_v18 = vrot.slane %v1206_v62, 5  ;;  %v3198_v22 = vcombine.low %v875_v61, %v878_v0  ;;  %v883_v23 = vrot.slane %v881_v11, 4  ;;  %v1214_v25 = vrot.slane %v1212_v8, 5  ;;  %v3211_v37 = vld [vmem:[%s2864_s9 + $0x70] sm:$0xf] }
  0x49   : > { %2609 = vmatprep.subr.bf16.mxu0 %v3174_v13  ;;  %v1218_v14 = vrot.slane %v1216_v59, 4  ;;  %v2333_v63 = vrot.slane %v3145_v51, 9  ;;  %v1365_v20 = vrot.slane %v3163_v43, 5  ;;  %v1368_v36 = vrot.slane %v280_v57, 5 }
  0x4a   : > { %2538 = vmatmul.mubr.msk.bf16.gmra.mxu0 %vm524_vm3, %v3151_v53  ;;  %v1209_v52 = vor.u32 %v1208_v18, %v1205_v17  ;;  %v1224_v41 = vrot.slane %v1222_v6, 5  ;;  %v1645_v33 = vshrl.u32 %v3204_v35, 16  ;;  %v1648_v44 = vshll.u32 %v3204_v35, 16 }
  0x4b   : > { %2541 = vmatprep.mubr.msk.bf16.mxu0 %vm524_vm3, %v3166_v58  ;;  %2552 = vmatpush3.bf16.msra.mxu1 %v2728_v1  ;;  %v1219_v40 = vor.u32 %v1218_v14, %v1214_v25  ;;  %v1366_v28 = vsel %vm3053_vm6, %v2333_v63, %v1365_v20  ;;  %v1367_v60 = vrot.slane %v1365_v20, 4  ;;  %v1658_v49 = vshrl.u32 %v3211_v37, 16 }
  0x4c   : > { %2589 = vmatprep.subr.bf16.mxu1 %v3196_v47  ;;  %v1210_v27 = vrot.slane %v1209_v52, 4  ;;  %v1647_v57 = vrot.slane %v1645_v33, 4  ;;  %v1650_v48 = vrot.slane %v1648_v44, 5  ;;  %v1654_v1 = vshll.u32 %v3211_v37, 16 }
  0x4d   : > { %v1220_v12 = vrot.slane %v1219_v40, 4  ;;  %v1369_v61 = vsel %vm3053_vm6, %v1367_v60, %v1368_v36  ;;  %v1660_v5 = vrot.slane %v1658_v49, 4  ;;  %v1664_v62 = vshll.u32 %v283_v2, 16 }
  0x4e   : > { %2518 = vmatmul.mubr.msk.bf16.gmra.mxu1 %vm524_vm3, %v3149_v46  ;;  %v1215_v54 = vsel %vm2904_vm2, %v1210_v27, %v1214_v25  ;;  %v3233_v59 = vcombine.low %v1366_v28, %v1369_v61  ;;  %v1651_v8 = vor.u32 %v1650_v48, %v1647_v57  ;;  %v1656_v6 = vrot.slane %v1654_v1, 5 }
  0x4f   : > { %2521 = vmatprep.mubr.msk.bf16.mxu1 %vm524_vm3, %v3155_v3  ;;  %v1225_v0 = vsel %vm2904_vm2, %v1220_v12, %v1224_v41  ;;  %v2379_v18 = vrot.slane %v3204_v35, 9  ;;  %v1807_v25 = vrot.slane %v3211_v37, 5  ;;  %v1666_v63 = vrot.slane %v1664_v62, 5 }
  0x50   : > { %v3235_v17 = vcombine.low %v1215_v54, %v1225_v0  ;;  %v1652_v14 = vrot.slane %v1651_v8, 4  ;;  %v1661_v52 = vor.u32 %v1660_v5, %v1656_v6  ;;  %v1810_v20 = vrot.slane %v283_v2, 5 }
  0x51   : > { %v2260_v36 = vcombine.low %v2920_v50, %v2924_v55  ;;  %v2261_v40 = vcombine.low %v2958_v24, %v2964_v32  ;;  %v3247_v41 = vsel %vm3053_vm6, %v2379_v18, %v1807_v25  ;;  %v1809_v33 = vrot.slane %v1807_v25, 4 }
  0x52   : > { %2542 = vmatmul.mubr.msk.bf16.gmra.mxu0 %vm524_vm3, %v3190_v10  ;;  %v882_v50 = vsel %vm3053_vm6, %v2280_v4, %v881_v11  ;;  %v885_v55 = vsel %vm3053_vm6, %v883_v23, %v884_v56  ;;  %v1657_v24 = vsel %vm2904_vm2, %v1652_v14, %v1656_v6  ;;  %v1662_v32 = vrot.slane %v1661_v52, 4 }
  0x53   : > { %2545 = vmatprep.mubr.msk.bf16.mxu0 %vm524_vm3, %v3198_v22  ;;  %v3263_v44 = vsel %vm3053_vm6, %v1809_v33, %v1810_v20  ;;  %v3270_v11 = vcombine.low %v882_v50, %v885_v55  ;;  %v2262_v56 = vcombine.low %v3009_v21, %v3015_v30  ;;  %v2739_v21 = vld [vmem:[%s3736_s1 + $0x88] sm:$0xff]   ;;  %v2738_v30 = vld [vmem:[%s3736_s1 + $0x78] sm:$0xff]   ;;  %v2307_v31 = vcombine.low %v3145_v51, %v3163_v43 }
  0x54   : > { %v1667_v2 = vsel %vm2904_vm2, %v1662_v32, %v1666_v63  ;;  %v2384_v27 = vcombine.low %v3247_v41, %v3263_v44 }
  0x55   : > { %v3272_v4 = vcombine.low %v1657_v24, %v1667_v2 }
  0x56   : > { %2522 = vmatmul.mubr.msk.bf16.gmra.mxu1 %vm524_vm3, %v2260_v36 }
  0x57   : > { %2525 = vmatprep.mubr.msk.bf16.mxu1 %vm524_vm3, %v2261_v40 }
  0x5a   : > { %2546 = vmatmul.mubr.msk.bf16.gmra.mxu0 %vm524_vm3, %v3270_v11 }
  0x5b   : > { %2573 = vmatprep.mubr.msk.bf16.mxu0 %vm524_vm3, %v2969_v34  ;;  %v2735_v34 = vld [vmem:[%s3736_s1 + $0x50] sm:$0xff]  }
  0x5e   : > { %2526 = vmatmul.mubr.msk.bf16.gmra.mxu1 %vm524_vm3, %v2262_v56 }
  0x5f   : > { %2553 = vmatprep.mubr.msk.bf16.mxu1 %vm524_vm3, %v3121_v39  ;;  %v2741_v39 = vld [vmem:[%s3736_s1 + $0x80] sm:$0xff]  }
  0x62   : > { %2574 = vmatmul.mubr.msk.bf16.vlgmr.msra.gmra.mxu0 %vm524_vm3, %v3026_v42 }
  0x63   : > { %2610 = vmatpush3.bf16.msra.mxu0 %v3174_v13  ;;  %2577 = vmatprep.mubr.msk.bf16.mxu0 %vm524_vm3, %v3067_v45 }
  0x64   : > { %2611 = vmatprep.subr.bf16.mxu0 %v2736_v29 }
  0x66   : > { %2554 = vmatmul.mubr.msk.bf16.vlgmr.msra.gmra.mxu1 %vm524_vm3, %v3138_v38 }
  0x67   : > { %2590 = vmatpush3.bf16.msra.mxu1 %v3196_v47  ;;  %2557 = vmatprep.mubr.msk.bf16.mxu1 %vm524_vm3, %v3149_v46 }
  0x68   : > { %2591 = vmatprep.subr.bf16.mxu1 %v2735_v34  ;;  %2612 = vmatpush3.bf16.msra.mxu0 %v2736_v29 }
  0x69   : > { %2649 = vmatprep.subr.bf16.mxu0 %v2739_v21 }
  0x6a   : > { %2578 = vmatmul.mubr.msk.bf16.gmra.mxu0 %vm524_vm3, %v2940_v7 }
  0x6b   : > { %2581 = vmatprep.mubr.msk.bf16.mxu0 %vm524_vm3, %v3002_v15  ;;  %2592 = vmatpush3.bf16.msra.mxu1 %v2735_v34 }
  0x6c   : > { %2629 = vmatprep.subr.bf16.mxu1 %v2738_v30 }
  0x6e   : > { %2558 = vmatmul.mubr.msk.bf16.gmra.mxu1 %vm524_vm3, %v3155_v3 }
  0x6f   : > { %2561 = vmatprep.mubr.msk.bf16.mxu1 %vm524_vm3, %v2260_v36 }
  0x72   : > { %2582 = vmatmul.mubr.msk.bf16.gmra.mxu0 %vm524_vm3, %v3047_v16 }
  0x73   : > { %2585 = vmatprep.mubr.msk.bf16.mxu0 %vm524_vm3, %v3094_v9 }
  0x76   : > { %2562 = vmatmul.mubr.msk.bf16.gmra.mxu1 %vm524_vm3, %v2261_v40 }
  0x77   : > { %2565 = vmatprep.mubr.msk.bf16.mxu1 %vm524_vm3, %v2262_v56 }
  0x7a   : > { %2586 = vmatmul.mubr.msk.bf16.gmra.mxu0 %vm524_vm3, %v3235_v17 }
  0x7b   : > { %2613 = vmatprep.mubr.msk.bf16.mxu0 %vm524_vm3, %v3138_v38  ;;  %v2740_v38 = vld [vmem:[%s3736_s1 + $0x70] sm:$0xff]  }
  0x7e   : > { %2566 = vmatmul.mubr.msk.bf16.gmra.mxu1 %vm524_vm3, %v2307_v31 }
  0x7f   : > { %2593 = vmatprep.mubr.msk.bf16.mxu1 %vm524_vm3, %v3105_v19  ;;  %v2353_v19 = vcombine.low %v3204_v35, %v3211_v37 }
  0x82   : > { %2614 = vmatmul.mubr.msk.bf16.vlgmr.msra.gmra.mxu0 %vm524_vm3, %v3149_v46 }
  0x83   : > { %2650 = vmatpush3.bf16.msra.mxu0 %v2739_v21  ;;  %2617 = vmatprep.mubr.msk.bf16.mxu0 %vm524_vm3, %v3155_v3 }
  0x84   : > { %2651 = vmatprep.subr.bf16.mxu0 %v2741_v39 }
  0x86   : > { %2594 = vmatmul.mubr.msk.bf16.vlgmr.msra.gmra.mxu1 %vm524_vm3, %v3112_v26 }
  0x87   : > { %2630 = vmatpush3.bf16.msra.mxu1 %v2738_v30  ;;  %2597 = vmatprep.mubr.msk.bf16.mxu1 %vm524_vm3, %v3151_v53 }
  0x88   : > { %2631 = vmatprep.subr.bf16.mxu1 %v2740_v38  ;;  %2652 = vmatpush3.bf16.msra.mxu0 %v2741_v39 }
  0x8a   : > { %2618 = vmatmul.mubr.msk.bf16.gmra.mxu0 %vm524_vm3, %v2260_v36 }
  0x8b   : > { %2621 = vmatprep.mubr.msk.bf16.mxu0 %vm524_vm3, %v2261_v40  ;;  %2632 = vmatpush3.bf16.msra.mxu1 %v2740_v38 }
  0x8e   : > { %2598 = vmatmul.mubr.msk.bf16.gmra.mxu1 %vm524_vm3, %v3166_v58 }
  0x8f   : > { %2601 = vmatprep.mubr.msk.bf16.mxu1 %vm524_vm3, %v3190_v10 }
  0x92   : > { %2622 = vmatmul.mubr.msk.bf16.gmra.mxu0 %vm524_vm3, %v2262_v56 }
  0x93   : > { %2625 = vmatprep.mubr.msk.bf16.mxu0 %vm524_vm3, %v2307_v31 }
  0x96   : > { %2602 = vmatmul.mubr.msk.bf16.gmra.mxu1 %vm524_vm3, %v3198_v22 }
  0x97   : > { %2605 = vmatprep.mubr.msk.bf16.mxu1 %vm524_vm3, %v3270_v11 }
  0x9a   : > { %2626 = vmatmul.mubr.msk.bf16.gmra.mxu0 %vm524_vm3, %v2353_v19 }
  0x9b   : > { %2653 = vmatprep.mubr.msk.bf16.mxu0 %vm524_vm3, %v3112_v26 }
  0x9e   : > { %2606 = vmatmul.mubr.msk.bf16.gmra.mxu1 %vm524_vm3, %v3233_v59 }
  0x9f   : > { %2633 = vmatprep.mubr.msk.bf16.mxu1 %vm524_vm3, %v3026_v42 }
  0xa2   : > { %2654 = vmatmul.mubr.msk.bf16.vlgmr.msra.gmra.mxu0 %vm524_vm3, %v3151_v53 }
  0xa3   : > { %2657 = vmatprep.mubr.msk.bf16.mxu0 %vm524_vm3, %v3166_v58 }
  0xa6   : > { %2634 = vmatmul.mubr.msk.bf16.vlgmr.msra.gmra.mxu1 %vm524_vm3, %v3067_v45 }
  0xa7   : > { %2637 = vmatprep.mubr.msk.bf16.mxu1 %vm524_vm3, %v2940_v7 }
  0xaa   : > { %2658 = vmatmul.mubr.msk.bf16.gmra.mxu0 %vm524_vm3, %v3190_v10 }
  0xab   : > { %2661 = vmatprep.mubr.msk.bf16.mxu0 %vm524_vm3, %v3198_v22 }
  0xae   : > { %2638 = vmatmul.mubr.msk.bf16.gmra.mxu1 %vm524_vm3, %v3002_v15 }
  0xaf   : > { %2641 = vmatprep.mubr.msk.bf16.mxu1 %vm524_vm3, %v3047_v16 }
  0xb2   : > { %2662 = vmatmul.mubr.msk.bf16.gmra.mxu0 %vm524_vm3, %v3270_v11 }
  0xb3   : > { %2665 = vmatprep.mubr.msk.bf16.mxu0 %vm524_vm3, %v3233_v59 }
  0xb6   : > { %2642 = vmatmul.mubr.msk.bf16.gmra.mxu1 %vm524_vm3, %v3094_v9 }
  0xb7   : > { %2645 = vmatprep.mubr.msk.bf16.mxu1 %vm524_vm3, %v3235_v17 }
  0xba   : > { %2666 = vmatmul.mubr.msk.bf16.gmra.mxu0 %vm524_vm3, %v2384_v27 }
  0xbe   : > { %2646 = vmatmul.mubr.msk.bf16.gmra.mxu1 %vm524_vm3, %v3272_v4 }
  0xe9   : > { %v2495_v7 = vpop.f32.mrf.mxu0 }
  0xeb   : > { %v583_v42 = vpop.f32.mrf.mxu0 }
  0xed   : > { %v2496_v45 = vpop.f32.mrf.mxu0 }
  0xee   : > { %v2503_v15 = vpop.f32.mrf.mxu1 }
  0xef   : > { %v586_v51 = vpop.f32.mrf.mxu0 }
  0xf0   : > { %v615_v16 = vpop.f32.mrf.mxu1 }
  0xf2   : > { %v2504_v26 = vpop.f32.mrf.mxu1 }
  0xf4   : > { %v618_v46 = vpop.f32.mrf.mxu1 }
  0xfa   : > { %v2499_v9 = vpop.f32.mrf.mxu0 }
  0xfc   : > { %v599_v53 = vpop.f32.mrf.mxu0 }
  0xfe   : > { %v2507_v3 = vpop.f32.mrf.mxu1  ;;  %v2500_v43 = vpop.f32.mrf.mxu0 }
 0x100   : > { %v631_v58 = vpop.f32.mrf.mxu1  ;;  %v602_v13 = vpop.f32.mrf.mxu0 }
 0x102   : > { %v2508_v10 = vpop.f32.mrf.mxu1  ;;  %v2535_v47 = vpop.f32.mrf.mxu0 }
 0x104   : > { %v3393_v22 = vpop.f32.mrf.mxu1  ;;  %v985_v23 = vpop.f32.mrf.mxu0 }
 0x106   : > { %v2515_v35 = vpop.f32.mrf.mxu1  ;;  %v2536_v37 = vpop.f32.mrf.mxu0 }
 0x107   : > { %v765_v28 = vadd.f32 %v2515_v35, %v2495_v7 }
 0x108   : > { %v756_v60 = vpop.f32.mrf.mxu1  ;;  %v988_v49 = vpop.f32.mrf.mxu0 }
 0x109   : > { %v3395_v12 = vadd.f32 %v2535_v47, %v765_v28  ;;  %v757_v57 = vadd.f32 %v756_v60, %v583_v42 }
 0x10a   : > { %v2516_v48 = vpop.f32.mrf.mxu1  ;;  %v2539_v1 = vpop.f32.mrf.mxu0 }
 0x10b   : > { %v3397_v54 = vadd.f32 %v985_v23, %v757_v57  ;;  %v768_v61 = vadd.f32 %v2516_v48, %v2496_v45 }
 0x10c   : > { %v759_v5 = vpop.f32.mrf.mxu1  ;;  %v1001_v62 = vpop.f32.mrf.mxu0 }
 0x10d   : > { %v3399_v0 = vadd.f32 %v2536_v37, %v768_v61  ;;  %v760_v59 = vadd.f32 %v759_v5, %v586_v51 }
 0x10e   : > { %v2519_v8 = vpop.f32.mrf.mxu1  ;;  %v2540_v6 = vpop.f32.mrf.mxu0 }
 0x10f   : > { %v3401_v17 = vadd.f32 %v988_v49, %v760_v59  ;;  %v781_v18 = vadd.f32 %v2519_v8, %v2499_v9 }
 0x110   : > { %v772_v25 = vpop.f32.mrf.mxu1  ;;  %v1004_v14 = vpop.f32.mrf.mxu0 }
 0x111   : > { %v3403_v52 = vadd.f32 %v2539_v1, %v781_v18  ;;  %v773_v63 = vadd.f32 %v772_v25, %v599_v53 }
 0x112   : > { %v2520_v20 = vpop.f32.mrf.mxu1  ;;  %v2543_v36 = vpop.f32.mrf.mxu0 }
 0x113   : > { %v3405_v40 = vadd.f32 %v1001_v62, %v773_v63  ;;  %v784_v41 = vadd.f32 %v2520_v20, %v2500_v43 }
 0x114   : > { %v775_v33 = vpop.f32.mrf.mxu1  ;;  %v1017_v50 = vpop.f32.mrf.mxu0 }
 0x115   : > { %v3407_v55 = vadd.f32 %v2540_v6, %v784_v41  ;;  %v776_v24 = vadd.f32 %v775_v33, %v602_v13 }
 0x116   : > { %v2523_v32 = vpop.f32.mrf.mxu1  ;;  %v2544_v44 = vpop.f32.mrf.mxu0 }
 0x117   : > { %v3409_v2 = vadd.f32 %v1004_v14, %v776_v24  ;;  %v797_v27 = vadd.f32 %v2523_v32, %v2503_v15 }
 0x118   : > { %v788_v11 = vpop.f32.mrf.mxu1  ;;  %v1020_v4 = vpop.f32.mrf.mxu0 }
 0x119   : > { %v3411_v56 = vadd.f32 %v2543_v36, %v797_v27  ;;  %v789_v29 = vadd.f32 %v788_v11, %v615_v16 }
 0x11a   : > { %v2524_v34 = vpop.f32.mrf.mxu1  ;;  %v2547_v21 = vpop.f32.mrf.mxu0 }
 0x11b   : > { %v3413_v30 = vadd.f32 %v1017_v50, %v789_v29  ;;  %v800_v31 = vadd.f32 %v2524_v34, %v2504_v26 }
 0x11c   : > { %v791_v39 = vpop.f32.mrf.mxu1  ;;  %v1033_v38 = vpop.f32.mrf.mxu0 }
 0x11d   : > { %v3415_v19 = vadd.f32 %v2544_v44, %v800_v31  ;;  %v792_v7 = vadd.f32 %v791_v39, %v618_v46 }
 0x11e   : > { %v2527_v42 = vpop.f32.mrf.mxu1  ;;  %v2548_v45 = vpop.f32.mrf.mxu0 }
 0x11f   : > { %v3417_v51 = vadd.f32 %v1020_v4, %v792_v7  ;;  %v813_v15 = vadd.f32 %v2527_v42, %v2507_v3 }
 0x120   : > { %v804_v9 = vpop.f32.mrf.mxu1  ;;  %v1036_v53 = vpop.f32.mrf.mxu0 }
 0x121   : > { %v3419_v43 = vadd.f32 %v2547_v21, %v813_v15  ;;  %v805_v16 = vadd.f32 %v804_v9, %v631_v58 }
 0x122   : > { %v2528_v13 = vpop.f32.mrf.mxu1  ;;  %v3421_v47 = vpop.f32.mrf.mxu0 }
 0x123   : > { %v3423_v23 = vadd.f32 %v1033_v38, %v805_v16  ;;  %v816_v26 = vadd.f32 %v2528_v13, %v2508_v10 }
 0x124   : > { %v807_v35 = vpop.f32.mrf.mxu1  ;;  %v3425_v37 = vpop.f32.mrf.mxu0 }
 0x125   : > { %3744 = vst [vmem:[#allocation2_spill] sm:$0xff] %v3423_v23  ;;  %v3427_v46 = vadd.f32 %v2548_v45, %v816_v26  ;;  %v808_v28 = vadd.f32 %v807_v35, %v3393_v22 }
 0x126   : > { %v2555_v60 = vpop.f32.mrf.mxu1  ;;  %v3430_v3 = vpop.f32.mrf.mxu0 }
 0x127   : > { %3745 = vst [vmem:[#allocation3_spill] sm:$0xff] %v3427_v46  ;;  %v3432_v49 = vadd.f32 %v1036_v53, %v808_v28 }
 0x128   : > { %v1123_v57 = vpop.f32.mrf.mxu1  ;;  %v3434_v58 = vpop.f32.mrf.mxu0 }
 0x129   : > { %3746 = vst [vmem:[#allocation4_spill] sm:$0xff] %v3432_v49  ;;  %v1186_v23 = vadd.f32 %v1123_v57, %v3397_v54 }
 0x12a   : > { %v2556_v48 = vpop.f32.mrf.mxu1  ;;  %v3436_v1 = vpop.f32.mrf.mxu0 }
 0x12c   : > { %v1126_v61 = vpop.f32.mrf.mxu1  ;;  %v3438_v10 = vpop.f32.mrf.mxu0 }
 0x12e   : > { %v3440_v5 = vpop.f32.mrf.mxu1  ;;  %v3442_v62 = vpop.f32.mrf.mxu0 }
 0x12f   : > { %v1192_v54 = vadd.f32 %v3440_v5, %v3403_v52 }
 0x130   : > { %v3444_v59 = vpop.f32.mrf.mxu1  ;;  %v3446_v22 = vpop.f32.mrf.mxu0 }
 0x131   : > { %v1352_v52 = vadd.f32 %v3436_v1, %v1192_v54  ;;  %v3558_v1 = vld [vmem:[%s3737_s2] ss:$0 sm:$0xff] }
 0x132   : > { %v3448_v8 = vpop.f32.mrf.mxu1  ;;  %v3450_v6 = vpop.f32.mrf.mxu0 }
 0x133   : > { %v1193_v5 = vadd.f32 %v3448_v8, %v3407_v55 }
 0x134   : > { %v3452_v18 = vpop.f32.mrf.mxu1  ;;  %v3454_v25 = vpop.f32.mrf.mxu0 }
 0x136   : > { %v3456_v14 = vpop.f32.mrf.mxu1  ;;  %v3458_v63 = vpop.f32.mrf.mxu0 }
 0x138   : > { %v3460_v20 = vpop.f32.mrf.mxu1  ;;  %v3462_v36 = vpop.f32.mrf.mxu0 }
 0x139   : > { %3747 = vst [vmem:[#allocation5_spill] sm:$0xff] %v3462_v36 }
 0x13a   : > { %v3464_v41 = vpop.f32.mrf.mxu1  ;;  %v3466_v33 = vpop.f32.mrf.mxu0 }
 0x13b   : > { %3748 = vst [vmem:[#allocation6_spill] sm:$0xff] %v3466_v33 }
 0x13c   : > { %v3468_v50 = vpop.f32.mrf.mxu1  ;;  %v3470_v24 = vpop.f32.mrf.mxu0 }
 0x13d   : > { %3749 = vst [vmem:[#allocation7_spill] sm:$0xff] %v3470_v24 }
 0x13e   : > { %v3472_v32 = vpop.f32.mrf.mxu1  ;;  %v3474_v44 = vpop.f32.mrf.mxu0 }
 0x13f   : > { %3750 = vst [vmem:[#allocation8_spill] sm:$0xff] %v3474_v44 }
 0x140   : > { %v3476_v27 = vpop.f32.mrf.mxu1  ;;  %v3478_v11 = vpop.f32.mrf.mxu0 }
 0x141   : > { %3751 = vst [vmem:[#allocation9_spill] sm:$0xff] %v3476_v27  ;;  %3752 = vst [vmem:[#allocation10_spill] sm:$0xff] %v3478_v11 }
 0x142   : > { %v3480_v4 = vpop.f32.mrf.mxu1  ;;  %v2615_v29 = vpop.f32.mrf.mxu0 }
 0x143   : > { %3753 = vst [vmem:[#allocation11_spill] sm:$0xff] %v3480_v4 }
 0x144   : > { %v3482_v34 = vpop.f32.mrf.mxu1  ;;  %v1565_v21 = vpop.f32.mrf.mxu0 }
 0x145   : > { %3754 = vst [vmem:[#allocation12_spill] sm:$0xff] %v3482_v34 }
 0x146   : > { %v2595_v31 = vpop.f32.mrf.mxu1  ;;  %v3484_v39 = vpop.f32.mrf.mxu0 }
 0x148   : > { %v1427_v38 = vpop.f32.mrf.mxu1  ;;  %v3486_v7 = vpop.f32.mrf.mxu0 }
 0x14a   : > { %v2596_v42 = vpop.f32.mrf.mxu1  ;;  %v3488_v45 = vpop.f32.mrf.mxu0 }
 0x14c   : > { %v1430_v15 = vpop.f32.mrf.mxu1  ;;  %v3490_v9 = vpop.f32.mrf.mxu0 }
 0x14e   : > { %v2599_v53 = vpop.f32.mrf.mxu1  ;;  %v3492_v16 = vpop.f32.mrf.mxu0 }
 0x150   : > { %v1443_v13 = vpop.f32.mrf.mxu1  ;;  %v3494_v26 = vpop.f32.mrf.mxu0 }
 0x151   : > { %3755 = vst [vmem:[#allocation13_spill] sm:$0xff] %v3494_v26 }
 0x152   : > { %v3496_v35 = vpop.f32.mrf.mxu1  ;;  %v3498_v28 = vpop.f32.mrf.mxu0 }
 0x153   : > { %3756 = vst [vmem:[#allocation14_spill] sm:$0xff] %v3498_v28  ;;  %v1188_v28 = vadd.f32 %v2555_v60, %v3395_v12  ;;  %v1346_v12 = vadd.f32 %v3425_v37, %v1186_v23  ;;  %v1187_v60 = vadd.f32 %v1126_v61, %v3401_v17 }
 0x154   : > { %v3500_v11 = vpop.f32.mrf.mxu1  ;;  %v3502_v44 = vpop.f32.mrf.mxu0 }
 0x155   : > { %3757 = vst [vmem:[#allocation15_spill] sm:$0xff] %v3502_v44  ;;  %v1347_v17 = vadd.f32 %v3434_v58, %v1187_v60  ;;  %v1496_v58 = vadd.f32 %v2599_v53, %v1352_v52 }
 0x156   : > { %v3504_v34 = vpop.f32.mrf.mxu1  ;;  %v3506_v49 = vpop.f32.mrf.mxu0 }
 0x157   : > { %3758 = vst [vmem:[#allocation16_spill] sm:$0xff] %v3506_v49 }
 0x158   : > { %v3509_v24 = vpop.f32.mrf.mxu1  ;;  %v3511_v4 = vpop.f32.mrf.mxu0 }
 0x159   : > { %3759 = vst [vmem:[#allocation17_spill] sm:$0xff] %v3511_v4  ;;  %v1348_v4 = vadd.f32 %v3421_v47, %v1188_v28 }
 0x15a   : > { %v3513_v46 = vpop.f32.mrf.mxu1  ;;  %v3515_v33 = vpop.f32.mrf.mxu0 }
 0x15b   : > { %3760 = vst [vmem:[#allocation18_spill] sm:$0xff] %v3513_v46  ;;  %3761 = vst [vmem:[#allocation19_spill] sm:$0xff] %v3515_v33  ;;  %v1189_v46 = vadd.f32 %v2556_v48, %v3399_v0  ;;  %v1490_v0 = vadd.f32 %v1427_v38, %v1346_v12  ;;  %v1190_v48 = vadd.f32 %v3444_v59, %v3405_v40 }
 0x15c   : > { %v3518_v27 = vpop.f32.mrf.mxu1  ;;  %v3520_v44 = vpop.f32.mrf.mxu0  ;;  %v1191_v38 = vadd.f32 %v3452_v18, %v3409_v2 }
 0x15d   : > { %3762 = vst [vmem:[#allocation20_spill] sm:$0xff] %v3520_v44  ;;  %v1492_v44 = vadd.f32 %v2595_v31, %v1348_v4  ;;  %v1349_v47 = vadd.f32 %v3430_v3, %v1189_v46  ;;  %v1628_v4 = vadd.f32 %v1565_v21, %v1490_v0  ;;  %v1491_v31 = vadd.f32 %v1430_v15, %v1347_v17 }
 0x15e   : > { %v3523_v49 = vpop.f32.mrf.mxu1  ;;  %v3525_v36 = vpop.f32.mrf.mxu0  ;;  %v1350_v59 = vadd.f32 %v3438_v10, %v1190_v48  ;;  %v1196_v10 = vadd.f32 %v3456_v14, %v3411_v56  ;;  %v1194_v56 = vadd.f32 %v3460_v20, %v3413_v30  ;;  %v1634_v14 = vadd.f32 %v3488_v45, %v1496_v58  ;;  %v3766_v58 = vld [vmem:[#allocation2_spill] sm:$0xff] }
 0x15f   : > { %3763 = vst [vmem:[#allocation21_spill] sm:$0xff] %v3525_v36  ;;  %v1630_v37 = vadd.f32 %v2615_v29, %v1492_v44  ;;  %v1493_v61 = vadd.f32 %v2596_v42, %v1349_v47  ;;  %v1353_v42 = vadd.f32 %v3442_v62, %v1193_v5  ;;  %v1629_v18 = vadd.f32 %v3486_v7, %v1491_v31 }
 0x160   : > { %v3529_v26 = vpop.f32.mrf.mxu1  ;;  %v3531_v33 = vpop.f32.mrf.mxu0  ;;  %v1494_v15 = vadd.f32 %v1443_v13, %v1350_v59  ;;  %v1351_v62 = vadd.f32 %v3446_v22, %v1191_v38  ;;  %v1356_v22 = vadd.f32 %v3450_v6, %v1196_v10  ;;  %v1197_v30 = vadd.f32 %v3464_v41, %v3415_v19  ;;  %v3765_v38 = vld [vmem:[#allocation5_spill] sm:$0xff] }
 0x161   : > { %v1631_v8 = vadd.f32 %v3484_v39, %v1493_v61  ;;  %v1497_v54 = vadd.f32 %v3496_v35, %v1353_v42  ;;  %v1354_v6 = vadd.f32 %v3454_v25, %v1194_v56  ;;  %v1195_v19 = vadd.f32 %v3468_v50, %v3417_v51 }
 0x162   : > { %v3538_v57 = vpop.f32.mrf.mxu1  ;;  %v2655_v36 = vpop.f32.mrf.mxu0  ;;  %v1632_v20 = vadd.f32 %v3490_v9, %v1494_v15  ;;  %v1495_v48 = vadd.f32 %v3500_v11, %v1351_v62  ;;  %v1500_v41 = vadd.f32 %v3504_v34, %v1356_v22  ;;  %v1357_v25 = vadd.f32 %v3458_v63, %v1197_v30  ;;  %v3775_v22 = vld [vmem:[#allocation4_spill] sm:$0xff] }
 0x163   : > { %v1635_v11 = vadd.f32 %v3492_v16, %v1497_v54  ;;  %v1200_v51 = vadd.f32 %v3472_v32, %v3419_v43  ;;  %v1498_v50 = vadd.f32 %v3509_v24, %v1354_v6  ;;  %v1355_v63 = vadd.f32 %v3765_v38, %v1195_v19  ;;  %v3768_v32 = vld [vmem:[#allocation14_spill] sm:$0xff]  ;;  %v3776_v30 = vld [vmem:[#allocation12_spill] sm:$0xff] }
 0x164   : > { %v3543_v28 = vpop.f32.mrf.mxu1  ;;  %v1869_v23 = vpop.f32.mrf.mxu0  ;;  %v1638_v24 = vadd.f32 %v3768_v32, %v1500_v41  ;;  %v3778_v19 = vld [vmem:[#allocation8_spill] sm:$0xff] }
 0x166   : > { %v2635_v46 = vpop.f32.mrf.mxu1  ;;  %v2656_v3 = vpop.f32.mrf.mxu0 }
 0x167   : > { %v1790_v40 = vadd.f32 %v2635_v46, %v1630_v37 }
 0x168   : > { %v1725_v44 = vpop.f32.mrf.mxu1  ;;  %v1872_v55 = vpop.f32.mrf.mxu0 }
 0x169   : > { %v1934_v29 = vadd.f32 %v2655_v36, %v1790_v40  ;;  %v1788_v21 = vadd.f32 %v1725_v44, %v1628_v4  ;;  %v3764_v4 = vld [vmem:[#allocation13_spill] sm:$0xff] }
 0x16a   : > { %v2636_v12 = vpop.f32.mrf.mxu1  ;;  %v2659_v2 = vpop.f32.mrf.mxu0  ;;  %v1633_v16 = vadd.f32 %v3764_v4, %v1495_v48  ;;  %v3767_v44 = vld [vmem:[#allocation9_spill] sm:$0xff] }
 0x16b   : > { %v1932_v39 = vadd.f32 %v1869_v23, %v1788_v21  ;;  %v1791_v36 = vadd.f32 %v2636_v12, %v1631_v8  ;;  %v1957_v53 = vadd.f32 %v3558_v1, %v1934_v29  ;;  %v1198_v43 = vadd.f32 %v3767_v44, %v3766_v58  ;;  %v3769_v29 = vld [vmem:[#allocation18_spill] sm:$0xff] }
 0x16c   : > { %v1728_v13 = vpop.f32.mrf.mxu1  ;;  %v1885_v60 = vpop.f32.mrf.mxu0  ;;  %v1501_v21 = vadd.f32 %v3769_v29, %v1357_v25  ;;  %v3770_v12 = vld [vmem:[#allocation6_spill] sm:$0xff] }
 0x16d   : > { %v1935_v47 = vadd.f32 %v2656_v3, %v1791_v36  ;;  %v1789_v0 = vadd.f32 %v1728_v13, %v1629_v18  ;;  %2007 = vrot.lane.b32.xlu1 %v1957_v53, %s2783_s8  ;;  %1973 = vst.msk [vmem:[%s3569_s7 + $0x10] sm:$0xff] %vm524_vm3, %v1957_v53  ;;  %v1955_v7 = vadd.f32 %v3558_v1, %v1932_v39  ;;  %v3771_v18 = vld [vmem:[#allocation3_spill] sm:$0xff] }
 0x16e   : > { %v2639_v45 = vpop.f32.mrf.mxu1  ;;  %v2660_v35 = vpop.f32.mrf.mxu0  ;;  %v3772_v39 = vld [vmem:[#allocation11_spill] sm:$0xff]  ;;  %v1499_v13 = vadd.f32 %v3518_v27, %v1355_v63 }
 0x16f   : > { %v1958_v23 = vadd.f32 %v3558_v1, %v1935_v47  ;;  %v1933_v17 = vadd.f32 %v1872_v55, %v1789_v0  ;;  %v1794_v37 = vadd.f32 %v2639_v45, %v1634_v14  ;;  %2003 = vrot.lane.b32.xlu0 %v1955_v7, %s2783_s8  ;;  %1971 = vst.msk [vmem:[%s3569_s7] sm:$0xff] %vm524_vm3, %v1955_v7  ;;  %v3773_v53 = vld [vmem:[#allocation15_spill] sm:$0xff] }
 0x170   : > { %v1741_v9 = vpop.f32.mrf.mxu1  ;;  %v1888_v61 = vpop.f32.mrf.mxu0  ;;  %v1201_v36 = vadd.f32 %v3772_v39, %v3771_v18  ;;  %v1636_v62 = vadd.f32 %v3773_v53, %v1498_v50  ;;  %v3774_v0 = vld [vmem:[#allocation7_spill] sm:$0xff] }
 0x171   : > { %1974 = vst.msk [vmem:[%s3569_s7 + $0x18] sm:$0xff] %vm524_vm3, %v1958_v23  ;;  %v1956_v52 = vadd.f32 %v3558_v1, %v1933_v17  ;;  %v1938_v5 = vadd.f32 %v2659_v2, %v1794_v37  ;;  %v1792_v46 = vadd.f32 %v1741_v9, %v1632_v20  ;;  %2009 = vrot.lane.b32.xlu1 %v1958_v23, %s2783_s8  ;;  %v3777_v23 = vld [vmem:[#allocation16_spill] sm:$0xff] }
 0x172   : > { %v2640_v34 = vpop.f32.mrf.mxu1  ;;  %v2663_v3 = vpop.f32.mrf.mxu0  ;;  %v1360_v2 = vadd.f32 %v3770_v12, %v1200_v51  ;;  %v1358_v7 = vadd.f32 %v3774_v0, %v1198_v43  ;;  %v1199_v20 = vadd.f32 %v3776_v30, %v3775_v22  ;;  %v1639_v27 = vadd.f32 %v3777_v23, %v1501_v21  ;;  %v3780_v51 = vld [vmem:[#allocation10_spill] sm:$0xff] }
 0x173   : > { %1972 = vst.msk [vmem:[%s3569_s7 + $0x8] sm:$0xff] %vm524_vm3, %v1956_v52  ;;  %v1961_v31 = vadd.f32 %v3558_v1, %v1938_v5  ;;  %v1936_v40 = vadd.f32 %v1885_v60, %v1792_v46  ;;  %v1795_v59 = vadd.f32 %v2640_v34, %v1635_v11  ;;  %2005 = vrot.lane.b32.xlu0 %v1956_v52, %s2783_s8  ;;  %v3781_v34 = vld [vmem:[#allocation19_spill] sm:$0xff] }
 0x174   : > { %v1744_v55 = vpop.f32.mrf.mxu1  ;;  %v1901_v8 = vpop.f32.mrf.mxu0  ;;  %v1504_v45 = vadd.f32 %v3523_v49, %v1360_v2  ;;  %v1361_v41 = vadd.f32 %v3778_v19, %v1201_v36  ;;  %v1502_v9 = vadd.f32 %v3529_v26, %v1358_v7  ;;  %v3779_v49 = vld [vmem:[#allocation17_spill] sm:$0xff]  ;;  %v1359_v50 = vadd.f32 %v3780_v51, %v1199_v20 }
 0x175   : > { %1977 = vst.msk [vmem:[%s3569_s7 + $0x30] sm:$0xff] %vm524_vm3, %v1961_v31  ;;  %v1959_v42 = vadd.f32 %v3558_v1, %v1936_v40  ;;  %v1939_v10 = vadd.f32 %v2660_v35, %v1795_v59  ;;  %v1793_v15 = vadd.f32 %v1744_v55, %v1633_v16  ;;  %v1637_v52 = vadd.f32 %v3779_v49, %v1499_v13  ;;  %v3782_v59 = vld [vmem:[#allocation20_spill] sm:$0xff]  ;;  %v3783_v55 = vld [vmem:[#allocation21_spill] sm:$0xff] }
 0x176   : > { %v2643_v56 = vpop.f32.mrf.mxu1  ;;  %v2664_v14 = vpop.f32.mrf.mxu0  ;;  %v1505_v26 = vadd.f32 %v3538_v57, %v1361_v41  ;;  %v1640_v38 = vadd.f32 %v3782_v59, %v1502_v9  ;;  %v1503_v44 = vadd.f32 %v3543_v28, %v1359_v50 }
 0x177   : > { %1975 = vst.msk [vmem:[%s3569_s7 + $0x20] sm:$0xff] %vm524_vm3, %v1959_v42  ;;  %v1962_v60 = vadd.f32 %v3558_v1, %v1939_v10  ;;  %v1937_v54 = vadd.f32 %v1888_v61, %v1793_v15  ;;  %v1798_v47 = vadd.f32 %v2643_v56, %v1638_v24  ;;  %2015 = vrot.lane.b32.xlu0 %v1961_v31, %s2783_s8 }
 0x178   : > { %v1757_v35 = vpop.f32.mrf.mxu1  ;;  %v1904_v48 = vpop.f32.mrf.mxu0  ;;  %v1641_v15 = vadd.f32 %v3531_v33, %v1503_v44 }
 0x179   : > { %1978 = vst.msk [vmem:[%s3569_s7 + $0x38] sm:$0xff] %vm524_vm3, %v1962_v60  ;;  %v1960_v17 = vadd.f32 %v3558_v1, %v1937_v54  ;;  %v1942_v37 = vadd.f32 %v2663_v3, %v1798_v47  ;;  %v1796_v6 = vadd.f32 %v1757_v35, %v1636_v62  ;;  %2017 = vrot.lane.b32.xlu1 %v1962_v60, %s2783_s8 }
 0x17a   : > { %v2644_v61 = vpop.f32.mrf.mxu1  ;;  %v2667_v11 = vpop.f32.mrf.mxu0  ;;  %v1642_v3 = vadd.f32 %v3781_v34, %v1504_v45 }
 0x17b   : > { %1976 = vst.msk [vmem:[%s3569_s7 + $0x28] sm:$0xff] %vm524_vm3, %v1960_v17  ;;  %v1965_v5 = vadd.f32 %v3558_v1, %v1942_v37  ;;  %v1940_v46 = vadd.f32 %v1901_v8, %v1796_v6  ;;  %v1799_v25 = vadd.f32 %v2644_v61, %v1639_v27  ;;  %2011 = vrot.lane.b32.xlu0 %v1959_v42, %s2783_s8 }
 0x17c   : > { %v1760_v4 = vpop.f32.mrf.mxu1  ;;  %v1917_v58 = vpop.f32.mrf.mxu0  ;;  %v1643_v8 = vadd.f32 %v3783_v55, %v1505_v26 }
 0x17d   : > { %1981 = vst.msk [vmem:[%s3569_s7 + $0x50] sm:$0xff] %vm524_vm3, %v1965_v5  ;;  %v1963_v16 = vadd.f32 %v3558_v1, %v1940_v46  ;;  %v1943_v31 = vadd.f32 %v2664_v14, %v1799_v25  ;;  %v1797_v40 = vadd.f32 %v1760_v4, %v1637_v52  ;;  %2013 = vrot.lane.b32.xlu1 %v1960_v17, %s2783_s8 }
 0x17e   : > { %v2647_v63 = vpop.f32.mrf.mxu1  ;;  %v2668_v10 = vpop.f32.mrf.mxu0 }
 0x17f   : > { %1979 = vst.msk [vmem:[%s3569_s7 + $0x40] sm:$0xff] %vm524_vm3, %v1963_v16  ;;  %v1966_v57 = vadd.f32 %v3558_v1, %v1943_v31  ;;  %v1941_v43 = vadd.f32 %v1904_v48, %v1797_v40  ;;  %v1802_v32 = vadd.f32 %v2647_v63, %v1642_v3  ;;  %2023 = vrot.lane.b32.xlu0 %v1965_v5, %s2783_s8 }
 0x180   : > { %v1773_v24 = vpop.f32.mrf.mxu1  ;;  %v1920_v33 = vpop.f32.mrf.mxu0 }
 0x181   : > { %1982 = vst.msk [vmem:[%s3569_s7 + $0x58] sm:$0xff] %vm524_vm3, %v1966_v57  ;;  %v1964_v29 = vadd.f32 %v3558_v1, %v1941_v43  ;;  %v1946_v21 = vadd.f32 %v2667_v11, %v1802_v32  ;;  %v1800_v42 = vadd.f32 %v1773_v24, %v1640_v38  ;;  %2025 = vrot.lane.b32.xlu1 %v1966_v57, %s2783_s8 }
 0x182   : > { %v2648_v28 = vpop.f32.mrf.mxu1 }
 0x183   : > { %1980 = vst.msk [vmem:[%s3569_s7 + $0x48] sm:$0xff] %vm524_vm3, %v1964_v29  ;;  %v1969_v12 = vadd.f32 %v3558_v1, %v1946_v21  ;;  %v1944_v2 = vadd.f32 %v1917_v58, %v1800_v42  ;;  %v1803_v18 = vadd.f32 %v2648_v28, %v1643_v8  ;;  %2019 = vrot.lane.b32.xlu0 %v1963_v16, %s2783_s8 }
 0x184   : > { %v1776_v39 = vpop.f32.mrf.mxu1 }
 0x185   : > { %1985 = vst.msk [vmem:[%s3569_s7 + $0x70] sm:$0xff] %vm524_vm3, %v1969_v12  ;;  %v1967_v36 = vadd.f32 %v3558_v1, %v1944_v2  ;;  %v1947_v53 = vadd.f32 %v2668_v10, %v1803_v18  ;;  %v1801_v62 = vadd.f32 %v1776_v39, %v1641_v15  ;;  %2021 = vrot.lane.b32.xlu1 %v1964_v29, %s2783_s8 }
 0x187   : > { %1983 = vst.msk [vmem:[%s3569_s7 + $0x60] sm:$0xff] %vm524_vm3, %v1967_v36  ;;  %v1970_v56 = vadd.f32 %v3558_v1, %v1947_v53  ;;  %v1945_v14 = vadd.f32 %v1920_v33, %v1801_v62  ;;  %2027 = vrot.lane.b32.xlu0 %v1967_v36, %s2783_s8 }
 0x189   : > { %1986 = vst.msk [vmem:[%s3569_s7 + $0x78] sm:$0xff] %vm524_vm3, %v1970_v56  ;;  %v1968_v13 = vadd.f32 %v3558_v1, %v1945_v14 }
 0x18b   : > { %1984 = vst.msk [vmem:[%s3569_s7 + $0x68] sm:$0xff] %vm524_vm3, %v1968_v13  ;;  %2031 = vrot.lane.b32.xlu0 %v1969_v12, %s2783_s8  ;;  %2029 = vrot.lane.b32.xlu1 %v1968_v13, %s2783_s8 }
 0x18f   : > { %2033 = vrot.lane.b32.xlu1 %v1970_v56, %s2783_s8 }
 0x1df   : > { %v2008_v1 = vpop.permute.xlu1 %2007 }
 0x1e0   : > { %2054 = vst.msk [vmem:[%s3686_s11 + $0x10] sm:$0xff] %vm2051_vm7, %v2008_v1 }
 0x1e1   : > { %v2004_v60 = vpop.permute.xlu0 %2003 }
 0x1e2   : > { %2052 = vst.msk [vmem:[%s3686_s11] sm:$0xff] %vm2051_vm7, %v2004_v60 }
 0x1e3   : > { %v2010_v54 = vpop.permute.xlu1 %2009 }
 0x1e4   : > { %2055 = vst.msk [vmem:[%s3686_s11 + $0x18] sm:$0xff] %vm2051_vm7, %v2010_v54 }
 0x1e5   : > { %v2006_v47 = vpop.permute.xlu0 %2005 }
 0x1e6   : > { %2053 = vst.msk [vmem:[%s3686_s11 + $0x8] sm:$0xff] %vm2051_vm7, %v2006_v47 }
 0x1e9   : > { %v2016_v0 = vpop.permute.xlu0 %2015 }
 0x1ea   : > { %2058 = vst.msk [vmem:[%s3686_s11 + $0x30] sm:$0xff] %vm2051_vm7, %v2016_v0 }
 0x1eb   : > { %v2018_v7 = vpop.permute.xlu1 %2017 }
 0x1ec   : > { %2059 = vst.msk [vmem:[%s3686_s11 + $0x38] sm:$0xff] %vm2051_vm7, %v2018_v7 }
 0x1ed   : > { %v2012_v22 = vpop.permute.xlu0 %2011 }
 0x1ee   : > { %2056 = vst.msk [vmem:[%s3686_s11 + $0x20] sm:$0xff] %vm2051_vm7, %v2012_v22 }
 0x1ef   : > { %v2014_v30 = vpop.permute.xlu1 %2013 }
 0x1f0   : > { %2057 = vst.msk [vmem:[%s3686_s11 + $0x28] sm:$0xff] %vm2051_vm7, %v2014_v30 }
 0x1f1   : > { %v2024_v20 = vpop.permute.xlu0 %2023 }
 0x1f2   : > { %2062 = vst.msk [vmem:[%s3686_s11 + $0x50] sm:$0xff] %vm2051_vm7, %v2024_v20 }
 0x1f3   : > { %v2026_v45 = vpop.permute.xlu1 %2025 }
 0x1f4   : > { %2063 = vst.msk [vmem:[%s3686_s11 + $0x58] sm:$0xff] %vm2051_vm7, %v2026_v45 }
 0x1f5   : > { %v2020_v35 = vpop.permute.xlu0 %2019 }
 0x1f6   : > { %2060 = vst.msk [vmem:[%s3686_s11 + $0x40] sm:$0xff] %vm2051_vm7, %v2020_v35 }
 0x1f7   : > { %v2022_v48 = vpop.permute.xlu1 %2021 }
 0x1f8   : > { %2061 = vst.msk [vmem:[%s3686_s11 + $0x48] sm:$0xff] %vm2051_vm7, %v2022_v48 }
 0x1f9   : > { %v2028_v23 = vpop.permute.xlu0 %2027 }
 0x1fa   : > { %2064 = vst.msk [vmem:[%s3686_s11 + $0x60] sm:$0xff] %vm2051_vm7, %v2028_v23 }
 0x1fd   : > { %v2032_v27 = vpop.permute.xlu0 %2031  ;;  %v2030_v17 = vpop.permute.xlu1 %2029 }
 0x1fe   : > { %2066 = vst.msk [vmem:[%s3686_s11 + $0x70] sm:$0xff] %vm2051_vm7, %v2032_v27  ;;  %2065 = vst.msk [vmem:[%s3686_s11 + $0x68] sm:$0xff] %vm2051_vm7, %v2030_v17 }
 0x201   : > { %v2034_v37 = vpop.permute.xlu1 %2033 }
 0x202   : > { %2067 = vst.msk [vmem:[%s3686_s11 + $0x78] sm:$0xff] %vm2051_vm7, %v2034_v37 }
 0x203 PF: > { %s15_s19 = sadd.s32 1, %s2781_s19   ;;  %s3784_s15 = smov %s2773_s17 }
 0x204   : > { %p12_p7 = scmp.ge.s32.totalorder %s15_s19, 6   ;;  %s3785_s16 = smov %s2777_s18 }
 0x205   : > { %s3786_s17 = smov %s3789_s20  ;;  %s3787_s18 = smov %s3793_s21 }
 0x206   :  { %14 = sbr.rel (!%p12_p7) target bundleno = 3 (0x3), region = 83 }

// kernel: global_local_attention.5
= control target key start
LH: loop header
LB: loop body
LE: loop exit
PB: predicated region body
PF: predicated region fallthrough
CT: control target
= control target key end

     0   :  { %s5510_s9 = smov 0   ;;  %s7090_s0 = inlined_call_operand.vmem [shape: f32[32,16,96], index: 0, kind: input, shape index: {}]   ;;  %s7091_s1 = inlined_call_operand.vmem [shape: f32[4,16,16], index: 1, kind: input, shape index: {}]   ;;  %s7092_s2 = inlined_call_operand.vmem [shape: f32[32,16,32], index: 2, kind: output, shape index: {}]  }
   0x1 LB: > { %s4594_s10 = sadd.s32 4294967295, %s5477_s9   ;;  %p4598_p0 = scmp.ge.s32.totalorder %s5477_s9, 1  ;;  %s5477_s9 = sphi %s5510_s9, %s12_s9  }
   0x2   : > { %p114_p1 = scmp.lt.s32.totalorder %s5477_s9, 5 }
   0x4   : > { %p115_p2 = pnand %p4598_p0, %p114_p1 }
   0x6   : > { %118 = sbr.rel (%p115_p2) target bundleno = 2645 (0xa55), region = 28 }
   0xb   : > { %s4599_s11 = sshll.u32 %s4594_s10, 3  ;;  %v7093_v0 = vmov 0.0   ;;  %vm5480_vm0 = vmmov 0   ;;  %s5481_s16 = smov 96   ;;  %vm180_vm1 = vcmask 64512   ;;  %v5628_v43 = vld [vmem:[%s7091_s1] sm:$0xff] }
   0xc   : > { %p139_p3 = scmp.lt.s32.totalorder %s4599_s11, 31  ;;  %4807 = vmatprep.subr.bf16.mxu0 %v7093_v0  ;;  %4813 = vmatprep.subr.bf16.mxu1 %v7093_v0  ;;  %s5482_s17 = smov 64   ;;  %vm612_vm2 = vcmask 130048   ;;  %v5636_v49 = vld [vmem:[%s7091_s1 + $0x8] sm:$0xff]  ;;  %vm4502_vm3 = vcmask 195584   ;;  %vm4519_vm4 = vcmask 261120  }
   0xd   : > { %4809 = vmatprep.mubr.msk.bf16.mxu0 %vm5480_vm0, %v7093_v0  ;;  %4815 = vmatprep.mubr.msk.bf16.mxu1 %vm5480_vm0, %v7093_v0  ;;  %s5483_s22 = smov 88   ;;  %s5484_s23 = smov 120  }
   0xe   : > { %s7137_s11 = smov (!%p139_p3, %s4599_s11), 31  ;;  %s5485_s24 = smov 56  }
   0xf   : > { %s4677_s12 = sshll.u32 %s7137_s11, 4  ;;  %s5486_s29 = smov 80  }
  0x10   : > { %s5532_s15 = scalar_lea.vmem %s7090_s0, %s4677_s12  ;;  %s5487_s30 = smov 112  }
  0x11   : > { %v153_v1 = vld [vmem:[%s5532_s15] sm:$0xff]  ;;  %v154_v2 = vld [vmem:[%s5532_s15 + $0x8] sm:$0xff]  ;;  %v155_v3 = vld [vmem:[%s5532_s15 + $0x10] sm:$0xff]  ;;  %s5488_s3 = smov 48   ;;  %s5489_s8 = smov 72  }
  0x12   : > { %v5537_v4 = vpack.c.bf16 %v154_v2, %v153_v1  ;;  %v156_v5 = vld [vmem:[%s5532_s15 + $0x18] sm:$0xff]  ;;  %v157_v6 = vld [vmem:[%s5532_s15 + $0x20] sm:$0xff]  ;;  %v158_v7 = vld [vmem:[%s5532_s15 + $0x28] sm:$0xff]  ;;  %s5490_s10 = smov 104   ;;  %s5491_s13 = smov 40  }
  0x13   : > { %v5542_v8 = vpack.c.bf16 %v158_v7, %v157_v6  ;;  %v159_v9 = vld [vmem:[%s5532_s15 + $0x30] sm:$0xff]  ;;  %v160_v10 = vld [vmem:[%s5532_s15 + $0x38] sm:$0xff]  ;;  %v5547_v11 = vpack.c.bf16 %v156_v5, %v155_v3  ;;  %v161_v13 = vld [vmem:[%s5532_s15 + $0x40] sm:$0xff]  ;;  %s5492_s18 = smov 8   ;;  %s5493_s19 = smov 16  }
  0x14   : > { %178 = vrot.lane.b32.xlu0 %v5537_v4, %s5481_s16  ;;  %v5550_v12 = vpack.c.bf16 %v160_v10, %v159_v9  ;;  %v162_v14 = vld [vmem:[%s5532_s15 + $0x48] sm:$0xff]  ;;  %v163_v15 = vld [vmem:[%s5532_s15 + $0x50] sm:$0xff]  ;;  %v164_v16 = vld [vmem:[%s5532_s15 + $0x58] sm:$0xff]  ;;  %s5494_s20 = smov 24  }
  0x15   : > { %279 = vrot.lane.b32.xlu1 %v5542_v8, %s5481_s16  ;;  %v5557_v17 = vpack.c.bf16 %v162_v14, %v161_v13  ;;  %v5560_v18 = vpack.c.bf16 %v164_v16, %v163_v15  ;;  %v165_v19 = vld [vmem:[%s5532_s15 + $0x60] sm:$0xff]  ;;  %v166_v20 = vld [vmem:[%s5532_s15 + $0x68] sm:$0xff]  ;;  %v167_v21 = vld [vmem:[%s5532_s15 + $0x70] sm:$0xff] }
  0x16   : > { %v168_v22 = vld [vmem:[%s5532_s15 + $0x78] sm:$0xff]  ;;  %v5567_v23 = vpack.c.bf16 %v166_v20, %v165_v19 }
  0x17   : > { %v5570_v24 = vpack.c.bf16 %v168_v22, %v167_v21 }
  0x18   : > { %229 = vrot.lane.b32.xlu0 %v5547_v11, %s5481_s16 }
  0x19   : > { %329 = vrot.lane.b32.xlu1 %v5550_v12, %s5481_s16 }
  0x1c   : > { %379 = vrot.lane.b32.xlu0 %v5557_v17, %s5481_s16 }
  0x1d   : > { %429 = vrot.lane.b32.xlu1 %v5560_v18, %s5481_s16 }
  0x20   : > { %479 = vrot.lane.b32.xlu0 %v5567_v23, %s5481_s16 }
  0x21   : > { %529 = vrot.lane.b32.xlu1 %v5570_v24, %s5481_s16 }
  0x25   : > { %797 = vrot.lane.b32.xlu1 %v5537_v4, %s5482_s17 }
  0x86   : > { %v179_v25 = vpop.permute.xlu0 %178 }
  0x87   : > { %v185_v26 = vsel %vm180_vm1, %v179_v25, 0  ;;  %v280_v27 = vpop.permute.xlu1 %279 }
  0x88   : > { %4808 = vmatpush3.bf16.xpose.msra.mxu0 %v185_v26  ;;  %v285_v30 = vsel %vm180_vm1, %v280_v27, 0 }
  0x89   : > { %4819 = vmatprep.subr.bf16.mxu0 %v7093_v0 }
  0x8a   : > { %v230_v28 = vpop.permute.xlu0 %229 }
  0x8b   : > { %v235_v29 = vsel %vm180_vm1, %v230_v28, 0  ;;  %v330_v31 = vpop.permute.xlu1 %329 }
  0x8c   : > { %4814 = vmatpush3.bf16.xpose.msra.mxu1 %v235_v29  ;;  %v335_v32 = vsel %vm180_vm1, %v330_v31, 0 }
  0x8d   : > { %4825 = vmatprep.subr.bf16.mxu1 %v7093_v0 }
  0x8e   : > { %v380_v33 = vpop.permute.xlu0 %379 }
  0x8f   : > { %4810 = vmatmul.mubr.msk.bf16.vlgmr.msra.gmra.mxu0 %vm180_vm1, %v5537_v4  ;;  %v385_v34 = vsel %vm180_vm1, %v380_v33, 0  ;;  %v430_v35 = vpop.permute.xlu1 %429 }
  0x90   : > { %4820 = vmatpush3.bf16.xpose.msra.mxu0 %v285_v30  ;;  %4821 = vmatprep.mubr.msk.bf16.mxu0 %vm5480_vm0, %v7093_v0  ;;  %v435_v36 = vsel %vm180_vm1, %v430_v35, 0 }
  0x91   : > { %4831 = vmatprep.subr.bf16.mxu0 %v7093_v0 }
  0x92   : > { %v480_v37 = vpop.permute.xlu0 %479 }
  0x93   : > { %4816 = vmatmul.mubr.msk.bf16.vlgmr.msra.gmra.mxu1 %vm180_vm1, %v5547_v11  ;;  %v485_v38 = vsel %vm180_vm1, %v480_v37, 0  ;;  %v530_v39 = vpop.permute.xlu1 %529 }
  0x94   : > { %4826 = vmatpush3.bf16.xpose.msra.mxu1 %v335_v32  ;;  %4827 = vmatprep.mubr.msk.bf16.mxu1 %vm5480_vm0, %v7093_v0  ;;  %v535_v40 = vsel %vm180_vm1, %v530_v39, 0 }
  0x95   : > { %4837 = vmatprep.subr.bf16.mxu1 %v7093_v0 }
  0x97   : > { %4822 = vmatmul.mubr.msk.bf16.vlgmr.msra.gmra.mxu0 %vm180_vm1, %v5542_v8  ;;  %v798_v41 = vpop.permute.xlu1 %797 }
  0x98   : > { %4832 = vmatpush3.bf16.xpose.msra.mxu0 %v385_v34  ;;  %4833 = vmatprep.mubr.msk.bf16.mxu0 %vm5480_vm0, %v7093_v0 }
  0x99   : > { %4843 = vmatprep.subr.bf16.mxu0 %v7093_v0 }
  0x9b   : > { %4828 = vmatmul.mubr.msk.bf16.vlgmr.msra.gmra.mxu1 %vm180_vm1, %v5550_v12 }
  0x9c   : > { %4838 = vmatpush3.bf16.xpose.msra.mxu1 %v435_v36  ;;  %4839 = vmatprep.mubr.msk.bf16.mxu1 %vm5480_vm0, %v7093_v0 }
  0x9d   : > { %4849 = vmatprep.subr.bf16.mxu1 %v7093_v0 }
  0x9f   : > { %4834 = vmatmul.mubr.msk.bf16.vlgmr.msra.gmra.mxu0 %vm180_vm1, %v5557_v17 }
  0xa0   : > { %4844 = vmatpush3.bf16.xpose.msra.mxu0 %v485_v38  ;;  %4845 = vmatprep.mubr.msk.bf16.mxu0 %vm5480_vm0, %v7093_v0 }
  0xa1   : > { %4855 = vmatprep.subr.bf16.mxu0 %v7093_v0 }
  0xa3   : > { %4840 = vmatmul.mubr.msk.bf16.vlgmr.msra.gmra.mxu1 %vm180_vm1, %v5560_v18 }
  0xa4   : > { %4850 = vmatpush3.bf16.xpose.msra.mxu1 %v535_v40  ;;  %4851 = vmatprep.mubr.msk.bf16.mxu1 %vm5480_vm0, %v7093_v0 }
  0xa5   : > { %4861 = vmatprep.subr.bf16.mxu1 %v7093_v0 }
  0xa7   : > { %4846 = vmatmul.mubr.msk.bf16.vlgmr.msra.gmra.mxu0 %vm180_vm1, %v5567_v23 }
  0xa8   : > { %4857 = vmatprep.mubr.msk.bf16.mxu0 %vm5480_vm0, %v7093_v0  ;;  %4856 = vmatpush3.bf16.msra.mxu0 %v798_v41 }
  0xa9   : > { %4867 = vmatprep.subr.bf16.mxu0 %v7093_v0 }
  0xab   : > { %4852 = vmatmul.mubr.msk.bf16.vlgmr.msra.gmra.mxu1 %vm180_vm1, %v5570_v24 }
  0xac   : > { %4863 = vmatprep.mubr.msk.bf16.mxu1 %vm5480_vm0, %v7093_v0 }
 0x14f   : > { %v221_v42 = vpop.f32.mrf.mxu0 }
 0x150   : > { %v578_v44 = vmul.f32 0.35355338, %v221_v42 }
 0x151   : > { %v4811_v45 = vpop.f32.mrf.mxu0 }
 0x152   : > { %v5631_v46 = vadd.f32 %v5628_v43, %v578_v44 }
 0x153   : > { %v224_v47 = vpop.f32.mrf.mxu0  ;;  %v271_v48 = vpop.f32.mrf.mxu1 }
 0x154   : > { %v579_v50 = vmul.f32 0.35355338, %v224_v47  ;;  %v580_v51 = vmul.f32 0.35355338, %v271_v48  ;;  %v613_v52 = vsel %vm612_vm2, %v5631_v46, -inf }
 0x155   : > { %614 = vmax.xlane.f32.xlu0 %v613_v52  ;;  %v4812_v53 = vpop.f32.mrf.mxu0  ;;  %v4817_v54 = vpop.f32.mrf.mxu1 }
 0x156   : > { %v5641_v55 = vadd.f32 %v5636_v49, %v579_v50  ;;  %v5644_v56 = vadd.f32 %v5628_v43, %v580_v51 }
 0x157   : > { %v274_v57 = vpop.f32.mrf.mxu1  ;;  %v321_v58 = vpop.f32.mrf.mxu0 }
 0x158   : > { %v581_v59 = vmul.f32 0.35355338, %v274_v57  ;;  %v582_v60 = vmul.f32 0.35355338, %v321_v58  ;;  %v616_v61 = vsel %vm612_vm2, %v5641_v55, -inf  ;;  %v619_v62 = vsel %vm612_vm2, %v5644_v56, -inf }
 0x159   : > { %617 = vmax.xlane.f32.xlu1 %v616_v61  ;;  %v4823_v63 = vpop.f32.mrf.mxu0  ;;  %620 = vmax.xlane.f32.xlu0 %v619_v62  ;;  %v4818_v1 = vpop.f32.mrf.mxu1 }
 0x15a   : > { %v5651_v2 = vadd.f32 %v5628_v43, %v582_v60  ;;  %v5654_v3 = vadd.f32 %v5636_v49, %v581_v59 }
 0x15b   : > { %v324_v5 = vpop.f32.mrf.mxu0  ;;  %v371_v6 = vpop.f32.mrf.mxu1 }
 0x15c   : > { %v583_v7 = vmul.f32 0.35355338, %v324_v5  ;;  %v584_v9 = vmul.f32 0.35355338, %v371_v6  ;;  %v625_v10 = vsel %vm612_vm2, %v5651_v2, -inf  ;;  %v622_v13 = vsel %vm612_vm2, %v5654_v3, -inf }
 0x15d   : > { %626 = vmax.xlane.f32.xlu1 %v625_v10  ;;  %v4824_v14 = vpop.f32.mrf.mxu0  ;;  %623 = vmax.xlane.f32.xlu0 %v622_v13  ;;  %v4829_v15 = vpop.f32.mrf.mxu1 }
 0x15e   : > { %v5661_v16 = vadd.f32 %v5636_v49, %v583_v7  ;;  %v5664_v19 = vadd.f32 %v5628_v43, %v584_v9 }
 0x15f   : > { %v374_v20 = vpop.f32.mrf.mxu1  ;;  %v421_v21 = vpop.f32.mrf.mxu0 }
 0x160   : > { %v585_v22 = vmul.f32 0.35355338, %v374_v20  ;;  %v586_v25 = vmul.f32 0.35355338, %v421_v21  ;;  %v628_v26 = vsel %vm612_vm2, %v5661_v16, -inf  ;;  %v631_v27 = vsel %vm612_vm2, %v5664_v19, -inf }
 0x161   : > { %629 = vmax.xlane.f32.xlu0 %v628_v26  ;;  %632 = vmax.xlane.f32.xlu1 %v631_v27  ;;  %v4830_v28 = vpop.f32.mrf.mxu1  ;;  %v4835_v29 = vpop.f32.mrf.mxu0 }
 0x162   : > { %v5671_v30 = vadd.f32 %v5636_v49, %v585_v22  ;;  %v5674_v31 = vadd.f32 %v5628_v43, %v586_v25 }
 0x163   : > { %v424_v32 = vpop.f32.mrf.mxu0  ;;  %v471_v33 = vpop.f32.mrf.mxu1 }
 0x164   : > { %v587_v34 = vmul.f32 0.35355338, %v424_v32  ;;  %v588_v35 = vmul.f32 0.35355338, %v471_v33  ;;  %v634_v36 = vsel %vm612_vm2, %v5671_v30, -inf  ;;  %v637_v37 = vsel %vm612_vm2, %v5674_v31, -inf }
 0x165   : > { %635 = vmax.xlane.f32.xlu0 %v634_v36  ;;  %v4841_v38 = vpop.f32.mrf.mxu1  ;;  %638 = vmax.xlane.f32.xlu1 %v637_v37  ;;  %v4836_v39 = vpop.f32.mrf.mxu0 }
 0x166   : > { %v5681_v40 = vadd.f32 %v5628_v43, %v588_v35  ;;  %v5684_v41 = vadd.f32 %v5636_v49, %v587_v34 }
 0x167   : > { %v474_v42 = vpop.f32.mrf.mxu1  ;;  %v521_v44 = vpop.f32.mrf.mxu0 }
 0x168   : > { %v589_v45 = vmul.f32 0.35355338, %v474_v42  ;;  %v590_v47 = vmul.f32 0.35355338, %v521_v44  ;;  %v643_v48 = vsel %vm612_vm2, %v5681_v40, -inf  ;;  %v640_v50 = vsel %vm612_vm2, %v5684_v41, -inf }
 0x169   : > { %v4842_v51 = vpop.f32.mrf.mxu1  ;;  %644 = vmax.xlane.f32.xlu1 %v643_v48  ;;  %641 = vmax.xlane.f32.xlu0 %v640_v50  ;;  %v4847_v52 = vpop.f32.mrf.mxu0 }
 0x16a   : > { %v5691_v53 = vadd.f32 %v5636_v49, %v589_v45  ;;  %v5694_v54 = vadd.f32 %v5628_v43, %v590_v47 }
 0x16b   : > { %v524_v57 = vpop.f32.mrf.mxu0  ;;  %v571_v58 = vpop.f32.mrf.mxu1 }
 0x16c   : > { %v591_v59 = vmul.f32 0.35355338, %v524_v57  ;;  %v592_v60 = vmul.f32 0.35355338, %v571_v58  ;;  %v646_v61 = vsel %vm612_vm2, %v5691_v53, -inf  ;;  %v649_v62 = vsel %vm612_vm2, %v5694_v54, -inf }
 0x16d   : > { %v4853_v63 = vpop.f32.mrf.mxu1  ;;  %647 = vmax.xlane.f32.xlu0 %v646_v61  ;;  %650 = vmax.xlane.f32.xlu1 %v649_v62  ;;  %v4848_v1 = vpop.f32.mrf.mxu0 }
 0x16e   : > { %v5701_v5 = vadd.f32 %v5628_v43, %v592_v60  ;;  %v5704_v6 = vadd.f32 %v5636_v49, %v591_v59 }
 0x16f   : > { %v574_v7 = vpop.f32.mrf.mxu1 }
 0x170   : > { %v593_v9 = vmul.f32 0.35355338, %v574_v7  ;;  %v655_v10 = vsel %vm612_vm2, %v5701_v5, -inf  ;;  %v652_v13 = vsel %vm612_vm2, %v5704_v6, -inf }
 0x171   : > { %v4854_v14 = vpop.f32.mrf.mxu1  ;;  %656 = vmax.xlane.f32.xlu1 %v655_v10  ;;  %653 = vmax.xlane.f32.xlu0 %v652_v13 }
 0x172   : > { %v5711_v15 = vadd.f32 %v5636_v49, %v593_v9 }
 0x174   : > { %v658_v43 = vsel %vm612_vm2, %v5711_v15, -inf }
 0x175   : > { %659 = vmax.xlane.f32.xlu0 %v658_v43 }
 0x182   : > { %891 = vrot.lane.b32.xlu1 %v5542_v8, %s5482_s17 }
 0x186   : > { %938 = vrot.lane.b32.xlu1 %v5550_v12, %s5482_s17 }
 0x18a   : > { %1032 = vrot.lane.b32.xlu1 %v5560_v18, %s5482_s17 }
 0x18b   : > { %844 = vrot.lane.b32.xlu0 %v5547_v11, %s5482_s17 }
 0x18e   : > { %1126 = vrot.lane.b32.xlu1 %v5570_v24, %s5482_s17 }
 0x18f   : > { %985 = vrot.lane.b32.xlu0 %v5557_v17, %s5482_s17 }
 0x193   : > { %1079 = vrot.lane.b32.xlu0 %v5567_v23, %s5482_s17 }
 0x1de   : > { %v615_v49 = vpop.xlane.xlu0 %614 }
 0x1df   : > { %v661_v20 = vsub.f32 %v5631_v46, %v615_v49 }
 0x1e1   : > { %v677_v21 = vmul.f32 1.442695, %v661_v20 }
 0x1e2   : > { %v618_v22 = vpop.xlane.xlu1 %617  ;;  %v621_v25 = vpop.xlane.xlu0 %620 }
 0x1e3   : > { %5215 = vpow2.f32 %v677_v21  ;;  %v662_v26 = vsub.f32 %v5641_v55, %v618_v22  ;;  %v663_v27 = vsub.f32 %v5644_v56, %v621_v25 }
 0x1e5   : > { %v679_v28 = vmul.f32 1.442695, %v662_v26  ;;  %v681_v29 = vmul.f32 1.442695, %v663_v27 }
 0x1e6   : > { %v627_v32 = vpop.xlane.xlu1 %626  ;;  %v624_v33 = vpop.xlane.xlu0 %623 }
 0x1e7   : > { %5217 = vpow2.f32 %v679_v28  ;;  %v665_v34 = vsub.f32 %v5651_v2, %v627_v32  ;;  %v664_v35 = vsub.f32 %v5654_v3, %v624_v33 }
 0x1e8   : > { %5219 = vpow2.f32 %v681_v29 }
 0x1e9   : > { %v685_v36 = vmul.f32 1.442695, %v665_v34  ;;  %v683_v46 = vmul.f32 1.442695, %v664_v35 }
 0x1ea   : > { %v633_v37 = vpop.xlane.xlu1 %632  ;;  %v630_v38 = vpop.xlane.xlu0 %629 }
 0x1eb   : > { %5221 = vpow2.f32 %v685_v36  ;;  %v667_v39 = vsub.f32 %v5664_v19, %v633_v37  ;;  %v666_v55 = vsub.f32 %v5661_v16, %v630_v38 }
 0x1ec   : > { %5223 = vpow2.f32 %v683_v46 }
 0x1ed   : > { %v689_v56 = vmul.f32 1.442695, %v667_v39  ;;  %v687_v42 = vmul.f32 1.442695, %v666_v55 }
 0x1ee   : > { %v639_v44 = vpop.xlane.xlu1 %638  ;;  %v636_v45 = vpop.xlane.xlu0 %635 }
 0x1ef   : > { %5225 = vpow2.f32 %v689_v56  ;;  %v669_v2 = vsub.f32 %v5674_v31, %v639_v44  ;;  %v668_v3 = vsub.f32 %v5671_v30, %v636_v45 }
 0x1f0   : > { %v5738_v47 = vpop.eup %5215  ;;  %5227 = vpow2.f32 %v687_v42 }
 0x1f1   : > { %v693_v48 = vmul.f32 1.442695, %v669_v2  ;;  %v691_v50 = vmul.f32 1.442695, %v668_v3  ;;  %v709_v19 = vsel %vm612_vm2, %v5738_v47, 0.0 }
 0x1f2   : > { %v645_v51 = vpop.xlane.xlu1 %644  ;;  %710 = vadd.xlane.f32.xlu1 %v709_v19  ;;  %v642_v16 = vpop.xlane.xlu0 %641 }
 0x1f3   : > { %5229 = vpow2.f32 %v693_v48  ;;  %v671_v52 = vsub.f32 %v5681_v40, %v645_v51  ;;  %v670_v57 = vsub.f32 %v5684_v41, %v642_v16 }
 0x1f4   : > { %v5744_v58 = vpop.eup %5217  ;;  %5231 = vpow2.f32 %v691_v50 }
 0x1f5   : > { %v5746_v30 = vpop.eup %5219  ;;  %v697_v31 = vmul.f32 1.442695, %v671_v52  ;;  %v695_v59 = vmul.f32 1.442695, %v670_v57  ;;  %v712_v60 = vsel %vm612_vm2, %v5744_v58, 0.0 }
 0x1f6   : > { %v651_v61 = vpop.xlane.xlu1 %650  ;;  %713 = vadd.xlane.f32.xlu0 %v712_v60  ;;  %v715_v62 = vsel %vm612_vm2, %v5746_v30, 0.0  ;;  %v648_v63 = vpop.xlane.xlu0 %647 }
 0x1f7   : > { %5233 = vpow2.f32 %v697_v31  ;;  %v673_v40 = vsub.f32 %v5694_v54, %v651_v61  ;;  %716 = vadd.xlane.f32.xlu1 %v715_v62  ;;  %v672_v41 = vsub.f32 %v5691_v53, %v648_v63 }
 0x1f8   : > { %v5754_v1 = vpop.eup %5221  ;;  %5235 = vpow2.f32 %v695_v59 }
 0x1f9   : > { %v5756_v7 = vpop.eup %5223  ;;  %v701_v9 = vmul.f32 1.442695, %v673_v40  ;;  %v699_v10 = vmul.f32 1.442695, %v672_v41  ;;  %v721_v13 = vsel %vm612_vm2, %v5754_v1, 0.0 }
 0x1fa   : > { %v657_v14 = vpop.xlane.xlu1 %656  ;;  %v718_v43 = vsel %vm612_vm2, %v5756_v7, 0.0  ;;  %v654_v49 = vpop.xlane.xlu0 %653 }
 0x1fb   : > { %5237 = vpow2.f32 %v701_v9  ;;  %v675_v54 = vsub.f32 %v5701_v5, %v657_v14  ;;  %722 = vadd.xlane.f32.xlu1 %v721_v13  ;;  %719 = vadd.xlane.f32.xlu0 %v718_v43  ;;  %v674_v53 = vsub.f32 %v5704_v6, %v654_v49 }
 0x1fc   : > { %v5764_v20 = vpop.eup %5225  ;;  %5239 = vpow2.f32 %v699_v10 }
 0x1fd   : > { %v5766_v21 = vpop.eup %5227  ;;  %v705_v22 = vmul.f32 1.442695, %v675_v54  ;;  %v703_v25 = vmul.f32 1.442695, %v674_v53  ;;  %v727_v26 = vsel %vm612_vm2, %v5764_v20, 0.0 }
 0x1fe   : > { %v724_v27 = vsel %vm612_vm2, %v5766_v21, 0.0  ;;  %v660_v28 = vpop.xlane.xlu0 %659  ;;  %v892_v50 = vpop.permute.xlu1 %891 }
 0x1ff   : > { %5241 = vpow2.f32 %v705_v22  ;;  %728 = vadd.xlane.f32.xlu1 %v727_v26  ;;  %725 = vadd.xlane.f32.xlu0 %v724_v27  ;;  %v676_v5 = vsub.f32 %v5711_v15, %v660_v28 }
 0x200   : > { %v5773_v6 = vpop.eup %5229  ;;  %5243 = vpow2.f32 %v703_v25 }
 0x201   : > { %v5775_v29 = vpop.eup %5231  ;;  %v707_v32 = vmul.f32 1.442695, %v676_v5  ;;  %v733_v33 = vsel %vm612_vm2, %v5773_v6, 0.0 }
 0x202   : > { %v730_v34 = vsel %vm612_vm2, %v5775_v29, 0.0  ;;  %v845_v35 = vpop.permute.xlu0 %844  ;;  %v939_v19 = vpop.permute.xlu1 %938 }
 0x203   : > { %5245 = vpow2.f32 %v707_v32  ;;  %734 = vadd.xlane.f32.xlu1 %v733_v33  ;;  %731 = vadd.xlane.f32.xlu0 %v730_v34 }
 0x204   : > { %v5781_v36 = vpop.eup %5233  ;;  %4862 = vmatpush3.bf16.msra.mxu1 %v845_v35 }
 0x205   : > { %v5783_v15 = vpop.eup %5235  ;;  %v739_v46 = vsel %vm612_vm2, %v5781_v36, 0.0  ;;  %4873 = vmatprep.subr.bf16.mxu1 %v7093_v0 }
 0x206   : > { %v736_v37 = vsel %vm612_vm2, %v5783_v15, 0.0  ;;  %v5826_v51 = vpop.permute.xlu1 %1032  ;;  %v986_v16 = vpop.permute.xlu0 %985 }
 0x207   : > { %740 = vadd.xlane.f32.xlu1 %v739_v46  ;;  %737 = vadd.xlane.f32.xlu0 %v736_v37 }
 0x208   : > { %v5790_v38 = vpop.eup %5237 }
 0x209   : > { %v5792_v39 = vpop.eup %5239  ;;  %v745_v55 = vsel %vm612_vm2, %v5790_v38, 0.0 }
 0x20a   : > { %v742_v56 = vsel %vm612_vm2, %v5792_v39, 0.0  ;;  %v5828_v52 = vpop.permute.xlu1 %1126  ;;  %v5830_v57 = vpop.permute.xlu0 %1079 }
 0x20b   : > { %746 = vadd.xlane.f32.xlu1 %v745_v55  ;;  %743 = vadd.xlane.f32.xlu0 %v742_v56 }
 0x20c   : > { %v5798_v42 = vpop.eup %5241 }
 0x20d   : > { %v5800_v44 = vpop.eup %5243  ;;  %v751_v45 = vsel %vm612_vm2, %v5798_v42, 0.0 }
 0x20e   : > { %v748_v2 = vsel %vm612_vm2, %v5800_v44, 0.0 }
 0x20f   : > { %752 = vadd.xlane.f32.xlu1 %v751_v45  ;;  %749 = vadd.xlane.f32.xlu0 %v748_v2 }
 0x210   : > { %v5806_v3 = vpop.eup %5245 }
 0x211   : > { %v754_v48 = vsel %vm612_vm2, %v5806_v3, 0.0 }
 0x213   : > { %755 = vadd.xlane.f32.xlu0 %v754_v48 }
 0x220   : > { %1252 = vrot.lane.b32.xlu1 %v5547_v11, %s5483_s22 }
 0x224   : > { %1250 = vrot.lane.b32.xlu1 %v5547_v11, %s5484_s23 }
 0x228   : > { %1356 = vrot.lane.b32.xlu1 %v5550_v12, %s5483_s22 }
 0x229   : > { %1200 = vrot.lane.b32.xlu0 %v5537_v4, %s5483_s22 }
 0x22c   : > { %1354 = vrot.lane.b32.xlu1 %v5550_v12, %s5484_s23 }
 0x22d   : > { %1198 = vrot.lane.b32.xlu0 %v5537_v4, %s5484_s23 }
 0x230   : > { %1460 = vrot.lane.b32.xlu1 %v5560_v18, %s5483_s22 }
 0x231   : > { %1304 = vrot.lane.b32.xlu0 %v5542_v8, %s5483_s22 }
 0x234   : > { %1458 = vrot.lane.b32.xlu1 %v5560_v18, %s5484_s23 }
 0x235   : > { %1302 = vrot.lane.b32.xlu0 %v5542_v8, %s5484_s23 }
 0x238   : > { %1564 = vrot.lane.b32.xlu1 %v5570_v24, %s5483_s22 }
 0x239   : > { %1408 = vrot.lane.b32.xlu0 %v5557_v17, %s5483_s22 }
 0x23c   : > { %1562 = vrot.lane.b32.xlu1 %v5570_v24, %s5484_s23 }
 0x23d   : > { %1406 = vrot.lane.b32.xlu0 %v5557_v17, %s5484_s23 }
 0x240   : > { %1832 = vrot.lane.b32.xlu1 %v5537_v4, %s5485_s24 }
 0x241   : > { %1512 = vrot.lane.b32.xlu0 %v5567_v23, %s5483_s22 }
 0x245   : > { %1510 = vrot.lane.b32.xlu0 %v5567_v23, %s5484_s23  ;;  %s6975_s23 = scalar_lea.vmem %s7092_s2, %s4677_s12 }
 0x27b   : > { %v711_v31 = vpop.xlane.xlu1 %710 }
 0x27c   : > { %5247 = vrcp.f32 %v711_v31 }
 0x27f   : > { %v714_v59 = vpop.xlane.xlu0 %713 }
 0x280   : > { %v717_v60 = vpop.xlane.xlu1 %716  ;;  %5249 = vrcp.f32 %v714_v59 }
 0x281   : > { %5251 = vrcp.f32 %v717_v60 }
 0x284   : > { %v723_v61 = vpop.xlane.xlu1 %722  ;;  %v720_v62 = vpop.xlane.xlu0 %719 }
 0x285   : > { %5253 = vrcp.f32 %v720_v62 }
 0x286   : > { %5255 = vrcp.f32 %v723_v61 }
 0x288   : > { %v729_v63 = vpop.xlane.xlu1 %728  ;;  %v726_v40 = vpop.xlane.xlu0 %725 }
 0x289   : > { %5257 = vrcp.f32 %v726_v40  ;;  %v5248_v41 = vpop.eup %5247 }
 0x28a   : > { %5259 = vrcp.f32 %v729_v63  ;;  %v773_v14 = vmul.f32 %v5248_v41, %v5738_v47 }
 0x28c   : > { %v735_v9 = vpop.xlane.xlu1 %734  ;;  %v732_v10 = vpop.xlane.xlu0 %731 }
 0x28d   : > { %v5250_v13 = vpop.eup %5249  ;;  %5261 = vrcp.f32 %v732_v10 }
 0x28e   : > { %v774_v43 = vmul.f32 %v5250_v13, %v5744_v58  ;;  %5263 = vrcp.f32 %v735_v9  ;;  %v5252_v22 = vpop.eup %5251 }
 0x28f   : > { %v775_v47 = vmul.f32 %v5252_v22, %v5746_v30 }
 0x290   : > { %v741_v49 = vpop.xlane.xlu1 %740  ;;  %v738_v54 = vpop.xlane.xlu0 %737  ;;  %v789_v53 = vpack.c.bf16 %v774_v43, %v773_v14 }
 0x291   : > { %5265 = vrcp.f32 %v738_v54 }
 0x292   : > { %4858 = vmatmul.mubr.msk.bf16.vlgmr.msra.gmra.mxu0 %vm612_vm2, %v789_v53  ;;  %v5254_v25 = vpop.eup %5253  ;;  %5267 = vrcp.f32 %v741_v49 }
 0x293   : > { %4868 = vmatpush3.bf16.msra.mxu0 %v892_v50  ;;  %4869 = vmatprep.mubr.msk.bf16.mxu0 %vm5480_vm0, %v7093_v0  ;;  %v776_v58 = vmul.f32 %v5254_v25, %v5756_v7  ;;  %v5256_v28 = vpop.eup %5255 }
 0x294   : > { %v747_v26 = vpop.xlane.xlu1 %746  ;;  %v744_v27 = vpop.xlane.xlu0 %743  ;;  %4879 = vmatprep.subr.bf16.mxu0 %v7093_v0  ;;  %v777_v35 = vmul.f32 %v5256_v28, %v5754_v1 }
 0x295   : > { %5269 = vrcp.f32 %v744_v27  ;;  %v790_v5 = vpack.c.bf16 %v776_v58, %v775_v47 }
 0x296   : > { %v5258_v32 = vpop.eup %5257  ;;  %5271 = vrcp.f32 %v747_v26 }
 0x297   : > { %4864 = vmatmul.mubr.msk.bf16.vlgmr.msra.gmra.mxu1 %vm612_vm2, %v790_v5  ;;  %v778_v46 = vmul.f32 %v5258_v32, %v5766_v21  ;;  %v5260_v37 = vpop.eup %5259 }
 0x298   : > { %v753_v33 = vpop.xlane.xlu1 %752  ;;  %v750_v34 = vpop.xlane.xlu0 %749  ;;  %4874 = vmatpush3.bf16.msra.mxu1 %v939_v19  ;;  %4875 = vmatprep.mubr.msk.bf16.mxu1 %vm5480_vm0, %v7093_v0  ;;  %v779_v56 = vmul.f32 %v5260_v37, %v5764_v20 }
 0x299   : > { %5273 = vrcp.f32 %v750_v34  ;;  %v791_v30 = vpack.c.bf16 %v778_v46, %v777_v35  ;;  %4885 = vmatprep.subr.bf16.mxu1 %v7093_v0 }
 0x29a   : > { %v5262_v7 = vpop.eup %5261  ;;  %5275 = vrcp.f32 %v753_v33 }
 0x29b   : > { %4870 = vmatmul.mubr.msk.bf16.vlgmr.msra.gmra.mxu0 %vm612_vm2, %v791_v30  ;;  %v780_v1 = vmul.f32 %v5262_v7, %v5775_v29  ;;  %v5264_v45 = vpop.eup %5263 }
 0x29c   : > { %v756_v55 = vpop.xlane.xlu0 %755  ;;  %4880 = vmatpush3.bf16.msra.mxu0 %v986_v16  ;;  %4881 = vmatprep.mubr.msk.bf16.mxu0 %vm5480_vm0, %v7093_v0  ;;  %v1253_v48 = vpop.permute.xlu1 %1252  ;;  %v781_v50 = vmul.f32 %v5264_v45, %v5773_v6 }
 0x29d   : > { %5277 = vrcp.f32 %v756_v55  ;;  %v792_v21 = vpack.c.bf16 %v780_v1, %v779_v56  ;;  %4891 = vmatprep.subr.bf16.mxu0 %v7093_v0 }
 0x29e   : > { %v5266_v2 = vpop.eup %5265 }
 0x29f   : > { %4876 = vmatmul.mubr.msk.bf16.vlgmr.msra.gmra.mxu1 %vm612_vm2, %v792_v21  ;;  %v782_v19 = vmul.f32 %v5266_v2, %v5783_v15  ;;  %v5268_v31 = vpop.eup %5267 }
 0x2a0   : > { %v1201_v20 = vpop.permute.xlu0 %1200  ;;  %4886 = vmatpush3.bf16.msra.mxu1 %v5826_v51  ;;  %4887 = vmatprep.mubr.msk.bf16.mxu1 %vm5480_vm0, %v7093_v0  ;;  %v783_v59 = vmul.f32 %v5268_v31, %v5781_v36  ;;  %v1251_v15 = vpop.permute.xlu1 %1250 }
 0x2a1   : > { %v793_v29 = vpack.c.bf16 %v782_v19, %v781_v50  ;;  %4897 = vmatprep.subr.bf16.mxu1 %v7093_v0  ;;  %v1206_v41 = vsel %vm180_vm1, %v1201_v20, 0 }
 0x2a2   : > { %v5270_v16 = vpop.eup %5269 }
 0x2a3   : > { %4882 = vmatmul.mubr.msk.bf16.vlgmr.msra.gmra.mxu0 %vm612_vm2, %v793_v29  ;;  %v784_v60 = vmul.f32 %v5270_v16, %v5792_v39  ;;  %v5272_v61 = vpop.eup %5271 }
 0x2a4   : > { %v1199_v6 = vpop.permute.xlu0 %1198  ;;  %4892 = vmatpush3.bf16.msra.mxu0 %v5830_v57  ;;  %4893 = vmatprep.mubr.msk.bf16.mxu0 %vm5480_vm0, %v7093_v0  ;;  %v785_v40 = vmul.f32 %v5272_v61, %v5790_v38  ;;  %v1357_v14 = vpop.permute.xlu1 %1356 }
 0x2a5   : > { %v794_v51 = vpack.c.bf16 %v784_v60, %v783_v59  ;;  %4903 = vmatprep.subr.bf16.mxu0 %v7093_v0  ;;  %v1362_v49 = vsel %vm180_vm1, %v1357_v14, 0 }
 0x2a6   : > { %v5274_v62 = vpop.eup %5273 }
 0x2a7   : > { %v5276_v63 = vpop.eup %5275  ;;  %4888 = vmatmul.mubr.msk.bf16.vlgmr.msra.gmra.mxu1 %vm612_vm2, %v794_v51  ;;  %v786_v36 = vmul.f32 %v5274_v62, %v5800_v44 }
 0x2a8   : > { %v1305_v39 = vpop.permute.xlu0 %1304  ;;  %4898 = vmatpush3.bf16.msra.mxu1 %v5828_v52  ;;  %4899 = vmatprep.mubr.msk.bf16.mxu1 %vm5480_vm0, %v7093_v0  ;;  %v787_v10 = vmul.f32 %v5276_v63, %v5798_v42  ;;  %v1258_v52 = vsel %vm180_vm1, %v1253_v48, 0  ;;  %v1355_v42 = vpop.permute.xlu1 %1354 }
 0x2a9   : > { %v795_v9 = vpack.c.bf16 %v786_v36, %v785_v40  ;;  %4909 = vmatprep.subr.bf16.mxu1 %v7093_v0 }
 0x2aa   : > { %v5278_v57 = vpop.eup %5277 }
 0x2ab   : > { %v788_v13 = vmul.f32 %v5278_v57, %v5806_v3  ;;  %4894 = vmatmul.mubr.msk.bf16.vlgmr.msra.gmra.mxu0 %vm612_vm2, %v795_v9  ;;  %v1310_v3 = vsel %vm180_vm1, %v1305_v39, 0 }
 0x2ac   : > { %4904 = vmatpush3.bf16.xpose.msra.mxu0 %v1206_v41  ;;  %4905 = vmatprep.mubr.msk.bf16.mxu0 %vm5480_vm0, %v7093_v0  ;;  %v1303_v44 = vpop.permute.xlu0 %1302  ;;  %v1461_v54 = vpop.permute.xlu1 %1460  ;;  %v5959_v41 = vld [vmem:[%s7091_s1 + $0x10] sm:$0xff] }
 0x2ad   : > { %v796_v38 = vpack.c.bf16 %v788_v13, %v787_v10  ;;  %4915 = vmatprep.subr.bf16.mxu0 %v7093_v0  ;;  %v1466_v26 = vsel %vm180_vm1, %v1461_v54, 0 }
 0x2af   : > { %4900 = vmatmul.mubr.msk.bf16.vlgmr.msra.gmra.mxu1 %vm612_vm2, %v796_v38 }
 0x2b0   : > { %4910 = vmatpush3.bf16.xpose.msra.mxu1 %v1258_v52  ;;  %4911 = vmatprep.mubr.msk.bf16.mxu1 %vm5480_vm0, %v7093_v0  ;;  %v1409_v43 = vpop.permute.xlu0 %1408  ;;  %v1459_v25 = vpop.permute.xlu1 %1458  ;;  %v5967_v52 = vld [vmem:[%s7091_s1 + $0x18] sm:$0xff] }
 0x2b1   : > { %4921 = vmatprep.subr.bf16.mxu1 %v7093_v0  ;;  %v1414_v22 = vsel %vm180_vm1, %v1409_v43, 0 }
 0x2b3   : > { %4906 = vmatmul.mubr.msk.bf16.vlgmr.msra.gmra.mxu0 %vm180_vm1, %v1199_v6 }
 0x2b4   : > { %4916 = vmatpush3.bf16.xpose.msra.mxu0 %v1310_v3  ;;  %4917 = vmatprep.mubr.msk.bf16.mxu0 %vm5480_vm0, %v7093_v0  ;;  %v1407_v53 = vpop.permute.xlu0 %1406  ;;  %v1565_v58 = vpop.permute.xlu1 %1564 }
 0x2b5   : > { %4927 = vmatprep.subr.bf16.mxu0 %v7093_v0  ;;  %v1570_v28 = vsel %vm180_vm1, %v1565_v58, 0 }
 0x2b7   : > { %4912 = vmatmul.mubr.msk.bf16.vlgmr.msra.gmra.mxu1 %vm180_vm1, %v1251_v15 }
 0x2b8   : > { %4922 = vmatpush3.bf16.xpose.msra.mxu1 %v1362_v49  ;;  %4923 = vmatprep.mubr.msk.bf16.mxu1 %vm5480_vm0, %v7093_v0  ;;  %v1513_v27 = vpop.permute.xlu0 %1512  ;;  %v1563_v32 = vpop.permute.xlu1 %1562 }
 0x2b9   : > { %4933 = vmatprep.subr.bf16.mxu1 %v7093_v0  ;;  %v1518_v47 = vsel %vm180_vm1, %v1513_v27, 0 }
 0x2bb   : > { %4918 = vmatmul.mubr.msk.bf16.vlgmr.msra.gmra.mxu0 %vm180_vm1, %v1303_v44 }
 0x2bc   : > { %4928 = vmatpush3.bf16.xpose.msra.mxu0 %v1414_v22  ;;  %4929 = vmatprep.mubr.msk.bf16.mxu0 %vm5480_vm0, %v7093_v0  ;;  %v1511_v5 = vpop.permute.xlu0 %1510  ;;  %v1833_v33 = vpop.permute.xlu1 %1832 }
 0x2bd   : > { %4939 = vmatprep.subr.bf16.mxu0 %v7093_v0 }
 0x2bf   : > { %4924 = vmatmul.mubr.msk.bf16.vlgmr.msra.gmra.mxu1 %vm180_vm1, %v1355_v42 }
 0x2c0   : > { %4934 = vmatpush3.bf16.xpose.msra.mxu1 %v1466_v26  ;;  %4935 = vmatprep.mubr.msk.bf16.mxu1 %vm5480_vm0, %v7093_v0 }
 0x2c1   : > { %4945 = vmatprep.subr.bf16.mxu1 %v7093_v0 }
 0x2c3   : > { %4930 = vmatmul.mubr.msk.bf16.vlgmr.msra.gmra.mxu0 %vm180_vm1, %v1407_v53 }
 0x2c4   : > { %4940 = vmatpush3.bf16.xpose.msra.mxu0 %v1518_v47  ;;  %4941 = vmatprep.mubr.msk.bf16.mxu0 %vm5480_vm0, %v7093_v0 }
 0x2c5   : > { %4951 = vmatprep.subr.bf16.mxu0 %v7093_v0 }
 0x2c7   : > { %4936 = vmatmul.mubr.msk.bf16.vlgmr.msra.gmra.mxu1 %vm180_vm1, %v1459_v25 }
 0x2c8   : > { %4946 = vmatpush3.bf16.xpose.msra.mxu1 %v1570_v28  ;;  %4947 = vmatprep.mubr.msk.bf16.mxu1 %vm5480_vm0, %v7093_v0 }
 0x2c9   : > { %4957 = vmatprep.subr.bf16.mxu1 %v7093_v0 }
 0x2cb   : > { %4942 = vmatmul.mubr.msk.bf16.vlgmr.msra.gmra.mxu0 %vm180_vm1, %v1511_v5 }
 0x2cc   : > { %4953 = vmatprep.mubr.msk.bf16.mxu0 %vm5480_vm0, %v7093_v0  ;;  %4952 = vmatpush3.bf16.msra.mxu0 %v1833_v33 }
 0x2cd   : > { %4963 = vmatprep.subr.bf16.mxu0 %v7093_v0 }
 0x2cf   : > { %4948 = vmatmul.mubr.msk.bf16.vlgmr.msra.gmra.mxu1 %vm180_vm1, %v1563_v32 }
 0x2d0   : > { %4959 = vmatprep.mubr.msk.bf16.mxu1 %vm5480_vm0, %v7093_v0 }
 0x352   : > { %v5924_v34 = vpop.f32.mrf.mxu0 }
 0x353   : > { %7095 = vst [vmem:[#allocation2_spill] sm:$0xff] %v5924_v34 }
 0x354   : > { %v4859_v35 = vpop.f32.mrf.mxu0 }
 0x356   : > { %v5926_v46 = vpop.f32.mrf.mxu0 }
 0x357   : > { %7096 = vst [vmem:[#allocation3_spill] sm:$0xff] %v5926_v46  ;;  %v5928_v37 = vpop.f32.mrf.mxu1 }
 0x358   : > { %7097 = vst [vmem:[#allocation4_spill] sm:$0xff] %v5928_v37  ;;  %v4860_v30 = vpop.f32.mrf.mxu0 }
 0x359   : > { %v4865_v7 = vpop.f32.mrf.mxu1 }
 0x35b   : > { %v5930_v55 = vpop.f32.mrf.mxu1  ;;  %v5932_v56 = vpop.f32.mrf.mxu0 }
 0x35c   : > { %7098 = vst [vmem:[#allocation5_spill] sm:$0xff] %v5930_v55  ;;  %7099 = vst [vmem:[#allocation6_spill] sm:$0xff] %v5932_v56 }
 0x35d   : > { %v4866_v1 = vpop.f32.mrf.mxu1  ;;  %v4871_v45 = vpop.f32.mrf.mxu0 }
 0x35f   : > { %v5934_v4 = vpop.f32.mrf.mxu0  ;;  %v5936_v21 = vpop.f32.mrf.mxu1 }
 0x360   : > { %7100 = vst [vmem:[#allocation7_spill] sm:$0xff] %v5934_v4  ;;  %7101 = vst [vmem:[#allocation8_spill] sm:$0xff] %v5936_v21 }
 0x361   : > { %v4872_v2 = vpop.f32.mrf.mxu0  ;;  %v4877_v48 = vpop.f32.mrf.mxu1 }
 0x363   : > { %v5938_v50 = vpop.f32.mrf.mxu1  ;;  %v5940_v19 = vpop.f32.mrf.mxu0 }
 0x364   : > { %7102 = vst [vmem:[#allocation9_spill] sm:$0xff] %v5938_v50  ;;  %7103 = vst [vmem:[#allocation10_spill] sm:$0xff] %v5940_v19 }
 0x365   : > { %v4878_v20 = vpop.f32.mrf.mxu1  ;;  %v4883_v31 = vpop.f32.mrf.mxu0 }
 0x367   : > { %v5942_v29 = vpop.f32.mrf.mxu0  ;;  %v5944_v16 = vpop.f32.mrf.mxu1 }
 0x368   : > { %7104 = vst [vmem:[#allocation11_spill] sm:$0xff] %v5942_v29  ;;  %7105 = vst [vmem:[#allocation12_spill] sm:$0xff] %v5944_v16 }
 0x369   : > { %v4884_v59 = vpop.f32.mrf.mxu0  ;;  %v4889_v60 = vpop.f32.mrf.mxu1 }
 0x36b   : > { %v5946_v6 = vpop.f32.mrf.mxu1  ;;  %v5948_v61 = vpop.f32.mrf.mxu0 }
 0x36c   : > { %7106 = vst [vmem:[#allocation13_spill] sm:$0xff] %v5946_v6  ;;  %7107 = vst [vmem:[#allocation14_spill] sm:$0xff] %v5948_v61 }
 0x36d   : > { %v4890_v15 = vpop.f32.mrf.mxu1  ;;  %v4895_v51 = vpop.f32.mrf.mxu0 }
 0x36f   : > { %v5950_v62 = vpop.f32.mrf.mxu0  ;;  %v5952_v63 = vpop.f32.mrf.mxu1 }
 0x370   : > { %7108 = vst [vmem:[#allocation15_spill] sm:$0xff] %v5950_v62  ;;  %7109 = vst [vmem:[#allocation16_spill] sm:$0xff] %v5952_v63 }
 0x371   : > { %v4896_v40 = vpop.f32.mrf.mxu0  ;;  %v4901_v36 = vpop.f32.mrf.mxu1 }
 0x373   : > { %v5954_v39 = vpop.f32.mrf.mxu1  ;;  %v1242_v57 = vpop.f32.mrf.mxu0 }
 0x374   : > { %7110 = vst [vmem:[#allocation17_spill] sm:$0xff] %v5954_v39  ;;  %v1613_v9 = vmul.f32 0.35355338, %v1242_v57 }
 0x375   : > { %v4902_v10 = vpop.f32.mrf.mxu1  ;;  %v4907_v13 = vpop.f32.mrf.mxu0 }
 0x376   : > { %v5962_v14 = vadd.f32 %v5959_v41, %v1613_v9 }
 0x377   : > { %v1245_v38 = vpop.f32.mrf.mxu0  ;;  %v1294_v44 = vpop.f32.mrf.mxu1 }
 0x378   : > { %v1614_v42 = vmul.f32 0.35355338, %v1245_v38  ;;  %v1615_v3 = vmul.f32 0.35355338, %v1294_v44  ;;  %v1648_v43 = vsel %vm612_vm2, %v5962_v14, -inf }
 0x379   : > { %v4913_v49 = vpop.f32.mrf.mxu1  ;;  %1649 = vmax.xlane.f32.xlu0 %v1648_v43  ;;  %v4908_v54 = vpop.f32.mrf.mxu0 }
 0x37a   : > { %v5972_v53 = vadd.f32 %v5959_v41, %v1615_v3  ;;  %v5975_v22 = vadd.f32 %v5967_v52, %v1614_v42 }
 0x37b   : > { %v1297_v25 = vpop.f32.mrf.mxu1  ;;  %v1346_v26 = vpop.f32.mrf.mxu0 }
 0x37c   : > { %v1616_v27 = vmul.f32 0.35355338, %v1297_v25  ;;  %v1617_v47 = vmul.f32 0.35355338, %v1346_v26  ;;  %v1654_v58 = vsel %vm612_vm2, %v5972_v53, -inf  ;;  %v1651_v28 = vsel %vm612_vm2, %v5975_v22, -inf }
 0x37d   : > { %v4914_v5 = vpop.f32.mrf.mxu1  ;;  %1655 = vmax.xlane.f32.xlu0 %v1654_v58  ;;  %1652 = vmax.xlane.f32.xlu1 %v1651_v28  ;;  %v4919_v32 = vpop.f32.mrf.mxu0 }
 0x37e   : > { %v5982_v33 = vadd.f32 %v5967_v52, %v1616_v27  ;;  %v5985_v35 = vadd.f32 %v5959_v41, %v1617_v47 }
 0x37f   : > { %v1349_v30 = vpop.f32.mrf.mxu0  ;;  %v1398_v7 = vpop.f32.mrf.mxu1 }
 0x380   : > { %v1618_v1 = vmul.f32 0.35355338, %v1349_v30  ;;  %v1619_v45 = vmul.f32 0.35355338, %v1398_v7  ;;  %v1657_v2 = vsel %vm612_vm2, %v5982_v33, -inf  ;;  %v1660_v48 = vsel %vm612_vm2, %v5985_v35, -inf }
 0x381   : > { %v4925_v20 = vpop.f32.mrf.mxu1  ;;  %1658 = vmax.xlane.f32.xlu0 %v1657_v2  ;;  %1661 = vmax.xlane.f32.xlu1 %v1660_v48  ;;  %v4920_v31 = vpop.f32.mrf.mxu0 }
 0x382   : > { %v5992_v59 = vadd.f32 %v5959_v41, %v1619_v45  ;;  %v5995_v60 = vadd.f32 %v5967_v52, %v1618_v1 }
 0x383   : > { %v1401_v15 = vpop.f32.mrf.mxu1  ;;  %v1450_v51 = vpop.f32.mrf.mxu0 }
 0x384   : > { %v1620_v40 = vmul.f32 0.35355338, %v1401_v15  ;;  %v1621_v36 = vmul.f32 0.35355338, %v1450_v51  ;;  %v1666_v57 = vsel %vm612_vm2, %v5992_v59, -inf  ;;  %v1663_v9 = vsel %vm612_vm2, %v5995_v60, -inf }
 0x385   : > { %v4926_v10 = vpop.f32.mrf.mxu1  ;;  %1667 = vmax.xlane.f32.xlu1 %v1666_v57  ;;  %1664 = vmax.xlane.f32.xlu0 %v1663_v9  ;;  %v4931_v13 = vpop.f32.mrf.mxu0 }
 0x386   : > { %v6002_v38 = vadd.f32 %v5967_v52, %v1620_v40  ;;  %v6005_v44 = vadd.f32 %v5959_v41, %v1621_v36 }
 0x387   : > { %v1453_v42 = vpop.f32.mrf.mxu0  ;;  %v1502_v3 = vpop.f32.mrf.mxu1 }
 0x388   : > { %v1622_v43 = vmul.f32 0.35355338, %v1453_v42  ;;  %v1623_v49 = vmul.f32 0.35355338, %v1502_v3  ;;  %v1669_v54 = vsel %vm612_vm2, %v6002_v38, -inf  ;;  %v1672_v25 = vsel %vm612_vm2, %v6005_v44, -inf }
 0x389   : > { %v4937_v26 = vpop.f32.mrf.mxu1  ;;  %1670 = vmax.xlane.f32.xlu0 %v1669_v54  ;;  %1673 = vmax.xlane.f32.xlu1 %v1672_v25  ;;  %v4932_v27 = vpop.f32.mrf.mxu0 }
 0x38a   : > { %v6012_v47 = vadd.f32 %v5959_v41, %v1623_v49  ;;  %v6015_v58 = vadd.f32 %v5967_v52, %v1622_v43 }
 0x38b   : > { %v1505_v28 = vpop.f32.mrf.mxu1  ;;  %v1554_v5 = vpop.f32.mrf.mxu0 }
 0x38c   : > { %v1624_v32 = vmul.f32 0.35355338, %v1505_v28  ;;  %v1625_v30 = vmul.f32 0.35355338, %v1554_v5  ;;  %v1678_v7 = vsel %vm612_vm2, %v6012_v47, -inf  ;;  %v1675_v1 = vsel %vm612_vm2, %v6015_v58, -inf }
 0x38d   : > { %v4938_v45 = vpop.f32.mrf.mxu1  ;;  %1679 = vmax.xlane.f32.xlu1 %v1678_v7  ;;  %1676 = vmax.xlane.f32.xlu0 %v1675_v1  ;;  %v4943_v2 = vpop.f32.mrf.mxu0 }
 0x38e   : > { %v6022_v48 = vadd.f32 %v5967_v52, %v1624_v32  ;;  %v6025_v20 = vadd.f32 %v5959_v41, %v1625_v30 }
 0x38f   : > { %v1557_v31 = vpop.f32.mrf.mxu0  ;;  %v1606_v15 = vpop.f32.mrf.mxu1 }
 0x390   : > { %v1626_v51 = vmul.f32 0.35355338, %v1557_v31  ;;  %v1627_v40 = vmul.f32 0.35355338, %v1606_v15  ;;  %v1681_v36 = vsel %vm612_vm2, %v6022_v48, -inf  ;;  %v1684_v57 = vsel %vm612_vm2, %v6025_v20, -inf }
 0x391   : > { %v4949_v9 = vpop.f32.mrf.mxu1  ;;  %1682 = vmax.xlane.f32.xlu0 %v1681_v36  ;;  %1685 = vmax.xlane.f32.xlu1 %v1684_v57  ;;  %v4944_v10 = vpop.f32.mrf.mxu0 }
 0x392   : > { %v6032_v13 = vadd.f32 %v5959_v41, %v1627_v40  ;;  %v6035_v42 = vadd.f32 %v5967_v52, %v1626_v51 }
 0x393   : > { %v1609_v3 = vpop.f32.mrf.mxu1 }
 0x394   : > { %v1628_v43 = vmul.f32 0.35355338, %v1609_v3  ;;  %v1690_v49 = vsel %vm612_vm2, %v6032_v13, -inf  ;;  %v1687_v54 = vsel %vm612_vm2, %v6035_v42, -inf }
 0x395   : > { %v4950_v25 = vpop.f32.mrf.mxu1  ;;  %1691 = vmax.xlane.f32.xlu1 %v1690_v49  ;;  %1688 = vmax.xlane.f32.xlu0 %v1687_v54 }
 0x396   : > { %v6042_v26 = vadd.f32 %v5967_v52, %v1628_v43 }
 0x398   : > { %v1693_v41 = vsel %vm612_vm2, %v6042_v26, -inf }
 0x399   : > { %1694 = vmax.xlane.f32.xlu0 %v1693_v41 }
 0x3a6   : > { %1926 = vrot.lane.b32.xlu1 %v5542_v8, %s5485_s24 }
 0x3aa   : > { %1973 = vrot.lane.b32.xlu1 %v5550_v12, %s5485_s24 }
 0x3ae   : > { %2067 = vrot.lane.b32.xlu1 %v5560_v18, %s5485_s24 }
 0x3af   : > { %1879 = vrot.lane.b32.xlu0 %v5547_v11, %s5485_s24 }
 0x3b2   : > { %2161 = vrot.lane.b32.xlu1 %v5570_v24, %s5485_s24 }
 0x3b3   : > { %2020 = vrot.lane.b32.xlu0 %v5557_v17, %s5485_s24 }
 0x3b7   : > { %2114 = vrot.lane.b32.xlu0 %v5567_v23, %s5485_s24 }
 0x402   : > { %v1650_v52 = vpop.xlane.xlu0 %1649 }
 0x403   : > { %v1696_v8 = vsub.f32 %v5962_v14, %v1650_v52 }
 0x405   : > { %v1712_v27 = vmul.f32 1.442695, %v1696_v8 }
 0x406   : > { %v1653_v12 = vpop.xlane.xlu1 %1652  ;;  %v1656_v28 = vpop.xlane.xlu0 %1655 }
 0x407   : > { %5279 = vpow2.f32 %v1712_v27  ;;  %v1697_v18 = vsub.f32 %v5975_v22, %v1653_v12  ;;  %v1698_v11 = vsub.f32 %v5972_v53, %v1656_v28 }
 0x409   : > { %v1714_v5 = vmul.f32 1.442695, %v1697_v18  ;;  %v1716_v32 = vmul.f32 1.442695, %v1698_v11 }
 0x40a   : > { %v1662_v24 = vpop.xlane.xlu1 %1661  ;;  %v1659_v30 = vpop.xlane.xlu0 %1658 }
 0x40b   : > { %5281 = vpow2.f32 %v1714_v5  ;;  %v1700_v17 = vsub.f32 %v5985_v35, %v1662_v24  ;;  %v1699_v23 = vsub.f32 %v5982_v33, %v1659_v30 }
 0x40c   : > { %5283 = vpow2.f32 %v1716_v32 }
 0x40d   : > { %v1720_v7 = vmul.f32 1.442695, %v1700_v17  ;;  %v1718_v14 = vmul.f32 1.442695, %v1699_v23 }
 0x40e   : > { %v1668_v1 = vpop.xlane.xlu1 %1667  ;;  %v1665_v45 = vpop.xlane.xlu0 %1664 }
 0x40f   : > { %5285 = vpow2.f32 %v1720_v7  ;;  %v1702_v2 = vsub.f32 %v5992_v59, %v1668_v1  ;;  %v1701_v22 = vsub.f32 %v5995_v60, %v1665_v45 }
 0x410   : > { %5287 = vpow2.f32 %v1718_v14 }
 0x411   : > { %v1724_v53 = vmul.f32 1.442695, %v1702_v2  ;;  %v1722_v31 = vmul.f32 1.442695, %v1701_v22 }
 0x412   : > { %v1674_v15 = vpop.xlane.xlu1 %1673  ;;  %v1671_v51 = vpop.xlane.xlu0 %1670 }
 0x413   : > { %5289 = vpow2.f32 %v1724_v53  ;;  %v1704_v35 = vsub.f32 %v6005_v44, %v1674_v15  ;;  %v1703_v33 = vsub.f32 %v6002_v38, %v1671_v51 }
 0x414   : > { %v6069_v40 = vpop.eup %5279  ;;  %5291 = vpow2.f32 %v1722_v31 }
 0x415   : > { %v1728_v36 = vmul.f32 1.442695, %v1704_v35  ;;  %v1726_v57 = vmul.f32 1.442695, %v1703_v33  ;;  %v1744_v59 = vsel %vm612_vm2, %v6069_v40, 0.0 }
 0x416   : > { %v1680_v9 = vpop.xlane.xlu1 %1679  ;;  %1745 = vadd.xlane.f32.xlu1 %v1744_v59  ;;  %v1677_v60 = vpop.xlane.xlu0 %1676 }
 0x417   : > { %5293 = vpow2.f32 %v1728_v36  ;;  %v1706_v10 = vsub.f32 %v6012_v47, %v1680_v9  ;;  %v1705_v3 = vsub.f32 %v6015_v58, %v1677_v60 }
 0x418   : > { %v6075_v43 = vpop.eup %5281  ;;  %5295 = vpow2.f32 %v1726_v57 }
 0x419   : > { %v6077_v38 = vpop.eup %5283  ;;  %v1732_v44 = vmul.f32 1.442695, %v1706_v10  ;;  %v1730_v49 = vmul.f32 1.442695, %v1705_v3  ;;  %v1747_v54 = vsel %vm612_vm2, %v6075_v43, 0.0 }
 0x41a   : > { %v1686_v25 = vpop.xlane.xlu1 %1685  ;;  %1748 = vadd.xlane.f32.xlu0 %v1747_v54  ;;  %v1750_v41 = vsel %vm612_vm2, %v6077_v38, 0.0  ;;  %v1683_v52 = vpop.xlane.xlu0 %1682  ;;  %v2210_v54 = vld [vmem:[%s5532_s15 + $0x10] sm:$0xff] }
 0x41b   : > { %5297 = vpow2.f32 %v1732_v44  ;;  %v1708_v47 = vsub.f32 %v6025_v20, %v1686_v25  ;;  %1751 = vadd.xlane.f32.xlu1 %v1750_v41  ;;  %v1707_v58 = vsub.f32 %v6022_v48, %v1683_v52  ;;  %v2211_v25 = vld [vmem:[%s5532_s15 + $0x18] sm:$0xff]  ;;  %v2214_v52 = vld [vmem:[%s5532_s15 + $0x30] sm:$0xff] }
 0x41c   : > { %v6085_v8 = vpop.eup %5285  ;;  %5299 = vpow2.f32 %v1730_v49  ;;  %v6143_v41 = vpack.c.bf16 %v2211_v25, %v2210_v54 }
 0x41d   : > { %v6087_v27 = vpop.eup %5287  ;;  %v1736_v12 = vmul.f32 1.442695, %v1708_v47  ;;  %v1734_v28 = vmul.f32 1.442695, %v1707_v58  ;;  %v1756_v18 = vsel %vm612_vm2, %v6085_v8, 0.0  ;;  %v2215_v47 = vld [vmem:[%s5532_s15 + $0x38] sm:$0xff] }
 0x41e   : > { %v1692_v11 = vpop.xlane.xlu1 %1691  ;;  %v1753_v5 = vsel %vm612_vm2, %v6087_v27, 0.0  ;;  %v1689_v32 = vpop.xlane.xlu0 %1688  ;;  %v2208_v58 = vld [vmem:[%s5532_s15] sm:$0xff] }
 0x41f   : > { %5301 = vpow2.f32 %v1736_v12  ;;  %v1710_v20 = vsub.f32 %v6032_v13, %v1692_v11  ;;  %1757 = vadd.xlane.f32.xlu1 %v1756_v18  ;;  %1754 = vadd.xlane.f32.xlu0 %v1753_v5  ;;  %v1709_v48 = vsub.f32 %v6035_v42, %v1689_v32  ;;  %v2209_v12 = vld [vmem:[%s5532_s15 + $0x8] sm:$0xff]  ;;  %v2218_v11 = vld [vmem:[%s5532_s15 + $0x50] sm:$0xff]  ;;  %v2219_v5 = vld [vmem:[%s5532_s15 + $0x58] sm:$0xff] }
 0x420   : > { %v6095_v24 = vpop.eup %5289  ;;  %5303 = vpow2.f32 %v1734_v28  ;;  %v6153_v28 = vpack.c.bf16 %v2215_v47, %v2214_v52  ;;  %v6155_v18 = vpack.c.bf16 %v2209_v12, %v2208_v58  ;;  %v2212_v32 = vld [vmem:[%s5532_s15 + $0x20] sm:$0xff] }
 0x421   : > { %v6097_v30 = vpop.eup %5291  ;;  %v1740_v17 = vmul.f32 1.442695, %v1710_v20  ;;  %v1738_v23 = vmul.f32 1.442695, %v1709_v48  ;;  %v1762_v7 = vsel %vm612_vm2, %v6095_v24, 0.0  ;;  %v2213_v20 = vld [vmem:[%s5532_s15 + $0x28] sm:$0xff]  ;;  %v6167_v48 = vpack.c.bf16 %v2219_v5, %v2218_v11 }
 0x422   : > { %v1759_v14 = vsel %vm612_vm2, %v6097_v30, 0.0  ;;  %v1695_v1 = vpop.xlane.xlu0 %1694 }
 0x423   : > { %5305 = vpow2.f32 %v1740_v17  ;;  %1763 = vadd.xlane.f32.xlu1 %v1762_v7  ;;  %1760 = vadd.xlane.f32.xlu0 %v1759_v14  ;;  %v1711_v13 = vsub.f32 %v6042_v26, %v1695_v1  ;;  %v6171_v17 = vpack.c.bf16 %v2213_v20, %v2212_v32  ;;  %v2223_v7 = vld [vmem:[%s5532_s15 + $0x78] sm:$0xff]  ;;  %v2216_v14 = vld [vmem:[%s5532_s15 + $0x40] sm:$0xff]  ;;  %v2217_v1 = vld [vmem:[%s5532_s15 + $0x48] sm:$0xff] }
 0x424   : > { %v6104_v42 = vpop.eup %5293  ;;  %5307 = vpow2.f32 %v1738_v23  ;;  %v2222_v23 = vld [vmem:[%s5532_s15 + $0x70] sm:$0xff] }
 0x425   : > { %v6106_v45 = vpop.eup %5295  ;;  %v1742_v2 = vmul.f32 1.442695, %v1711_v13  ;;  %v1768_v22 = vsel %vm612_vm2, %v6104_v42, 0.0  ;;  %v6183_v13 = vpack.c.bf16 %v2223_v7, %v2222_v23 }
 0x426   : > { %v1765_v53 = vsel %vm612_vm2, %v6106_v45, 0.0  ;;  %v1880_v31 = vpop.permute.xlu0 %1879 }
 0x427   : > { %5309 = vpow2.f32 %v1742_v2  ;;  %1769 = vadd.xlane.f32.xlu1 %v1768_v22  ;;  %1766 = vadd.xlane.f32.xlu0 %v1765_v53  ;;  %v6187_v2 = vpack.c.bf16 %v2217_v1, %v2216_v14  ;;  %v2220_v22 = vld [vmem:[%s5532_s15 + $0x60] sm:$0xff]  ;;  %v2221_v53 = vld [vmem:[%s5532_s15 + $0x68] sm:$0xff] }
 0x428   : > { %v6112_v15 = vpop.eup %5297  ;;  %4958 = vmatpush3.bf16.msra.mxu1 %v1880_v31  ;;  %v6199_v31 = vpack.c.bf16 %v2221_v53, %v2220_v22 }
 0x429   : > { %v6114_v26 = vpop.eup %5299  ;;  %v1774_v51 = vsel %vm612_vm2, %v6112_v15, 0.0  ;;  %4969 = vmatprep.subr.bf16.mxu1 %v7093_v0 }
 0x42a   : > { %v1771_v35 = vsel %vm612_vm2, %v6114_v26, 0.0 }
 0x42b   : > { %1775 = vadd.xlane.f32.xlu1 %v1774_v51  ;;  %1772 = vadd.xlane.f32.xlu0 %v1771_v35  ;;  %v1927_v51 = vpop.permute.xlu1 %1926 }
 0x42c   : > { %v6121_v33 = vpop.eup %5301 }
 0x42d   : > { %v6123_v36 = vpop.eup %5303  ;;  %v1780_v57 = vsel %vm612_vm2, %v6121_v33, 0.0 }
 0x42e   : > { %v1777_v59 = vsel %vm612_vm2, %v6123_v36, 0.0 }
 0x42f   : > { %1781 = vadd.xlane.f32.xlu1 %v1780_v57  ;;  %1778 = vadd.xlane.f32.xlu0 %v1777_v59  ;;  %v1974_v35 = vpop.permute.xlu1 %1973  ;;  %v2021_v59 = vpop.permute.xlu0 %2020 }
 0x430   : > { %v6129_v9 = vpop.eup %5305 }
 0x431   : > { %v6131_v60 = vpop.eup %5307  ;;  %v1786_v10 = vsel %vm612_vm2, %v6129_v9, 0.0 }
 0x432   : > { %v1783_v3 = vsel %vm612_vm2, %v6131_v60, 0.0 }
 0x433   : > { %1787 = vadd.xlane.f32.xlu1 %v1786_v10  ;;  %1784 = vadd.xlane.f32.xlu0 %v1783_v3  ;;  %v6205_v57 = vpop.permute.xlu1 %2067  ;;  %v6209_v3 = vpop.permute.xlu0 %2114 }
 0x434   : > { %v6137_v44 = vpop.eup %5309 }
 0x435   : > { %v1789_v49 = vsel %vm612_vm2, %v6137_v44, 0.0 }
 0x437   : > { %1790 = vadd.xlane.f32.xlu0 %v1789_v49  ;;  %v6207_v10 = vpop.permute.xlu1 %2161 }
 0x444   : > { %2287 = vrot.lane.b32.xlu1 %v6143_v41, %s5486_s29 }
 0x448   : > { %2285 = vrot.lane.b32.xlu1 %v6143_v41, %s5487_s30 }
 0x44c   : > { %2391 = vrot.lane.b32.xlu1 %v6153_v28, %s5486_s29 }
 0x44d   : > { %2235 = vrot.lane.b32.xlu0 %v6155_v18, %s5486_s29 }
 0x450   : > { %2389 = vrot.lane.b32.xlu1 %v6153_v28, %s5487_s30 }
 0x451   : > { %2233 = vrot.lane.b32.xlu0 %v6155_v18, %s5487_s30 }
 0x454   : > { %2495 = vrot.lane.b32.xlu1 %v6167_v48, %s5486_s29 }
 0x455   : > { %2339 = vrot.lane.b32.xlu0 %v6171_v17, %s5486_s29 }
 0x458   : > { %2493 = vrot.lane.b32.xlu1 %v6167_v48, %s5487_s30 }
 0x459   : > { %2337 = vrot.lane.b32.xlu0 %v6171_v17, %s5487_s30 }
 0x45c   : > { %2599 = vrot.lane.b32.xlu1 %v6183_v13, %s5486_s29 }
 0x45d   : > { %2443 = vrot.lane.b32.xlu0 %v6187_v2, %s5486_s29 }
 0x460   : > { %2597 = vrot.lane.b32.xlu1 %v6183_v13, %s5487_s30 }
 0x461   : > { %2441 = vrot.lane.b32.xlu0 %v6187_v2, %s5487_s30 }
 0x464   : > { %2867 = vrot.lane.b32.xlu1 %v6155_v18, %s5488_s3 }
 0x465   : > { %2547 = vrot.lane.b32.xlu0 %v6199_v31, %s5486_s29 }
 0x469   : > { %2545 = vrot.lane.b32.xlu0 %v6199_v31, %s5487_s30 }
 0x49f   : > { %v1746_v49 = vpop.xlane.xlu1 %1745 }
 0x4a0   : > { %5311 = vrcp.f32 %v1746_v49 }
 0x4a3   : > { %v1749_v54 = vpop.xlane.xlu0 %1748 }
 0x4a4   : > { %v1752_v25 = vpop.xlane.xlu1 %1751  ;;  %5313 = vrcp.f32 %v1749_v54 }
 0x4a5   : > { %5315 = vrcp.f32 %v1752_v25 }
 0x4a8   : > { %v1758_v52 = vpop.xlane.xlu1 %1757  ;;  %v1755_v47 = vpop.xlane.xlu0 %1754 }
 0x4a9   : > { %5317 = vrcp.f32 %v1755_v47 }
 0x4aa   : > { %5319 = vrcp.f32 %v1758_v52 }
 0x4ac   : > { %v1764_v58 = vpop.xlane.xlu1 %1763  ;;  %v1761_v12 = vpop.xlane.xlu0 %1760 }
 0x4ad   : > { %5321 = vrcp.f32 %v1761_v12  ;;  %v5312_v11 = vpop.eup %5311 }
 0x4ae   : > { %5323 = vrcp.f32 %v1764_v58  ;;  %v1808_v23 = vmul.f32 %v5312_v11, %v6069_v40 }
 0x4b0   : > { %v1770_v5 = vpop.xlane.xlu1 %1769  ;;  %v1767_v32 = vpop.xlane.xlu0 %1766 }
 0x4b1   : > { %v5314_v20 = vpop.eup %5313  ;;  %5325 = vrcp.f32 %v1767_v32 }
 0x4b2   : > { %v1809_v7 = vmul.f32 %v5314_v20, %v6075_v43  ;;  %5327 = vrcp.f32 %v1770_v5  ;;  %v5316_v53 = vpop.eup %5315 }
 0x4b3   : > { %v1810_v40 = vmul.f32 %v5316_v53, %v6077_v38 }
 0x4b4   : > { %v1776_v14 = vpop.xlane.xlu1 %1775  ;;  %v1773_v1 = vpop.xlane.xlu0 %1772  ;;  %v1824_v22 = vpack.c.bf16 %v1809_v7, %v1808_v23 }
 0x4b5   : > { %5329 = vrcp.f32 %v1773_v1 }
 0x4b6   : > { %4954 = vmatmul.mubr.msk.bf16.vlgmr.msra.gmra.mxu0 %vm612_vm2, %v1824_v22  ;;  %v5318_v49 = vpop.eup %5317  ;;  %5331 = vrcp.f32 %v1776_v14 }
 0x4b7   : > { %4964 = vmatpush3.bf16.msra.mxu0 %v1927_v51  ;;  %4965 = vmatprep.mubr.msk.bf16.mxu0 %vm5480_vm0, %v7093_v0  ;;  %v1811_v43 = vmul.f32 %v5318_v49, %v6087_v27  ;;  %v5320_v52 = vpop.eup %5319 }
 0x4b8   : > { %v1782_v54 = vpop.xlane.xlu1 %1781  ;;  %v1779_v25 = vpop.xlane.xlu0 %1778  ;;  %4975 = vmatprep.subr.bf16.mxu0 %v7093_v0  ;;  %v1812_v11 = vmul.f32 %v5320_v52, %v6085_v8 }
 0x4b9   : > { %5333 = vrcp.f32 %v1779_v25  ;;  %v1825_v47 = vpack.c.bf16 %v1811_v43, %v1810_v40 }
 0x4ba   : > { %v5322_v58 = vpop.eup %5321  ;;  %5335 = vrcp.f32 %v1782_v54 }
 0x4bb   : > { %4960 = vmatmul.mubr.msk.bf16.vlgmr.msra.gmra.mxu1 %vm612_vm2, %v1825_v47  ;;  %v1813_v5 = vmul.f32 %v5322_v58, %v6097_v30  ;;  %v5324_v32 = vpop.eup %5323 }
 0x4bc   : > { %v1788_v51 = vpop.xlane.xlu1 %1787  ;;  %v1785_v12 = vpop.xlane.xlu0 %1784  ;;  %4970 = vmatpush3.bf16.msra.mxu1 %v1974_v35  ;;  %4971 = vmatprep.mubr.msk.bf16.mxu1 %vm5480_vm0, %v7093_v0  ;;  %v1814_v23 = vmul.f32 %v5324_v32, %v6095_v24 }
 0x4bd   : > { %5337 = vrcp.f32 %v1785_v12  ;;  %v1826_v38 = vpack.c.bf16 %v1813_v5, %v1812_v11  ;;  %4981 = vmatprep.subr.bf16.mxu1 %v7093_v0 }
 0x4be   : > { %v5326_v27 = vpop.eup %5325  ;;  %5339 = vrcp.f32 %v1788_v51 }
 0x4bf   : > { %4966 = vmatmul.mubr.msk.bf16.vlgmr.msra.gmra.mxu0 %vm612_vm2, %v1826_v38  ;;  %v1815_v8 = vmul.f32 %v5326_v27, %v6106_v45  ;;  %v5328_v7 = vpop.eup %5327 }
 0x4c0   : > { %v1791_v20 = vpop.xlane.xlu0 %1790  ;;  %4976 = vmatpush3.bf16.msra.mxu0 %v2021_v59  ;;  %4977 = vmatprep.mubr.msk.bf16.mxu0 %vm5480_vm0, %v7093_v0  ;;  %v2288_v14 = vpop.permute.xlu1 %2287  ;;  %v1816_v1 = vmul.f32 %v5328_v7, %v6104_v42 }
 0x4c1   : > { %5341 = vrcp.f32 %v1791_v20  ;;  %v1827_v30 = vpack.c.bf16 %v1815_v8, %v1814_v23  ;;  %4987 = vmatprep.subr.bf16.mxu0 %v7093_v0 }
 0x4c2   : > { %v5330_v35 = vpop.eup %5329 }
 0x4c3   : > { %4972 = vmatmul.mubr.msk.bf16.vlgmr.msra.gmra.mxu1 %vm612_vm2, %v1827_v30  ;;  %v1817_v22 = vmul.f32 %v5330_v35, %v6114_v26  ;;  %v5332_v53 = vpop.eup %5331 }
 0x4c4   : > { %v2236_v24 = vpop.permute.xlu0 %2235  ;;  %4982 = vmatpush3.bf16.msra.mxu1 %v6205_v57  ;;  %4983 = vmatprep.mubr.msk.bf16.mxu1 %vm5480_vm0, %v7093_v0  ;;  %v1818_v49 = vmul.f32 %v5332_v53, %v6112_v15  ;;  %v2286_v26 = vpop.permute.xlu1 %2285 }
 0x4c5   : > { %v1828_v45 = vpack.c.bf16 %v1817_v22, %v1816_v1  ;;  %4993 = vmatprep.subr.bf16.mxu1 %v7093_v0  ;;  %v2241_v47 = vsel %vm180_vm1, %v2236_v24, 0 }
 0x4c6   : > { %v5334_v59 = vpop.eup %5333 }
 0x4c7   : > { %4978 = vmatmul.mubr.msk.bf16.vlgmr.msra.gmra.mxu0 %vm612_vm2, %v1828_v45  ;;  %v1819_v54 = vmul.f32 %v5334_v59, %v6123_v36  ;;  %v5336_v25 = vpop.eup %5335 }
 0x4c8   : > { %v2234_v42 = vpop.permute.xlu0 %2233  ;;  %4988 = vmatpush3.bf16.msra.mxu0 %v6209_v3  ;;  %4989 = vmatprep.mubr.msk.bf16.mxu0 %vm5480_vm0, %v7093_v0  ;;  %v1820_v52 = vmul.f32 %v5336_v25, %v6121_v33  ;;  %v2392_v11 = vpop.permute.xlu1 %2391 }
 0x4c9   : > { %v1829_v57 = vpack.c.bf16 %v1819_v54, %v1818_v49  ;;  %4999 = vmatprep.subr.bf16.mxu0 %v7093_v0  ;;  %v2397_v32 = vsel %vm180_vm1, %v2392_v11, 0 }
 0x4ca   : > { %v5338_v40 = vpop.eup %5337 }
 0x4cb   : > { %v5340_v43 = vpop.eup %5339  ;;  %4984 = vmatmul.mubr.msk.bf16.vlgmr.msra.gmra.mxu1 %vm612_vm2, %v1829_v57  ;;  %v1821_v15 = vmul.f32 %v5338_v40, %v6131_v60 }
 0x4cc   : > { %v2340_v36 = vpop.permute.xlu0 %2339  ;;  %4994 = vmatpush3.bf16.msra.mxu1 %v6207_v10  ;;  %4995 = vmatprep.mubr.msk.bf16.mxu1 %vm5480_vm0, %v7093_v0  ;;  %v1822_v51 = vmul.f32 %v5340_v43, %v6129_v9  ;;  %v2293_v10 = vsel %vm180_vm1, %v2288_v14, 0  ;;  %v2390_v9 = vpop.permute.xlu1 %2389 }
 0x4cd   : > { %v1830_v58 = vpack.c.bf16 %v1821_v15, %v1820_v52  ;;  %5005 = vmatprep.subr.bf16.mxu1 %v7093_v0 }
 0x4ce   : > { %v5342_v3 = vpop.eup %5341 }
 0x4cf   : > { %v1823_v12 = vmul.f32 %v5342_v3, %v6137_v44  ;;  %4990 = vmatmul.mubr.msk.bf16.vlgmr.msra.gmra.mxu0 %vm612_vm2, %v1830_v58  ;;  %v2345_v44 = vsel %vm180_vm1, %v2340_v36, 0 }
 0x4d0   : > { %5000 = vmatpush3.bf16.xpose.msra.mxu0 %v2241_v47  ;;  %5001 = vmatprep.mubr.msk.bf16.mxu0 %vm5480_vm0, %v7093_v0  ;;  %v2338_v60 = vpop.permute.xlu0 %2337  ;;  %v2496_v38 = vpop.permute.xlu1 %2495 }
 0x4d1   : > { %v1831_v33 = vpack.c.bf16 %v1823_v12, %v1822_v51  ;;  %5011 = vmatprep.subr.bf16.mxu0 %v7093_v0  ;;  %v2501_v8 = vsel %vm180_vm1, %v2496_v38, 0 }
 0x4d3   : > { %4996 = vmatmul.mubr.msk.bf16.vlgmr.msra.gmra.mxu1 %vm612_vm2, %v1831_v33 }
 0x4d4   : > { %5006 = vmatpush3.bf16.xpose.msra.mxu1 %v2293_v10  ;;  %5007 = vmatprep.mubr.msk.bf16.mxu1 %vm5480_vm0, %v7093_v0  ;;  %v2444_v5 = vpop.permute.xlu0 %2443  ;;  %v2494_v23 = vpop.permute.xlu1 %2493 }
 0x4d5   : > { %5017 = vmatprep.subr.bf16.mxu1 %v7093_v0  ;;  %v2449_v20 = vsel %vm180_vm1, %v2444_v5, 0 }
 0x4d7   : > { %5002 = vmatmul.mubr.msk.bf16.vlgmr.msra.gmra.mxu0 %vm180_vm1, %v2234_v42 }
 0x4d8   : > { %5012 = vmatpush3.bf16.xpose.msra.mxu0 %v2345_v44  ;;  %5013 = vmatprep.mubr.msk.bf16.mxu0 %vm5480_vm0, %v7093_v0  ;;  %v2442_v27 = vpop.permute.xlu0 %2441  ;;  %v2600_v35 = vpop.permute.xlu1 %2599 }
 0x4d9   : > { %5023 = vmatprep.subr.bf16.mxu0 %v7093_v0  ;;  %v2605_v14 = vsel %vm180_vm1, %v2600_v35, 0 }
 0x4db   : > { %5008 = vmatmul.mubr.msk.bf16.vlgmr.msra.gmra.mxu1 %vm180_vm1, %v2286_v26 }
 0x4dc   : > { %5018 = vmatpush3.bf16.xpose.msra.mxu1 %v2397_v32  ;;  %5019 = vmatprep.mubr.msk.bf16.mxu1 %vm5480_vm0, %v7093_v0  ;;  %v2548_v7 = vpop.permute.xlu0 %2547  ;;  %v2598_v22 = vpop.permute.xlu1 %2597 }
 0x4dd   : > { %5029 = vmatprep.subr.bf16.mxu1 %v7093_v0  ;;  %v2553_v30 = vsel %vm180_vm1, %v2548_v7, 0  ;;  %v6338_v7 = vld [vmem:[%s7091_s1 + $0x20] sm:$0xff] }
 0x4df   : > { %5014 = vmatmul.mubr.msk.bf16.vlgmr.msra.gmra.mxu0 %vm180_vm1, %v2338_v60 }
 0x4e0   : > { %5024 = vmatpush3.bf16.xpose.msra.mxu0 %v2449_v20  ;;  %5025 = vmatprep.mubr.msk.bf16.mxu0 %vm5480_vm0, %v7093_v0  ;;  %v2546_v1 = vpop.permute.xlu0 %2545  ;;  %v2868_v24 = vpop.permute.xlu1 %2867 }
 0x4e1   : > { %5035 = vmatprep.subr.bf16.mxu0 %v7093_v0 }
 0x4e3   : > { %5020 = vmatmul.mubr.msk.bf16.vlgmr.msra.gmra.mxu1 %vm180_vm1, %v2390_v9 }
 0x4e4   : > { %5030 = vmatpush3.bf16.xpose.msra.mxu1 %v2501_v8  ;;  %5031 = vmatprep.mubr.msk.bf16.mxu1 %vm5480_vm0, %v7093_v0 }
 0x4e5   : > { %5041 = vmatprep.subr.bf16.mxu1 %v7093_v0 }
 0x4e7   : > { %5026 = vmatmul.mubr.msk.bf16.vlgmr.msra.gmra.mxu0 %vm180_vm1, %v2442_v27 }
 0x4e8   : > { %5036 = vmatpush3.bf16.xpose.msra.mxu0 %v2553_v30  ;;  %5037 = vmatprep.mubr.msk.bf16.mxu0 %vm5480_vm0, %v7093_v0 }
 0x4e9   : > { %5047 = vmatprep.subr.bf16.mxu0 %v7093_v0 }
 0x4eb   : > { %5032 = vmatmul.mubr.msk.bf16.vlgmr.msra.gmra.mxu1 %vm180_vm1, %v2494_v23 }
 0x4ec   : > { %5042 = vmatpush3.bf16.xpose.msra.mxu1 %v2605_v14  ;;  %5043 = vmatprep.mubr.msk.bf16.mxu1 %vm5480_vm0, %v7093_v0 }
 0x4ed   : > { %5053 = vmatprep.subr.bf16.mxu1 %v7093_v0 }
 0x4ef   : > { %5038 = vmatmul.mubr.msk.bf16.vlgmr.msra.gmra.mxu0 %vm180_vm1, %v2546_v1 }
 0x4f0   : > { %5049 = vmatprep.mubr.msk.bf16.mxu0 %vm5480_vm0, %v7093_v0  ;;  %5048 = vmatpush3.bf16.msra.mxu0 %v2868_v24  ;;  %v6346_v24 = vld [vmem:[%s7091_s1 + $0x28] sm:$0xff] }
 0x4f1   : > { %5059 = vmatprep.subr.bf16.mxu0 %v7093_v0 }
 0x4f3   : > { %5044 = vmatmul.mubr.msk.bf16.vlgmr.msra.gmra.mxu1 %vm180_vm1, %v2598_v22 }
 0x4f4   : > { %5055 = vmatprep.mubr.msk.bf16.mxu1 %vm5480_vm0, %v7093_v0 }
 0x576   : > { %v6303_v53 = vpop.f32.mrf.mxu0 }
 0x578   : > { %v4955_v45 = vpop.f32.mrf.mxu0 }
 0x57a   : > { %v6305_v59 = vpop.f32.mrf.mxu0 }
 0x57b   : > { %v6307_v49 = vpop.f32.mrf.mxu1 }
 0x57c   : > { %v4956_v54 = vpop.f32.mrf.mxu0 }
 0x57d   : > { %v4961_v42 = vpop.f32.mrf.mxu1 }
 0x57f   : > { %v6309_v25 = vpop.f32.mrf.mxu1  ;;  %v6311_v26 = vpop.f32.mrf.mxu0 }
 0x581   : > { %v4962_v57 = vpop.f32.mrf.mxu1  ;;  %v4967_v40 = vpop.f32.mrf.mxu0 }
 0x583   : > { %v6313_v43 = vpop.f32.mrf.mxu0  ;;  %v6315_v52 = vpop.f32.mrf.mxu1 }
 0x585   : > { %v4968_v15 = vpop.f32.mrf.mxu0  ;;  %v4973_v36 = vpop.f32.mrf.mxu1 }
 0x587   : > { %v6317_v3 = vpop.f32.mrf.mxu1  ;;  %v6319_v47 = vpop.f32.mrf.mxu0 }
 0x589   : > { %v4974_v58 = vpop.f32.mrf.mxu1  ;;  %v4979_v51 = vpop.f32.mrf.mxu0 }
 0x58b   : > { %v6321_v12 = vpop.f32.mrf.mxu0  ;;  %v6323_v11 = vpop.f32.mrf.mxu1 }
 0x58d   : > { %v4980_v33 = vpop.f32.mrf.mxu0  ;;  %v4985_v60 = vpop.f32.mrf.mxu1 }
 0x58f   : > { %v6325_v10 = vpop.f32.mrf.mxu1  ;;  %v6327_v9 = vpop.f32.mrf.mxu0 }
 0x591   : > { %v4986_v44 = vpop.f32.mrf.mxu1  ;;  %v4991_v5 = vpop.f32.mrf.mxu0 }
 0x593   : > { %v6329_v32 = vpop.f32.mrf.mxu0  ;;  %v6331_v38 = vpop.f32.mrf.mxu1 }
 0x595   : > { %v4992_v27 = vpop.f32.mrf.mxu0  ;;  %v4997_v20 = vpop.f32.mrf.mxu1 }
 0x597   : > { %v6333_v23 = vpop.f32.mrf.mxu1  ;;  %v2277_v8 = vpop.f32.mrf.mxu0 }
 0x598   : > { %v2648_v30 = vmul.f32 0.35355338, %v2277_v8 }
 0x599   : > { %v4998_v35 = vpop.f32.mrf.mxu1  ;;  %v5003_v14 = vpop.f32.mrf.mxu0 }
 0x59a   : > { %v6341_v1 = vadd.f32 %v6338_v7, %v2648_v30 }
 0x59b   : > { %v2280_v22 = vpop.f32.mrf.mxu0  ;;  %v2329_v45 = vpop.f32.mrf.mxu1 }
 0x59c   : > { %v2649_v54 = vmul.f32 0.35355338, %v2280_v22  ;;  %v2650_v42 = vmul.f32 0.35355338, %v2329_v45  ;;  %v2683_v57 = vsel %vm612_vm2, %v6341_v1, -inf }
 0x59d   : > { %v5009_v40 = vpop.f32.mrf.mxu1  ;;  %2684 = vmax.xlane.f32.xlu0 %v2683_v57  ;;  %v5004_v15 = vpop.f32.mrf.mxu0 }
 0x59e   : > { %v6351_v36 = vadd.f32 %v6346_v24, %v2649_v54  ;;  %v6354_v58 = vadd.f32 %v6338_v7, %v2650_v42 }
 0x59f   : > { %v2332_v51 = vpop.f32.mrf.mxu1  ;;  %v2381_v33 = vpop.f32.mrf.mxu0 }
 0x5a0   : > { %v2651_v60 = vmul.f32 0.35355338, %v2332_v51  ;;  %v2652_v44 = vmul.f32 0.35355338, %v2381_v33  ;;  %v2689_v5 = vsel %vm612_vm2, %v6354_v58, -inf  ;;  %v2686_v27 = vsel %vm612_vm2, %v6351_v36, -inf }
 0x5a1   : > { %v5010_v20 = vpop.f32.mrf.mxu1  ;;  %2690 = vmax.xlane.f32.xlu0 %v2689_v5  ;;  %2687 = vmax.xlane.f32.xlu1 %v2686_v27  ;;  %v5015_v8 = vpop.f32.mrf.mxu0 }
 0x5a2   : > { %v6361_v30 = vadd.f32 %v6346_v24, %v2651_v60  ;;  %v6364_v35 = vadd.f32 %v6338_v7, %v2652_v44 }
 0x5a3   : > { %v2384_v14 = vpop.f32.mrf.mxu0  ;;  %v2433_v22 = vpop.f32.mrf.mxu1 }
 0x5a4   : > { %v2653_v45 = vmul.f32 0.35355338, %v2384_v14  ;;  %v2654_v54 = vmul.f32 0.35355338, %v2433_v22  ;;  %v2692_v42 = vsel %vm612_vm2, %v6361_v30, -inf  ;;  %v2695_v57 = vsel %vm612_vm2, %v6364_v35, -inf }
 0x5a5   : > { %v5021_v40 = vpop.f32.mrf.mxu1  ;;  %2693 = vmax.xlane.f32.xlu0 %v2692_v42  ;;  %2696 = vmax.xlane.f32.xlu1 %v2695_v57  ;;  %v5016_v15 = vpop.f32.mrf.mxu0 }
 0x5a6   : > { %v6371_v51 = vadd.f32 %v6346_v24, %v2653_v45  ;;  %v6374_v33 = vadd.f32 %v6338_v7, %v2654_v54 }
 0x5a7   : > { %v2436_v60 = vpop.f32.mrf.mxu1  ;;  %v2485_v44 = vpop.f32.mrf.mxu0 }
 0x5a8   : > { %v2655_v5 = vmul.f32 0.35355338, %v2436_v60  ;;  %v2656_v27 = vmul.f32 0.35355338, %v2485_v44  ;;  %v2701_v20 = vsel %vm612_vm2, %v6374_v33, -inf  ;;  %v2698_v8 = vsel %vm612_vm2, %v6371_v51, -inf }
 0x5a9   : > { %v5022_v14 = vpop.f32.mrf.mxu1  ;;  %2702 = vmax.xlane.f32.xlu1 %v2701_v20  ;;  %2699 = vmax.xlane.f32.xlu0 %v2698_v8  ;;  %v5027_v22 = vpop.f32.mrf.mxu0 }
 0x5aa   : > { %v6381_v45 = vadd.f32 %v6346_v24, %v2655_v5  ;;  %v6384_v54 = vadd.f32 %v6338_v7, %v2656_v27 }
 0x5ab   : > { %v2488_v42 = vpop.f32.mrf.mxu0  ;;  %v2537_v57 = vpop.f32.mrf.mxu1 }
 0x5ac   : > { %v2657_v40 = vmul.f32 0.35355338, %v2488_v42  ;;  %v2658_v15 = vmul.f32 0.35355338, %v2537_v57  ;;  %v2704_v60 = vsel %vm612_vm2, %v6381_v45, -inf  ;;  %v2707_v44 = vsel %vm612_vm2, %v6384_v54, -inf }
 0x5ad   : > { %v5033_v14 = vpop.f32.mrf.mxu1  ;;  %2705 = vmax.xlane.f32.xlu0 %v2704_v60  ;;  %2708 = vmax.xlane.f32.xlu1 %v2707_v44  ;;  %v5028_v20 = vpop.f32.mrf.mxu0 }
 0x5ae   : > { %v6391_v5 = vadd.f32 %v6346_v24, %v2657_v40  ;;  %v6394_v27 = vadd.f32 %v6338_v7, %v2658_v15 }
 0x5af   : > { %v2540_v8 = vpop.f32.mrf.mxu1  ;;  %v2589_v22 = vpop.f32.mrf.mxu0 }
 0x5b0   : > { %v2659_v42 = vmul.f32 0.35355338, %v2540_v8  ;;  %v2660_v57 = vmul.f32 0.35355338, %v2589_v22  ;;  %v2713_v0 = vsel %vm612_vm2, %v6394_v27, -inf  ;;  %v2710_v39 = vsel %vm612_vm2, %v6391_v5, -inf }
 0x5b1   : > { %v5034_v14 = vpop.f32.mrf.mxu1  ;;  %2714 = vmax.xlane.f32.xlu1 %v2713_v0  ;;  %2711 = vmax.xlane.f32.xlu0 %v2710_v39  ;;  %v5039_v60 = vpop.f32.mrf.mxu0 }
 0x5b2   : > { %v6401_v40 = vadd.f32 %v6346_v24, %v2659_v42  ;;  %v6404_v15 = vadd.f32 %v6338_v7, %v2660_v57 }
 0x5b3   : > { %v2592_v44 = vpop.f32.mrf.mxu0  ;;  %v2641_v20 = vpop.f32.mrf.mxu1 }
 0x5b4   : > { %v2661_v8 = vmul.f32 0.35355338, %v2592_v44  ;;  %v2662_v22 = vmul.f32 0.35355338, %v2641_v20  ;;  %v2716_v63 = vsel %vm612_vm2, %v6401_v40, -inf  ;;  %v2719_v62 = vsel %vm612_vm2, %v6404_v15, -inf }
 0x5b5   : > { %v5045_v14 = vpop.f32.mrf.mxu1  ;;  %2717 = vmax.xlane.f32.xlu0 %v2716_v63  ;;  %2720 = vmax.xlane.f32.xlu1 %v2719_v62  ;;  %v5040_v0 = vpop.f32.mrf.mxu0 }
 0x5b6   : > { %v6411_v39 = vadd.f32 %v6346_v24, %v2661_v8  ;;  %v6414_v42 = vadd.f32 %v6338_v7, %v2662_v22 }
 0x5b7   : > { %v2644_v57 = vpop.f32.mrf.mxu1 }
 0x5b8   : > { %v2663_v60 = vmul.f32 0.35355338, %v2644_v57  ;;  %v2725_v44 = vsel %vm612_vm2, %v6414_v42, -inf  ;;  %v2722_v20 = vsel %vm612_vm2, %v6411_v39, -inf }
 0x5b9   : > { %v5046_v61 = vpop.f32.mrf.mxu1  ;;  %2726 = vmax.xlane.f32.xlu1 %v2725_v44  ;;  %2723 = vmax.xlane.f32.xlu0 %v2722_v20 }
 0x5ba   : > { %v6421_v62 = vadd.f32 %v6346_v24, %v2663_v60 }
 0x5bc   : > { %v2728_v63 = vsel %vm612_vm2, %v6421_v62, -inf }
 0x5bd   : > { %2729 = vmax.xlane.f32.xlu0 %v2728_v63 }
 0x5ca   : > { %2961 = vrot.lane.b32.xlu1 %v6171_v17, %s5488_s3 }
 0x5ce   : > { %3008 = vrot.lane.b32.xlu1 %v6153_v28, %s5488_s3 }
 0x5d2   : > { %3102 = vrot.lane.b32.xlu1 %v6167_v48, %s5488_s3 }
 0x5d3   : > { %2914 = vrot.lane.b32.xlu0 %v6143_v41, %s5488_s3 }
 0x5d6   : > { %3196 = vrot.lane.b32.xlu1 %v6183_v13, %s5488_s3 }
 0x5d7   : > { %3055 = vrot.lane.b32.xlu0 %v6187_v2, %s5488_s3 }
 0x5db   : > { %3149 = vrot.lane.b32.xlu0 %v6199_v31, %s5488_s3 }
 0x626   : > { %v2685_v61 = vpop.xlane.xlu0 %2684 }
 0x627   : > { %v2731_v7 = vsub.f32 %v6341_v1, %v2685_v61 }
 0x629   : > { %v2747_v24 = vmul.f32 1.442695, %v2731_v7 }
 0x62a   : > { %v2688_v8 = vpop.xlane.xlu1 %2687  ;;  %v2691_v22 = vpop.xlane.xlu0 %2690 }
 0x62b   : > { %5343 = vpow2.f32 %v2747_v24  ;;  %v2732_v14 = vsub.f32 %v6351_v36, %v2688_v8  ;;  %v2733_v0 = vsub.f32 %v6354_v58, %v2691_v22 }
 0x62d   : > { %v2749_v57 = vmul.f32 1.442695, %v2732_v14  ;;  %v2751_v60 = vmul.f32 1.442695, %v2733_v0 }
 0x62e   : > { %v2697_v44 = vpop.xlane.xlu1 %2696  ;;  %v2694_v20 = vpop.xlane.xlu0 %2693 }
 0x62f   : > { %5345 = vpow2.f32 %v2749_v57  ;;  %v2735_v63 = vsub.f32 %v6364_v35, %v2697_v44  ;;  %v2734_v6 = vsub.f32 %v6361_v30, %v2694_v20 }
 0x630   : > { %5347 = vpow2.f32 %v2751_v60 }
 0x631   : > { %v2755_v16 = vmul.f32 1.442695, %v2735_v63  ;;  %v2753_v1 = vmul.f32 1.442695, %v2734_v6 }
 0x632   : > { %v2703_v61 = vpop.xlane.xlu1 %2702  ;;  %v2700_v7 = vpop.xlane.xlu0 %2699 }
 0x633   : > { %5349 = vpow2.f32 %v2755_v16  ;;  %v2737_v24 = vsub.f32 %v6374_v33, %v2703_v61  ;;  %v2736_v36 = vsub.f32 %v6371_v51, %v2700_v7 }
 0x634   : > { %5351 = vpow2.f32 %v2753_v1 }
 0x635   : > { %v2759_v58 = vmul.f32 1.442695, %v2737_v24  ;;  %v2757_v8 = vmul.f32 1.442695, %v2736_v36 }
 0x636   : > { %v2709_v22 = vpop.xlane.xlu1 %2708  ;;  %v2706_v14 = vpop.xlane.xlu0 %2705 }
 0x637   : > { %5353 = vpow2.f32 %v2759_v58  ;;  %v2739_v35 = vsub.f32 %v6384_v54, %v2709_v22  ;;  %v2738_v30 = vsub.f32 %v6381_v45, %v2706_v14 }
 0x638   : > { %v6448_v0 = vpop.eup %5343  ;;  %5355 = vpow2.f32 %v2757_v8 }
 0x639   : > { %v2763_v6 = vmul.f32 1.442695, %v2739_v35  ;;  %v2761_v57 = vmul.f32 1.442695, %v2738_v30  ;;  %v2779_v16 = vsel %vm612_vm2, %v6448_v0, 0.0 }
 0x63a   : > { %v2715_v33 = vpop.xlane.xlu1 %2714  ;;  %2780 = vadd.xlane.f32.xlu1 %v2779_v16  ;;  %v2712_v51 = vpop.xlane.xlu0 %2711 }
 0x63b   : > { %5357 = vpow2.f32 %v2763_v6  ;;  %v2741_v60 = vsub.f32 %v6394_v27, %v2715_v33  ;;  %v2740_v44 = vsub.f32 %v6391_v5, %v2712_v51 }
 0x63c   : > { %v6454_v20 = vpop.eup %5345  ;;  %5359 = vpow2.f32 %v2761_v57 }
 0x63d   : > { %v6456_v45 = vpop.eup %5347  ;;  %v2767_v54 = vmul.f32 1.442695, %v2741_v60  ;;  %v2765_v63 = vmul.f32 1.442695, %v2740_v44  ;;  %v2782_v1 = vsel %vm612_vm2, %v6454_v20, 0.0 }
 0x63e   : > { %v2721_v61 = vpop.xlane.xlu1 %2720  ;;  %2783 = vadd.xlane.f32.xlu0 %v2782_v1  ;;  %v2785_v7 = vsel %vm612_vm2, %v6456_v45, 0.0  ;;  %v2718_v24 = vpop.xlane.xlu0 %2717 }
 0x63f   : > { %5361 = vpow2.f32 %v2767_v54  ;;  %v2743_v27 = vsub.f32 %v6404_v15, %v2721_v61  ;;  %2786 = vadd.xlane.f32.xlu1 %v2785_v7  ;;  %v2742_v5 = vsub.f32 %v6401_v40, %v2718_v24 }
 0x640   : > { %v6464_v36 = vpop.eup %5349  ;;  %5363 = vpow2.f32 %v2765_v63 }
 0x641   : > { %v6466_v58 = vpop.eup %5351  ;;  %v2771_v8 = vmul.f32 1.442695, %v2743_v27  ;;  %v2769_v22 = vmul.f32 1.442695, %v2742_v5  ;;  %v2791_v14 = vsel %vm612_vm2, %v6464_v36, 0.0 }
 0x642   : > { %v2727_v35 = vpop.xlane.xlu1 %2726  ;;  %v2788_v30 = vsel %vm612_vm2, %v6466_v58, 0.0  ;;  %v2724_v6 = vpop.xlane.xlu0 %2723 }
 0x643   : > { %5365 = vpow2.f32 %v2771_v8  ;;  %v2745_v15 = vsub.f32 %v6414_v42, %v2727_v35  ;;  %2792 = vadd.xlane.f32.xlu1 %v2791_v14  ;;  %2789 = vadd.xlane.f32.xlu0 %v2788_v30  ;;  %v2744_v40 = vsub.f32 %v6411_v39, %v2724_v6  ;;  %v7111_v8 = vmov 0.0  }
 0x644   : > { %v6474_v57 = vpop.eup %5353  ;;  %5367 = vpow2.f32 %v2769_v22 }
 0x645   : > { %v6476_v16 = vpop.eup %5355  ;;  %v2775_v33 = vmul.f32 1.442695, %v2745_v15  ;;  %v2773_v51 = vmul.f32 1.442695, %v2744_v40  ;;  %v2797_v60 = vsel %vm612_vm2, %v6474_v57, 0.0 }
 0x646   : > { %v2794_v44 = vsel %vm612_vm2, %v6476_v16, 0.0  ;;  %v2730_v54 = vpop.xlane.xlu0 %2729 }
 0x647   : > { %5369 = vpow2.f32 %v2775_v33  ;;  %2798 = vadd.xlane.f32.xlu1 %v2797_v60  ;;  %2795 = vadd.xlane.f32.xlu0 %v2794_v44  ;;  %v2746_v42 = vsub.f32 %v6421_v62, %v2730_v54  ;;  %v2962_v54 = vpop.permute.xlu1 %2961 }
 0x648   : > { %v6483_v39 = vpop.eup %5357  ;;  %5371 = vpow2.f32 %v2773_v51 }
 0x649   : > { %v6485_v63 = vpop.eup %5359  ;;  %v2777_v1 = vmul.f32 1.442695, %v2746_v42  ;;  %v2803_v61 = vsel %vm612_vm2, %v6483_v39, 0.0 }
 0x64a   : > { %v2800_v7 = vsel %vm612_vm2, %v6485_v63, 0.0  ;;  %v2915_v24 = vpop.permute.xlu0 %2914 }
 0x64b   : > { %5373 = vpow2.f32 %v2777_v1  ;;  %2804 = vadd.xlane.f32.xlu1 %v2803_v61  ;;  %2801 = vadd.xlane.f32.xlu0 %v2800_v7  ;;  %v3009_v42 = vpop.permute.xlu1 %3008 }
 0x64c   : > { %v6491_v27 = vpop.eup %5361  ;;  %5054 = vmatpush3.bf16.msra.mxu1 %v2915_v24 }
 0x64d   : > { %v6493_v62 = vpop.eup %5363  ;;  %v2809_v5 = vsel %vm612_vm2, %v6491_v27, 0.0  ;;  %5065 = vmatprep.subr.bf16.mxu1 %v7111_v8 }
 0x64e   : > { %v2806_v22 = vsel %vm612_vm2, %v6493_v62, 0.0  ;;  %v3056_v61 = vpop.permute.xlu0 %3055 }
 0x64f   : > { %2810 = vadd.xlane.f32.xlu1 %v2809_v5  ;;  %2807 = vadd.xlane.f32.xlu0 %v2806_v22  ;;  %v6536_v1 = vpop.permute.xlu1 %3102 }
 0x650   : > { %v6500_v14 = vpop.eup %5365 }
 0x651   : > { %v6502_v35 = vpop.eup %5367  ;;  %v2815_v30 = vsel %vm612_vm2, %v6500_v14, 0.0 }
 0x652   : > { %v2812_v6 = vsel %vm612_vm2, %v6502_v35, 0.0  ;;  %v6540_v24 = vpop.permute.xlu0 %3149 }
 0x653   : > { %2816 = vadd.xlane.f32.xlu1 %v2815_v30  ;;  %2813 = vadd.xlane.f32.xlu0 %v2812_v6  ;;  %v6538_v7 = vpop.permute.xlu1 %3196 }
 0x654   : > { %v6508_v15 = vpop.eup %5369 }
 0x655   : > { %v6510_v40 = vpop.eup %5371  ;;  %v2821_v33 = vsel %vm612_vm2, %v6508_v15, 0.0 }
 0x656   : > { %v2818_v51 = vsel %vm612_vm2, %v6510_v40, 0.0 }
 0x657   : > { %2822 = vadd.xlane.f32.xlu1 %v2821_v33  ;;  %2819 = vadd.xlane.f32.xlu0 %v2818_v51 }
 0x658   : > { %v6516_v60 = vpop.eup %5373 }
 0x659   : > { %v2824_v44 = vsel %vm612_vm2, %v6516_v60, 0.0 }
 0x65b   : > { %2825 = vadd.xlane.f32.xlu0 %v2824_v44 }
 0x668   : > { %3322 = vrot.lane.b32.xlu1 %v6143_v41, %s5489_s8 }
 0x66c   : > { %3320 = vrot.lane.b32.xlu1 %v6143_v41, %s5490_s10 }
 0x670   : > { %3426 = vrot.lane.b32.xlu1 %v6153_v28, %s5489_s8 }
 0x671   : > { %3270 = vrot.lane.b32.xlu0 %v6155_v18, %s5489_s8 }
 0x674   : > { %3424 = vrot.lane.b32.xlu1 %v6153_v28, %s5490_s10 }
 0x675   : > { %3268 = vrot.lane.b32.xlu0 %v6155_v18, %s5490_s10 }
 0x678   : > { %3530 = vrot.lane.b32.xlu1 %v6167_v48, %s5489_s8 }
 0x679   : > { %3374 = vrot.lane.b32.xlu0 %v6171_v17, %s5489_s8 }
 0x67c   : > { %3528 = vrot.lane.b32.xlu1 %v6167_v48, %s5490_s10 }
 0x67d   : > { %3372 = vrot.lane.b32.xlu0 %v6171_v17, %s5490_s10 }
 0x680   : > { %3634 = vrot.lane.b32.xlu1 %v6183_v13, %s5489_s8 }
 0x681   : > { %3478 = vrot.lane.b32.xlu0 %v6187_v2, %s5489_s8 }
 0x684   : > { %3632 = vrot.lane.b32.xlu1 %v6183_v13, %s5490_s10 }
 0x685   : > { %3476 = vrot.lane.b32.xlu0 %v6187_v2, %s5490_s10 }
 0x688   : > { %3902 = vrot.lane.b32.xlu1 %v6155_v18, %s5491_s13 }
 0x689   : > { %3582 = vrot.lane.b32.xlu0 %v6199_v31, %s5489_s8 }
 0x68d   : > { %3580 = vrot.lane.b32.xlu0 %v6199_v31, %s5490_s10 }
 0x6c3   : > { %v2781_v5 = vpop.xlane.xlu1 %2780 }
 0x6c4   : > { %5375 = vrcp.f32 %v2781_v5 }
 0x6c7   : > { %v2784_v22 = vpop.xlane.xlu0 %2783 }
 0x6c8   : > { %v2787_v30 = vpop.xlane.xlu1 %2786  ;;  %5377 = vrcp.f32 %v2784_v22 }
 0x6c9   : > { %5379 = vrcp.f32 %v2787_v30 }
 0x6cc   : > { %v2793_v6 = vpop.xlane.xlu1 %2792  ;;  %v2790_v33 = vpop.xlane.xlu0 %2789 }
 0x6cd   : > { %5381 = vrcp.f32 %v2790_v33 }
 0x6ce   : > { %5383 = vrcp.f32 %v2793_v6 }
 0x6d0   : > { %v2799_v51 = vpop.xlane.xlu1 %2798  ;;  %v2796_v44 = vpop.xlane.xlu0 %2795 }
 0x6d1   : > { %5385 = vrcp.f32 %v2796_v44  ;;  %v5376_v29 = vpop.eup %5375 }
 0x6d2   : > { %5387 = vrcp.f32 %v2799_v51  ;;  %v2843_v4 = vmul.f32 %v5376_v29, %v6448_v0 }
 0x6d4   : > { %v2805_v19 = vpop.xlane.xlu1 %2804  ;;  %v2802_v50 = vpop.xlane.xlu0 %2801 }
 0x6d5   : > { %v5378_v21 = vpop.eup %5377  ;;  %5389 = vrcp.f32 %v2802_v50 }
 0x6d6   : > { %v2844_v5 = vmul.f32 %v5378_v21, %v6454_v20  ;;  %5391 = vrcp.f32 %v2805_v19  ;;  %v5380_v55 = vpop.eup %5379 }
 0x6d7   : > { %v2845_v29 = vmul.f32 %v5380_v55, %v6456_v45 }
 0x6d8   : > { %v2811_v22 = vpop.xlane.xlu1 %2810  ;;  %v2808_v30 = vpop.xlane.xlu0 %2807  ;;  %v2859_v56 = vpack.c.bf16 %v2844_v5, %v2843_v4 }
 0x6d9   : > { %5393 = vrcp.f32 %v2808_v30 }
 0x6da   : > { %5050 = vmatmul.mubr.msk.bf16.vlgmr.msra.gmra.mxu0 %vm612_vm2, %v2859_v56  ;;  %v5382_v6 = vpop.eup %5381  ;;  %5395 = vrcp.f32 %v2811_v22 }
 0x6db   : > { %5060 = vmatpush3.bf16.msra.mxu0 %v2962_v54  ;;  %5061 = vmatprep.mubr.msk.bf16.mxu0 %vm5480_vm0, %v7111_v8  ;;  %v2846_v21 = vmul.f32 %v5382_v6, %v6466_v58  ;;  %v5384_v19 = vpop.eup %5383 }
 0x6dc   : > { %v2817_v33 = vpop.xlane.xlu1 %2816  ;;  %v2814_v50 = vpop.xlane.xlu0 %2813  ;;  %5071 = vmatprep.subr.bf16.mxu0 %v7111_v8  ;;  %v2847_v54 = vmul.f32 %v5384_v19, %v6464_v36 }
 0x6dd   : > { %5397 = vrcp.f32 %v2814_v50  ;;  %v2860_v4 = vpack.c.bf16 %v2846_v21, %v2845_v29 }
 0x6de   : > { %v5386_v0 = vpop.eup %5385  ;;  %5399 = vrcp.f32 %v2817_v33 }
 0x6df   : > { %5056 = vmatmul.mubr.msk.bf16.vlgmr.msra.gmra.mxu1 %vm612_vm2, %v2860_v4  ;;  %v2848_v51 = vmul.f32 %v5386_v0, %v6476_v16  ;;  %v5388_v44 = vpop.eup %5387 }
 0x6e0   : > { %v2823_v56 = vpop.xlane.xlu1 %2822  ;;  %v2820_v20 = vpop.xlane.xlu0 %2819  ;;  %5066 = vmatpush3.bf16.msra.mxu1 %v3009_v42  ;;  %5067 = vmatprep.mubr.msk.bf16.mxu1 %vm5480_vm0, %v7111_v8  ;;  %v2849_v5 = vmul.f32 %v5388_v44, %v6474_v57 }
 0x6e1   : > { %5401 = vrcp.f32 %v2820_v20  ;;  %v2861_v55 = vpack.c.bf16 %v2848_v51, %v2847_v54  ;;  %5077 = vmatprep.subr.bf16.mxu1 %v7111_v8 }
 0x6e2   : > { %v5390_v45 = vpop.eup %5389  ;;  %5403 = vrcp.f32 %v2823_v56 }
 0x6e3   : > { %5062 = vmatmul.mubr.msk.bf16.vlgmr.msra.gmra.mxu0 %vm612_vm2, %v2861_v55  ;;  %v2850_v36 = vmul.f32 %v5390_v45, %v6485_v63  ;;  %v5392_v22 = vpop.eup %5391 }
 0x6e4   : > { %v2826_v58 = vpop.xlane.xlu0 %2825  ;;  %5072 = vmatpush3.bf16.msra.mxu0 %v3056_v61  ;;  %5073 = vmatprep.mubr.msk.bf16.mxu0 %vm5480_vm0, %v7111_v8  ;;  %v3323_v30 = vpop.permute.xlu1 %3322  ;;  %v2851_v6 = vmul.f32 %v5392_v22, %v6483_v39 }
 0x6e5   : > { %5405 = vrcp.f32 %v2826_v58  ;;  %v2862_v16 = vpack.c.bf16 %v2850_v36, %v2849_v5  ;;  %5083 = vmatprep.subr.bf16.mxu0 %v7111_v8 }
 0x6e6   : > { %v5394_v42 = vpop.eup %5393 }
 0x6e7   : > { %5068 = vmatmul.mubr.msk.bf16.vlgmr.msra.gmra.mxu1 %vm612_vm2, %v2862_v16  ;;  %v2852_v33 = vmul.f32 %v5394_v42, %v6493_v62  ;;  %v5396_v50 = vpop.eup %5395 }
 0x6e8   : > { %v3271_v57 = vpop.permute.xlu0 %3270  ;;  %5078 = vmatpush3.bf16.msra.mxu1 %v6536_v1  ;;  %5079 = vmatprep.mubr.msk.bf16.mxu1 %vm5480_vm0, %v7111_v8  ;;  %v2853_v29 = vmul.f32 %v5396_v50, %v6491_v27  ;;  %v3321_v62 = vpop.permute.xlu1 %3320 }
 0x6e9   : > { %v2863_v63 = vpack.c.bf16 %v2852_v33, %v2851_v6  ;;  %5089 = vmatprep.subr.bf16.mxu1 %v7111_v8  ;;  %v3276_v20 = vsel %vm180_vm1, %v3271_v57, 0 }
 0x6ea   : > { %v5398_v61 = vpop.eup %5397 }
 0x6eb   : > { %5074 = vmatmul.mubr.msk.bf16.vlgmr.msra.gmra.mxu0 %vm612_vm2, %v2863_v63  ;;  %v2854_v21 = vmul.f32 %v5398_v61, %v6502_v35  ;;  %v5400_v19 = vpop.eup %5399 }
 0x6ec   : > { %v3269_v39 = vpop.permute.xlu0 %3268  ;;  %5084 = vmatpush3.bf16.msra.mxu0 %v6540_v24  ;;  %5085 = vmatprep.mubr.msk.bf16.mxu0 %vm5480_vm0, %v7111_v8  ;;  %v2855_v56 = vmul.f32 %v5400_v19, %v6500_v14  ;;  %v3427_v55 = vpop.permute.xlu1 %3426 }
 0x6ed   : > { %v2864_v1 = vpack.c.bf16 %v2854_v21, %v2853_v29  ;;  %5095 = vmatprep.subr.bf16.mxu0 %v7111_v8  ;;  %v3432_v58 = vsel %vm180_vm1, %v3427_v55, 0 }
 0x6ee   : > { %v5402_v4 = vpop.eup %5401 }
 0x6ef   : > { %v5404_v0 = vpop.eup %5403  ;;  %5080 = vmatmul.mubr.msk.bf16.vlgmr.msra.gmra.mxu1 %vm612_vm2, %v2864_v1  ;;  %v2856_v27 = vmul.f32 %v5402_v4, %v6510_v40 }
 0x6f0   : > { %v3375_v35 = vpop.permute.xlu0 %3374  ;;  %5090 = vmatpush3.bf16.msra.mxu1 %v6538_v7  ;;  %5091 = vmatprep.mubr.msk.bf16.mxu1 %vm5480_vm0, %v7111_v8  ;;  %v2857_v51 = vmul.f32 %v5404_v0, %v6508_v15  ;;  %v3328_v7 = vsel %vm180_vm1, %v3323_v30, 0  ;;  %v3425_v15 = vpop.permute.xlu1 %3424 }
 0x6f1   : > { %v2865_v54 = vpack.c.bf16 %v2856_v27, %v2855_v56  ;;  %5101 = vmatprep.subr.bf16.mxu1 %v7111_v8 }
 0x6f2   : > { %v5406_v24 = vpop.eup %5405 }
 0x6f3   : > { %v2858_v44 = vmul.f32 %v5406_v24, %v6516_v60  ;;  %5086 = vmatmul.mubr.msk.bf16.vlgmr.msra.gmra.mxu0 %vm612_vm2, %v2865_v54  ;;  %v3380_v60 = vsel %vm180_vm1, %v3375_v35, 0 }
 0x6f4   : > { %5096 = vmatpush3.bf16.xpose.msra.mxu0 %v3276_v20  ;;  %5097 = vmatprep.mubr.msk.bf16.mxu0 %vm5480_vm0, %v7111_v8  ;;  %v3373_v40 = vpop.permute.xlu0 %3372  ;;  %v3531_v5 = vpop.permute.xlu1 %3530 }
 0x6f5   : > { %v2866_v14 = vpack.c.bf16 %v2858_v44, %v2857_v51  ;;  %5107 = vmatprep.subr.bf16.mxu0 %v7111_v8  ;;  %v3536_v42 = vsel %vm180_vm1, %v3531_v5, 0 }
 0x6f7   : > { %5092 = vmatmul.mubr.msk.bf16.vlgmr.msra.gmra.mxu1 %vm612_vm2, %v2866_v14 }
 0x6f8   : > { %5102 = vmatpush3.bf16.xpose.msra.mxu1 %v3328_v7  ;;  %5103 = vmatprep.mubr.msk.bf16.mxu1 %vm5480_vm0, %v7111_v8  ;;  %v3479_v45 = vpop.permute.xlu0 %3478  ;;  %v3529_v16 = vpop.permute.xlu1 %3528 }
 0x6f9   : > { %5113 = vmatprep.subr.bf16.mxu1 %v7111_v8  ;;  %v3484_v22 = vsel %vm180_vm1, %v3479_v45, 0 }
 0x6fb   : > { %5098 = vmatmul.mubr.msk.bf16.vlgmr.msra.gmra.mxu0 %vm180_vm1, %v3269_v39 }
 0x6fc   : > { %5108 = vmatpush3.bf16.xpose.msra.mxu0 %v3380_v60  ;;  %5109 = vmatprep.mubr.msk.bf16.mxu0 %vm5480_vm0, %v7111_v8  ;;  %v3477_v36 = vpop.permute.xlu0 %3476  ;;  %v3635_v33 = vpop.permute.xlu1 %3634 }
 0x6fd   : > { %5119 = vmatprep.subr.bf16.mxu0 %v7111_v8  ;;  %v3640_v57 = vsel %vm180_vm1, %v3635_v33, 0  ;;  %v6669_v33 = vld [vmem:[%s7091_s1 + $0x30] sm:$0xff] }
 0x6ff   : > { %5104 = vmatmul.mubr.msk.bf16.vlgmr.msra.gmra.mxu1 %vm180_vm1, %v3321_v62 }
 0x700   : > { %5114 = vmatpush3.bf16.xpose.msra.mxu1 %v3432_v58  ;;  %5115 = vmatprep.mubr.msk.bf16.mxu1 %vm5480_vm0, %v7111_v8  ;;  %v3583_v30 = vpop.permute.xlu0 %3582  ;;  %v3633_v63 = vpop.permute.xlu1 %3632 }
 0x701   : > { %5125 = vmatprep.subr.bf16.mxu1 %v7111_v8  ;;  %v3588_v6 = vsel %vm180_vm1, %v3583_v30, 0 }
 0x703   : > { %5110 = vmatmul.mubr.msk.bf16.vlgmr.msra.gmra.mxu0 %vm180_vm1, %v3373_v40 }
 0x704   : > { %5120 = vmatpush3.bf16.xpose.msra.mxu0 %v3484_v22  ;;  %5121 = vmatprep.mubr.msk.bf16.mxu0 %vm5480_vm0, %v7111_v8  ;;  %v3581_v50 = vpop.permute.xlu0 %3580  ;;  %v3903_v61 = vpop.permute.xlu1 %3902 }
 0x705   : > { %5131 = vmatprep.subr.bf16.mxu0 %v7111_v8 }
 0x707   : > { %5116 = vmatmul.mubr.msk.bf16.vlgmr.msra.gmra.mxu1 %vm180_vm1, %v3425_v15 }
 0x708   : > { %5126 = vmatpush3.bf16.xpose.msra.mxu1 %v3536_v42  ;;  %5127 = vmatprep.mubr.msk.bf16.mxu1 %vm5480_vm0, %v7111_v8 }
 0x709   : > { %5137 = vmatprep.subr.bf16.mxu1 %v7111_v8 }
 0x70b   : > { %5122 = vmatmul.mubr.msk.bf16.vlgmr.msra.gmra.mxu0 %vm180_vm1, %v3477_v36 }
 0x70c   : > { %5132 = vmatpush3.bf16.xpose.msra.mxu0 %v3588_v6  ;;  %5133 = vmatprep.mubr.msk.bf16.mxu0 %vm5480_vm0, %v7111_v8 }
 0x70d   : > { %5143 = vmatprep.subr.bf16.mxu0 %v7111_v8 }
 0x70f   : > { %5128 = vmatmul.mubr.msk.bf16.vlgmr.msra.gmra.mxu1 %vm180_vm1, %v3529_v16 }
 0x710   : > { %5138 = vmatpush3.bf16.xpose.msra.mxu1 %v3640_v57  ;;  %5139 = vmatprep.mubr.msk.bf16.mxu1 %vm5480_vm0, %v7111_v8 }
 0x711   : > { %5149 = vmatprep.subr.bf16.mxu1 %v7111_v8 }
 0x713   : > { %5134 = vmatmul.mubr.msk.bf16.vlgmr.msra.gmra.mxu0 %vm180_vm1, %v3581_v50 }
 0x714   : > { %5145 = vmatprep.mubr.msk.bf16.mxu0 %vm5480_vm0, %v7111_v8  ;;  %5144 = vmatpush3.bf16.msra.mxu0 %v3903_v61 }
 0x715   : > { %5155 = vmatprep.subr.bf16.mxu0 %v7111_v8 }
 0x717   : > { %5140 = vmatmul.mubr.msk.bf16.vlgmr.msra.gmra.mxu1 %vm180_vm1, %v3633_v63 }
 0x718   : > { %5151 = vmatprep.mubr.msk.bf16.mxu1 %vm5480_vm0, %v7111_v8 }
 0x79a   : > { %v6634_v29 = vpop.f32.mrf.mxu0 }
 0x79c   : > { %v5051_v21 = vpop.f32.mrf.mxu0 }
 0x79e   : > { %v6636_v39 = vpop.f32.mrf.mxu0 }
 0x79f   : > { %v6638_v19 = vpop.f32.mrf.mxu1 }
 0x7a0   : > { %v5052_v62 = vpop.f32.mrf.mxu0 }
 0x7a1   : > { %v5057_v1 = vpop.f32.mrf.mxu1  ;;  %v6677_v62 = vld [vmem:[%s7091_s1 + $0x38] sm:$0xff] }
 0x7a3   : > { %v6640_v4 = vpop.f32.mrf.mxu1  ;;  %v6642_v0 = vpop.f32.mrf.mxu0 }
 0x7a5   : > { %v5058_v56 = vpop.f32.mrf.mxu1  ;;  %v5063_v27 = vpop.f32.mrf.mxu0 }
 0x7a7   : > { %v6644_v18 = vpop.f32.mrf.mxu0  ;;  %v6646_v35 = vpop.f32.mrf.mxu1 }
 0x7a9   : > { %v5064_v24 = vpop.f32.mrf.mxu0  ;;  %v5069_v20 = vpop.f32.mrf.mxu1 }
 0x7ab   : > { %v6648_v54 = vpop.f32.mrf.mxu1  ;;  %v6650_v51 = vpop.f32.mrf.mxu0 }
 0x7ad   : > { %v5070_v44 = vpop.f32.mrf.mxu1  ;;  %v5075_v55 = vpop.f32.mrf.mxu0 }
 0x7af   : > { %v6652_v14 = vpop.f32.mrf.mxu0  ;;  %v6654_v40 = vpop.f32.mrf.mxu1 }
 0x7b0   : > { %7112 = vst [vmem:[#allocation18_spill] sm:$0xff] %v6654_v40 }
 0x7b1   : > { %v5076_v7 = vpop.f32.mrf.mxu0  ;;  %v5081_v15 = vpop.f32.mrf.mxu1 }
 0x7b3   : > { %v6656_v60 = vpop.f32.mrf.mxu1  ;;  %v6658_v45 = vpop.f32.mrf.mxu0 }
 0x7b4   : > { %7113 = vst [vmem:[#allocation19_spill] sm:$0xff] %v6658_v45 }
 0x7b5   : > { %v5082_v58 = vpop.f32.mrf.mxu1  ;;  %v5087_v5 = vpop.f32.mrf.mxu0 }
 0x7b7   : > { %v6660_v36 = vpop.f32.mrf.mxu0  ;;  %v6662_v22 = vpop.f32.mrf.mxu1 }
 0x7b8   : > { %7114 = vst [vmem:[#allocation20_spill] sm:$0xff] %v6662_v22 }
 0x7b9   : > { %v5088_v16 = vpop.f32.mrf.mxu0  ;;  %v5093_v42 = vpop.f32.mrf.mxu1 }
 0x7bb   : > { %v6664_v30 = vpop.f32.mrf.mxu1  ;;  %v3312_v6 = vpop.f32.mrf.mxu0 }
 0x7bc   : > { %7115 = vst [vmem:[#allocation21_spill] sm:$0xff] %v6664_v30  ;;  %v3683_v57 = vmul.f32 0.35355338, %v3312_v6 }
 0x7bd   : > { %v5094_v50 = vpop.f32.mrf.mxu1  ;;  %v5099_v63 = vpop.f32.mrf.mxu0 }
 0x7be   : > { %v6672_v61 = vadd.f32 %v6669_v33, %v3683_v57 }
 0x7bf   : > { %v3315_v21 = vpop.f32.mrf.mxu0  ;;  %v3364_v1 = vpop.f32.mrf.mxu1 }
 0x7c0   : > { %v3684_v56 = vmul.f32 0.35355338, %v3315_v21  ;;  %v3685_v27 = vmul.f32 0.35355338, %v3364_v1  ;;  %v3718_v24 = vsel %vm612_vm2, %v6672_v61, -inf }
 0x7c1   : > { %v5105_v20 = vpop.f32.mrf.mxu1  ;;  %3719 = vmax.xlane.f32.xlu0 %v3718_v24  ;;  %v5100_v44 = vpop.f32.mrf.mxu0 }
 0x7c2   : > { %v6682_v55 = vadd.f32 %v6677_v62, %v3684_v56  ;;  %v6685_v7 = vadd.f32 %v6669_v33, %v3685_v27 }
 0x7c3   : > { %v3367_v15 = vpop.f32.mrf.mxu1  ;;  %v3416_v58 = vpop.f32.mrf.mxu0 }
 0x7c4   : > { %v3686_v5 = vmul.f32 0.35355338, %v3367_v15  ;;  %v3687_v16 = vmul.f32 0.35355338, %v3416_v58  ;;  %v3724_v42 = vsel %vm612_vm2, %v6685_v7, -inf  ;;  %v3721_v6 = vsel %vm612_vm2, %v6682_v55, -inf }
 0x7c5   : > { %v5106_v57 = vpop.f32.mrf.mxu1  ;;  %3725 = vmax.xlane.f32.xlu0 %v3724_v42  ;;  %3722 = vmax.xlane.f32.xlu1 %v3721_v6  ;;  %v5111_v50 = vpop.f32.mrf.mxu0 }
 0x7c6   : > { %v6692_v63 = vadd.f32 %v6677_v62, %v3686_v5  ;;  %v6695_v21 = vadd.f32 %v6669_v33, %v3687_v16 }
 0x7c7   : > { %v3419_v1 = vpop.f32.mrf.mxu0  ;;  %v3468_v56 = vpop.f32.mrf.mxu1 }
 0x7c8   : > { %v3688_v27 = vmul.f32 0.35355338, %v3419_v1  ;;  %v3689_v24 = vmul.f32 0.35355338, %v3468_v56  ;;  %v3727_v20 = vsel %vm612_vm2, %v6692_v63, -inf  ;;  %v3730_v44 = vsel %vm612_vm2, %v6695_v21, -inf }
 0x7c9   : > { %v5117_v15 = vpop.f32.mrf.mxu1  ;;  %3728 = vmax.xlane.f32.xlu0 %v3727_v20  ;;  %3731 = vmax.xlane.f32.xlu1 %v3730_v44  ;;  %v5112_v58 = vpop.f32.mrf.mxu0 }
 0x7ca   : > { %v6702_v5 = vadd.f32 %v6677_v62, %v3688_v27  ;;  %v6705_v16 = vadd.f32 %v6669_v33, %v3689_v24 }
 0x7cb   : > { %v3471_v42 = vpop.f32.mrf.mxu1  ;;  %v3520_v6 = vpop.f32.mrf.mxu0 }
 0x7cc   : > { %v3690_v57 = vmul.f32 0.35355338, %v3471_v42  ;;  %v3691_v50 = vmul.f32 0.35355338, %v3520_v6  ;;  %v3736_v1 = vsel %vm612_vm2, %v6705_v16, -inf  ;;  %v3733_v56 = vsel %vm612_vm2, %v6702_v5, -inf }
 0x7cd   : > { %v5118_v15 = vpop.f32.mrf.mxu1  ;;  %3737 = vmax.xlane.f32.xlu1 %v3736_v1  ;;  %3734 = vmax.xlane.f32.xlu0 %v3733_v56  ;;  %v5123_v20 = vpop.f32.mrf.mxu0 }
 0x7ce   : > { %v6712_v27 = vadd.f32 %v6677_v62, %v3690_v57  ;;  %v6715_v24 = vadd.f32 %v6669_v33, %v3691_v50 }
 0x7cf   : > { %v3523_v44 = vpop.f32.mrf.mxu0  ;;  %v3572_v58 = vpop.f32.mrf.mxu1 }
 0x7d0   : > { %v3692_v42 = vmul.f32 0.35355338, %v3523_v44  ;;  %v3693_v6 = vmul.f32 0.35355338, %v3572_v58  ;;  %v3739_v37 = vsel %vm612_vm2, %v6712_v27, -inf  ;;  %v3742_v46 = vsel %vm612_vm2, %v6715_v24, -inf }
 0x7d1   : > { %v5129_v15 = vpop.f32.mrf.mxu1  ;;  %3740 = vmax.xlane.f32.xlu0 %v3739_v37  ;;  %3743 = vmax.xlane.f32.xlu1 %v3742_v46  ;;  %v5124_v1 = vpop.f32.mrf.mxu0 }
 0x7d2   : > { %v6722_v57 = vadd.f32 %v6677_v62, %v3692_v42  ;;  %v6725_v50 = vadd.f32 %v6669_v33, %v3693_v6 }
 0x7d3   : > { %v3575_v56 = vpop.f32.mrf.mxu1  ;;  %v3624_v20 = vpop.f32.mrf.mxu0 }
 0x7d4   : > { %v3694_v44 = vmul.f32 0.35355338, %v3575_v56  ;;  %v3695_v58 = vmul.f32 0.35355338, %v3624_v20  ;;  %v3748_v34 = vsel %vm612_vm2, %v6725_v50, -inf  ;;  %v3745_v22 = vsel %vm612_vm2, %v6722_v57, -inf }
 0x7d5   : > { %v5130_v15 = vpop.f32.mrf.mxu1  ;;  %3749 = vmax.xlane.f32.xlu1 %v3748_v34  ;;  %3746 = vmax.xlane.f32.xlu0 %v3745_v22  ;;  %v5135_v46 = vpop.f32.mrf.mxu0 }
 0x7d6   : > { %v6732_v37 = vadd.f32 %v6677_v62, %v3694_v44  ;;  %v6735_v42 = vadd.f32 %v6669_v33, %v3695_v58 }
 0x7d7   : > { %v3627_v6 = vpop.f32.mrf.mxu0  ;;  %v3676_v1 = vpop.f32.mrf.mxu1 }
 0x7d8   : > { %v3696_v56 = vmul.f32 0.35355338, %v3627_v6  ;;  %v3697_v20 = vmul.f32 0.35355338, %v3676_v1  ;;  %v3751_v45 = vsel %vm612_vm2, %v6732_v37, -inf  ;;  %v3754_v40 = vsel %vm612_vm2, %v6735_v42, -inf }
 0x7d9   : > { %v5141_v15 = vpop.f32.mrf.mxu1  ;;  %3752 = vmax.xlane.f32.xlu0 %v3751_v45  ;;  %3755 = vmax.xlane.f32.xlu1 %v3754_v40  ;;  %v5136_v34 = vpop.f32.mrf.mxu0 }
 0x7da   : > { %v6742_v22 = vadd.f32 %v6677_v62, %v3696_v56  ;;  %v6745_v44 = vadd.f32 %v6669_v33, %v3697_v20 }
 0x7db   : > { %v3679_v58 = vpop.f32.mrf.mxu1 }
 0x7dc   : > { %v3698_v46 = vmul.f32 0.35355338, %v3679_v58  ;;  %v3760_v6 = vsel %vm612_vm2, %v6745_v44, -inf  ;;  %v3757_v1 = vsel %vm612_vm2, %v6742_v22, -inf }
 0x7dd   : > { %v5142_v30 = vpop.f32.mrf.mxu1  ;;  %3761 = vmax.xlane.f32.xlu1 %v3760_v6  ;;  %3758 = vmax.xlane.f32.xlu0 %v3757_v1 }
 0x7de   : > { %v6752_v40 = vadd.f32 %v6677_v62, %v3698_v46 }
 0x7e0   : > { %v3763_v45 = vsel %vm612_vm2, %v6752_v40, -inf }
 0x7e1   : > { %3764 = vmax.xlane.f32.xlu0 %v3763_v45 }
 0x7ee   : > { %3996 = vrot.lane.b32.xlu1 %v6171_v17, %s5491_s13 }
 0x7f2   : > { %4043 = vrot.lane.b32.xlu1 %v6153_v28, %s5491_s13 }
 0x7f6   : > { %4137 = vrot.lane.b32.xlu1 %v6167_v48, %s5491_s13 }
 0x7f7   : > { %3949 = vrot.lane.b32.xlu0 %v6143_v41, %s5491_s13 }
 0x7fb   : > { %4090 = vrot.lane.b32.xlu0 %v6187_v2, %s5491_s13 }
 0x84a   : > { %v3720_v30 = vpop.xlane.xlu0 %3719 }
 0x84b   : > { %v3766_v33 = vsub.f32 %v6672_v61, %v3720_v30 }
 0x84d   : > { %v3782_v62 = vmul.f32 1.442695, %v3766_v33 }
 0x84e   : > { %v3723_v56 = vpop.xlane.xlu1 %3722  ;;  %v3726_v20 = vpop.xlane.xlu0 %3725 }
 0x84f   : > { %5407 = vpow2.f32 %v3782_v62  ;;  %v3767_v17 = vsub.f32 %v6682_v55, %v3723_v56  ;;  %v3768_v28 = vsub.f32 %v6685_v7, %v3726_v20 }
 0x851   : > { %v3784_v15 = vmul.f32 1.442695, %v3767_v17  ;;  %v3786_v34 = vmul.f32 1.442695, %v3768_v28 }
 0x852   : > { %v3732_v48 = vpop.xlane.xlu1 %3731  ;;  %v3729_v58 = vpop.xlane.xlu0 %3728 }
 0x853   : > { %5409 = vpow2.f32 %v3784_v15  ;;  %v3770_v41 = vsub.f32 %v6695_v21, %v3732_v48  ;;  %v3769_v2 = vsub.f32 %v6692_v63, %v3729_v58 }
 0x854   : > { %5411 = vpow2.f32 %v3786_v34 }
 0x855   : > { %v3790_v46 = vmul.f32 1.442695, %v3770_v41  ;;  %v3788_v61 = vmul.f32 1.442695, %v3769_v2 }
 0x856   : > { %v3738_v6 = vpop.xlane.xlu1 %3737  ;;  %v3735_v1 = vpop.xlane.xlu0 %3734 }
 0x857   : > { %5413 = vpow2.f32 %v3790_v46  ;;  %v3772_v45 = vsub.f32 %v6705_v16, %v3738_v6  ;;  %v3771_v55 = vsub.f32 %v6702_v5, %v3735_v1 }
 0x858   : > { %5415 = vpow2.f32 %v3788_v61 }
 0x859   : > { %v3794_v7 = vmul.f32 1.442695, %v3772_v45  ;;  %v3792_v30 = vmul.f32 1.442695, %v3771_v55 }
 0x85a   : > { %v3744_v33 = vpop.xlane.xlu1 %3743  ;;  %v3741_v62 = vpop.xlane.xlu0 %3740 }
 0x85b   : > { %5417 = vpow2.f32 %v3794_v7  ;;  %v3774_v21 = vsub.f32 %v6715_v24, %v3744_v33  ;;  %v3773_v63 = vsub.f32 %v6712_v27, %v3741_v62 }
 0x85c   : > { %v6775_v56 = vpop.eup %5407  ;;  %5419 = vpow2.f32 %v3792_v30 }
 0x85d   : > { %v3798_v20 = vmul.f32 1.442695, %v3774_v21  ;;  %v3796_v17 = vmul.f32 1.442695, %v3773_v63  ;;  %v3814_v16 = vsel %vm612_vm2, %v6775_v56, 0.0 }
 0x85e   : > { %v3750_v28 = vpop.xlane.xlu1 %3749  ;;  %3815 = vadd.xlane.f32.xlu1 %v3814_v16  ;;  %v3747_v5 = vpop.xlane.xlu0 %3746 }
 0x85f   : > { %5421 = vpow2.f32 %v3798_v20  ;;  %v3776_v15 = vsub.f32 %v6725_v50, %v3750_v28  ;;  %v3775_v34 = vsub.f32 %v6722_v57, %v3747_v5 }
 0x860   : > { %v6781_v48 = vpop.eup %5409  ;;  %5423 = vpow2.f32 %v3796_v17 }
 0x861   : > { %v6783_v27 = vpop.eup %5411  ;;  %v3802_v24 = vmul.f32 1.442695, %v3776_v15  ;;  %v3800_v58 = vmul.f32 1.442695, %v3775_v34  ;;  %v3817_v41 = vsel %vm612_vm2, %v6781_v48, 0.0 }
 0x862   : > { %v3756_v2 = vpop.xlane.xlu1 %3755  ;;  %3818 = vadd.xlane.f32.xlu0 %v3817_v41  ;;  %v3820_v46 = vsel %vm612_vm2, %v6783_v27, 0.0  ;;  %v3753_v61 = vpop.xlane.xlu0 %3752 }
 0x863   : > { %5425 = vpow2.f32 %v3802_v24  ;;  %v3778_v50 = vsub.f32 %v6735_v42, %v3756_v2  ;;  %3821 = vadd.xlane.f32.xlu1 %v3820_v46  ;;  %v3777_v57 = vsub.f32 %v6732_v37, %v3753_v61 }
 0x864   : > { %v6791_v6 = vpop.eup %5413  ;;  %5427 = vpow2.f32 %v3800_v58 }
 0x865   : > { %v6793_v1 = vpop.eup %5415  ;;  %v3806_v45 = vmul.f32 1.442695, %v3778_v50  ;;  %v3804_v55 = vmul.f32 1.442695, %v3777_v57  ;;  %v3826_v7 = vsel %vm612_vm2, %v6791_v6, 0.0 }
 0x866   : > { %v3762_v30 = vpop.xlane.xlu1 %3761  ;;  %v3823_v33 = vsel %vm612_vm2, %v6793_v1, 0.0  ;;  %v3759_v62 = vpop.xlane.xlu0 %3758 }
 0x867   : > { %5429 = vpow2.f32 %v3806_v45  ;;  %v3780_v42 = vsub.f32 %v6745_v44, %v3762_v30  ;;  %3827 = vadd.xlane.f32.xlu1 %v3826_v7  ;;  %3824 = vadd.xlane.f32.xlu0 %v3823_v33  ;;  %v3779_v37 = vsub.f32 %v6742_v22, %v3759_v62 }
 0x868   : > { %v6801_v21 = vpop.eup %5417  ;;  %5431 = vpow2.f32 %v3804_v55 }
 0x869   : > { %v6803_v63 = vpop.eup %5419  ;;  %v3810_v20 = vmul.f32 1.442695, %v3780_v42  ;;  %v3808_v17 = vmul.f32 1.442695, %v3779_v37  ;;  %v3832_v16 = vsel %vm612_vm2, %v6801_v21, 0.0 }
 0x86a   : > { %v3829_v28 = vsel %vm612_vm2, %v6803_v63, 0.0  ;;  %v3765_v5 = vpop.xlane.xlu0 %3764 }
 0x86b   : > { %5433 = vpow2.f32 %v3810_v20  ;;  %3833 = vadd.xlane.f32.xlu1 %v3832_v16  ;;  %3830 = vadd.xlane.f32.xlu0 %v3829_v28  ;;  %v3781_v44 = vsub.f32 %v6752_v40, %v3765_v5 }
 0x86c   : > { %v6810_v22 = vpop.eup %5421  ;;  %5435 = vpow2.f32 %v3808_v17 }
 0x86d   : > { %v6812_v15 = vpop.eup %5423  ;;  %v3812_v34 = vmul.f32 1.442695, %v3781_v44  ;;  %v3838_v24 = vsel %vm612_vm2, %v6810_v22, 0.0 }
 0x86e   : > { %v3835_v58 = vsel %vm612_vm2, %v6812_v15, 0.0  ;;  %v3950_v41 = vpop.permute.xlu0 %3949 }
 0x86f   : > { %5437 = vpow2.f32 %v3812_v34  ;;  %3839 = vadd.xlane.f32.xlu1 %v3838_v24  ;;  %3836 = vadd.xlane.f32.xlu0 %v3835_v58 }
 0x870   : > { %v6818_v2 = vpop.eup %5425  ;;  %5150 = vmatpush3.bf16.msra.mxu1 %v3950_v41 }
 0x871   : > { %v6820_v40 = vpop.eup %5427  ;;  %v3844_v46 = vsel %vm612_vm2, %v6818_v2, 0.0  ;;  %5161 = vmatprep.subr.bf16.mxu1 %v7111_v8 }
 0x872   : > { %v3841_v61 = vsel %vm612_vm2, %v6820_v40, 0.0 }
 0x873   : > { %3845 = vadd.xlane.f32.xlu1 %v3844_v46  ;;  %3842 = vadd.xlane.f32.xlu0 %v3841_v61 }
 0x874   : > { %v6827_v50 = vpop.eup %5429 }
 0x875   : > { %v6829_v57 = vpop.eup %5431  ;;  %v3850_v45 = vsel %vm612_vm2, %v6827_v50, 0.0 }
 0x876   : > { %v3847_v55 = vsel %vm612_vm2, %v6829_v57, 0.0 }
 0x877   : > { %3851 = vadd.xlane.f32.xlu1 %v3850_v45  ;;  %3848 = vadd.xlane.f32.xlu0 %v3847_v55 }
 0x878   : > { %v6835_v7 = vpop.eup %5433 }
 0x879   : > { %v6837_v30 = vpop.eup %5435  ;;  %v3856_v33 = vsel %vm612_vm2, %v6835_v7, 0.0 }
 0x87a   : > { %v3853_v62 = vsel %vm612_vm2, %v6837_v30, 0.0 }
 0x87b   : > { %3857 = vadd.xlane.f32.xlu1 %v3856_v33  ;;  %3854 = vadd.xlane.f32.xlu0 %v3853_v62 }
 0x87c   : > { %v6843_v42 = vpop.eup %5437 }
 0x87d   : > { %v3859_v37 = vsel %vm612_vm2, %v6843_v42, 0.0 }
 0x87f   : > { %3860 = vadd.xlane.f32.xlu0 %v3859_v37 }
 0x88c   : > { %4231 = vrot.lane.b32.xlu1 %v6183_v13, %s5491_s13  ;;  %v7116_v13 = vld [vmem:[#allocation21_spill] sm:$0xff] }
 0x890   : > { %4296 = vrot.lane.b32.xlu1 %v6305_v59, %s5492_s18  ;;  %v7119_v59 = vld [vmem:[#allocation20_spill] sm:$0xff] }
 0x894   : > { %4300 = vrot.lane.b32.xlu1 %v6309_v25, %s5492_s18 }
 0x895   : > { %4184 = vrot.lane.b32.xlu0 %v6199_v31, %s5491_s13  ;;  %v7117_v31 = vld [vmem:[#allocation18_spill] sm:$0xff] }
 0x898   : > { %4304 = vrot.lane.b32.xlu1 %v6313_v43, %s5492_s18  ;;  %v4091_v43 = vpop.permute.xlu0 %4090 }
 0x899   : > { %4294 = vrot.lane.b32.xlu0 %v6303_v53, %s5492_s18  ;;  %v7118_v53 = vld [vmem:[#allocation19_spill] sm:$0xff] }
 0x89c   : > { %4308 = vrot.lane.b32.xlu1 %v6317_v3, %s5492_s18 }
 0x89d   : > { %4298 = vrot.lane.b32.xlu0 %v6307_v49, %s5492_s18  ;;  %v3997_v49 = vpop.permute.xlu1 %3996 }
 0x8a0   : > { %4312 = vrot.lane.b32.xlu1 %v6321_v12, %s5492_s18 }
 0x8a1   : > { %4302 = vrot.lane.b32.xlu0 %v6311_v26, %s5492_s18  ;;  %v4044_v25 = vpop.permute.xlu1 %4043 }
 0x8a4   : > { %4316 = vrot.lane.b32.xlu1 %v6325_v10, %s5492_s18 }
 0x8a5   : > { %4306 = vrot.lane.b32.xlu0 %v6315_v52, %s5492_s18  ;;  %v6883_v26 = vpop.permute.xlu1 %4137 }
 0x8a8   : > { %4320 = vrot.lane.b32.xlu1 %v6329_v32, %s5492_s18 }
 0x8a9   : > { %4310 = vrot.lane.b32.xlu0 %v6319_v47, %s5492_s18 }
 0x8ac   : > { %4324 = vrot.lane.b32.xlu1 %v6333_v23, %s5492_s18 }
 0x8ad   : > { %4314 = vrot.lane.b32.xlu0 %v6323_v11, %s5492_s18 }
 0x8b0   : > { %4360 = vrot.lane.b32.xlu1 %v6636_v39, %s5493_s19 }
 0x8b1   : > { %4318 = vrot.lane.b32.xlu0 %v6327_v9, %s5492_s18 }
 0x8b4   : > { %4364 = vrot.lane.b32.xlu1 %v6640_v4, %s5493_s19 }
 0x8b5   : > { %4322 = vrot.lane.b32.xlu0 %v6331_v38, %s5492_s18 }
 0x8b8   : > { %4368 = vrot.lane.b32.xlu1 %v6644_v18, %s5493_s19 }
 0x8b9   : > { %4358 = vrot.lane.b32.xlu0 %v6634_v29, %s5493_s19 }
 0x8bc   : > { %4372 = vrot.lane.b32.xlu1 %v6648_v54, %s5493_s19 }
 0x8bd   : > { %4362 = vrot.lane.b32.xlu0 %v6638_v19, %s5493_s19 }
 0x8c0   : > { %4376 = vrot.lane.b32.xlu1 %v6652_v14, %s5493_s19 }
 0x8c1   : > { %4366 = vrot.lane.b32.xlu0 %v6642_v0, %s5493_s19 }
 0x8c4   : > { %4380 = vrot.lane.b32.xlu1 %v6656_v60, %s5493_s19 }
 0x8c5   : > { %4370 = vrot.lane.b32.xlu0 %v6646_v35, %s5493_s19 }
 0x8c8   : > { %4384 = vrot.lane.b32.xlu1 %v6660_v36, %s5493_s19 }
 0x8c9   : > { %4374 = vrot.lane.b32.xlu0 %v6650_v51, %s5493_s19 }
 0x8cc   : > { %4388 = vrot.lane.b32.xlu1 %v7116_v13, %s5493_s19 }
 0x8cd   : > { %4378 = vrot.lane.b32.xlu0 %v7117_v31, %s5493_s19 }
 0x8d1   : > { %4382 = vrot.lane.b32.xlu0 %v7118_v53, %s5493_s19 }
 0x8d5   : > { %4386 = vrot.lane.b32.xlu0 %v7119_v59, %s5493_s19 }
 0x8e7   : > { %v3816_v52 = vpop.xlane.xlu1 %3815 }
 0x8e8   : > { %5439 = vrcp.f32 %v3816_v52 }
 0x8eb   : > { %v3819_v3 = vpop.xlane.xlu0 %3818 }
 0x8ec   : > { %v3822_v47 = vpop.xlane.xlu1 %3821  ;;  %5441 = vrcp.f32 %v3819_v3 }
 0x8ed   : > { %5443 = vrcp.f32 %v3822_v47 }
 0x8f0   : > { %v3828_v12 = vpop.xlane.xlu1 %3827  ;;  %v3825_v11 = vpop.xlane.xlu0 %3824 }
 0x8f1   : > { %5445 = vrcp.f32 %v3825_v11 }
 0x8f2   : > { %5447 = vrcp.f32 %v3828_v12 }
 0x8f4   : > { %v3834_v10 = vpop.xlane.xlu1 %3833  ;;  %v3831_v9 = vpop.xlane.xlu0 %3830 }
 0x8f5   : > { %5449 = vrcp.f32 %v3831_v9  ;;  %v5440_v32 = vpop.eup %5439 }
 0x8f6   : > { %5451 = vrcp.f32 %v3834_v10  ;;  %v3878_v39 = vmul.f32 %v5440_v32, %v6775_v56 }
 0x8f8   : > { %v3840_v38 = vpop.xlane.xlu1 %3839  ;;  %v3837_v23 = vpop.xlane.xlu0 %3836 }
 0x8f9   : > { %v5442_v29 = vpop.eup %5441  ;;  %5453 = vrcp.f32 %v3837_v23 }
 0x8fa   : > { %v3879_v19 = vmul.f32 %v5442_v29, %v6781_v48  ;;  %5455 = vrcp.f32 %v3840_v38  ;;  %v5444_v35 = vpop.eup %5443 }
 0x8fb   : > { %v3880_v51 = vmul.f32 %v5444_v35, %v6783_v27 }
 0x8fc   : > { %v3894_v4 = vpack.c.bf16 %v3879_v19, %v3878_v39  ;;  %v3846_v0 = vpop.xlane.xlu1 %3845  ;;  %v3843_v18 = vpop.xlane.xlu0 %3842 }
 0x8fd   : > { %5457 = vrcp.f32 %v3843_v18 }
 0x8fe   : > { %5146 = vmatmul.mubr.msk.bf16.vlgmr.msra.gmra.mxu0 %vm612_vm2, %v3894_v4  ;;  %v5446_v54 = vpop.eup %5445  ;;  %5459 = vrcp.f32 %v3846_v0 }
 0x8ff   : > { %5156 = vmatpush3.bf16.msra.mxu0 %v3997_v49  ;;  %5157 = vmatprep.mubr.msk.bf16.mxu0 %vm5480_vm0, %v7111_v8  ;;  %v3881_v14 = vmul.f32 %v5446_v54, %v6793_v1  ;;  %v5448_v56 = vpop.eup %5447 }
 0x900   : > { %v3852_v60 = vpop.xlane.xlu1 %3851  ;;  %v3849_v36 = vpop.xlane.xlu0 %3848  ;;  %5167 = vmatprep.subr.bf16.mxu0 %v7111_v8  ;;  %v3882_v17 = vmul.f32 %v5448_v56, %v6791_v6 }
 0x901   : > { %v3895_v48 = vpack.c.bf16 %v3881_v14, %v3880_v51  ;;  %5461 = vrcp.f32 %v3849_v36 }
 0x902   : > { %v5450_v20 = vpop.eup %5449  ;;  %5463 = vrcp.f32 %v3852_v60 }
 0x903   : > { %v3883_v16 = vmul.f32 %v5450_v20, %v6803_v63  ;;  %5152 = vmatmul.mubr.msk.bf16.vlgmr.msra.gmra.mxu1 %vm612_vm2, %v3895_v48  ;;  %v5452_v5 = vpop.eup %5451 }
 0x904   : > { %v3858_v28 = vpop.xlane.xlu1 %3857  ;;  %v3855_v27 = vpop.xlane.xlu0 %3854  ;;  %5162 = vmatpush3.bf16.msra.mxu1 %v4044_v25  ;;  %5163 = vmatprep.mubr.msk.bf16.mxu1 %vm5480_vm0, %v7111_v8  ;;  %v3884_v6 = vmul.f32 %v5452_v5, %v6801_v21 }
 0x905   : > { %v3896_v1 = vpack.c.bf16 %v3883_v16, %v3882_v17  ;;  %5465 = vrcp.f32 %v3855_v27  ;;  %5173 = vmatprep.subr.bf16.mxu1 %v7111_v8 }
 0x906   : > { %v5454_v44 = vpop.eup %5453  ;;  %5467 = vrcp.f32 %v3858_v28 }
 0x907   : > { %v3885_v63 = vmul.f32 %v5454_v44, %v6812_v15  ;;  %5158 = vmatmul.mubr.msk.bf16.vlgmr.msra.gmra.mxu0 %vm612_vm2, %v3896_v1  ;;  %v5456_v24 = vpop.eup %5455 }
 0x908   : > { %v3861_v34 = vpop.xlane.xlu0 %3860  ;;  %5168 = vmatpush3.bf16.msra.mxu0 %v4091_v43  ;;  %5169 = vmatprep.mubr.msk.bf16.mxu0 %vm5480_vm0, %v7111_v8  ;;  %v3886_v46 = vmul.f32 %v5456_v24, %v6810_v22  ;;  %v4232_v59 = vpop.permute.xlu1 %4231 }
 0x909   : > { %5469 = vrcp.f32 %v3861_v34  ;;  %v3897_v58 = vpack.c.bf16 %v3885_v63, %v3884_v6  ;;  %5179 = vmatprep.subr.bf16.mxu0 %v7111_v8 }
 0x90a   : > { %v5458_v41 = vpop.eup %5457 }
 0x90b   : > { %v3887_v61 = vmul.f32 %v5458_v41, %v6820_v40  ;;  %5164 = vmatmul.mubr.msk.bf16.vlgmr.msra.gmra.mxu1 %vm612_vm2, %v3897_v58  ;;  %v5460_v21 = vpop.eup %5459 }
 0x90c   : > { %5174 = vmatpush3.bf16.msra.mxu1 %v6883_v26  ;;  %5175 = vmatprep.mubr.msk.bf16.mxu1 %vm5480_vm0, %v7111_v8  ;;  %v3888_v55 = vmul.f32 %v5460_v21, %v6818_v2  ;;  %v4185_v62 = vpop.permute.xlu0 %4184  ;;  %v4297_v54 = vpop.permute.xlu1 %4296 }
 0x90d   : > { %v3898_v15 = vpack.c.bf16 %v3887_v61, %v3886_v46  ;;  %5185 = vmatprep.subr.bf16.mxu1 %v7111_v8 }
 0x90e   : > { %v5462_v45 = vpop.eup %5461 }
 0x90f   : > { %v3889_v33 = vmul.f32 %v5462_v45, %v6829_v57  ;;  %5170 = vmatmul.mubr.msk.bf16.vlgmr.msra.gmra.mxu0 %vm612_vm2, %v3898_v15  ;;  %v5464_v22 = vpop.eup %5463 }
 0x910   : > { %5180 = vmatpush3.bf16.msra.mxu0 %v4185_v62  ;;  %5181 = vmatprep.mubr.msk.bf16.mxu0 %vm5480_vm0, %v7111_v8  ;;  %v3890_v31 = vmul.f32 %v5464_v22, %v6827_v50  ;;  %v4295_v19 = vpop.permute.xlu0 %4294  ;;  %v4301_v17 = vpop.permute.xlu1 %4300 }
 0x911   : > { %v3899_v40 = vpack.c.bf16 %v3889_v33, %v3888_v55 }
 0x912   : > { %v5466_v37 = vpop.eup %5465 }
 0x913   : > { %v5468_v13 = vpop.eup %5467  ;;  %v3891_v53 = vmul.f32 %v5466_v37, %v6837_v30  ;;  %5176 = vmatmul.mubr.msk.bf16.vlgmr.msra.gmra.mxu1 %vm612_vm2, %v3899_v40 }
 0x914   : > { %5186 = vmatpush3.bf16.msra.mxu1 %v4232_v59  ;;  %5187 = vmatprep.mubr.msk.bf16.mxu1 %vm5480_vm0, %v7111_v8  ;;  %v3892_v49 = vmul.f32 %v5468_v13, %v6835_v7  ;;  %v4299_v60 = vpop.permute.xlu0 %4298  ;;  %v4305_v44 = vpop.permute.xlu1 %4304 }
 0x915   : > { %v3900_v57 = vpack.c.bf16 %v3891_v53, %v3890_v31 }
 0x916   : > { %v5470_v2 = vpop.eup %5469 }
 0x917   : > { %v3893_v25 = vmul.f32 %v5470_v2, %v6843_v42  ;;  %5182 = vmatmul.mubr.msk.bf16.vlgmr.msra.gmra.mxu0 %vm612_vm2, %v3900_v57 }
 0x918   : > { %v4303_v27 = vpop.permute.xlu0 %4302  ;;  %v6942_v63 = vpop.permute.xlu1 %4308 }
 0x919   : > { %v3901_v26 = vpack.c.bf16 %v3893_v25, %v3892_v49 }
 0x91b   : > { %5188 = vmatmul.mubr.msk.bf16.vlgmr.msra.gmra.mxu1 %vm612_vm2, %v3901_v26  ;;  %v7120_v26 = vld [vmem:[#allocation2_spill] sm:$0xff] }
 0x91c   : > { %v4307_v6 = vpop.permute.xlu0 %4306  ;;  %v6946_v24 = vpop.permute.xlu1 %4312 }
 0x920   : > { %v6944_v34 = vpop.permute.xlu0 %4310  ;;  %v6950_v41 = vpop.permute.xlu1 %4316 }
 0x924   : > { %v6948_v58 = vpop.permute.xlu0 %4314  ;;  %v6954_v61 = vpop.permute.xlu1 %4320 }
 0x928   : > { %v6952_v46 = vpop.permute.xlu0 %4318  ;;  %v6958_v15 = vpop.permute.xlu1 %4324 }
 0x92c   : > { %v6956_v21 = vpop.permute.xlu0 %4322  ;;  %v4361_v55 = vpop.permute.xlu1 %4360 }
 0x930   : > { %v4359_v45 = vpop.permute.xlu0 %4358  ;;  %v4365_v62 = vpop.permute.xlu1 %4364 }
 0x934   : > { %v4363_v33 = vpop.permute.xlu0 %4362  ;;  %v4369_v40 = vpop.permute.xlu1 %4368 }
 0x938   : > { %v4367_v22 = vpop.permute.xlu0 %4366  ;;  %v4373_v13 = vpop.permute.xlu1 %4372 }
 0x93c   : > { %v4371_v37 = vpop.permute.xlu0 %4370  ;;  %v4377_v53 = vpop.permute.xlu1 %4376 }
 0x940   : > { %v4375_v31 = vpop.permute.xlu0 %4374  ;;  %v6960_v2 = vpop.permute.xlu1 %4380 }
 0x944   : > { %v4379_v59 = vpop.permute.xlu0 %4378  ;;  %v6964_v49 = vpop.permute.xlu1 %4384 }
 0x948   : > { %v6962_v57 = vpop.permute.xlu0 %4382 }
 0x94c   : > { %v6966_v25 = vpop.permute.xlu0 %4386 }
 0x9be   : > { %v3942_v50 = vpop.f32.mrf.mxu0 }
 0x9bf   : > { %4422 = vrot.lane.b32.xlu0 %v3942_v50, %s5494_s20  ;;  %v4470_v50 = vsel %vm180_vm1, %v7120_v26, %v4295_v19 }
 0x9c0   : > { %v5147_v30 = vpop.f32.mrf.mxu0 }
 0x9c1   : > { %v4486_v30 = vsel %vm612_vm2, %v4470_v50, %v4359_v45 }
 0x9c2   : > { %v3945_v43 = vpop.f32.mrf.mxu0 }
 0x9c3   : > { %4424 = vrot.lane.b32.xlu1 %v3945_v43, %s5494_s20  ;;  %v3989_v8 = vpop.f32.mrf.mxu1  ;;  %v6978_v43 = vpop.permute.xlu1 %4388 }
 0x9c4   : > { %v5148_v52 = vpop.f32.mrf.mxu0  ;;  %4426 = vrot.lane.b32.xlu0 %v3989_v8, %s5494_s20 }
 0x9c5   : > { %v5153_v7 = vpop.f32.mrf.mxu1 }
 0x9c6   : > { %v7121_v7 = vld [vmem:[#allocation3_spill] sm:$0xff] }
 0x9c7   : > { %v3992_v3 = vpop.f32.mrf.mxu1  ;;  %v4036_v42 = vpop.f32.mrf.mxu0 }
 0x9c8   : > { %4428 = vrot.lane.b32.xlu1 %v3992_v3, %s5494_s20  ;;  %4430 = vrot.lane.b32.xlu0 %v4036_v42, %s5494_s20  ;;  %v4471_v3 = vsel %vm180_vm1, %v7121_v7, %v4297_v54 }
 0x9c9   : > { %v5154_v47 = vpop.f32.mrf.mxu1  ;;  %v5159_v12 = vpop.f32.mrf.mxu0  ;;  %v4487_v42 = vsel %vm612_vm2, %v4471_v3, %v4361_v55 }
 0x9ca   : > { %v7122_v12 = vld [vmem:[#allocation4_spill] sm:$0xff] }
 0x9cb   : > { %v4039_v11 = vpop.f32.mrf.mxu0  ;;  %v4083_v10 = vpop.f32.mrf.mxu1 }
 0x9cc   : > { %4432 = vrot.lane.b32.xlu1 %v4039_v11, %s5494_s20  ;;  %4434 = vrot.lane.b32.xlu0 %v4083_v10, %s5494_s20  ;;  %v4472_v11 = vsel %vm180_vm1, %v7122_v12, %v4299_v60 }
 0x9cd   : > { %v5160_v9 = vpop.f32.mrf.mxu0  ;;  %v5165_v32 = vpop.f32.mrf.mxu1 }
 0x9ce   : > { %v4488_v9 = vsel %vm612_vm2, %v4472_v11, %v4363_v33 }
 0x9cf   : > { %v4086_v38 = vpop.f32.mrf.mxu1  ;;  %v4130_v23 = vpop.f32.mrf.mxu0 }
 0x9d0   : > { %4436 = vrot.lane.b32.xlu1 %v4086_v38, %s5494_s20  ;;  %4438 = vrot.lane.b32.xlu0 %v4130_v23, %s5494_s20  ;;  %v7123_v23 = vld [vmem:[#allocation5_spill] sm:$0xff] }
 0x9d1   : > { %v5166_v29 = vpop.f32.mrf.mxu1  ;;  %v5171_v39 = vpop.f32.mrf.mxu0 }
 0x9d2   : > { %v4473_v29 = vsel %vm180_vm1, %v7123_v23, %v4301_v17  ;;  %v7124_v39 = vld [vmem:[#allocation6_spill] sm:$0xff] }
 0x9d3   : > { %v4133_v4 = vpop.f32.mrf.mxu0  ;;  %v4177_v0 = vpop.f32.mrf.mxu1  ;;  %v4474_v19 = vsel %vm180_vm1, %v7124_v39, %v4303_v27 }
 0x9d4   : > { %4440 = vrot.lane.b32.xlu1 %v4133_v4, %s5494_s20  ;;  %4442 = vrot.lane.b32.xlu0 %v4177_v0, %s5494_s20  ;;  %v4489_v4 = vsel %vm612_vm2, %v4473_v29, %v4365_v62  ;;  %v4490_v0 = vsel %vm612_vm2, %v4474_v19, %v4367_v22 }
 0x9d5   : > { %v5172_v18 = vpop.f32.mrf.mxu0  ;;  %v5177_v35 = vpop.f32.mrf.mxu1 }
 0x9d7   : > { %v4180_v51 = vpop.f32.mrf.mxu1  ;;  %v4224_v14 = vpop.f32.mrf.mxu0 }
 0x9d8   : > { %4444 = vrot.lane.b32.xlu1 %v4180_v51, %s5494_s20  ;;  %4446 = vrot.lane.b32.xlu0 %v4224_v14, %s5494_s20  ;;  %v7125_v14 = vld [vmem:[#allocation7_spill] sm:$0xff] }
 0x9d9   : > { %v5178_v36 = vpop.f32.mrf.mxu1  ;;  %v5183_v56 = vpop.f32.mrf.mxu0  ;;  %v4475_v60 = vsel %vm180_vm1, %v7125_v14, %v4305_v44  ;;  %v7128_v44 = vld [vmem:[#allocation10_spill] sm:$0xff] }
 0x9da   : > { %v7126_v36 = vld [vmem:[#allocation8_spill] sm:$0xff] }
 0x9db   : > { %v4227_v48 = vpop.f32.mrf.mxu0  ;;  %v4271_v20 = vpop.f32.mrf.mxu1  ;;  %v4476_v56 = vsel %vm180_vm1, %v7126_v36, %v4307_v6  ;;  %v4478_v6 = vsel %vm180_vm1, %v7128_v44, %v6944_v34 }
 0x9dc   : > { %4450 = vrot.lane.b32.xlu0 %v4271_v20, %s5494_s20  ;;  %4448 = vrot.lane.b32.xlu1 %v4227_v48, %s5494_s20  ;;  %v4491_v48 = vsel %vm612_vm2, %v4475_v60, %v4369_v40  ;;  %v4492_v20 = vsel %vm612_vm2, %v4476_v56, %v4371_v37  ;;  %v4494_v55 = vsel %vm612_vm2, %v4478_v6, %v4375_v31  ;;  %v7130_v37 = vld [vmem:[#allocation12_spill] sm:$0xff] }
 0x9dd   : > { %v5184_v16 = vpop.f32.mrf.mxu0  ;;  %v5189_v28 = vpop.f32.mrf.mxu1 }
 0x9df   : > { %v4274_v5 = vpop.f32.mrf.mxu1 }
 0x9e0   : > { %4452 = vrot.lane.b32.xlu1 %v4274_v5, %s5494_s20  ;;  %v7127_v5 = vld [vmem:[#allocation9_spill] sm:$0xff] }
 0x9e1   : > { %v5190_v1 = vpop.f32.mrf.mxu1 }
 0x9e2   : > { %v4477_v1 = vsel %vm180_vm1, %v7127_v5, %v6942_v63  ;;  %v7129_v63 = vld [vmem:[#allocation11_spill] sm:$0xff] }
 0x9e3   : > { %v4493_v45 = vsel %vm612_vm2, %v4477_v1, %v4373_v13  ;;  %v4479_v34 = vsel %vm180_vm1, %v7129_v63, %v6946_v24  ;;  %v4480_v13 = vsel %vm180_vm1, %v7130_v37, %v6948_v58  ;;  %v7131_v24 = vld [vmem:[#allocation13_spill] sm:$0xff] }
 0x9e4   : > { %v4495_v31 = vsel %vm612_vm2, %v4479_v34, %v4377_v53  ;;  %v4496_v26 = vsel %vm612_vm2, %v4480_v13, %v4379_v59  ;;  %v4481_v58 = vsel %vm180_vm1, %v7131_v24, %v6950_v41  ;;  %v7132_v53 = vld [vmem:[#allocation14_spill] sm:$0xff]  ;;  %v7133_v41 = vld [vmem:[#allocation15_spill] sm:$0xff] }
 0x9e5   : > { %v4482_v7 = vsel %vm180_vm1, %v7132_v53, %v6952_v46  ;;  %v4497_v59 = vsel %vm612_vm2, %v4481_v58, %v6960_v2  ;;  %v4483_v46 = vsel %vm180_vm1, %v7133_v41, %v6954_v61  ;;  %v7134_v2 = vld [vmem:[#allocation16_spill] sm:$0xff]  ;;  %v7135_v61 = vld [vmem:[#allocation17_spill] sm:$0xff] }
 0x9e6   : > { %v4498_v3 = vsel %vm612_vm2, %v4482_v7, %v6962_v57  ;;  %v4484_v57 = vsel %vm180_vm1, %v7134_v2, %v6956_v21  ;;  %v4485_v21 = vsel %vm180_vm1, %v7135_v61, %v6958_v15 }
 0xa31   : > { %v4423_v8 = vpop.permute.xlu0 %4422 }
 0xa32   : > { %v4503_v52 = vsel %vm4502_vm3, %v4486_v30, %v4423_v8 }
 0xa33   : > { %4520 = vst.msk [vmem:[%s6975_s23] sm:$0xff] %vm4519_vm4, %v4503_v52 }
 0xa35   : > { %v4425_v47 = vpop.permute.xlu1 %4424 }
 0xa36   : > { %v4504_v10 = vsel %vm4502_vm3, %v4487_v42, %v4425_v47  ;;  %v4427_v32 = vpop.permute.xlu0 %4426 }
 0xa37   : > { %4521 = vst.msk [vmem:[%s6975_s23 + $0x8] sm:$0xff] %vm4519_vm4, %v4504_v10  ;;  %v4505_v38 = vsel %vm4502_vm3, %v4488_v9, %v4427_v32  ;;  %v4499_v10 = vsel %vm612_vm2, %v4483_v46, %v6964_v49  ;;  %v4500_v9 = vsel %vm612_vm2, %v4484_v57, %v6966_v25  ;;  %v4501_v49 = vsel %vm612_vm2, %v4485_v21, %v6978_v43 }
 0xa38   : > { %4522 = vst.msk [vmem:[%s6975_s23 + $0x10] sm:$0xff] %vm4519_vm4, %v4505_v38 }
 0xa3a   : > { %v4429_v18 = vpop.permute.xlu1 %4428  ;;  %v4431_v35 = vpop.permute.xlu0 %4430 }
 0xa3b   : > { %v4506_v54 = vsel %vm4502_vm3, %v4489_v4, %v4429_v18  ;;  %v4507_v51 = vsel %vm4502_vm3, %v4490_v0, %v4431_v35 }
 0xa3c   : > { %4523 = vst.msk [vmem:[%s6975_s23 + $0x18] sm:$0xff] %vm4519_vm4, %v4506_v54  ;;  %4524 = vst.msk [vmem:[%s6975_s23 + $0x20] sm:$0xff] %vm4519_vm4, %v4507_v51 }
 0xa3e   : > { %v4433_v17 = vpop.permute.xlu1 %4432  ;;  %v4435_v16 = vpop.permute.xlu0 %4434 }
 0xa3f   : > { %v4508_v28 = vsel %vm4502_vm3, %v4491_v48, %v4433_v17  ;;  %v4509_v27 = vsel %vm4502_vm3, %v4492_v20, %v4435_v16 }
 0xa40   : > { %4525 = vst.msk [vmem:[%s6975_s23 + $0x28] sm:$0xff] %vm4519_vm4, %v4508_v28  ;;  %4526 = vst.msk [vmem:[%s6975_s23 + $0x30] sm:$0xff] %vm4519_vm4, %v4509_v27 }
 0xa42   : > { %v4437_v33 = vpop.permute.xlu1 %4436  ;;  %v4439_v62 = vpop.permute.xlu0 %4438 }
 0xa43   : > { %v4510_v22 = vsel %vm4502_vm3, %v4493_v45, %v4437_v33  ;;  %v4511_v40 = vsel %vm4502_vm3, %v4494_v55, %v4439_v62 }
 0xa44   : > { %4527 = vst.msk [vmem:[%s6975_s23 + $0x38] sm:$0xff] %vm4519_vm4, %v4510_v22  ;;  %4528 = vst.msk [vmem:[%s6975_s23 + $0x40] sm:$0xff] %vm4519_vm4, %v4511_v40 }
 0xa46   : > { %v4441_v50 = vpop.permute.xlu1 %4440  ;;  %v4443_v30 = vpop.permute.xlu0 %4442 }
 0xa47   : > { %v4512_v8 = vsel %vm4502_vm3, %v4495_v31, %v4441_v50  ;;  %v4513_v52 = vsel %vm4502_vm3, %v4496_v26, %v4443_v30 }
 0xa48   : > { %4529 = vst.msk [vmem:[%s6975_s23 + $0x48] sm:$0xff] %vm4519_vm4, %v4512_v8  ;;  %4530 = vst.msk [vmem:[%s6975_s23 + $0x50] sm:$0xff] %vm4519_vm4, %v4513_v52 }
 0xa4a   : > { %v4445_v42 = vpop.permute.xlu1 %4444  ;;  %v4447_v47 = vpop.permute.xlu0 %4446 }
 0xa4b   : > { %v4514_v12 = vsel %vm4502_vm3, %v4497_v59, %v4445_v42  ;;  %v4515_v11 = vsel %vm4502_vm3, %v4498_v3, %v4447_v47 }
 0xa4c   : > { %4531 = vst.msk [vmem:[%s6975_s23 + $0x58] sm:$0xff] %vm4519_vm4, %v4514_v12  ;;  %4532 = vst.msk [vmem:[%s6975_s23 + $0x60] sm:$0xff] %vm4519_vm4, %v4515_v11 }
 0xa4e   : > { %v4449_v32 = vpop.permute.xlu1 %4448  ;;  %v4451_v38 = vpop.permute.xlu0 %4450 }
 0xa4f   : > { %v4516_v23 = vsel %vm4502_vm3, %v4499_v10, %v4449_v32  ;;  %v4517_v29 = vsel %vm4502_vm3, %v4500_v9, %v4451_v38 }
 0xa50   : > { %4533 = vst.msk [vmem:[%s6975_s23 + $0x68] sm:$0xff] %vm4519_vm4, %v4516_v23  ;;  %4534 = vst.msk [vmem:[%s6975_s23 + $0x70] sm:$0xff] %vm4519_vm4, %v4517_v29 }
 0xa52   : > { %v4453_v39 = vpop.permute.xlu1 %4452 }
 0xa53   : > { %v4518_v25 = vsel %vm4502_vm3, %v4501_v49, %v4453_v39 }
 0xa54   : > { %4535 = vst.msk [vmem:[%s6975_s23 + $0x78] sm:$0xff] %vm4519_vm4, %v4518_v25 }
 0xa55 PF: > { %s12_s9 = sadd.s32 1, %s5477_s9  }
 0xa56   : > { %p9_p4 = scmp.ge.s32.totalorder %s12_s9, 6  }
 0xa58   :  { %11 = sbr.rel (!%p9_p4) target bundleno = 1 (0x1), region = 61 }

// kernel: global_local_attention.7
= control target key start
LH: loop header
LB: loop body
LE: loop exit
PB: predicated region body
PF: predicated region fallthrough
CT: control target
= control target key end

     0   :  { %8 = vsyncpa [#allocation3], 0  ;;  %s3777_s0 = inlined_call_operand.vmem [shape: f32[2,21,21,32], index: 0, kind: input, shape index: {}]   ;;  %s3778_s1 = inlined_call_operand.vmem [shape: f32[4,4,32], index: 1, kind: input, shape index: {}]   ;;  %s3779_s2 = inlined_call_operand.vmem [shape: bf16[32,32], index: 2, kind: input, shape index: {}]   ;;  %s3780_s3 = inlined_call_operand.hbm [shape: f32[2,16,16,32], index: 3, kind: output, shape index: {}]  }
   0x1   :  { %10 = vsyncpa [#allocation3 + $0x1], 0  ;;  %s2450_s12 = smov 0   ;;  %s2452_s13 = smov 0  }
   0x2   :  { %s2454_s14 = smov 0   ;;  %s2456_s15 = smov 0  }
   0x3   :  { %s2458_s16 = smov 0   ;;  %s2460_s17 = smov 0  }
   0x4   :  { %s2462_s18 = smov 0   ;;  %s2464_s19 = smov 0  }
   0x5 LB: > { %s2132_s20 = sadd.s32 4294967295, %s2425_s19   ;;  %s2133_s21 = sadd.s32 4294967294, %s2425_s19   ;;  %s2425_s19 = sphi %s2464_s19, %s16_s19   ;;  %s2421_s18 = sphi %s2462_s18, %s3789_s18   ;;  %s2417_s17 = sphi %s2460_s17, %s3788_s17   ;;  %s2413_s16 = sphi %s2458_s16, %s3787_s16   ;;  %s2409_s15 = sphi %s2456_s15, %s3786_s15   ;;  %s2405_s14 = sphi %s2454_s14, %s3785_s14   ;;  %s2401_s13 = sphi %s2452_s13, %s3784_s13   ;;  %s2397_s12 = sphi %s2450_s12, %s3783_s12  }
   0x6   : > { %s25_s22 = sadd.s32 1, %s2417_s17  ;;  %s28_s23 = sadd.s32 1, %s2421_s18 }
   0x7   : > { %p26_p0 = scmp.ge.s32.totalorder %s25_s22, 2  ;;  %p115_p1 = scmp.ne.s32.totalorder %s2405_s14, %s2401_s13 }
   0x8   : > { %p116_p2 = scmp.eq.s32.totalorder %s2132_s20, 3  ;;  %p121_p5 = scmp.ne.s32.totalorder %s2401_s13, %s2397_s12 }
   0x9   : > { %s3791_s22 = smov (%p26_p0, %s25_s22), 0  ;;  %s3793_s23 = smov (!%p26_p0, %s28_s23), %s2421_s18 }
   0xa   : > { %s101_s24 = ssub.s32 %s2417_s17, %s3791_s22  ;;  %p2501_p3 = por %p116_p2, %p115_p1 }
   0xb   : > { %p30_p4 = scmp.ge.s32.totalorder %s3793_s23, 2  ;;  %p122_p6 = scmp.eq.s32.totalorder %s2133_s21, 3 }
   0xc   : > { %p2136_p7 = scmp.ge.s32.totalorder %s2425_s19, 1  ;;  %p154_p9 = scmp.lt.s32.totalorder %s2425_s19, 5 }
   0xd   : > { %s3795_s23 = smov (%p30_p4, %s3793_s23), 0  ;;  %p2510_p8 = por %p122_p6, %p121_p5 }
   0xe   : > { %s100_s27 = ssub.s32 %s2421_s18, %s3795_s23  ;;  %s105_s28 = sadd.s32 1, %s2405_s14 }
   0xf   : > { %s102_s29 = sor.u32 %s101_s24, %s100_s27  ;;  %p155_p10 = pnand %p2136_p7, %p154_p9 }
  0x10   : > { %p103_p11 = scmp.eq.s32.totalorder %s102_s29, 0  ;;  %p178_p12 = scmp.lt.s32.totalorder (!%p155_p10), %s2413_s16, 1 }
  0x11   : > { %158 = sbr.rel (%p155_p10) target bundleno = 517 (0x205), region = 32  ;;  %s2186_s27 = sshll.u32 (!%p155_p10), %s2409_s15, 4 }
  0x12   : > { %s2519_s30 = scalar_select %p103_p11, %s2405_s14, %s105_s28  }
  0x13   : > { %s2140_s9 = smul.u32 (!%p155_p10), 192, %s2409_s15  ;;  %s2182_s28 = sshll.u32 (!%p155_p10), %s2413_s16, 5 }
  0x14   : > { %s2051_s29 = sadd.s32 (!%p155_p10), %s2186_s27, %s2182_s28 }
  0x15   : > { %s2183_s5 = sshll.u32 (!%p155_p10), %s2051_s29, 7 }
  0x16   : > { %v2295_v0 = vld [vmem:[%s3779_s2 + $0x8] sm:$0xff]   ;;  %v2296_v1 = vld [vmem:[%s3779_s2] sm:$0xff]   ;;  %s179_s8 = scalar_select %p178_p12, %s2413_s16, 1  ;;  %vm311_vm0 = vcmask 1046528   ;;  %vm437_vm1 = vcmask 1045504   ;;  %vm563_vm2 = vcmask 1044480  }
  0x17   : > { %2197 = vmatprep.subr.bf16.mxu0 %v2295_v0  ;;  %2217 = vmatprep.subr.bf16.mxu1 %v2295_v0  ;;  %v2536_v2 = vld [vmem:[%s3778_s1] ss:$0 sm:$0xff]  ;;  %v2541_v3 = vld [vmem:[%s3778_s1 + $0x1] ss:$0 sm:$0xff]  ;;  %v2548_v4 = vld [vmem:[%s3778_s1 + $0x2] ss:$0 sm:$0xff] }
  0x18   : > { %2198 = vmatpush3.bf16.msra.mxu0 %v2295_v0  ;;  %2219 = vmatpush3.bf16.msra.mxu1 %v2295_v0  ;;  %s2221_s10 = smul.u32 504, %s179_s8  ;;  %v2553_v5 = vld [vmem:[%s3778_s1 + $0x3] ss:$0 sm:$0xff]  ;;  %v2571_v25 = vld [vmem:[%s3778_s1 + $0x4] ss:$0 sm:$0xff]  ;;  %vm1899_vm3 = vcmask 261120  }
  0x19   : > { %2199 = vmatprep.subr.bf16.mxu0 %v2296_v1  ;;  %2218 = vmatprep.subr.bf16.mxu1 %v2296_v1  ;;  %v2578_v30 = vld [vmem:[%s3778_s1 + $0x5] ss:$0 sm:$0xff]  ;;  %v2589_v36 = vld [vmem:[%s3778_s1 + $0x6] ss:$0 sm:$0xff]  ;;  %v2614_v51 = vld [vmem:[%s3778_s1 + $0x7] ss:$0 sm:$0xff] }
  0x1a   : > { %s182_s21 = scalar_lea.vmem %s3777_s0, %s2221_s10  ;;  %v2626_v0 = vld [vmem:[%s3778_s1 + $0x8] ss:$0 sm:$0xff]  ;;  %s2427_s10 = smov [#allocation2]  }
  0x1b   : > { %s2543_s4 = scalar_lea.vmem %s182_s21, %s2140_s9  ;;  %s3716_s9 = scalar_lea.hbm %s3780_s3, %s2183_s5 }
  0x1c   : > { %2200 = vmatpush3.bf16.msra.mxu0 %v2296_v1  ;;  %2220 = vmatpush3.bf16.msra.mxu1 %v2296_v1  ;;  %v188_v6 = vld [vmem:[%s2543_s4] sm:$0xff]  ;;  %v189_v7 = vld [vmem:[%s2543_s4 + $0x8] sm:$0xff]  ;;  %v190_v8 = vld [vmem:[%s2543_s4 + $0x10] sm:$0x1f]  ;;  %s2337_s11 = sshll.u32 %s2427_s10, 4  ;;  %s2338_s11 = int_to_ptr.vmem [resolvable:$false] %s2337_s11 }
  0x1d   : > { %v226_v9 = vmul.f32 %v2536_v2, %v188_v6  ;;  %v227_v10 = vmul.f32 %v2536_v2, %v189_v7  ;;  %v263_v11 = vmul.f32 %v2541_v3, %v188_v6  ;;  %v264_v12 = vmul.f32 %v2541_v3, %v189_v7  ;;  %v2581_v31 = vld [vmem:[%s2543_s4 + $0x18] sm:$0xff]  ;;  %v2592_v37 = vld [vmem:[%s2543_s4 + $0x20] sm:$0xff]  ;;  %v2598_v42 = vld [vmem:[%s2543_s4 + $0x28] sm:$0x1f]  ;;  %s2339_s20 = scalar_lea.vmem %s2338_s11, 4096 }
  0x1e   : > { %v265_v13 = vmul.f32 %v2541_v3, %v190_v8  ;;  %v389_v14 = vmul.f32 %v2548_v4, %v188_v6  ;;  %v390_v15 = vmul.f32 %v2548_v4, %v189_v7  ;;  %v391_v16 = vmul.f32 %v2548_v4, %v190_v8 }
  0x1f   : > { %v312_v17 = vrot.slane %v263_v11, 1  ;;  %v313_v18 = vrot.slane %v264_v12, 1  ;;  %v515_v19 = vmul.f32 %v2553_v5, %v188_v6  ;;  %v516_v20 = vmul.f32 %v2553_v5, %v189_v7 }
  0x20   : > { %v315_v21 = vrot.slane %v265_v13, 1  ;;  %v438_v22 = vrot.slane %v389_v14, 2  ;;  %v439_v23 = vrot.slane %v390_v15, 2  ;;  %v441_v24 = vrot.slane %v391_v16, 2  ;;  %v2643_v15 = vld [vmem:[%s2543_s4 + $0x38] sm:$0xff] }
  0x21   : > { %v314_v26 = vsel %vm311_vm0, %v312_v17, %v313_v18  ;;  %v517_v27 = vmul.f32 %v2553_v5, %v190_v8  ;;  %v564_v28 = vrot.slane %v515_v19, 3  ;;  %v565_v29 = vrot.slane %v516_v20, 3  ;;  %v2651_v20 = vld [vmem:[%s3778_s1 + $0xa] ss:$0 sm:$0xff] }
  0x22   : > { %v316_v32 = vsel %vm311_vm0, %v313_v18, %v315_v21  ;;  %v368_v33 = vadd.f32 %v314_v26, %v226_v9  ;;  %v440_v34 = vsel %vm437_vm1, %v438_v22, %v439_v23  ;;  %v442_v35 = vsel %vm437_vm1, %v439_v23, %v441_v24  ;;  %v2634_v9 = vld [vmem:[%s3778_s1 + $0x9] ss:$0 sm:$0xff]  ;;  %v2654_v21 = vld [vmem:[%s2543_s4 + $0x40] sm:$0x1f] }
  0x23   : > { %v369_v38 = vadd.f32 %v316_v32, %v227_v10  ;;  %v566_v39 = vsel %vm563_vm2, %v564_v28, %v565_v29  ;;  %v567_v40 = vrot.slane %v517_v27, 3  ;;  %v642_v41 = vmul.f32 %v2571_v25, %v2581_v31  ;;  %v2637_v10 = vld [vmem:[%s2543_s4 + $0x30] sm:$0xff] }
  0x24   : > { %v494_v43 = vadd.f32 %v440_v34, %v368_v33  ;;  %v643_v44 = vmul.f32 %v2571_v25, %v2592_v37  ;;  %v679_v45 = vmul.f32 %v2578_v30, %v2581_v31  ;;  %v680_v46 = vmul.f32 %v2578_v30, %v2592_v37  ;;  %v2668_v33 = vld [vmem:[%s3778_s1 + $0xb] ss:$0 sm:$0xff] }
  0x25   : > { %v495_v47 = vadd.f32 %v442_v35, %v369_v38  ;;  %v568_v48 = vsel %vm563_vm2, %v565_v29, %v567_v40  ;;  %v681_v49 = vmul.f32 %v2578_v30, %v2598_v42  ;;  %v804_v50 = vmul.f32 %v2589_v36, %v2581_v31 }
  0x26   : > { %v620_v52 = vadd.f32 %v566_v39, %v494_v43  ;;  %v727_v53 = vrot.slane %v679_v45, 1  ;;  %v728_v54 = vrot.slane %v680_v46, 1  ;;  %v805_v55 = vmul.f32 %v2589_v36, %v2592_v37 }
  0x27   : > { %v621_v56 = vadd.f32 %v568_v48, %v495_v47  ;;  %v730_v57 = vrot.slane %v681_v49, 1  ;;  %v806_v58 = vmul.f32 %v2589_v36, %v2598_v42  ;;  %v852_v59 = vrot.slane %v804_v50, 2  ;;  %v2682_v49 = vld [vmem:[%s3778_s1 + $0xc] ss:$0 sm:$0xff] }
  0x28   : > { %v658_v60 = vadd.f32 %v642_v41, %v620_v52  ;;  %v729_v61 = vsel %vm311_vm0, %v727_v53, %v728_v54  ;;  %v853_v62 = vrot.slane %v805_v55, 2  ;;  %v929_v63 = vmul.f32 %v2614_v51, %v2581_v31  ;;  %v2687_v55 = vld [vmem:[%s2543_s4 + $0x48] sm:$0xff] }
  0x29   : > { %v659_v1 = vadd.f32 %v643_v44, %v621_v56  ;;  %v731_v6 = vsel %vm311_vm0, %v728_v54, %v730_v57  ;;  %v855_v7 = vrot.slane %v806_v58, 2  ;;  %v930_v8 = vmul.f32 %v2614_v51, %v2592_v37 }
  0x2a   : > { %v783_v11 = vadd.f32 %v729_v61, %v658_v60  ;;  %v854_v12 = vsel %vm437_vm1, %v852_v59, %v853_v62  ;;  %v931_v13 = vmul.f32 %v2614_v51, %v2598_v42  ;;  %v977_v14 = vrot.slane %v929_v63, 3  ;;  %v2696_v60 = vld [vmem:[%s3778_s1 + $0xd] ss:$0 sm:$0xff] }
  0x2b   : > { %v784_v16 = vadd.f32 %v731_v6, %v659_v1  ;;  %v856_v17 = vsel %vm437_vm1, %v853_v62, %v855_v7  ;;  %v978_v18 = vrot.slane %v930_v8, 3  ;;  %v1055_v19 = vmul.f32 %v2626_v0, %v2637_v10  ;;  %v2704_v6 = vld [vmem:[%s3778_s1 + $0xe] ss:$0 sm:$0xff]  ;;  %v2707_v7 = vld [vmem:[%s2543_s4 + $0x50] sm:$0xff] }
  0x2c   : > { %v908_v22 = vadd.f32 %v854_v12, %v783_v11  ;;  %v980_v23 = vrot.slane %v931_v13, 3  ;;  %v1056_v24 = vmul.f32 %v2626_v0, %v2643_v15  ;;  %v1092_v26 = vmul.f32 %v2634_v9, %v2637_v10 }
  0x2d   : > { %v909_v27 = vadd.f32 %v856_v17, %v784_v16  ;;  %v979_v28 = vsel %vm563_vm2, %v977_v14, %v978_v18  ;;  %v1093_v29 = vmul.f32 %v2634_v9, %v2643_v15  ;;  %v1094_v32 = vmul.f32 %v2634_v9, %v2654_v21  ;;  %v2711_v14 = vld [vmem:[%s2543_s4 + $0x58] sm:$0x1f] }
  0x2e   : > { %v981_v34 = vsel %vm563_vm2, %v978_v18, %v980_v23  ;;  %v1033_v35 = vadd.f32 %v979_v28, %v908_v22  ;;  %v1140_v38 = vrot.slane %v1092_v26, 1  ;;  %v1217_v39 = vmul.f32 %v2651_v20, %v2637_v10 }
  0x2f   : > { %v1034_v40 = vadd.f32 %v981_v34, %v909_v27  ;;  %v1141_v41 = vrot.slane %v1093_v29, 1  ;;  %v1143_v43 = vrot.slane %v1094_v32, 1  ;;  %v1218_v44 = vmul.f32 %v2651_v20, %v2643_v15  ;;  %v2728_v27 = vld [vmem:[%s3778_s1 + $0xf] ss:$0 sm:$0xff] }
  0x30   : > { %v1071_v45 = vadd.f32 %v1055_v19, %v1033_v35  ;;  %v1219_v46 = vmul.f32 %v2651_v20, %v2654_v21  ;;  %v1265_v47 = vrot.slane %v1217_v39, 2  ;;  %v1342_v48 = vmul.f32 %v2668_v33, %v2637_v10 }
  0x31   : > { %v1072_v50 = vadd.f32 %v1056_v24, %v1034_v40  ;;  %v1142_v52 = vsel %vm311_vm0, %v1140_v38, %v1141_v41  ;;  %v1144_v53 = vsel %vm311_vm0, %v1141_v41, %v1143_v43  ;;  %v1266_v54 = vrot.slane %v1218_v44, 2 }
  0x32   : > { %v1196_v56 = vadd.f32 %v1142_v52, %v1071_v45  ;;  %v1268_v57 = vrot.slane %v1219_v46, 2  ;;  %v1343_v58 = vmul.f32 %v2668_v33, %v2643_v15  ;;  %v1344_v59 = vmul.f32 %v2668_v33, %v2654_v21 }
  0x33   : > { %v1197_v61 = vadd.f32 %v1144_v53, %v1072_v50  ;;  %v1267_v62 = vsel %vm437_vm1, %v1265_v47, %v1266_v54  ;;  %v1390_v63 = vrot.slane %v1342_v48, 3  ;;  %v1468_v1 = vmul.f32 %v2682_v49, %v2687_v55 }
  0x34   : > { %v1269_v8 = vsel %vm437_vm1, %v1266_v54, %v1268_v57  ;;  %v1321_v11 = vadd.f32 %v1267_v62, %v1196_v56  ;;  %v1391_v12 = vrot.slane %v1343_v58, 3  ;;  %v1393_v13 = vrot.slane %v1344_v59, 3  ;;  %v2743_v57 = vld [vmem:[%s2543_s4 + $0x60] sm:$0xff]  ;;  %v2746_v58 = vld [vmem:[%s2543_s4 + $0x68] sm:$0xff]  ;;  %v2749_v59 = vld [vmem:[%s2543_s4 + $0x70] sm:$0x1f] }
  0x35   : > { %v1322_v16 = vadd.f32 %v1269_v8, %v1197_v61  ;;  %v1469_v17 = vmul.f32 %v2682_v49, %v2707_v7  ;;  %v1505_v18 = vmul.f32 %v2696_v60, %v2687_v55  ;;  %v1506_v19 = vmul.f32 %v2696_v60, %v2707_v7 }
  0x36   : > { %v1392_v22 = vsel %vm563_vm2, %v1390_v63, %v1391_v12  ;;  %v1394_v23 = vsel %vm563_vm2, %v1391_v12, %v1393_v13  ;;  %v1507_v24 = vmul.f32 %v2696_v60, %v2711_v14  ;;  %v1630_v26 = vmul.f32 %v2704_v6, %v2687_v55 }
  0x37   : > { %v1446_v28 = vadd.f32 %v1392_v22, %v1321_v11  ;;  %v1447_v29 = vadd.f32 %v1394_v23, %v1322_v16  ;;  %v1553_v32 = vrot.slane %v1505_v18, 1  ;;  %v1554_v34 = vrot.slane %v1506_v19, 1 }
  0x38   : > { %v1556_v35 = vrot.slane %v1507_v24, 1  ;;  %v1631_v38 = vmul.f32 %v2704_v6, %v2707_v7  ;;  %v1632_v39 = vmul.f32 %v2704_v6, %v2711_v14  ;;  %v1678_v40 = vrot.slane %v1630_v26, 2 }
  0x39   : > { %v1484_v41 = vadd.f32 %v1468_v1, %v1446_v28  ;;  %v1485_v43 = vadd.f32 %v1469_v17, %v1447_v29  ;;  %v1555_v44 = vsel %vm311_vm0, %v1553_v32, %v1554_v34  ;;  %v1755_v45 = vmul.f32 %v2728_v27, %v2687_v55 }
  0x3a   : > { %v1557_v46 = vsel %vm311_vm0, %v1554_v34, %v1556_v35  ;;  %v1679_v47 = vrot.slane %v1631_v38, 2  ;;  %v1681_v48 = vrot.slane %v1632_v39, 2  ;;  %v1756_v50 = vmul.f32 %v2728_v27, %v2707_v7 }
  0x3b   : > { %v1609_v52 = vadd.f32 %v1555_v44, %v1484_v41  ;;  %v1610_v53 = vadd.f32 %v1557_v46, %v1485_v43  ;;  %v1757_v54 = vmul.f32 %v2728_v27, %v2711_v14  ;;  %v1803_v56 = vrot.slane %v1755_v45, 3  ;;  %v2778_v46 = vld [vmem:[%s2543_s4 + $0x78] sm:$0xff] }
  0x3c   : > { %v1680_v61 = vsel %vm437_vm1, %v1678_v40, %v1679_v47  ;;  %v1682_v62 = vsel %vm437_vm1, %v1679_v47, %v1681_v48  ;;  %v1804_v63 = vrot.slane %v1756_v50, 3  ;;  %v234_v1 = vmul.f32 %v2536_v2, %v2743_v57 }
  0x3d   : > { %v1734_v8 = vadd.f32 %v1680_v61, %v1609_v52  ;;  %v1735_v11 = vadd.f32 %v1682_v62, %v1610_v53  ;;  %v1806_v12 = vrot.slane %v1757_v54, 3  ;;  %v235_v13 = vmul.f32 %v2536_v2, %v2746_v58  ;;  %v2783_v53 = vld [vmem:[%s2543_s4 + $0x80] sm:$0xff] }
  0x3e   : > { %v1805_v16 = vsel %vm563_vm2, %v1803_v56, %v1804_v63  ;;  %v275_v17 = vmul.f32 %v2541_v3, %v2743_v57  ;;  %v276_v18 = vmul.f32 %v2541_v3, %v2746_v58  ;;  %v277_v19 = vmul.f32 %v2541_v3, %v2749_v59 }
  0x3f   : > { %v1807_v22 = vsel %vm563_vm2, %v1804_v63, %v1806_v12  ;;  %v1859_v23 = vadd.f32 %v1805_v16, %v1734_v8  ;;  %v401_v24 = vmul.f32 %v2548_v4, %v2743_v57  ;;  %v402_v26 = vmul.f32 %v2548_v4, %v2746_v58  ;;  %v2795_v12 = vld [vmem:[%s2543_s4 + $0x88] sm:$0x1f] }
  0x40   : > { %v1860_v28 = vadd.f32 %v1807_v22, %v1735_v11  ;;  %v332_v29 = vrot.slane %v275_v17, 1  ;;  %v333_v32 = vrot.slane %v276_v18, 1  ;;  %v335_v34 = vrot.slane %v277_v19, 1 }
  0x41   : > { %v403_v35 = vmul.f32 %v2548_v4, %v2749_v59  ;;  %v458_v38 = vrot.slane %v401_v24, 2  ;;  %v459_v39 = vrot.slane %v402_v26, 2  ;;  %v527_v40 = vmul.f32 %v2553_v5, %v2743_v57 }
  0x42   : > { %v1875_v41 = vpack.c.bf16 %v1860_v28, %v1859_v23  ;;  %v334_v43 = vsel %vm311_vm0, %v332_v29, %v333_v32  ;;  %v336_v44 = vsel %vm311_vm0, %v333_v32, %v335_v34  ;;  %v528_v45 = vmul.f32 %v2553_v5, %v2746_v58 }
  0x43   : > { %v376_v47 = vadd.f32 %v334_v43, %v234_v1  ;;  %v377_v48 = vadd.f32 %v336_v44, %v235_v13  ;;  %v460_v50 = vsel %vm437_vm1, %v458_v38, %v459_v39  ;;  %v461_v52 = vrot.slane %v403_v35, 2 }
  0x44   : > { %2201 = vmatprep.mubr.msk.bf16.mxu0 %vm1899_vm3, %v1875_v41  ;;  %v529_v54 = vmul.f32 %v2553_v5, %v2749_v59  ;;  %v584_v56 = vrot.slane %v527_v40, 3  ;;  %v585_v61 = vrot.slane %v528_v45, 3  ;;  %v650_v62 = vmul.f32 %v2571_v25, %v2778_v46 }
  0x45   : > { %v462_v63 = vsel %vm437_vm1, %v459_v39, %v461_v52  ;;  %v502_v8 = vadd.f32 %v460_v50, %v376_v47  ;;  %v651_v1 = vmul.f32 %v2571_v25, %v2783_v53  ;;  %v691_v11 = vmul.f32 %v2578_v30, %v2778_v46  ;;  %v2816_v52 = vld [vmem:[%s2543_s4 + $0x90] sm:$0xff] }
  0x46   : > { %v503_v13 = vadd.f32 %v462_v63, %v377_v48  ;;  %v586_v16 = vsel %vm563_vm2, %v584_v56, %v585_v61  ;;  %v587_v17 = vrot.slane %v529_v54, 3  ;;  %v692_v18 = vmul.f32 %v2578_v30, %v2783_v53  ;;  %v2823_v63 = vld [vmem:[%s2543_s4 + $0x98] sm:$0xff] }
  0x47   : > { %v628_v19 = vadd.f32 %v586_v16, %v502_v8  ;;  %v693_v22 = vmul.f32 %v2578_v30, %v2795_v12  ;;  %v747_v23 = vrot.slane %v691_v11, 1  ;;  %v816_v24 = vmul.f32 %v2589_v36, %v2778_v46  ;;  %v2828_v16 = vld [vmem:[%s2543_s4 + $0xa0] sm:$0x1f] }
  0x48   : > { %v588_v26 = vsel %vm563_vm2, %v585_v61, %v587_v17  ;;  %v748_v28 = vrot.slane %v692_v18, 1  ;;  %v817_v29 = vmul.f32 %v2589_v36, %v2783_v53  ;;  %v818_v32 = vmul.f32 %v2589_v36, %v2795_v12 }
  0x49   : > { %v629_v34 = vadd.f32 %v588_v26, %v503_v13  ;;  %v666_v35 = vadd.f32 %v650_v62, %v628_v19  ;;  %v750_v38 = vrot.slane %v693_v22, 1  ;;  %v872_v39 = vrot.slane %v816_v24, 2 }
  0x4a   : > { %v749_v40 = vsel %vm311_vm0, %v747_v23, %v748_v28  ;;  %v873_v41 = vrot.slane %v817_v29, 2  ;;  %v875_v43 = vrot.slane %v818_v32, 2  ;;  %v941_v44 = vmul.f32 %v2614_v51, %v2778_v46 }
  0x4b   : > { %v667_v45 = vadd.f32 %v651_v1, %v629_v34  ;;  %v751_v47 = vsel %vm311_vm0, %v748_v28, %v750_v38  ;;  %v791_v48 = vadd.f32 %v749_v40, %v666_v35  ;;  %v942_v50 = vmul.f32 %v2614_v51, %v2783_v53 }
  0x4c   : > { %v874_v54 = vsel %vm437_vm1, %v872_v39, %v873_v41  ;;  %v876_v56 = vsel %vm437_vm1, %v873_v41, %v875_v43  ;;  %v943_v61 = vmul.f32 %v2614_v51, %v2795_v12  ;;  %v997_v62 = vrot.slane %v941_v44, 3 }
  0x4d   : > { %v792_v8 = vadd.f32 %v751_v47, %v667_v45  ;;  %v916_v1 = vadd.f32 %v874_v54, %v791_v48  ;;  %v998_v11 = vrot.slane %v942_v50, 3  ;;  %v1063_v13 = vmul.f32 %v2626_v0, %v2816_v52 }
  0x4e   : > { %v1000_v17 = vrot.slane %v943_v61, 3  ;;  %v1064_v18 = vmul.f32 %v2626_v0, %v2823_v63  ;;  %v1104_v19 = vmul.f32 %v2634_v9, %v2816_v52  ;;  %v1105_v22 = vmul.f32 %v2634_v9, %v2823_v63  ;;  %v2851_v61 = vld [vmem:[%s2543_s4 + $0xa8] sm:$0xff] }
  0x4f   : > { %v917_v23 = vadd.f32 %v876_v56, %v792_v8  ;;  %v999_v24 = vsel %vm563_vm2, %v997_v62, %v998_v11  ;;  %v1106_v26 = vmul.f32 %v2634_v9, %v2828_v16  ;;  %v1229_v28 = vmul.f32 %v2651_v20, %v2816_v52 }
  0x50   : > { %v1001_v29 = vsel %vm563_vm2, %v998_v11, %v1000_v17  ;;  %v1041_v32 = vadd.f32 %v999_v24, %v916_v1  ;;  %v1160_v34 = vrot.slane %v1104_v19, 1  ;;  %v1161_v35 = vrot.slane %v1105_v22, 1 }
  0x51   : > { %v1042_v38 = vadd.f32 %v1001_v29, %v917_v23  ;;  %v1163_v39 = vrot.slane %v1106_v26, 1  ;;  %v1230_v40 = vmul.f32 %v2651_v20, %v2823_v63  ;;  %v1231_v41 = vmul.f32 %v2651_v20, %v2828_v16  ;;  %v2865_v23 = vld [vmem:[%s2543_s4 + $0xb8] sm:$0x1f] }
  0x52   : > { %v1079_v43 = vadd.f32 %v1063_v13, %v1041_v32  ;;  %v1162_v44 = vsel %vm311_vm0, %v1160_v34, %v1161_v35  ;;  %v1285_v45 = vrot.slane %v1229_v28, 2  ;;  %v1354_v47 = vmul.f32 %v2668_v33, %v2816_v52  ;;  %v2858_v13 = vld [vmem:[%s2543_s4 + $0xb0] sm:$0xff] }
  0x53   : > { %v1080_v48 = vadd.f32 %v1064_v18, %v1042_v38  ;;  %v1164_v50 = vsel %vm311_vm0, %v1161_v35, %v1163_v39  ;;  %v1286_v54 = vrot.slane %v1230_v40, 2  ;;  %v1288_v56 = vrot.slane %v1231_v41, 2 }
  0x54   : > { %v1204_v62 = vadd.f32 %v1162_v44, %v1079_v43  ;;  %v1355_v8 = vmul.f32 %v2668_v33, %v2823_v63  ;;  %v1356_v1 = vmul.f32 %v2668_v33, %v2828_v16  ;;  %v1410_v11 = vrot.slane %v1354_v47, 3 }
  0x55   : > { %v1205_v17 = vadd.f32 %v1164_v50, %v1080_v48  ;;  %v1287_v19 = vsel %vm437_vm1, %v1285_v45, %v1286_v54  ;;  %v1289_v18 = vsel %vm437_vm1, %v1286_v54, %v1288_v56  ;;  %v1476_v22 = vmul.f32 %v2682_v49, %v2851_v61 }
  0x56   : > { %v1329_v24 = vadd.f32 %v1287_v19, %v1204_v62  ;;  %v1411_v26 = vrot.slane %v1355_v8, 3  ;;  %v1413_v28 = vrot.slane %v1356_v1, 3  ;;  %v1477_v29 = vmul.f32 %v2682_v49, %v2858_v13 }
  0x57   : > { %v1330_v32 = vadd.f32 %v1289_v18, %v1205_v17  ;;  %v1517_v34 = vmul.f32 %v2696_v60, %v2851_v61  ;;  %v1518_v35 = vmul.f32 %v2696_v60, %v2858_v13  ;;  %v1519_v38 = vmul.f32 %v2696_v60, %v2865_v23 }
  0x58   : > { %v1412_v39 = vsel %vm563_vm2, %v1410_v11, %v1411_v26  ;;  %v1414_v40 = vsel %vm563_vm2, %v1411_v26, %v1413_v28  ;;  %v1642_v41 = vmul.f32 %v2704_v6, %v2851_v61  ;;  %v1643_v43 = vmul.f32 %v2704_v6, %v2858_v13 }
  0x59   : > { %v1454_v44 = vadd.f32 %v1412_v39, %v1329_v24  ;;  %v1455_v45 = vadd.f32 %v1414_v40, %v1330_v32  ;;  %v1573_v47 = vrot.slane %v1517_v34, 1  ;;  %v1574_v48 = vrot.slane %v1518_v35, 1 }
  0x5a   : > { %v1576_v50 = vrot.slane %v1519_v38, 1  ;;  %v1644_v54 = vmul.f32 %v2704_v6, %v2865_v23  ;;  %v1698_v56 = vrot.slane %v1642_v41, 2  ;;  %v1699_v62 = vrot.slane %v1643_v43, 2 }
  0x5b   : > { %v1492_v8 = vadd.f32 %v1476_v22, %v1454_v44  ;;  %v1493_v1 = vadd.f32 %v1477_v29, %v1455_v45  ;;  %v1575_v11 = vsel %vm311_vm0, %v1573_v47, %v1574_v48  ;;  %v1767_v17 = vmul.f32 %v2728_v27, %v2851_v61 }
  0x5c   : > { %v1577_v19 = vsel %vm311_vm0, %v1574_v48, %v1576_v50  ;;  %v1700_v18 = vsel %vm437_vm1, %v1698_v56, %v1699_v62  ;;  %v1701_v24 = vrot.slane %v1644_v54, 2  ;;  %v1768_v26 = vmul.f32 %v2728_v27, %v2858_v13 }
  0x5d   : > { %v1617_v28 = vadd.f32 %v1575_v11, %v1492_v8  ;;  %v1618_v32 = vadd.f32 %v1577_v19, %v1493_v1  ;;  %v1769_v34 = vmul.f32 %v2728_v27, %v2865_v23  ;;  %v1823_v22 = vrot.slane %v1767_v17, 3 }
  0x5e   : > { %v1702_v29 = vsel %vm437_vm1, %v1699_v62, %v1701_v24  ;;  %v1824_v35 = vrot.slane %v1768_v26, 3  ;;  %v228_v38 = vmul.f32 %v2536_v2, %v2581_v31  ;;  %v229_v39 = vmul.f32 %v2536_v2, %v2592_v37 }
  0x5f   : > { %v1742_v40 = vadd.f32 %v1700_v18, %v1617_v28  ;;  %v1743_v41 = vadd.f32 %v1702_v29, %v1618_v32  ;;  %v1826_v43 = vrot.slane %v1769_v34, 3  ;;  %v266_v44 = vmul.f32 %v2541_v3, %v2581_v31 }
  0x60   : > { %v1825_v45 = vsel %vm563_vm2, %v1823_v22, %v1824_v35  ;;  %v267_v47 = vmul.f32 %v2541_v3, %v2592_v37  ;;  %v268_v48 = vmul.f32 %v2541_v3, %v2598_v42  ;;  %v392_v50 = vmul.f32 %v2548_v4, %v2581_v31 }
  0x61   : > { %v1827_v54 = vsel %vm563_vm2, %v1824_v35, %v1826_v43  ;;  %v1867_v56 = vadd.f32 %v1825_v45, %v1742_v40  ;;  %v317_v62 = vrot.slane %v266_v44, 1  ;;  %v393_v8 = vmul.f32 %v2548_v4, %v2592_v37 }
  0x62   : > { %v1868_v1 = vadd.f32 %v1827_v54, %v1743_v41  ;;  %v318_v11 = vrot.slane %v267_v47, 1  ;;  %v320_v17 = vrot.slane %v268_v48, 1  ;;  %v394_v19 = vmul.f32 %v2548_v4, %v2598_v42 }
  0x63   : > { %v443_v18 = vrot.slane %v392_v50, 2  ;;  %v444_v24 = vrot.slane %v393_v8, 2  ;;  %v518_v26 = vmul.f32 %v2553_v5, %v2581_v31  ;;  %v519_v28 = vmul.f32 %v2553_v5, %v2592_v37 }
  0x64   : > { %v1879_v32 = vpack.c.bf16 %v1868_v1, %v1867_v56  ;;  %v319_v34 = vsel %vm311_vm0, %v317_v62, %v318_v11  ;;  %v321_v22 = vsel %vm311_vm0, %v318_v11, %v320_v17  ;;  %v446_v29 = vrot.slane %v394_v19, 2 }
  0x65   : > { %v370_v35 = vadd.f32 %v319_v34, %v228_v38  ;;  %v371_v40 = vadd.f32 %v321_v22, %v229_v39  ;;  %v445_v41 = vsel %vm437_vm1, %v443_v18, %v444_v24  ;;  %v520_v43 = vmul.f32 %v2553_v5, %v2598_v42 }
  0x66   : > { %2209 = vmatprep.mubr.msk.bf16.mxu1 %vm1899_vm3, %v1879_v32  ;;  %v447_v31 = vsel %vm437_vm1, %v444_v24, %v446_v29  ;;  %v569_v44 = vrot.slane %v518_v26, 3  ;;  %v570_v45 = vrot.slane %v519_v28, 3  ;;  %v644_v37 = vmul.f32 %v2571_v25, %v2637_v10 }
  0x67   : > { %v496_v47 = vadd.f32 %v445_v41, %v370_v35  ;;  %v497_v48 = vadd.f32 %v447_v31, %v371_v40  ;;  %v572_v50 = vrot.slane %v520_v43, 3  ;;  %v645_v38 = vmul.f32 %v2571_v25, %v2643_v15 }
  0x68   : > { %v571_v39 = vsel %vm563_vm2, %v569_v44, %v570_v45  ;;  %v682_v42 = vmul.f32 %v2578_v30, %v2637_v10  ;;  %v683_v54 = vmul.f32 %v2578_v30, %v2643_v15  ;;  %v684_v56 = vmul.f32 %v2578_v30, %v2654_v21 }
  0x69   : > { %v573_v62 = vsel %vm563_vm2, %v570_v45, %v572_v50  ;;  %v622_v8 = vadd.f32 %v571_v39, %v496_v47  ;;  %v807_v1 = vmul.f32 %v2589_v36, %v2637_v10  ;;  %v808_v11 = vmul.f32 %v2589_v36, %v2643_v15 }
  0x6a   : > { %v623_v17 = vadd.f32 %v573_v62, %v497_v48  ;;  %v732_v19 = vrot.slane %v682_v42, 1  ;;  %v733_v18 = vrot.slane %v683_v54, 1  ;;  %v735_v24 = vrot.slane %v684_v56, 1 }
  0x6b   : > { %v660_v26 = vadd.f32 %v644_v37, %v622_v8  ;;  %v809_v28 = vmul.f32 %v2589_v36, %v2654_v21  ;;  %v857_v32 = vrot.slane %v807_v1, 2  ;;  %v858_v34 = vrot.slane %v808_v11, 2 }
  0x6c   : > { %v661_v22 = vadd.f32 %v645_v38, %v623_v17  ;;  %v734_v29 = vsel %vm311_vm0, %v732_v19, %v733_v18  ;;  %v736_v35 = vsel %vm311_vm0, %v733_v18, %v735_v24  ;;  %v932_v40 = vmul.f32 %v2614_v51, %v2637_v10 }
  0x6d   : > { %v785_v41 = vadd.f32 %v734_v29, %v660_v26  ;;  %v859_v43 = vsel %vm437_vm1, %v857_v32, %v858_v34  ;;  %v860_v31 = vrot.slane %v809_v28, 2  ;;  %v933_v44 = vmul.f32 %v2614_v51, %v2643_v15 }
  0x6e   : > { %v786_v45 = vadd.f32 %v736_v35, %v661_v22  ;;  %v934_v37 = vmul.f32 %v2614_v51, %v2654_v21  ;;  %v982_v47 = vrot.slane %v932_v40, 3  ;;  %v1057_v48 = vmul.f32 %v2626_v0, %v2687_v55 }
  0x6f   : > { %v861_v50 = vsel %vm437_vm1, %v858_v34, %v860_v31  ;;  %v910_v38 = vadd.f32 %v859_v43, %v785_v41  ;;  %v983_v39 = vrot.slane %v933_v44, 3  ;;  %v1058_v42 = vmul.f32 %v2626_v0, %v2707_v7 }
  0x70   : > { %v911_v54 = vadd.f32 %v861_v50, %v786_v45  ;;  %v985_v56 = vrot.slane %v934_v37, 3  ;;  %v1095_v62 = vmul.f32 %v2634_v9, %v2687_v55  ;;  %v1096_v8 = vmul.f32 %v2634_v9, %v2707_v7 }
  0x71   : > { %v984_v1 = vsel %vm563_vm2, %v982_v47, %v983_v39  ;;  %v1097_v11 = vmul.f32 %v2634_v9, %v2711_v14  ;;  %v1220_v17 = vmul.f32 %v2651_v20, %v2687_v55  ;;  %v1221_v19 = vmul.f32 %v2651_v20, %v2707_v7 }
  0x72   : > { %v986_v18 = vsel %vm563_vm2, %v983_v39, %v985_v56  ;;  %v1035_v24 = vadd.f32 %v984_v1, %v910_v38  ;;  %v1145_v26 = vrot.slane %v1095_v62, 1  ;;  %v1146_v28 = vrot.slane %v1096_v8, 1 }
  0x73   : > { %v1036_v32 = vadd.f32 %v986_v18, %v911_v54  ;;  %v1148_v34 = vrot.slane %v1097_v11, 1  ;;  %v1222_v22 = vmul.f32 %v2651_v20, %v2711_v14  ;;  %v1270_v29 = vrot.slane %v1220_v17, 2 }
  0x74   : > { %v1073_v35 = vadd.f32 %v1057_v48, %v1035_v24  ;;  %v1147_v40 = vsel %vm311_vm0, %v1145_v26, %v1146_v28  ;;  %v1271_v41 = vrot.slane %v1221_v19, 2  ;;  %v1345_v43 = vmul.f32 %v2668_v33, %v2687_v55 }
  0x75   : > { %v1074_v31 = vadd.f32 %v1058_v42, %v1036_v32  ;;  %v1149_v44 = vsel %vm311_vm0, %v1146_v28, %v1148_v34  ;;  %v1273_v45 = vrot.slane %v1222_v22, 2  ;;  %v1346_v37 = vmul.f32 %v2668_v33, %v2707_v7 }
  0x76   : > { %v1198_v47 = vadd.f32 %v1147_v40, %v1073_v35  ;;  %v1272_v50 = vsel %vm437_vm1, %v1270_v29, %v1271_v41  ;;  %v1347_v38 = vmul.f32 %v2668_v33, %v2711_v14  ;;  %v1395_v48 = vrot.slane %v1345_v43, 3 }
  0x77   : > { %v1199_v39 = vadd.f32 %v1149_v44, %v1074_v31  ;;  %v1274_v54 = vsel %vm437_vm1, %v1271_v41, %v1273_v45  ;;  %v1396_v56 = vrot.slane %v1346_v37, 3  ;;  %v1470_v42 = vmul.f32 %v2682_v49, %v2743_v57 }
  0x78   : > { %v1323_v62 = vadd.f32 %v1272_v50, %v1198_v47  ;;  %v1398_v8 = vrot.slane %v1347_v38, 3  ;;  %v1471_v1 = vmul.f32 %v2682_v49, %v2746_v58  ;;  %v1508_v11 = vmul.f32 %v2696_v60, %v2743_v57 }
  0x79   : > { %v1324_v17 = vadd.f32 %v1274_v54, %v1199_v39  ;;  %v1397_v19 = vsel %vm563_vm2, %v1395_v48, %v1396_v56  ;;  %v1509_v18 = vmul.f32 %v2696_v60, %v2746_v58  ;;  %v1510_v24 = vmul.f32 %v2696_v60, %v2749_v59 }
  0x7a   : > { %v1399_v26 = vsel %vm563_vm2, %v1396_v56, %v1398_v8  ;;  %v1448_v28 = vadd.f32 %v1397_v19, %v1323_v62  ;;  %v1558_v32 = vrot.slane %v1508_v11, 1  ;;  %v1633_v34 = vmul.f32 %v2704_v6, %v2743_v57 }
  0x7b   : > { %v1449_v22 = vadd.f32 %v1399_v26, %v1324_v17  ;;  %v1559_v29 = vrot.slane %v1509_v18, 1  ;;  %v1561_v35 = vrot.slane %v1510_v24, 1  ;;  %v1634_v40 = vmul.f32 %v2704_v6, %v2746_v58 }
  0x7c   : > { %v1486_v41 = vadd.f32 %v1470_v42, %v1448_v28  ;;  %v1635_v43 = vmul.f32 %v2704_v6, %v2749_v59  ;;  %v1683_v31 = vrot.slane %v1633_v34, 2  ;;  %v1758_v44 = vmul.f32 %v2728_v27, %v2743_v57 }
  0x7d   : > { %v1487_v45 = vadd.f32 %v1471_v1, %v1449_v22  ;;  %v1560_v37 = vsel %vm311_vm0, %v1558_v32, %v1559_v29  ;;  %v1562_v47 = vsel %vm311_vm0, %v1559_v29, %v1561_v35  ;;  %v1684_v50 = vrot.slane %v1634_v40, 2 }
  0x7e   : > { %v1611_v38 = vadd.f32 %v1560_v37, %v1486_v41  ;;  %v1686_v48 = vrot.slane %v1635_v43, 2  ;;  %v1759_v39 = vmul.f32 %v2728_v27, %v2746_v58  ;;  %v1760_v54 = vmul.f32 %v2728_v27, %v2749_v59 }
  0x7f   : > { %v1612_v56 = vadd.f32 %v1562_v47, %v1487_v45  ;;  %v1685_v42 = vsel %vm437_vm1, %v1683_v31, %v1684_v50  ;;  %v1808_v62 = vrot.slane %v1758_v44, 3  ;;  %v236_v8 = vmul.f32 %v2536_v2, %v2778_v46 }
  0x80   : > { %v1687_v1 = vsel %vm437_vm1, %v1684_v50, %v1686_v48  ;;  %v1736_v11 = vadd.f32 %v1685_v42, %v1611_v38  ;;  %v1809_v17 = vrot.slane %v1759_v39, 3  ;;  %v1811_v19 = vrot.slane %v1760_v54, 3 }
  0x81   : > { %v1737_v18 = vadd.f32 %v1687_v1, %v1612_v56  ;;  %v237_v24 = vmul.f32 %v2536_v2, %v2783_v53  ;;  %v278_v26 = vmul.f32 %v2541_v3, %v2778_v46  ;;  %v279_v28 = vmul.f32 %v2541_v3, %v2783_v53 }
  0x82   : > { %v1810_v32 = vsel %vm563_vm2, %v1808_v62, %v1809_v17  ;;  %v1812_v34 = vsel %vm563_vm2, %v1809_v17, %v1811_v19  ;;  %v280_v22 = vmul.f32 %v2541_v3, %v2795_v12  ;;  %v404_v29 = vmul.f32 %v2548_v4, %v2778_v46 }
  0x83   : > { %v1861_v35 = vadd.f32 %v1810_v32, %v1736_v11  ;;  %v1862_v40 = vadd.f32 %v1812_v34, %v1737_v18  ;;  %v337_v41 = vrot.slane %v278_v26, 1  ;;  %v338_v2 = vrot.slane %v279_v28, 1 }
  0x84   : > { %v340_v43 = vrot.slane %v280_v22, 1  ;;  %v405_v31 = vmul.f32 %v2548_v4, %v2783_v53  ;;  %v406_v44 = vmul.f32 %v2548_v4, %v2795_v12  ;;  %v463_v45 = vrot.slane %v404_v29, 2 }
  0x85   : > { %v1876_v37 = vpack.c.bf16 %v1862_v40, %v1861_v35  ;;  %v339_v47 = vsel %vm311_vm0, %v337_v41, %v338_v2  ;;  %v530_v3 = vmul.f32 %v2553_v5, %v2778_v46  ;;  %v531_v50 = vmul.f32 %v2553_v5, %v2783_v53 }
  0x86   : > { %v341_v38 = vsel %vm311_vm0, %v338_v2, %v340_v43  ;;  %v378_v48 = vadd.f32 %v339_v47, %v236_v8  ;;  %v464_v39 = vrot.slane %v405_v31, 2  ;;  %v466_v54 = vrot.slane %v406_v44, 2 }
  0x87   : > { %2202 = vmatmul.mubr.msk.bf16.vlgmr.msra.gmra.mxu0 %vm1899_vm3, %v1876_v37  ;;  %v379_v56 = vadd.f32 %v341_v38, %v237_v24  ;;  %v532_v4 = vmul.f32 %v2553_v5, %v2795_v12  ;;  %v589_v42 = vrot.slane %v530_v3, 3  ;;  %v590_v62 = vrot.slane %v531_v50, 3 }
  0x88   : > { %v465_v1 = vsel %vm437_vm1, %v463_v45, %v464_v39  ;;  %v467_v11 = vsel %vm437_vm1, %v464_v39, %v466_v54  ;;  %v652_v17 = vmul.f32 %v2571_v25, %v2816_v52  ;;  %v653_v8 = vmul.f32 %v2571_v25, %v2823_v63 }
  0x89   : > { %v504_v19 = vadd.f32 %v465_v1, %v378_v48  ;;  %v505_v18 = vadd.f32 %v467_v11, %v379_v56  ;;  %v591_v26 = vsel %vm563_vm2, %v589_v42, %v590_v62  ;;  %v592_v24 = vrot.slane %v532_v4, 3 }
  0x8a   : > { %v694_v5 = vmul.f32 %v2578_v30, %v2816_v52  ;;  %v695_v28 = vmul.f32 %v2578_v30, %v2823_v63  ;;  %v696_v32 = vmul.f32 %v2578_v30, %v2828_v16  ;;  %v819_v34 = vmul.f32 %v2589_v36, %v2816_v52 }
  0x8b   : > { %v593_v22 = vsel %vm563_vm2, %v590_v62, %v592_v24  ;;  %v630_v25 = vadd.f32 %v591_v26, %v504_v19  ;;  %v820_v29 = vmul.f32 %v2589_v36, %v2823_v63  ;;  %v821_v35 = vmul.f32 %v2589_v36, %v2828_v16 }
  0x8c   : > { %v631_v40 = vadd.f32 %v593_v22, %v505_v18  ;;  %v752_v41 = vrot.slane %v694_v5, 1  ;;  %v753_v2 = vrot.slane %v695_v28, 1  ;;  %v755_v43 = vrot.slane %v696_v32, 1 }
  0x8d   : > { %v668_v31 = vadd.f32 %v652_v17, %v630_v25  ;;  %v877_v44 = vrot.slane %v819_v34, 2  ;;  %v878_v45 = vrot.slane %v820_v29, 2  ;;  %v880_v30 = vrot.slane %v821_v35, 2 }
  0x8e   : > { %v669_v37 = vadd.f32 %v653_v8, %v631_v40  ;;  %v754_v47 = vsel %vm311_vm0, %v752_v41, %v753_v2  ;;  %v756_v3 = vsel %vm311_vm0, %v753_v2, %v755_v43  ;;  %v944_v50 = vmul.f32 %v2614_v51, %v2816_v52 }
  0x8f   : > { %v793_v38 = vadd.f32 %v754_v47, %v668_v31  ;;  %v879_v48 = vsel %vm437_vm1, %v877_v44, %v878_v45  ;;  %v881_v36 = vsel %vm437_vm1, %v878_v45, %v880_v30  ;;  %v945_v39 = vmul.f32 %v2614_v51, %v2823_v63  ;;  %v3086_v31 = vld [vmem:[%s2543_s4 + $0xc0] sm:$0xff] }
  0x90   : > { %v794_v54 = vadd.f32 %v756_v3, %v669_v37  ;;  %v946_v56 = vmul.f32 %v2614_v51, %v2828_v16  ;;  %v1002_v4 = vrot.slane %v944_v50, 3  ;;  %v1065_v42 = vmul.f32 %v2626_v0, %v2851_v61  ;;  %v3092_v37 = vld [vmem:[%s2543_s4 + $0xc8] sm:$0xff] }
  0x91   : > { %v918_v62 = vadd.f32 %v879_v48, %v793_v38  ;;  %v1003_v1 = vrot.slane %v945_v39, 3  ;;  %v1066_v11 = vmul.f32 %v2626_v0, %v2858_v13  ;;  %v1107_v17 = vmul.f32 %v2634_v9, %v2851_v61 }
  0x92   : > { %v919_v8 = vadd.f32 %v881_v36, %v794_v54  ;;  %v1005_v19 = vrot.slane %v946_v56, 3  ;;  %v1108_v18 = vmul.f32 %v2634_v9, %v2858_v13  ;;  %v1109_v51 = vmul.f32 %v2634_v9, %v2865_v23  ;;  %v3102_v56 = vld [vmem:[%s2543_s4 + $0xd0] sm:$0x1f] }
  0x93   : > { %v1004_v26 = vsel %vm563_vm2, %v1002_v4, %v1003_v1  ;;  %v1165_v24 = vrot.slane %v1107_v17, 1  ;;  %v1232_v5 = vmul.f32 %v2651_v20, %v2851_v61  ;;  %v1233_v0 = vmul.f32 %v2651_v20, %v2858_v13 }
  0x94   : > { %v1006_v28 = vsel %vm563_vm2, %v1003_v1, %v1005_v19  ;;  %v1043_v32 = vadd.f32 %v1004_v26, %v918_v62  ;;  %v1166_v34 = vrot.slane %v1108_v18, 1  ;;  %v1168_v22 = vrot.slane %v1109_v51, 1 }
  0x95   : > { %v1044_v25 = vadd.f32 %v1006_v28, %v919_v8  ;;  %v1234_v9 = vmul.f32 %v2651_v20, %v2865_v23  ;;  %v1290_v29 = vrot.slane %v1232_v5, 2  ;;  %v1291_v35 = vrot.slane %v1233_v0, 2 }
  0x96   : > { %v1081_v40 = vadd.f32 %v1065_v42, %v1043_v32  ;;  %v1167_v41 = vsel %vm311_vm0, %v1165_v24, %v1166_v34  ;;  %v1169_v2 = vsel %vm311_vm0, %v1166_v34, %v1168_v22  ;;  %v1357_v43 = vmul.f32 %v2668_v33, %v2851_v61 }
  0x97   : > { %v1082_v44 = vadd.f32 %v1066_v11, %v1044_v25  ;;  %v1292_v45 = vsel %vm437_vm1, %v1290_v29, %v1291_v35  ;;  %v1293_v30 = vrot.slane %v1234_v9, 2  ;;  %v1358_v20 = vmul.f32 %v2668_v33, %v2858_v13 }
  0x98   : > { %v1206_v47 = vadd.f32 %v1167_v41, %v1081_v40  ;;  %v1359_v3 = vmul.f32 %v2668_v33, %v2865_v23  ;;  %v1415_v50 = vrot.slane %v1357_v43, 3  ;;  %v1478_v38 = vmul.f32 %v2682_v49, %v3086_v31 }
  0x99   : > { %v1207_v48 = vadd.f32 %v1169_v2, %v1082_v44  ;;  %v1294_v36 = vsel %vm437_vm1, %v1291_v35, %v1293_v30  ;;  %v1416_v39 = vrot.slane %v1358_v20, 3  ;;  %v1479_v54 = vmul.f32 %v2682_v49, %v3092_v37 }
  0x9a   : > { %v1331_v4 = vadd.f32 %v1292_v45, %v1206_v47  ;;  %v1418_v42 = vrot.slane %v1359_v3, 3  ;;  %v1520_v62 = vmul.f32 %v2696_v60, %v3086_v31  ;;  %v1521_v33 = vmul.f32 %v2696_v60, %v3092_v37  ;;  %v3131_v45 = vld [vmem:[%s3778_s1] ss:$0 sm:$0xff] }
  0x9b   : > { %v1332_v1 = vadd.f32 %v1294_v36, %v1207_v48  ;;  %v1417_v11 = vsel %vm563_vm2, %v1415_v50, %v1416_v39  ;;  %v1522_v17 = vmul.f32 %v2696_v60, %v3102_v56  ;;  %v1645_v8 = vmul.f32 %v2704_v6, %v3086_v31  ;;  %v2299_v48 = vld [vmem:[%s2543_s4 + $0x30] sm:$0xff] }
  0x9c   : > { %v1419_v49 = vsel %vm563_vm2, %v1416_v39, %v1418_v42  ;;  %v1456_v19 = vadd.f32 %v1417_v11, %v1331_v4  ;;  %v1578_v18 = vrot.slane %v1520_v62, 1  ;;  %v1579_v51 = vrot.slane %v1521_v33, 1  ;;  %v2300_v39 = vld [vmem:[%s2543_s4 + $0x38] sm:$0xff]  ;;  %v3153_v42 = vld [vmem:[%s3778_s1 + $0x2] ss:$0 sm:$0xff] }
  0x9d   : > { %v1457_v26 = vadd.f32 %v1419_v49, %v1332_v1  ;;  %v1581_v24 = vrot.slane %v1522_v17, 1  ;;  %v1646_v5 = vmul.f32 %v2704_v6, %v3092_v37  ;;  %v1647_v0 = vmul.f32 %v2704_v6, %v3102_v56 }
  0x9e   : > { %v1494_v28 = vadd.f32 %v1478_v38, %v1456_v19  ;;  %v1580_v32 = vsel %vm311_vm0, %v1578_v18, %v1579_v51  ;;  %v1703_v60 = vrot.slane %v1645_v8, 2  ;;  %v1770_v34 = vmul.f32 %v2728_v27, %v3086_v31  ;;  %v3140_v38 = vld [vmem:[%s3778_s1 + $0x1] ss:$0 sm:$0xff] }
  0x9f   : > { %v1495_v22 = vadd.f32 %v1479_v54, %v1457_v26  ;;  %v1582_v25 = vsel %vm311_vm0, %v1579_v51, %v1581_v24  ;;  %v1704_v9 = vrot.slane %v1646_v5, 2  ;;  %v1706_v29 = vrot.slane %v1647_v0, 2  ;;  %v2302_v19 = vld [vmem:[%s2543_s4 + $0x40] sm:$0x1f] }
  0xa0   : > { %v1619_v35 = vadd.f32 %v1580_v32, %v1494_v28  ;;  %v1771_v40 = vmul.f32 %v2728_v27, %v3092_v37  ;;  %v1772_v6 = vmul.f32 %v2728_v27, %v3102_v56  ;;  %v1828_v41 = vrot.slane %v1770_v34, 3  ;;  %v3163_v5 = vld [vmem:[%s3778_s1 + $0x3] ss:$0 sm:$0xff] }
  0xa1   : > { %v1620_v2 = vadd.f32 %v1582_v25, %v1495_v22  ;;  %v1705_v43 = vsel %vm437_vm1, %v1703_v60, %v1704_v9  ;;  %v1707_v44 = vsel %vm437_vm1, %v1704_v9, %v1706_v29  ;;  %v230_v30 = vmul.f32 %v3131_v45, %v2637_v10 }
  0xa2   : > { %v1744_v20 = vadd.f32 %v1705_v43, %v1619_v35  ;;  %v1829_v47 = vrot.slane %v1771_v40, 3  ;;  %v1831_v3 = vrot.slane %v1772_v6, 3  ;;  %v231_v27 = vmul.f32 %v3131_v45, %v2643_v15 }
  0xa3   : > { %v1745_v50 = vadd.f32 %v1707_v44, %v1620_v2  ;;  %v269_v36 = vmul.f32 %v2299_v48, %v3140_v38  ;;  %v270_v54 = vmul.f32 %v2300_v39, %v3140_v38  ;;  %v271_v10 = vmul.f32 %v3140_v38, %v2654_v21 }
  0xa4   : > { %v1830_v4 = vsel %vm563_vm2, %v1828_v41, %v1829_v47  ;;  %v1832_v15 = vsel %vm563_vm2, %v1829_v47, %v1831_v3  ;;  %v395_v62 = vmul.f32 %v3153_v42, %v2299_v48  ;;  %v396_v33 = vmul.f32 %v3153_v42, %v2300_v39  ;;  %v3175_v41 = vld [vmem:[%s3778_s1 + $0x4] ss:$0 sm:$0xff]  ;;  %v3185_v47 = vld [vmem:[%s3778_s1 + $0x5] ss:$0 sm:$0xff]  ;;  %v3188_v3 = vld [vmem:[%s2543_s4 + $0x48] sm:$0xff] }
  0xa5   : > { %v1869_v1 = vadd.f32 %v1830_v4, %v1744_v20  ;;  %v1870_v11 = vadd.f32 %v1832_v15, %v1745_v50  ;;  %v322_v17 = vrot.slane %v269_v36, 1  ;;  %v323_v8 = vrot.slane %v270_v54, 1  ;;  %v3199_v36 = vld [vmem:[%s3778_s1 + $0x6] ss:$0 sm:$0xff] }
  0xa6   : > { %v325_v49 = vrot.slane %v271_v10, 1  ;;  %v397_v21 = vmul.f32 %v2302_v19, %v3153_v42  ;;  %v448_v18 = vrot.slane %v395_v62, 2  ;;  %v449_v51 = vrot.slane %v396_v33, 2 }
  0xa7   : > { %v1880_v26 = vpack.c.bf16 %v1870_v11, %v1869_v1  ;;  %v324_v24 = vsel %vm311_vm0, %v322_v17, %v323_v8  ;;  %v521_v0 = vmul.f32 %v3163_v5, %v2299_v48  ;;  %v522_v28 = vmul.f32 %v3163_v5, %v2300_v39 }
  0xa8   : > { %v326_v32 = vsel %vm311_vm0, %v323_v8, %v325_v49  ;;  %v372_v60 = vadd.f32 %v324_v24, %v230_v30  ;;  %v450_v34 = vsel %vm437_vm1, %v448_v18, %v449_v51  ;;  %v451_v22 = vrot.slane %v397_v21, 2 }
  0xa9   : > { %2210 = vmatmul.mubr.msk.bf16.vlgmr.msra.gmra.mxu1 %vm1899_vm3, %v1880_v26  ;;  %v373_v25 = vadd.f32 %v326_v32, %v231_v27  ;;  %v523_v9 = vmul.f32 %v3163_v5, %v2302_v19  ;;  %v574_v29 = vrot.slane %v521_v0, 3  ;;  %v575_v35 = vrot.slane %v522_v28, 3  ;;  %v3211_v19 = vld [vmem:[%s3778_s1 + $0x7] ss:$0 sm:$0xff]  ;;  %v3225_v32 = vld [vmem:[%s2543_s4 + $0x58] sm:$0x1f] }
  0xaa   : > { %v452_v40 = vsel %vm437_vm1, %v449_v51, %v451_v22  ;;  %v498_v6 = vadd.f32 %v450_v34, %v372_v60  ;;  %v646_v2 = vmul.f32 %v3175_v41, %v2687_v55  ;;  %v647_v43 = vmul.f32 %v3175_v41, %v2707_v7  ;;  %v3218_v51 = vld [vmem:[%s2543_s4 + $0x50] sm:$0xff] }
  0xab   : > { %v499_v44 = vadd.f32 %v452_v40, %v373_v25  ;;  %v576_v30 = vsel %vm563_vm2, %v574_v29, %v575_v35  ;;  %v577_v20 = vrot.slane %v523_v9, 3  ;;  %v685_v27 = vmul.f32 %v3188_v3, %v3185_v47  ;;  %v3232_v9 = vld [vmem:[%s3778_s1 + $0x8] ss:$0 sm:$0xff] }
  0xac   : > { %v624_v50 = vadd.f32 %v576_v30, %v498_v6  ;;  %v686_v55 = vmul.f32 %v3185_v47, %v2707_v7  ;;  %v687_v48 = vmul.f32 %v3185_v47, %v2711_v14  ;;  %v810_v39 = vmul.f32 %v3199_v36, %v3188_v3 }
  0xad   : > { %v578_v54 = vsel %vm563_vm2, %v575_v35, %v577_v20  ;;  %v737_v10 = vrot.slane %v685_v27, 1  ;;  %v811_v4 = vmul.f32 %v3199_v36, %v2707_v7  ;;  %v812_v15 = vmul.f32 %v3199_v36, %v2711_v14 }
  0xae   : > { %v625_v62 = vadd.f32 %v578_v54, %v499_v44  ;;  %v662_v33 = vadd.f32 %v646_v2, %v624_v50  ;;  %v738_v1 = vrot.slane %v686_v55, 1  ;;  %v740_v11 = vrot.slane %v687_v48, 1  ;;  %v3241_v2 = vld [vmem:[%s3778_s1 + $0x9] ss:$0 sm:$0xff] }
  0xaf   : > { %v862_v17 = vrot.slane %v810_v39, 2  ;;  %v863_v8 = vrot.slane %v811_v4, 2  ;;  %v865_v49 = vrot.slane %v812_v15, 2  ;;  %v935_v21 = vmul.f32 %v3211_v19, %v3188_v3  ;;  %v3254_v39 = vld [vmem:[%s3778_s1 + $0xa] ss:$0 sm:$0xff] }
  0xb0   : > { %v663_v7 = vadd.f32 %v647_v43, %v625_v62  ;;  %v739_v18 = vsel %vm311_vm0, %v737_v10, %v738_v1  ;;  %v741_v14 = vsel %vm311_vm0, %v738_v1, %v740_v11  ;;  %v936_v26 = vmul.f32 %v3218_v51, %v3211_v19 }
  0xb1   : > { %v787_v24 = vadd.f32 %v739_v18, %v662_v33  ;;  %v864_v0 = vsel %vm437_vm1, %v862_v17, %v863_v8  ;;  %v866_v28 = vsel %vm437_vm1, %v863_v8, %v865_v49  ;;  %v937_v60 = vmul.f32 %v3225_v32, %v3211_v19  ;;  %v3265_v17 = vld [vmem:[%s3778_s1 + $0xb] ss:$0 sm:$0xff]  ;;  %v3268_v8 = vld [vmem:[%s2543_s4 + $0x60] sm:$0xff] }
  0xb2   : > { %v788_v34 = vadd.f32 %v741_v14, %v663_v7  ;;  %v987_v22 = vrot.slane %v935_v21, 3  ;;  %v988_v25 = vrot.slane %v936_v26, 3  ;;  %v1059_v29 = vmul.f32 %v3232_v9, %v2743_v57 }
  0xb3   : > { %v912_v35 = vadd.f32 %v864_v0, %v787_v24  ;;  %v990_v40 = vrot.slane %v937_v60, 3  ;;  %v1060_v6 = vmul.f32 %v3232_v9, %v2746_v58  ;;  %v1098_v43 = vmul.f32 %v3241_v2, %v2743_v57  ;;  %v3280_v24 = vld [vmem:[%s2543_s4 + $0x70] sm:$0x1f] }
  0xb4   : > { %v913_v44 = vadd.f32 %v866_v28, %v788_v34  ;;  %v989_v30 = vsel %vm563_vm2, %v987_v22, %v988_v25  ;;  %v1099_v20 = vmul.f32 %v3241_v2, %v2746_v58  ;;  %v1100_v27 = vmul.f32 %v3241_v2, %v2749_v59  ;;  %v3288_v22 = vld [vmem:[%s3778_s1 + $0xc] ss:$0 sm:$0xff] }
  0xb5   : > { %v991_v50 = vsel %vm563_vm2, %v988_v25, %v990_v40  ;;  %v1037_v55 = vadd.f32 %v989_v30, %v912_v35  ;;  %v1150_v48 = vrot.slane %v1098_v43, 1  ;;  %v1223_v54 = vmul.f32 %v3254_v39, %v2743_v57  ;;  %v3298_v30 = vld [vmem:[%s3778_s1 + $0xd] ss:$0 sm:$0xff] }
  0xb6   : > { %v1038_v10 = vadd.f32 %v991_v50, %v913_v44  ;;  %v1151_v4 = vrot.slane %v1099_v20, 1  ;;  %v1153_v15 = vrot.slane %v1100_v27, 1  ;;  %v1224_v62 = vmul.f32 %v3254_v39, %v2746_v58 }
  0xb7   : > { %v1075_v33 = vadd.f32 %v1059_v29, %v1037_v55  ;;  %v1225_v1 = vmul.f32 %v3254_v39, %v2749_v59  ;;  %v1275_v11 = vrot.slane %v1223_v54, 2  ;;  %v1348_v57 = vmul.f32 %v3268_v8, %v3265_v17  ;;  %v3275_v59 = vld [vmem:[%s2543_s4 + $0x68] sm:$0xff] }
  0xb8   : > { %v1076_v49 = vadd.f32 %v1060_v6, %v1038_v10  ;;  %v1152_v21 = vsel %vm311_vm0, %v1150_v48, %v1151_v4  ;;  %v1154_v58 = vsel %vm311_vm0, %v1151_v4, %v1153_v15  ;;  %v1276_v7 = vrot.slane %v1224_v62, 2  ;;  %v3311_v54 = vld [vmem:[%s3778_s1 + $0xe] ss:$0 sm:$0xff] }
  0xb9   : > { %v1200_v18 = vadd.f32 %v1152_v21, %v1075_v33  ;;  %v1278_v14 = vrot.slane %v1225_v1, 2  ;;  %v1349_v26 = vmul.f32 %v3275_v59, %v3265_v17  ;;  %v1350_v0 = vmul.f32 %v3280_v24, %v3265_v17 }
  0xba   : > { %v1201_v28 = vadd.f32 %v1154_v58, %v1076_v49  ;;  %v1277_v60 = vsel %vm437_vm1, %v1275_v11, %v1276_v7  ;;  %v1400_v34 = vrot.slane %v1348_v57, 3  ;;  %v1472_v25 = vmul.f32 %v3288_v22, %v2778_v46 }
  0xbb   : > { %v1279_v29 = vsel %vm437_vm1, %v1276_v7, %v1278_v14  ;;  %v1325_v35 = vadd.f32 %v1277_v60, %v1200_v18  ;;  %v1401_v40 = vrot.slane %v1349_v26, 3  ;;  %v1403_v6 = vrot.slane %v1350_v0, 3  ;;  %v3326_v18 = vld [vmem:[%s2543_s4 + $0x78] sm:$0xff] }
  0xbc   : > { %v1326_v43 = vadd.f32 %v1279_v29, %v1201_v28  ;;  %v1473_v44 = vmul.f32 %v3288_v22, %v2783_v53  ;;  %v1511_v20 = vmul.f32 %v3298_v30, %v2778_v46  ;;  %v1512_v27 = vmul.f32 %v3298_v30, %v2783_v53  ;;  %v3332_v28 = vld [vmem:[%s2543_s4 + $0x80] sm:$0xff] }
  0xbd   : > { %v1402_v50 = vsel %vm563_vm2, %v1400_v34, %v1401_v40  ;;  %v1404_v55 = vsel %vm563_vm2, %v1401_v40, %v1403_v6  ;;  %v1513_v48 = vmul.f32 %v3298_v30, %v2795_v12  ;;  %v1636_v10 = vmul.f32 %v3311_v54, %v2778_v46  ;;  %v3323_v46 = vld [vmem:[%s3778_s1 + $0xf] ss:$0 sm:$0xff] }
  0xbe   : > { %v1450_v4 = vadd.f32 %v1402_v50, %v1325_v35  ;;  %v1451_v15 = vadd.f32 %v1404_v55, %v1326_v43  ;;  %v1563_v62 = vrot.slane %v1511_v20, 1  ;;  %v1564_v33 = vrot.slane %v1512_v27, 1 }
  0xbf   : > { %v1566_v1 = vrot.slane %v1513_v48, 1  ;;  %v1637_v11 = vmul.f32 %v3311_v54, %v2783_v53  ;;  %v1638_v57 = vmul.f32 %v3311_v54, %v2795_v12  ;;  %v1688_v49 = vrot.slane %v1636_v10, 2 }
  0xc0   : > { %v1488_v21 = vadd.f32 %v1472_v25, %v1450_v4  ;;  %v1489_v58 = vadd.f32 %v1473_v44, %v1451_v15  ;;  %v1565_v7 = vsel %vm311_vm0, %v1563_v62, %v1564_v33  ;;  %v1761_v14 = vmul.f32 %v3326_v18, %v3323_v46 }
  0xc1   : > { %v1567_v53 = vsel %vm311_vm0, %v1564_v33, %v1566_v1  ;;  %v1689_v26 = vrot.slane %v1637_v11, 2  ;;  %v1691_v0 = vrot.slane %v1638_v57, 2  ;;  %v1762_v60 = vmul.f32 %v3332_v28, %v3323_v46 }
  0xc2   : > { %v1613_v34 = vadd.f32 %v1565_v7, %v1488_v21  ;;  %v1614_v25 = vadd.f32 %v1567_v53, %v1489_v58  ;;  %v1763_v29 = vmul.f32 %v3323_v46, %v2795_v12  ;;  %v1813_v35 = vrot.slane %v1761_v14, 3 }
  0xc3   : > { %v1690_v40 = vsel %vm437_vm1, %v1688_v49, %v1689_v26  ;;  %v1692_v6 = vsel %vm437_vm1, %v1689_v26, %v1691_v0  ;;  %v1814_v43 = vrot.slane %v1762_v60, 3  ;;  %v238_v44 = vmul.f32 %v3131_v45, %v2816_v52 }
  0xc4   : > { %v1738_v20 = vadd.f32 %v1690_v40, %v1613_v34  ;;  %v1739_v27 = vadd.f32 %v1692_v6, %v1614_v25  ;;  %v1816_v50 = vrot.slane %v1763_v29, 3  ;;  %v239_v55 = vmul.f32 %v3131_v45, %v2823_v63 }
  0xc5   : > { %v1815_v48 = vsel %vm563_vm2, %v1813_v35, %v1814_v43  ;;  %v281_v12 = vmul.f32 %v3140_v38, %v2816_v52  ;;  %v282_v10 = vmul.f32 %v3140_v38, %v2823_v63  ;;  %v283_v4 = vmul.f32 %v3140_v38, %v2828_v16 }
  0xc6   : > { %v1817_v15 = vsel %vm563_vm2, %v1814_v43, %v1816_v50  ;;  %v1863_v62 = vadd.f32 %v1815_v48, %v1738_v20  ;;  %v407_v33 = vmul.f32 %v3153_v42, %v2816_v52  ;;  %v408_v1 = vmul.f32 %v3153_v42, %v2823_v63 }
  0xc7   : > { %v1864_v11 = vadd.f32 %v1817_v15, %v1739_v27  ;;  %v342_v57 = vrot.slane %v281_v12, 1  ;;  %v343_v49 = vrot.slane %v282_v10, 1  ;;  %v345_v21 = vrot.slane %v283_v4, 1 }
  0xc8   : > { %v409_v58 = vmul.f32 %v3153_v42, %v2828_v16  ;;  %v468_v7 = vrot.slane %v407_v33, 2  ;;  %v469_v14 = vrot.slane %v408_v1, 2  ;;  %v533_v53 = vmul.f32 %v3163_v5, %v2816_v52 }
  0xc9   : > { %v1877_v26 = vpack.c.bf16 %v1864_v11, %v1863_v62  ;;  %v344_v0 = vsel %vm311_vm0, %v342_v57, %v343_v49  ;;  %v346_v60 = vsel %vm311_vm0, %v343_v49, %v345_v21  ;;  %v534_v34 = vmul.f32 %v3163_v5, %v2823_v63 }
  0xca   : > { %v380_v25 = vadd.f32 %v344_v0, %v238_v44  ;;  %v381_v29 = vadd.f32 %v346_v60, %v239_v55  ;;  %v470_v35 = vsel %vm437_vm1, %v468_v7, %v469_v14  ;;  %v471_v40 = vrot.slane %v409_v58, 2  ;;  %v3389_v0 = vld [vmem:[%s2543_s4 + $0xa8] sm:$0xff] }
  0xcb   : > { %2205 = vmatprep.mubr.msk.bf16.mxu0 %vm1899_vm3, %v1877_v26  ;;  %v535_v6 = vmul.f32 %v3163_v5, %v2828_v16  ;;  %v594_v43 = vrot.slane %v533_v53, 3  ;;  %v595_v52 = vrot.slane %v534_v34, 3  ;;  %v654_v20 = vmul.f32 %v3175_v41, %v2851_v61 }
  0xcc   : > { %v472_v27 = vsel %vm437_vm1, %v469_v14, %v471_v40  ;;  %v506_v50 = vadd.f32 %v470_v35, %v380_v25  ;;  %v655_v63 = vmul.f32 %v3175_v41, %v2858_v13  ;;  %v697_v44 = vmul.f32 %v3185_v47, %v2851_v61  ;;  %v3395_v25 = vld [vmem:[%s2543_s4 + $0xb0] sm:$0xff] }
  0xcd   : > { %v507_v55 = vadd.f32 %v472_v27, %v381_v29  ;;  %v596_v48 = vsel %vm563_vm2, %v594_v43, %v595_v52  ;;  %v597_v12 = vrot.slane %v535_v6, 3  ;;  %v698_v16 = vmul.f32 %v3185_v47, %v2858_v13 }
  0xce   : > { %v632_v10 = vadd.f32 %v596_v48, %v506_v50  ;;  %v699_v4 = vmul.f32 %v3185_v47, %v2865_v23  ;;  %v757_v15 = vrot.slane %v697_v44, 1  ;;  %v822_v62 = vmul.f32 %v3199_v36, %v2851_v61 }
  0xcf   : > { %v598_v33 = vsel %vm563_vm2, %v595_v52, %v597_v12  ;;  %v758_v1 = vrot.slane %v698_v16, 1  ;;  %v823_v11 = vmul.f32 %v3199_v36, %v2858_v13  ;;  %v824_v57 = vmul.f32 %v3199_v36, %v2865_v23 }
  0xd0   : > { %v633_v49 = vadd.f32 %v598_v33, %v507_v55  ;;  %v670_v21 = vadd.f32 %v654_v20, %v632_v10  ;;  %v760_v58 = vrot.slane %v699_v4, 1  ;;  %v882_v7 = vrot.slane %v822_v62, 2 }
  0xd1   : > { %v759_v14 = vsel %vm311_vm0, %v757_v15, %v758_v1  ;;  %v883_v53 = vrot.slane %v823_v11, 2  ;;  %v885_v26 = vrot.slane %v824_v57, 2  ;;  %v947_v61 = vmul.f32 %v3389_v0, %v3211_v19 }
  0xd2   : > { %v671_v60 = vadd.f32 %v655_v63, %v633_v49  ;;  %v761_v34 = vsel %vm311_vm0, %v758_v1, %v760_v58  ;;  %v795_v13 = vadd.f32 %v759_v14, %v670_v21  ;;  %v948_v29 = vmul.f32 %v3395_v25, %v3211_v19 }
  0xd3   : > { %v884_v35 = vsel %vm437_vm1, %v882_v7, %v883_v53  ;;  %v886_v40 = vsel %vm437_vm1, %v883_v53, %v885_v26  ;;  %v949_v6 = vmul.f32 %v3211_v19, %v2865_v23  ;;  %v1007_v43 = vrot.slane %v947_v61, 3 }
  0xd4   : > { %v796_v52 = vadd.f32 %v761_v34, %v671_v60  ;;  %v920_v20 = vadd.f32 %v884_v35, %v795_v13  ;;  %v1008_v27 = vrot.slane %v948_v29, 3  ;;  %v1067_v50 = vmul.f32 %v3232_v9, %v3086_v31  ;;  %v3426_v34 = vld [vmem:[%s2543_s4 + $0xd8] sm:$0xff] }
  0xd5   : > { %v1010_v63 = vrot.slane %v949_v6, 3  ;;  %v1068_v44 = vmul.f32 %v3232_v9, %v3092_v37  ;;  %v1110_v55 = vmul.f32 %v3241_v2, %v3086_v31  ;;  %v1111_v48 = vmul.f32 %v3241_v2, %v3092_v37  ;;  %v3433_v6 = vld [vmem:[%s2543_s4 + $0xe0] sm:$0xff] }
  0xd6   : > { %v921_v12 = vadd.f32 %v886_v40, %v796_v52  ;;  %v1009_v23 = vsel %vm563_vm2, %v1007_v43, %v1008_v27  ;;  %v1112_v16 = vmul.f32 %v3241_v2, %v3102_v56  ;;  %v1235_v10 = vmul.f32 %v3254_v39, %v3086_v31 }
  0xd7   : > { %v1011_v4 = vsel %vm563_vm2, %v1008_v27, %v1010_v63  ;;  %v1045_v15 = vadd.f32 %v1009_v23, %v920_v20  ;;  %v1170_v62 = vrot.slane %v1110_v55, 1  ;;  %v1171_v33 = vrot.slane %v1111_v48, 1 }
  0xd8   : > { %v1046_v1 = vadd.f32 %v1011_v4, %v921_v12  ;;  %v1173_v11 = vrot.slane %v1112_v16, 1  ;;  %v1236_v57 = vmul.f32 %v3254_v39, %v3092_v37  ;;  %v1237_v49 = vmul.f32 %v3254_v39, %v3102_v56 }
  0xd9   : > { %v1083_v21 = vadd.f32 %v1067_v50, %v1045_v15  ;;  %v1172_v58 = vsel %vm311_vm0, %v1170_v62, %v1171_v33  ;;  %v1295_v7 = vrot.slane %v1235_v10, 2  ;;  %v1360_v14 = vmul.f32 %v3265_v17, %v3086_v31  ;;  %v3440_v50 = vld [vmem:[%s2543_s4 + $0xe8] sm:$0x1f] }
  0xda   : > { %v1084_v53 = vadd.f32 %v1068_v44, %v1046_v1  ;;  %v1174_v26 = vsel %vm311_vm0, %v1171_v33, %v1173_v11  ;;  %v1296_v61 = vrot.slane %v1236_v57, 2  ;;  %v1298_v60 = vrot.slane %v1237_v49, 2 }
  0xdb   : > { %v1208_v13 = vadd.f32 %v1172_v58, %v1083_v21  ;;  %v1361_v29 = vmul.f32 %v3265_v17, %v3092_v37  ;;  %v1362_v35 = vmul.f32 %v3265_v17, %v3102_v56  ;;  %v1420_v40 = vrot.slane %v1360_v14, 3 }
  0xdc   : > { %v1209_v43 = vadd.f32 %v1174_v26, %v1084_v53  ;;  %v1297_v52 = vsel %vm437_vm1, %v1295_v7, %v1296_v61  ;;  %v1299_v20 = vsel %vm437_vm1, %v1296_v61, %v1298_v60  ;;  %v1480_v27 = vmul.f32 %v3288_v22, %v3426_v34 }
  0xdd   : > { %v1333_v63 = vadd.f32 %v1297_v52, %v1208_v13  ;;  %v1421_v44 = vrot.slane %v1361_v29, 3  ;;  %v1423_v55 = vrot.slane %v1362_v35, 3  ;;  %v1481_v48 = vmul.f32 %v3288_v22, %v3433_v6 }
  0xde   : > { %v1334_v12 = vadd.f32 %v1299_v20, %v1209_v43  ;;  %v1523_v23 = vmul.f32 %v3298_v30, %v3426_v34  ;;  %v1524_v16 = vmul.f32 %v3298_v30, %v3433_v6  ;;  %v1525_v10 = vmul.f32 %v3298_v30, %v3440_v50 }
  0xdf   : > { %v1422_v4 = vsel %vm563_vm2, %v1420_v40, %v1421_v44  ;;  %v1424_v15 = vsel %vm563_vm2, %v1421_v44, %v1423_v55  ;;  %v1648_v62 = vmul.f32 %v3311_v54, %v3426_v34  ;;  %v1649_v33 = vmul.f32 %v3311_v54, %v3433_v6 }
  0xe0   : > { %v1458_v1 = vadd.f32 %v1422_v4, %v1333_v63  ;;  %v1459_v11 = vadd.f32 %v1424_v15, %v1334_v12  ;;  %v1583_v57 = vrot.slane %v1523_v23, 1  ;;  %v1584_v49 = vrot.slane %v1524_v16, 1 }
  0xe1   : > { %v1586_v21 = vrot.slane %v1525_v10, 1  ;;  %v1650_v58 = vmul.f32 %v3311_v54, %v3440_v50  ;;  %v1708_v7 = vrot.slane %v1648_v62, 2  ;;  %v1709_v14 = vrot.slane %v1649_v33, 2 }
  0xe2   : > { %v1496_v53 = vadd.f32 %v1480_v27, %v1458_v1  ;;  %v1497_v26 = vadd.f32 %v1481_v48, %v1459_v11  ;;  %v1585_v61 = vsel %vm311_vm0, %v1583_v57, %v1584_v49  ;;  %v1773_v60 = vmul.f32 %v3323_v46, %v3426_v34 }
  0xe3   : > { %v1587_v13 = vsel %vm311_vm0, %v1584_v49, %v1586_v21  ;;  %v1710_v29 = vsel %vm437_vm1, %v1708_v7, %v1709_v14  ;;  %v1711_v35 = vrot.slane %v1650_v58, 2  ;;  %v1774_v40 = vmul.f32 %v3323_v46, %v3433_v6 }
  0xe4   : > { %v1621_v43 = vadd.f32 %v1585_v61, %v1496_v53  ;;  %v1622_v52 = vadd.f32 %v1587_v13, %v1497_v26  ;;  %v1775_v20 = vmul.f32 %v3323_v46, %v3440_v50  ;;  %v1833_v27 = vrot.slane %v1773_v60, 3 }
  0xe5   : > { %v1712_v63 = vsel %vm437_vm1, %v1709_v14, %v1711_v35  ;;  %v1834_v44 = vrot.slane %v1774_v40, 3  ;;  %v232_v55 = vmul.f32 %v3188_v3, %v3131_v45  ;;  %v233_v48 = vmul.f32 %v3218_v51, %v3131_v45 }
  0xe6   : > { %v1746_v12 = vadd.f32 %v1710_v29, %v1621_v43  ;;  %v1747_v23 = vadd.f32 %v1712_v63, %v1622_v52  ;;  %v1836_v16 = vrot.slane %v1775_v20, 3  ;;  %v272_v10 = vmul.f32 %v3188_v3, %v3140_v38 }
  0xe7   : > { %v1835_v4 = vsel %vm563_vm2, %v1833_v27, %v1834_v44  ;;  %v273_v15 = vmul.f32 %v3218_v51, %v3140_v38  ;;  %v274_v62 = vmul.f32 %v3225_v32, %v3140_v38  ;;  %v398_v33 = vmul.f32 %v3188_v3, %v3153_v42 }
  0xe8   : > { %v1837_v1 = vsel %vm563_vm2, %v1834_v44, %v1836_v16  ;;  %v1871_v11 = vadd.f32 %v1835_v4, %v1746_v12  ;;  %v327_v57 = vrot.slane %v272_v10, 1  ;;  %v399_v49 = vmul.f32 %v3218_v51, %v3153_v42 }
  0xe9   : > { %v1872_v21 = vadd.f32 %v1837_v1, %v1747_v23  ;;  %v328_v58 = vrot.slane %v273_v15, 1  ;;  %v330_v7 = vrot.slane %v274_v62, 1  ;;  %v400_v14 = vmul.f32 %v3225_v32, %v3153_v42 }
  0xea   : > { %v453_v53 = vrot.slane %v398_v33, 2  ;;  %v454_v26 = vrot.slane %v399_v49, 2  ;;  %v524_v61 = vmul.f32 %v3188_v3, %v3163_v5  ;;  %v525_v60 = vmul.f32 %v3218_v51, %v3163_v5 }
  0xeb   : > { %v1881_v13 = vpack.c.bf16 %v1872_v21, %v1871_v11  ;;  %v329_v29 = vsel %vm311_vm0, %v327_v57, %v328_v58  ;;  %v331_v35 = vsel %vm311_vm0, %v328_v58, %v330_v7  ;;  %v456_v40 = vrot.slane %v400_v14, 2 }
  0xec   : > { %v374_v43 = vadd.f32 %v329_v29, %v232_v55  ;;  %v375_v52 = vadd.f32 %v331_v35, %v233_v48  ;;  %v455_v20 = vsel %vm437_vm1, %v453_v53, %v454_v26  ;;  %v526_v27 = vmul.f32 %v3225_v32, %v3163_v5 }
  0xed   : > { %2213 = vmatprep.mubr.msk.bf16.mxu1 %vm1899_vm3, %v1881_v13  ;;  %v457_v3 = vsel %vm437_vm1, %v454_v26, %v456_v40  ;;  %v579_v63 = vrot.slane %v524_v61, 3  ;;  %v580_v44 = vrot.slane %v525_v60, 3  ;;  %v648_v51 = vmul.f32 %v3268_v8, %v3175_v41 }
  0xee   : > { %v500_v12 = vadd.f32 %v455_v20, %v374_v43  ;;  %v501_v23 = vadd.f32 %v457_v3, %v375_v52  ;;  %v582_v16 = vrot.slane %v526_v27, 3  ;;  %v649_v55 = vmul.f32 %v3275_v59, %v3175_v41 }
  0xef   : > { %v581_v48 = vsel %vm563_vm2, %v579_v63, %v580_v44  ;;  %v688_v32 = vmul.f32 %v3268_v8, %v3185_v47  ;;  %v689_v10 = vmul.f32 %v3275_v59, %v3185_v47  ;;  %v690_v4 = vmul.f32 %v3280_v24, %v3185_v47 }
  0xf0   : > { %v583_v15 = vsel %vm563_vm2, %v580_v44, %v582_v16  ;;  %v626_v62 = vadd.f32 %v581_v48, %v500_v12  ;;  %v813_v33 = vmul.f32 %v3268_v8, %v3199_v36  ;;  %v814_v1 = vmul.f32 %v3275_v59, %v3199_v36 }
  0xf1   : > { %v627_v11 = vadd.f32 %v583_v15, %v501_v23  ;;  %v742_v57 = vrot.slane %v688_v32, 1  ;;  %v743_v49 = vrot.slane %v689_v10, 1  ;;  %v745_v21 = vrot.slane %v690_v4, 1 }
  0xf2   : > { %v664_v58 = vadd.f32 %v648_v51, %v626_v62  ;;  %v815_v7 = vmul.f32 %v3280_v24, %v3199_v36  ;;  %v867_v14 = vrot.slane %v813_v33, 2  ;;  %v868_v53 = vrot.slane %v814_v1, 2 }
  0xf3   : > { %v665_v26 = vadd.f32 %v649_v55, %v627_v11  ;;  %v744_v61 = vsel %vm311_vm0, %v742_v57, %v743_v49  ;;  %v746_v60 = vsel %vm311_vm0, %v743_v49, %v745_v21  ;;  %v938_v13 = vmul.f32 %v3268_v8, %v3211_v19  ;;  %v2326_v55 = vld [vmem:[%s2543_s4 + $0x88] sm:$0x1f] }
  0xf4   : > { %v789_v29 = vadd.f32 %v744_v61, %v664_v58  ;;  %v869_v35 = vsel %vm437_vm1, %v867_v14, %v868_v53  ;;  %v870_v40 = vrot.slane %v815_v7, 2  ;;  %v939_v43 = vmul.f32 %v3275_v59, %v3211_v19 }
  0xf5   : > { %v790_v52 = vadd.f32 %v746_v60, %v665_v26  ;;  %v940_v20 = vmul.f32 %v3280_v24, %v3211_v19  ;;  %v992_v27 = vrot.slane %v938_v13, 3  ;;  %v1061_v3 = vmul.f32 %v3326_v18, %v3232_v9 }
  0xf6   : > { %v871_v63 = vsel %vm437_vm1, %v868_v53, %v870_v40  ;;  %v914_v44 = vadd.f32 %v869_v35, %v789_v29  ;;  %v993_v8 = vrot.slane %v939_v43, 3  ;;  %v1062_v51 = vmul.f32 %v3332_v28, %v3232_v9 }
  0xf7   : > { %v915_v12 = vadd.f32 %v871_v63, %v790_v52  ;;  %v995_v23 = vrot.slane %v940_v20, 3  ;;  %v1101_v59 = vmul.f32 %v3326_v18, %v3241_v2  ;;  %v1102_v16 = vmul.f32 %v3332_v28, %v3241_v2 }
  0xf8   : > { %v994_v24 = vsel %vm563_vm2, %v992_v27, %v993_v8  ;;  %v1103_v48 = vmul.f32 %v2326_v55, %v3241_v2  ;;  %v1226_v32 = vmul.f32 %v3326_v18, %v3254_v39  ;;  %v1227_v10 = vmul.f32 %v3332_v28, %v3254_v39 }
  0xf9   : > { %v996_v4 = vsel %vm563_vm2, %v993_v8, %v995_v23  ;;  %v1039_v15 = vadd.f32 %v994_v24, %v914_v44  ;;  %v1155_v62 = vrot.slane %v1101_v59, 1  ;;  %v1156_v33 = vrot.slane %v1102_v16, 1  ;;  %v2328_v44 = vld [vmem:[%s2543_s4 + $0x98] sm:$0xff]  ;;  %v2329_v59 = vld [vmem:[%s2543_s4 + $0xa0] sm:$0x1f] }
  0xfa   : > { %v1040_v1 = vadd.f32 %v996_v4, %v915_v12  ;;  %v1158_v11 = vrot.slane %v1103_v48, 1  ;;  %v1228_v57 = vmul.f32 %v2326_v55, %v3254_v39  ;;  %v1280_v49 = vrot.slane %v1226_v32, 2 }
  0xfb   : > { %v1077_v21 = vadd.f32 %v1061_v3, %v1039_v15  ;;  %v1157_v58 = vsel %vm311_vm0, %v1155_v62, %v1156_v33  ;;  %v1281_v7 = vrot.slane %v1227_v10, 2  ;;  %v1351_v14 = vmul.f32 %v3326_v18, %v3265_v17  ;;  %v2327_v18 = vld [vmem:[%s2543_s4 + $0x90] sm:$0xff] }
  0xfc   : > { %v1078_v53 = vadd.f32 %v1062_v51, %v1040_v1  ;;  %v1159_v26 = vsel %vm311_vm0, %v1156_v33, %v1158_v11  ;;  %v1283_v61 = vrot.slane %v1228_v57, 2  ;;  %v1352_v60 = vmul.f32 %v3332_v28, %v3265_v17 }
  0xfd   : > { %v1202_v13 = vadd.f32 %v1157_v58, %v1077_v21  ;;  %v1282_v29 = vsel %vm437_vm1, %v1280_v49, %v1281_v7  ;;  %v1353_v35 = vmul.f32 %v2326_v55, %v3265_v17  ;;  %v1405_v40 = vrot.slane %v1351_v14, 3 }
  0xfe   : > { %v1203_v43 = vadd.f32 %v1159_v26, %v1078_v53  ;;  %v1284_v52 = vsel %vm437_vm1, %v1281_v7, %v1283_v61  ;;  %v1406_v20 = vrot.slane %v1352_v60, 3  ;;  %v1474_v27 = vmul.f32 %v2327_v18, %v3288_v22 }
  0xff   : > { %v1327_v3 = vadd.f32 %v1282_v29, %v1202_v13  ;;  %v1408_v63 = vrot.slane %v1353_v35, 3  ;;  %v1475_v8 = vmul.f32 %v2328_v44, %v3288_v22  ;;  %v1514_v28 = vmul.f32 %v2327_v18, %v3298_v30 }
 0x100   : > { %v1328_v51 = vadd.f32 %v1284_v52, %v1203_v43  ;;  %v1407_v12 = vsel %vm563_vm2, %v1405_v40, %v1406_v20  ;;  %v1515_v23 = vmul.f32 %v2328_v44, %v3298_v30  ;;  %v1516_v16 = vmul.f32 %v2329_v59, %v3298_v30 }
 0x101   : > { %v1409_v24 = vsel %vm563_vm2, %v1406_v20, %v1408_v63  ;;  %v1452_v55 = vadd.f32 %v1407_v12, %v1327_v3  ;;  %v1568_v48 = vrot.slane %v1514_v28, 1  ;;  %v1639_v32 = vmul.f32 %v2327_v18, %v3311_v54  ;;  %v2330_v28 = vld [vmem:[%s2543_s4 + $0xb8] sm:$0x1f] }
 0x102   : > { %v1453_v10 = vadd.f32 %v1409_v24, %v1328_v51  ;;  %v1569_v4 = vrot.slane %v1515_v23, 1  ;;  %v1571_v15 = vrot.slane %v1516_v16, 1  ;;  %v1640_v62 = vmul.f32 %v2328_v44, %v3311_v54 }
 0x103   : > { %v1490_v33 = vadd.f32 %v1474_v27, %v1452_v55  ;;  %v1641_v1 = vmul.f32 %v2329_v59, %v3311_v54  ;;  %v1693_v11 = vrot.slane %v1639_v32, 2  ;;  %v1764_v57 = vmul.f32 %v2327_v18, %v3323_v46 }
 0x104   : > { %v1491_v49 = vadd.f32 %v1475_v8, %v1453_v10  ;;  %v1570_v21 = vsel %vm311_vm0, %v1568_v48, %v1569_v4  ;;  %v1572_v58 = vsel %vm311_vm0, %v1569_v4, %v1571_v15  ;;  %v1694_v7 = vrot.slane %v1640_v62, 2 }
 0x105   : > { %v1615_v14 = vadd.f32 %v1570_v21, %v1490_v33  ;;  %v1696_v53 = vrot.slane %v1641_v1, 2  ;;  %v1765_v26 = vmul.f32 %v2328_v44, %v3323_v46  ;;  %v1766_v61 = vmul.f32 %v2329_v59, %v3323_v46 }
 0x106   : > { %v1616_v60 = vadd.f32 %v1572_v58, %v1491_v49  ;;  %v1695_v13 = vsel %vm437_vm1, %v1693_v11, %v1694_v7  ;;  %v1818_v29 = vrot.slane %v1764_v57, 3  ;;  %v240_v35 = vmul.f32 %v3389_v0, %v3131_v45 }
 0x107   : > { %v1697_v40 = vsel %vm437_vm1, %v1694_v7, %v1696_v53  ;;  %v1740_v43 = vadd.f32 %v1695_v13, %v1615_v14  ;;  %v1819_v52 = vrot.slane %v1765_v26, 3  ;;  %v1821_v20 = vrot.slane %v1766_v61, 3 }
 0x108   : > { %v1741_v18 = vadd.f32 %v1697_v40, %v1616_v60  ;;  %v241_v27 = vmul.f32 %v3395_v25, %v3131_v45  ;;  %v284_v3 = vmul.f32 %v3389_v0, %v3140_v38  ;;  %v285_v63 = vmul.f32 %v3395_v25, %v3140_v38 }
 0x109   : > { %v1820_v44 = vsel %vm563_vm2, %v1818_v29, %v1819_v52  ;;  %v1822_v8 = vsel %vm563_vm2, %v1819_v52, %v1821_v20  ;;  %v286_v51 = vmul.f32 %v2330_v28, %v3140_v38  ;;  %v410_v12 = vmul.f32 %v3389_v0, %v3153_v42 }
 0x10a   : > { %v1865_v23 = vadd.f32 %v1820_v44, %v1740_v43  ;;  %v1866_v59 = vadd.f32 %v1822_v8, %v1741_v18  ;;  %v347_v16 = vrot.slane %v284_v3, 1  ;;  %v348_v45 = vrot.slane %v285_v63, 1 }
 0x10b   : > { %v350_v24 = vrot.slane %v286_v51, 1  ;;  %v411_v55 = vmul.f32 %v3395_v25, %v3153_v42  ;;  %v412_v48 = vmul.f32 %v2330_v28, %v3153_v42  ;;  %v473_v32 = vrot.slane %v410_v12, 2  ;;  %v2331_v51 = vld [vmem:[%s2543_s4 + $0xc0] sm:$0xff] }
 0x10c   : > { %v1878_v10 = vpack.c.bf16 %v1866_v59, %v1865_v23  ;;  %v349_v4 = vsel %vm311_vm0, %v347_v16, %v348_v45  ;;  %v536_v38 = vmul.f32 %v3389_v0, %v3163_v5  ;;  %v537_v15 = vmul.f32 %v3395_v25, %v3163_v5  ;;  %v2332_v59 = vld [vmem:[%s2543_s4 + $0xc8] sm:$0xff] }
 0x10d   : > { %v351_v62 = vsel %vm311_vm0, %v348_v45, %v350_v24  ;;  %v382_v33 = vadd.f32 %v349_v4, %v240_v35  ;;  %v474_v1 = vrot.slane %v411_v55, 2  ;;  %v476_v11 = vrot.slane %v412_v48, 2 }
 0x10e   : > { %2206 = vmatmul.mubr.msk.bf16.gmra.mxu0 %vm1899_vm3, %v1878_v10  ;;  %v383_v57 = vadd.f32 %v351_v62, %v241_v27  ;;  %v538_v42 = vmul.f32 %v2330_v28, %v3163_v5  ;;  %v599_v49 = vrot.slane %v536_v38, 3  ;;  %v600_v21 = vrot.slane %v537_v15, 3 }
 0x10f   : > { %v475_v58 = vsel %vm437_vm1, %v473_v32, %v474_v1  ;;  %v477_v7 = vsel %vm437_vm1, %v474_v1, %v476_v11  ;;  %v656_v0 = vmul.f32 %v3175_v41, %v3086_v31  ;;  %v657_v25 = vmul.f32 %v3175_v41, %v3092_v37 }
 0x110   : > { %v508_v14 = vadd.f32 %v475_v58, %v382_v33  ;;  %v509_v53 = vadd.f32 %v477_v7, %v383_v57  ;;  %v601_v26 = vsel %vm563_vm2, %v599_v49, %v600_v21  ;;  %v602_v61 = vrot.slane %v538_v42, 3  ;;  %v218_v58 = vld [vmem:[%s2543_s4 + $0xf0] sm:$0xff] }
 0x111   : > { %v700_v5 = vmul.f32 %v3185_v47, %v3086_v31  ;;  %v701_v60 = vmul.f32 %v3185_v47, %v3092_v37  ;;  %v702_v13 = vmul.f32 %v3185_v47, %v3102_v56  ;;  %v825_v29 = vmul.f32 %v3199_v36, %v3086_v31 }
 0x112   : > { %v603_v41 = vsel %vm563_vm2, %v600_v21, %v602_v61  ;;  %v634_v35 = vadd.f32 %v601_v26, %v508_v14  ;;  %v826_v40 = vmul.f32 %v3199_v36, %v3092_v37  ;;  %v827_v43 = vmul.f32 %v3199_v36, %v3102_v56  ;;  %v219_v14 = vld [vmem:[%s2543_s4 + $0xf8] sm:$0xff] }
 0x113   : > { %v635_v52 = vadd.f32 %v603_v41, %v509_v53  ;;  %v762_v20 = vrot.slane %v700_v5, 1  ;;  %v763_v18 = vrot.slane %v701_v60, 1  ;;  %v765_v27 = vrot.slane %v702_v13, 1 }
 0x114   : > { %v672_v3 = vadd.f32 %v656_v0, %v634_v35  ;;  %v887_v47 = vrot.slane %v825_v29, 2  ;;  %v888_v63 = vrot.slane %v826_v40, 2  ;;  %v890_v44 = vrot.slane %v827_v43, 2  ;;  %v220_v35 = vld [vmem:[%s2543_s4 + $0x100] sm:$0x1f]  ;;  %s175_s4 = sand.u32 1, %s2401_s13  }
 0x115   : > { %v673_v31 = vadd.f32 %v657_v25, %v635_v52  ;;  %v764_v8 = vsel %vm311_vm0, %v762_v20, %v763_v18  ;;  %v766_v28 = vsel %vm311_vm0, %v763_v18, %v765_v27  ;;  %v950_v37 = vmul.f32 %v2331_v51, %v3211_v19  ;;  %s2137_s21 = sshll.u32 %s175_s4, 7  ;;  %s3726_s15 = scalar_lea.sflag [#allocation3], %s175_s4 }
 0x116   : > { %v797_v12 = vadd.f32 %v764_v8, %v672_v3  ;;  %v889_v36 = vsel %vm437_vm1, %v887_v47, %v888_v63  ;;  %v891_v23 = vsel %vm437_vm1, %v888_v63, %v890_v44  ;;  %v951_v16 = vmul.f32 %v2332_v59, %v3211_v19  ;;  %s3680_s24 = scalar_lea.vmem [#allocation2], %s2137_s21 }
 0x117   : > { %v798_v45 = vadd.f32 %v766_v28, %v673_v31  ;;  %v952_v24 = vmul.f32 %v3211_v19, %v3102_v56  ;;  %v1012_v55 = vrot.slane %v950_v37, 3  ;;  %v1069_v48 = vmul.f32 %v3232_v9, %v3426_v34  ;;  %s2054_s6 = sshll.u32 %s3680_s24, 4  ;;  %s3718_s6 = int_to_ptr.vmem [resolvable:$true] %s2054_s6 }
 0x118   : > { %v922_v32 = vadd.f32 %v889_v36, %v797_v12  ;;  %v1013_v10 = vrot.slane %v951_v16, 3  ;;  %v1070_v4 = vmul.f32 %v3232_v9, %v3433_v6  ;;  %v1113_v38 = vmul.f32 %v3241_v2, %v3426_v34  ;;  %s2333_s16 = scalar_lea.vmem %s3718_s6, 2048  ;;  %p2340_p2 = scmp.lt.s32.totalorder %s3718_s6, %s2338_s11 }
 0x119   : > { %v923_v15 = vadd.f32 %v891_v23, %v798_v45  ;;  %v1015_v62 = vrot.slane %v952_v24, 3  ;;  %v1114_v33 = vmul.f32 %v3241_v2, %v3433_v6  ;;  %v1115_v56 = vmul.f32 %v3241_v2, %v3440_v50  ;;  %p2334_p13 = scmp.ne.s32.totalorder %s3718_s6, %s2333_s16  ;;  %p2341_p4 = scmp.lt.s32.totalorder %s2339_s20, %s2333_s16 }
 0x11a   : > { %v1014_v19 = vsel %vm563_vm2, %v1012_v55, %v1013_v10  ;;  %v1175_v1 = vrot.slane %v1113_v38, 1  ;;  %v1238_v11 = vmul.f32 %v3254_v39, %v3426_v34  ;;  %v1239_v9 = vmul.f32 %v3254_v39, %v3433_v6 }
 0x11b   : > { %v1016_v57 = vsel %vm563_vm2, %v1013_v10, %v1015_v62  ;;  %v1047_v42 = vadd.f32 %v1014_v19, %v922_v32  ;;  %v1176_v49 = vrot.slane %v1114_v33, 1  ;;  %v1178_v21 = vrot.slane %v1115_v56, 1  ;;  %p2335_p0 = pnand %p2334_p13, %p2501_p3  ;;  %p2342_p5 = por %p2341_p4, %p2340_p2 }
 0x11c   : > { %v1048_v7 = vadd.f32 %v1016_v57, %v923_v15  ;;  %v1240_v2 = vmul.f32 %v3254_v39, %v3440_v50  ;;  %v1300_v0 = vrot.slane %v1238_v11, 2  ;;  %v1301_v25 = vrot.slane %v1239_v9, 2 }
 0x11d   : > { %v1085_v53 = vadd.f32 %v1069_v48, %v1047_v42  ;;  %v1177_v26 = vsel %vm311_vm0, %v1175_v1, %v1176_v49  ;;  %v1179_v61 = vsel %vm311_vm0, %v1176_v49, %v1178_v21  ;;  %v1363_v5 = vmul.f32 %v3265_v17, %v3426_v34  ;;  %p2336_p1 = pneg %p2335_p0 }
 0x11e   : > { %v1086_v60 = vadd.f32 %v1070_v4, %v1048_v7  ;;  %v1302_v13 = vsel %vm437_vm1, %v1300_v0, %v1301_v25  ;;  %v1303_v29 = vrot.slane %v1240_v2, 2  ;;  %v1364_v41 = vmul.f32 %v3265_v17, %v3433_v6 }
 0x11f   : > { %v1210_v39 = vadd.f32 %v1177_v26, %v1085_v53  ;;  %v1365_v40 = vmul.f32 %v3265_v17, %v3440_v50  ;;  %v1425_v43 = vrot.slane %v1363_v5, 3  ;;  %v1482_v52 = vmul.f32 %v3288_v22, %v218_v58  ;;  %p2343_p6 = pnand %p2342_p5, %p2336_p1 }
 0x120   : > { %v1211_v20 = vadd.f32 %v1179_v61, %v1086_v60  ;;  %v1304_v18 = vsel %vm437_vm1, %v1301_v25, %v1303_v29  ;;  %v1426_v27 = vrot.slane %v1364_v41, 3  ;;  %v1483_v34 = vmul.f32 %v3288_v22, %v219_v14 }
 0x121   : > { %v1335_v3 = vadd.f32 %v1302_v13, %v1210_v39  ;;  %v1428_v47 = vrot.slane %v1365_v40, 3  ;;  %v1526_v63 = vmul.f32 %v3298_v30, %v218_v58  ;;  %v1527_v6 = vmul.f32 %v3298_v30, %v219_v14 }
 0x122   : > { %v1336_v44 = vadd.f32 %v1304_v18, %v1211_v20  ;;  %v1427_v31 = vsel %vm563_vm2, %v1425_v43, %v1426_v27  ;;  %v1528_v17 = vmul.f32 %v3298_v30, %v220_v35  ;;  %v1651_v50 = vmul.f32 %v3311_v54, %v218_v58 }
 0x123   : > { %v1429_v8 = vsel %vm563_vm2, %v1426_v27, %v1428_v47  ;;  %v1460_v28 = vadd.f32 %v1427_v31, %v1335_v3  ;;  %v1588_v51 = vrot.slane %v1526_v63, 1  ;;  %v1589_v37 = vrot.slane %v1527_v6, 1 }
 0x124   : > { %v1461_v12 = vadd.f32 %v1429_v8, %v1336_v44  ;;  %v1591_v22 = vrot.slane %v1528_v17, 1  ;;  %v1652_v36 = vmul.f32 %v3311_v54, %v219_v14  ;;  %v1653_v23 = vmul.f32 %v3311_v54, %v220_v35 }
 0x125   : > { %v1498_v59 = vadd.f32 %v1482_v52, %v1460_v28  ;;  %v1590_v16 = vsel %vm311_vm0, %v1588_v51, %v1589_v37  ;;  %v1713_v45 = vrot.slane %v1651_v50, 2  ;;  %v1776_v24 = vmul.f32 %v3323_v46, %v218_v58 }
 0x126   : > { %v1499_v30 = vadd.f32 %v1483_v34, %v1461_v12  ;;  %v1592_v55 = vsel %vm311_vm0, %v1589_v37, %v1591_v22  ;;  %v1714_v48 = vrot.slane %v1652_v36, 2  ;;  %v1716_v32 = vrot.slane %v1653_v23, 2 }
 0x127   : > { %v1623_v10 = vadd.f32 %v1590_v16, %v1498_v59  ;;  %v1777_v4 = vmul.f32 %v3323_v46, %v219_v14  ;;  %v1778_v38 = vmul.f32 %v3323_v46, %v220_v35  ;;  %v1838_v15 = vrot.slane %v1776_v24, 3 }
 0x128   : > { %v1624_v54 = vadd.f32 %v1592_v55, %v1499_v30  ;;  %v1715_v62 = vsel %vm437_vm1, %v1713_v45, %v1714_v48  ;;  %v1717_v33 = vsel %vm437_vm1, %v1714_v48, %v1716_v32 }
 0x129   : > { %v1748_v56 = vadd.f32 %v1715_v62, %v1623_v10  ;;  %v1839_v19 = vrot.slane %v1777_v4, 3  ;;  %v1841_v1 = vrot.slane %v1778_v38, 3 }
 0x12a   : > { %v1749_v11 = vadd.f32 %v1717_v33, %v1624_v54 }
 0x12b   : > { %v1840_v9 = vsel %vm563_vm2, %v1838_v15, %v1839_v19  ;;  %v1842_v57 = vsel %vm563_vm2, %v1839_v19, %v1841_v1 }
 0x12c   : > { %v1873_v42 = vadd.f32 %v1840_v9, %v1748_v56  ;;  %v1874_v49 = vadd.f32 %v1842_v57, %v1749_v11 }
 0x12e   : > { %v1882_v21 = vpack.c.bf16 %v1874_v49, %v1873_v42 }
 0x130   : > { %2214 = vmatmul.mubr.msk.bf16.gmra.mxu1 %vm1899_vm3, %v1882_v21 }
 0x147   : > { %v2203_v46 = vpop.f32.mrf.mxu0 }
 0x148   : > { %2023 = vst.msk [vmem:[%s3680_s24 + $0x10] sm:$0xff] %vm1899_vm3, %v2203_v46 }
 0x149   : > { %v1958_v58 = vpop.f32.mrf.mxu0 }
 0x14a   : > { %2021 = vst.msk [vmem:[%s3680_s24] sm:$0xff] %vm1899_vm3, %v1958_v58 }
 0x14b   : > { %v2204_v7 = vpop.f32.mrf.mxu0 }
 0x14c   : > { %2024 = vst.msk [vmem:[%s3680_s24 + $0x18] sm:$0xff] %vm1899_vm3, %v2204_v7 }
 0x14d   : > { %v1961_v2 = vpop.f32.mrf.mxu0 }
 0x14e   : > { %2022 = vst.msk [vmem:[%s3680_s24 + $0x8] sm:$0xff] %vm1899_vm3, %v1961_v2 }
 0x169   : > { %v2211_v0 = vpop.f32.mrf.mxu1 }
 0x16a   : > { %2031 = vst.msk [vmem:[%s3680_s24 + $0x50] sm:$0xff] %vm1899_vm3, %v2211_v0 }
 0x16b   : > { %v1990_v25 = vpop.f32.mrf.mxu1 }
 0x16c   : > { %2029 = vst.msk [vmem:[%s3680_s24 + $0x40] sm:$0xff] %vm1899_vm3, %v1990_v25 }
 0x16d   : > { %v2212_v14 = vpop.f32.mrf.mxu1 }
 0x16e   : > { %2032 = vst.msk [vmem:[%s3680_s24 + $0x58] sm:$0xff] %vm1899_vm3, %v2212_v14 }
 0x16f   : > { %v1993_v53 = vpop.f32.mrf.mxu1 }
 0x170   : > { %2030 = vst.msk [vmem:[%s3680_s24 + $0x48] sm:$0xff] %vm1899_vm3, %v1993_v53 }
 0x1ce   : > { %v2207_v26 = vpop.f32.mrf.mxu0 }
 0x1cf   : > { %2027 = vst.msk [vmem:[%s3680_s24 + $0x30] sm:$0xff] %vm1899_vm3, %v2207_v26 }
 0x1d0   : > { %v1974_v61 = vpop.f32.mrf.mxu0 }
 0x1d1   : > { %2025 = vst.msk [vmem:[%s3680_s24 + $0x20] sm:$0xff] %vm1899_vm3, %v1974_v61 }
 0x1d2   : > { %v2208_v5 = vpop.f32.mrf.mxu0 }
 0x1d3   : > { %2028 = vst.msk [vmem:[%s3680_s24 + $0x38] sm:$0xff] %vm1899_vm3, %v2208_v5 }
 0x1d4   : > { %v1977_v60 = vpop.f32.mrf.mxu0 }
 0x1d5   : > { %2026 = vst.msk [vmem:[%s3680_s24 + $0x28] sm:$0xff] %vm1899_vm3, %v1977_v60 }
 0x1f0   : > { %v2215_v13 = vpop.f32.mrf.mxu1 }
 0x1f1   : > { %2035 = vst.msk [vmem:[%s3680_s24 + $0x70] sm:$0xff] %vm1899_vm3, %v2215_v13 }
 0x1f2   : > { %v2006_v29 = vpop.f32.mrf.mxu1 }
 0x1f3   : > { %2033 = vst.msk [vmem:[%s3680_s24 + $0x60] sm:$0xff] %vm1899_vm3, %v2006_v29 }
 0x1f4   : > { %v2216_v41 = vpop.f32.mrf.mxu1 }
 0x1f5   : > { %2036 = vst.msk [vmem:[%s3680_s24 + $0x78] sm:$0xff] %vm1899_vm3, %v2216_v41 }
 0x1f6   : > { %v2009_v35 = vpop.f32.mrf.mxu1 }
 0x1f7   : > { %2034 = vst.msk [vmem:[%s3680_s24 + $0x68] sm:$0xff] %vm1899_vm3, %v2009_v35 }
 0x1f8   : > { %2346 = shalt.err (!%p2343_p6)
}
 0x1f9   : > { %s2347_s4 = scalar_lea.hbm %s3716_s9, 2048  ;;  %s2351_s27 = scalar_lea.hbm %s3780_s3, 8192 }
 0x1fa   : > { %p2348_p7 = scmp.ne.s32.totalorder %s3716_s9, %s2347_s4  ;;  %p2352_p11 = scmp.lt.s32.totalorder %s3716_s9, %s3780_s3 }
 0x1fb   : > { %p2353_p12 = scmp.lt.s32.totalorder %s2351_s27, %s2347_s4 }
 0x1fc   : > { %p2349_p9 = pnand %p2348_p7, %p2501_p3 }
 0x1fd   : > { %p2354_p13 = por %p2353_p12, %p2352_p11 }
 0x1fe   : > { %p2350_p10 = pneg %p2349_p9 }
 0x200   : > { %p2355_p0 = pnand %p2354_p13, %p2350_p10 }
 0x202   : > { %2358 = shalt.err (!%p2355_p0)
}
 0x203   : > { %s2428_s5 = smov 128   ;;  %s2429_s7 = smov 8  }
 0x204   : > { %2222 = dma.vmem_to_hbm [thread:$0]  (%p2501_p3), %s3718_s6, 2048, %s3716_s9, %s3726_s15, %s2428_s5, %s2428_s5, %s2429_s7  }
 0x205 PF: > { %p2228_p1 = scmp.ge.s32.totalorder %s2425_s19, 2  ;;  %s2069_s8 = sand.u32 1, %s2397_s12  }
 0x206   : > { %s2070_s16 = scalar_lea.sflag [#allocation3], %s2069_s8 }
 0x207   : > { %p2225_p2 = pnand %p2228_p1, %p2510_p8 }
 0x209   : > { %p2226_p4 = pneg %p2225_p2 }
 0x20b   : > { %2392 = dma.done.wait (%p2226_p4), %s2070_s16, 2048  }
 0x20c   : > { %2394 = vsyncadd (%p2226_p4), %s2070_s16, 4294965248  ;;  %s16_s19 = sadd.s32 1, %s2425_s19   ;;  %s3783_s12 = smov %s2401_s13 }
 0x20d   : > { %p13_p5 = scmp.ge.s32.totalorder %s16_s19, 6   ;;  %s3784_s13 = smov %s2405_s14 }
 0x20e   : > { %s3785_s14 = smov %s2519_s30  ;;  %s3786_s15 = smov %s2417_s17 }
 0x20f   : > { %s3787_s16 = smov %s2421_s18  ;;  %s3788_s17 = smov %s3791_s22 }
 0x210   : > { %s3789_s18 = smov %s3795_s23  ;;  %15 = sbr.rel (!%p13_p5) target bundleno = 5 (0x5), region = 71 }
 0x215   :  { %2075 = vsyncpa [#allocation3], 1 }
 0x216   :  { %2077 = vsyncpa [#allocation3 + $0x1], 1 }

</bundles_post_ra>
